<compile_context>
chip_gen: v5e
topology: v5e:2x2
jax: 0.10.0
libtpu: 0.0.40
codegen_flags: <defaults>
</compile_context>

<pallas_src>
import jax
import jax.numpy as jnp
from jax import lax
from jax.experimental import pallas as pl
from jax.experimental.pallas import tpu as pltpu

BN_EPS = 1e-5
LANE = 128  # lane width; logits are padded to this inside the kernel


def mlp5_kernel(x_ref,
                w1_ref, g1_ref, be1_ref,
                w2_ref, g2_ref, be2_ref,
                w3_ref, g3_ref, be3_ref,
                w4_ref, g4_ref, be4_ref,
                w5_ref, b5_ref,
                out_ref):
    """One independent micro-batch per grid step: x (B, F) -> logits (B, LANE)."""

    def matmul(h, w_ref):
        # bf16 x bf16 on the MXU with f32 accumulation.  Activations are only
        # cast at the MXU boundary; all BN/elementwise math stays f32.
        return jnp.dot(h.astype(jnp.bfloat16), w_ref[...],
                       preferred_element_type=jnp.float32)

    def bn_relu(y, g_ref, be_ref):
        # Training-mode BatchNorm1d: batch mean / biased variance over axis 0 in
        # a single pass (sum + sum-of-squares), gamma*invstd fused into one scale.
        # (The Linear bias is omitted upstream: subtracting the batch mean cancels
        # any per-feature constant exactly.)
        inv_n = 1.0 / y.shape[0]
        mean = jnp.sum(y, axis=0, keepdims=True) * inv_n
        ex2 = jnp.sum(y * y, axis=0, keepdims=True) * inv_n
        var = ex2 - mean * mean
        scale = g_ref[...] * lax.rsqrt(var + BN_EPS)
        shift = be_ref[...] - mean * scale
        return jnp.maximum(y * scale + shift, 0.0)

    x = x_ref[...].astype(jnp.float32)
    h = bn_relu(matmul(x, w1_ref), g1_ref, be1_ref)
    h = bn_relu(matmul(h, w2_ref), g2_ref, be2_ref)
    h = bn_relu(matmul(h, w3_ref), g3_ref, be3_ref)
    h = bn_relu(matmul(h, w4_ref), g4_ref, be4_ref)
    out_ref[...] = (matmul(h, w5_ref) + b5_ref[...]).astype(out_ref.dtype)


def _mlp5_pallas(x_nbf, params):
    """x_nbf: (N, B, F) -> logits (N, B, num_classes). N independent micro-batches."""
    N, B, F = x_nbf.shape
    c_pad = params["w5"].shape[1]  # LANE-padded logits width

    weight_args = [
        params["w1"], params["g1"], params["be1"],
        params["w2"], params["g2"], params["be2"],
        params["w3"], params["g3"], params["be3"],
        params["w4"], params["g4"], params["be4"],
        params["w5"], params["b5"],
    ]

    def resident(a):
        # Full-array block, same block index every grid step -> DMA'd once and
        # kept VMEM-resident across all N micro-batches.
        return pl.BlockSpec(a.shape, lambda n: (0,) * a.ndim)

    out = pl.pallas_call(
        mlp5_kernel,
        out_shape=jax.ShapeDtypeStruct((N, B, c_pad), jnp.float32),
        grid=(N,),
        in_specs=[pl.BlockSpec((None, B, F), lambda n: (n, 0, 0))]
                 + [resident(a) for a in weight_args],
        out_specs=pl.BlockSpec((None, B, c_pad), lambda n: (n, 0, 0)),
        compiler_params=pltpu.CompilerParams(
            dimension_semantics=("parallel",),   # shard micro-batches across v7x's 2 TCs
            vmem_limit_bytes=48 << 20,           # <= v7x's 64 MiB physical VMEM
        ),
    )(x_nbf, *weight_args)
    return out[..., :params["num_classes"]]


def mlp5_forward(x_nchw, params):
    """Single forward: x (B, C, H, W) -> logits (B, num_classes)."""
    B = x_nchw.shape[0]
    return _mlp5_pallas(x_nchw.reshape(1, B, -1), params)[0]


def mlp5_forward_many(x_batches, params):
    """N independent forwards (each with its own BatchNorm statistics):
    x (N, B, C, H, W) -> (N, B, num_classes).  Weights stay VMEM-resident across N."""
    N, B = x_batches.shape[:2]
    return _mlp5_pallas(x_batches.reshape(N, B, -1), params)


def init_params(key, num_features=784, hidden_units=(2048, 512, 128, 32),
                num_classes=10):
    """PyTorch-style Linear init (U[-1/sqrt(fan_in), +]); weights stored bf16 (in,out)."""
    dims = [num_features, *hidden_units, num_classes]
    params = {"num_classes": num_classes}
    for li in range(5):
        fan_in, fan_out = dims[li], dims[li + 1]
        key, kw, kb = jax.random.split(key, 3)
        bound = 1.0 / jnp.sqrt(jnp.float32(fan_in))
        w = jax.random.uniform(kw, (fan_in, fan_out), jnp.float32, -bound, bound)
        b = jax.random.uniform(kb, (1, fan_out), jnp.float32, -bound, bound)
        if li == 4:  # pad the logits layer to a lane-dense width
            pad = LANE - fan_out
            w = jnp.pad(w, ((0, 0), (0, pad)))
            b = jnp.pad(b, ((0, 0), (0, pad)))
        params[f"w{li + 1}"] = w.astype(jnp.bfloat16)
        params[f"b{li + 1}"] = b  # f32; b1..b4 exist per module but cancel under BN
    for li, h in enumerate(hidden_units, start=1):
        params[f"g{li}"] = jnp.ones((1, h), jnp.float32)    # BN weight (gamma)
        params[f"be{li}"] = jnp.zeros((1, h), jnp.float32)  # BN bias (beta)
    return params


def mlp5_reference(x_nchw, params):
    """Module-faithful JAX reference (Linear+bias, training-mode BatchNorm1d, ReLU),
    evaluated at the same bf16 weight/activation quantization points as the kernel."""
    nc = params["num_classes"]
    x = x_nchw.reshape(x_nchw.shape[0], -1)

    def linear(h, w, b):
        return jnp.dot(h.astype(jnp.bfloat16), w,
                       preferred_element_type=jnp.float32) + b

    def bn(y, g, be):
        mean = jnp.mean(y, axis=0, keepdims=True)
        var = jnp.mean((y - mean) ** 2, axis=0, keepdims=True)
        return (y - mean) / jnp.sqrt(var + BN_EPS) * g + be

    h = x
    for li in range(1, 5):
        h = jnp.maximum(
            bn(linear(h, params[f"w{li}"], params[f"b{li}"]),
               params[f"g{li}"], params[f"be{li}"]), 0.0)
    return linear(h, params["w5"], params["b5"])[:, :nc]


if __name__ == "__main__":
    key = jax.random.PRNGKey(0)
    key, kx = jax.random.split(key)
    # MNIST-like input implied by num_features=784 (1x28x28); small batch of 8.
    x = jax.random.normal(kx, (8, 1, 28, 28), jnp.float32)
    params = init_params(key)

    out = jax.block_until_ready(mlp5_forward(x, params))
    ref = mlp5_reference(x, params)
    assert out.shape == (8, 10), out.shape
    # Tolerance covers divergence from mathematically-equivalent rearrangements
    # (bias cancellation under BN, one-pass variance, fused scale) occasionally
    # flipping a bf16 rounding at the MXU inputs.
    assert jnp.allclose(out, ref, atol=2e-2, rtol=2e-2), \
        float(jnp.max(jnp.abs(out - ref)))

    # Gridded path: 2 independent micro-batches sharing VMEM-resident weights.
    key, kx2 = jax.random.split(key)
    x2 = jax.random.normal(kx2, (2, 8, 1, 28, 28), jnp.float32)
    out2 = jax.block_until_ready(mlp5_forward_many(x2, params))
    ref2 = jnp.stack([mlp5_reference(x2[i], params) for i in range(2)])
    assert out2.shape == (2, 8, 10), out2.shape
    assert jnp.allclose(out2, ref2, atol=2e-2, rtol=2e-2), \
        float(jnp.max(jnp.abs(out2 - ref2)))

    print("KERNEL_OK")
</pallas_src>

<mosaic_0001>
module attributes {stable_mosaic.version = 11 : i64} {
  func.func @mlp5_kernel(%arg0: i32, %arg1: memref<1x8x784xf32, #tpu.memory_space<vmem>>, %arg2: memref<784x2048xbf16, #tpu.memory_space<vmem>>, %arg3: memref<1x2048xf32, #tpu.memory_space<vmem>>, %arg4: memref<1x2048xf32, #tpu.memory_space<vmem>>, %arg5: memref<2048x512xbf16, #tpu.memory_space<vmem>>, %arg6: memref<1x512xf32, #tpu.memory_space<vmem>>, %arg7: memref<1x512xf32, #tpu.memory_space<vmem>>, %arg8: memref<512x128xbf16, #tpu.memory_space<vmem>>, %arg9: memref<1x128xf32, #tpu.memory_space<vmem>>, %arg10: memref<1x128xf32, #tpu.memory_space<vmem>>, %arg11: memref<128x32xbf16, #tpu.memory_space<vmem>>, %arg12: memref<1x32xf32, #tpu.memory_space<vmem>>, %arg13: memref<1x32xf32, #tpu.memory_space<vmem>>, %arg14: memref<32x128xbf16, #tpu.memory_space<vmem>>, %arg15: memref<1x128xf32, #tpu.memory_space<vmem>>, %arg16: memref<1x8x128xf32, #tpu.memory_space<vmem>>) attributes {dimension_semantics = [#tpu.dimension_semantics<parallel>], iteration_bounds = array<i64: 1>, scalar_prefetch = 0 : i64, scratch_operands = 0 : i64, tpu.core_type = #tpu.core_type<tc>, window_params = [{transform_indices = @transform_0, window_bounds = array<i64: 1, 8, 784>}, {pipeline_mode = #tpu.pipeline_mode<synchronous>, transform_indices = @transform_1, window_bounds = array<i64: 784, 2048>}, {pipeline_mode = #tpu.pipeline_mode<synchronous>, transform_indices = @transform_2, window_bounds = array<i64: 1, 2048>}, {pipeline_mode = #tpu.pipeline_mode<synchronous>, transform_indices = @transform_3, window_bounds = array<i64: 1, 2048>}, {pipeline_mode = #tpu.pipeline_mode<synchronous>, transform_indices = @transform_4, window_bounds = array<i64: 2048, 512>}, {pipeline_mode = #tpu.pipeline_mode<synchronous>, transform_indices = @transform_5, window_bounds = array<i64: 1, 512>}, {pipeline_mode = #tpu.pipeline_mode<synchronous>, transform_indices = @transform_6, window_bounds = array<i64: 1, 512>}, {pipeline_mode = #tpu.pipeline_mode<synchronous>, transform_indices = @transform_7, window_bounds = array<i64: 512, 128>}, {pipeline_mode = #tpu.pipeline_mode<synchronous>, transform_indices = @transform_8, window_bounds = array<i64: 1, 128>}, {pipeline_mode = #tpu.pipeline_mode<synchronous>, transform_indices = @transform_9, window_bounds = array<i64: 1, 128>}, {pipeline_mode = #tpu.pipeline_mode<synchronous>, transform_indices = @transform_10, window_bounds = array<i64: 128, 32>}, {pipeline_mode = #tpu.pipeline_mode<synchronous>, transform_indices = @transform_11, window_bounds = array<i64: 1, 32>}, {pipeline_mode = #tpu.pipeline_mode<synchronous>, transform_indices = @transform_12, window_bounds = array<i64: 1, 32>}, {pipeline_mode = #tpu.pipeline_mode<synchronous>, transform_indices = @transform_13, window_bounds = array<i64: 32, 128>}, {pipeline_mode = #tpu.pipeline_mode<synchronous>, transform_indices = @transform_14, window_bounds = array<i64: 1, 128>}, {transform_indices = @transform_15, window_bounds = array<i64: 1, 8, 128>}]} {
    %c0 = arith.constant 0 : index
    %c0_0 = arith.constant 0 : index
    %c0_1 = arith.constant 0 : index
    %0 = vector.load %arg1[%c0, %c0_0, %c0_1] : memref<1x8x784xf32, #tpu.memory_space<vmem>>, vector<1x8x784xf32>
    %1 = vector.shape_cast %0 : vector<1x8x784xf32> to vector<8x784xf32>
    %2 = arith.truncf %1 : vector<8x784xf32> to vector<8x784xbf16>
    %c0_2 = arith.constant 0 : index
    %c0_3 = arith.constant 0 : index
    %3 = vector.load %arg2[%c0_2, %c0_3] : memref<784x2048xbf16, #tpu.memory_space<vmem>>, vector<784x2048xbf16>
    %cst = arith.constant dense<0.000000e+00> : vector<8x2048xf32>
    %4 = tpu.matmul %2, %3, %cst {dimension_numbers = #tpu.dot_dimension_numbers<[1], [0], [0], [1], [0, 0, 1, 1], [], []>} : vector<8x784xbf16>, vector<784x2048xbf16>, vector<8x2048xf32> -> vector<8x2048xf32>
    %cst_4 = arith.constant dense<0.000000e+00> : vector<2048xf32>
    %5 = vector.multi_reduction <add>, %4, %cst_4 [0] : vector<8x2048xf32> to vector<2048xf32>
    %6 = vector.shape_cast %5 : vector<2048xf32> to vector<1x2048xf32>
    %cst_5 = arith.constant 1.250000e-01 : f32
    %7 = vector.broadcast %cst_5 : f32 to vector<1x2048xf32>
    %8 = arith.mulf %6, %7 : vector<1x2048xf32>
    %9 = arith.mulf %4, %4 : vector<8x2048xf32>
    %cst_6 = arith.constant dense<0.000000e+00> : vector<2048xf32>
    %10 = vector.multi_reduction <add>, %9, %cst_6 [0] : vector<8x2048xf32> to vector<2048xf32>
    %11 = vector.shape_cast %10 : vector<2048xf32> to vector<1x2048xf32>
    %cst_7 = arith.constant 1.250000e-01 : f32
    %12 = vector.broadcast %cst_7 : f32 to vector<1x2048xf32>
    %13 = arith.mulf %11, %12 : vector<1x2048xf32>
    %14 = arith.mulf %8, %8 : vector<1x2048xf32>
    %15 = arith.subf %13, %14 : vector<1x2048xf32>
    %c0_8 = arith.constant 0 : index
    %c0_9 = arith.constant 0 : index
    %16 = vector.load %arg3[%c0_8, %c0_9] : memref<1x2048xf32, #tpu.memory_space<vmem>>, vector<1x2048xf32>
    %cst_10 = arith.constant 9.99999974E-6 : f32
    %17 = vector.broadcast %cst_10 : f32 to vector<1x2048xf32>
    %18 = arith.addf %15, %17 : vector<1x2048xf32>
    %19 = math.rsqrt %18 : vector<1x2048xf32>
    %20 = arith.mulf %16, %19 : vector<1x2048xf32>
    %c0_11 = arith.constant 0 : index
    %c0_12 = arith.constant 0 : index
    %21 = vector.load %arg4[%c0_11, %c0_12] : memref<1x2048xf32, #tpu.memory_space<vmem>>, vector<1x2048xf32>
    %22 = arith.mulf %8, %20 : vector<1x2048xf32>
    %23 = arith.subf %21, %22 : vector<1x2048xf32>
    %24 = vector.broadcast %20 : vector<1x2048xf32> to vector<8x2048xf32>
    %25 = arith.mulf %4, %24 : vector<8x2048xf32>
    %26 = vector.broadcast %23 : vector<1x2048xf32> to vector<8x2048xf32>
    %27 = arith.addf %25, %26 : vector<8x2048xf32>
    %cst_13 = arith.constant 0.000000e+00 : f32
    %28 = vector.broadcast %cst_13 : f32 to vector<8x2048xf32>
    %29 = arith.maximumf %27, %28 : vector<8x2048xf32>
    %30 = arith.truncf %29 : vector<8x2048xf32> to vector<8x2048xbf16>
    %c0_14 = arith.constant 0 : index
    %c0_15 = arith.constant 0 : index
    %31 = vector.load %arg5[%c0_14, %c0_15] : memref<2048x512xbf16, #tpu.memory_space<vmem>>, vector<2048x512xbf16>
    %cst_16 = arith.constant dense<0.000000e+00> : vector<8x512xf32>
    %32 = tpu.matmul %30, %31, %cst_16 {dimension_numbers = #tpu.dot_dimension_numbers<[1], [0], [0], [1], [0, 0, 1, 1], [], []>} : vector<8x2048xbf16>, vector<2048x512xbf16>, vector<8x512xf32> -> vector<8x512xf32>
    %cst_17 = arith.constant dense<0.000000e+00> : vector<512xf32>
    %33 = vector.multi_reduction <add>, %32, %cst_17 [0] : vector<8x512xf32> to vector<512xf32>
    %34 = vector.shape_cast %33 : vector<512xf32> to vector<1x512xf32>
    %cst_18 = arith.constant 1.250000e-01 : f32
    %35 = vector.broadcast %cst_18 : f32 to vector<1x512xf32>
    %36 = arith.mulf %34, %35 : vector<1x512xf32>
    %37 = arith.mulf %32, %32 : vector<8x512xf32>
    %cst_19 = arith.constant dense<0.000000e+00> : vector<512xf32>
    %38 = vector.multi_reduction <add>, %37, %cst_19 [0] : vector<8x512xf32> to vector<512xf32>
    %39 = vector.shape_cast %38 : vector<512xf32> to vector<1x512xf32>
    %cst_20 = arith.constant 1.250000e-01 : f32
    %40 = vector.broadcast %cst_20 : f32 to vector<1x512xf32>
    %41 = arith.mulf %39, %40 : vector<1x512xf32>
    %42 = arith.mulf %36, %36 : vector<1x512xf32>
    %43 = arith.subf %41, %42 : vector<1x512xf32>
    %c0_21 = arith.constant 0 : index
    %c0_22 = arith.constant 0 : index
    %44 = vector.load %arg6[%c0_21, %c0_22] : memref<1x512xf32, #tpu.memory_space<vmem>>, vector<1x512xf32>
    %cst_23 = arith.constant 9.99999974E-6 : f32
    %45 = vector.broadcast %cst_23 : f32 to vector<1x512xf32>
    %46 = arith.addf %43, %45 : vector<1x512xf32>
    %47 = math.rsqrt %46 : vector<1x512xf32>
    %48 = arith.mulf %44, %47 : vector<1x512xf32>
    %c0_24 = arith.constant 0 : index
    %c0_25 = arith.constant 0 : index
    %49 = vector.load %arg7[%c0_24, %c0_25] : memref<1x512xf32, #tpu.memory_space<vmem>>, vector<1x512xf32>
    %50 = arith.mulf %36, %48 : vector<1x512xf32>
    %51 = arith.subf %49, %50 : vector<1x512xf32>
    %52 = vector.broadcast %48 : vector<1x512xf32> to vector<8x512xf32>
    %53 = arith.mulf %32, %52 : vector<8x512xf32>
    %54 = vector.broadcast %51 : vector<1x512xf32> to vector<8x512xf32>
    %55 = arith.addf %53, %54 : vector<8x512xf32>
    %cst_26 = arith.constant 0.000000e+00 : f32
    %56 = vector.broadcast %cst_26 : f32 to vector<8x512xf32>
    %57 = arith.maximumf %55, %56 : vector<8x512xf32>
    %58 = arith.truncf %57 : vector<8x512xf32> to vector<8x512xbf16>
    %c0_27 = arith.constant 0 : index
    %c0_28 = arith.constant 0 : index
    %59 = vector.load %arg8[%c0_27, %c0_28] : memref<512x128xbf16, #tpu.memory_space<vmem>>, vector<512x128xbf16>
    %cst_29 = arith.constant dense<0.000000e+00> : vector<8x128xf32>
    %60 = tpu.matmul %58, %59, %cst_29 {dimension_numbers = #tpu.dot_dimension_numbers<[1], [0], [0], [1], [0, 0, 1, 1], [], []>} : vector<8x512xbf16>, vector<512x128xbf16>, vector<8x128xf32> -> vector<8x128xf32>
    %cst_30 = arith.constant dense<0.000000e+00> : vector<128xf32>
    %61 = vector.multi_reduction <add>, %60, %cst_30 [0] : vector<8x128xf32> to vector<128xf32>
    %62 = vector.shape_cast %61 : vector<128xf32> to vector<1x128xf32>
    %cst_31 = arith.constant 1.250000e-01 : f32
    %63 = vector.broadcast %cst_31 : f32 to vector<1x128xf32>
    %64 = arith.mulf %62, %63 : vector<1x128xf32>
    %65 = arith.mulf %60, %60 : vector<8x128xf32>
    %cst_32 = arith.constant dense<0.000000e+00> : vector<128xf32>
    %66 = vector.multi_reduction <add>, %65, %cst_32 [0] : vector<8x128xf32> to vector<128xf32>
    %67 = vector.shape_cast %66 : vector<128xf32> to vector<1x128xf32>
    %cst_33 = arith.constant 1.250000e-01 : f32
    %68 = vector.broadcast %cst_33 : f32 to vector<1x128xf32>
    %69 = arith.mulf %67, %68 : vector<1x128xf32>
    %70 = arith.mulf %64, %64 : vector<1x128xf32>
    %71 = arith.subf %69, %70 : vector<1x128xf32>
    %c0_34 = arith.constant 0 : index
    %c0_35 = arith.constant 0 : index
    %72 = vector.load %arg9[%c0_34, %c0_35] : memref<1x128xf32, #tpu.memory_space<vmem>>, vector<1x128xf32>
    %cst_36 = arith.constant 9.99999974E-6 : f32
    %73 = vector.broadcast %cst_36 : f32 to vector<1x128xf32>
    %74 = arith.addf %71, %73 : vector<1x128xf32>
    %75 = math.rsqrt %74 : vector<1x128xf32>
    %76 = arith.mulf %72, %75 : vector<1x128xf32>
    %c0_37 = arith.constant 0 : index
    %c0_38 = arith.constant 0 : index
    %77 = vector.load %arg10[%c0_37, %c0_38] : memref<1x128xf32, #tpu.memory_space<vmem>>, vector<1x128xf32>
    %78 = arith.mulf %64, %76 : vector<1x128xf32>
    %79 = arith.subf %77, %78 : vector<1x128xf32>
    %80 = vector.broadcast %76 : vector<1x128xf32> to vector<8x128xf32>
    %81 = arith.mulf %60, %80 : vector<8x128xf32>
    %82 = vector.broadcast %79 : vector<1x128xf32> to vector<8x128xf32>
    %83 = arith.addf %81, %82 : vector<8x128xf32>
    %cst_39 = arith.constant 0.000000e+00 : f32
    %84 = vector.broadcast %cst_39 : f32 to vector<8x128xf32>
    %85 = arith.maximumf %83, %84 : vector<8x128xf32>
    %86 = arith.truncf %85 : vector<8x128xf32> to vector<8x128xbf16>
    %c0_40 = arith.constant 0 : index
    %c0_41 = arith.constant 0 : index
    %87 = vector.load %arg11[%c0_40, %c0_41] : memref<128x32xbf16, #tpu.memory_space<vmem>>, vector<128x32xbf16>
    %cst_42 = arith.constant dense<0.000000e+00> : vector<8x32xf32>
    %88 = tpu.matmul %86, %87, %cst_42 {dimension_numbers = #tpu.dot_dimension_numbers<[1], [0], [0], [1], [0, 0, 1, 1], [], []>} : vector<8x128xbf16>, vector<128x32xbf16>, vector<8x32xf32> -> vector<8x32xf32>
    %cst_43 = arith.constant dense<0.000000e+00> : vector<32xf32>
    %89 = vector.multi_reduction <add>, %88, %cst_43 [0] : vector<8x32xf32> to vector<32xf32>
    %90 = vector.shape_cast %89 : vector<32xf32> to vector<1x32xf32>
    %cst_44 = arith.constant 1.250000e-01 : f32
    %91 = vector.broadcast %cst_44 : f32 to vector<1x32xf32>
    %92 = arith.mulf %90, %91 : vector<1x32xf32>
    %93 = arith.mulf %88, %88 : vector<8x32xf32>
    %cst_45 = arith.constant dense<0.000000e+00> : vector<32xf32>
    %94 = vector.multi_reduction <add>, %93, %cst_45 [0] : vector<8x32xf32> to vector<32xf32>
    %95 = vector.shape_cast %94 : vector<32xf32> to vector<1x32xf32>
    %cst_46 = arith.constant 1.250000e-01 : f32
    %96 = vector.broadcast %cst_46 : f32 to vector<1x32xf32>
    %97 = arith.mulf %95, %96 : vector<1x32xf32>
    %98 = arith.mulf %92, %92 : vector<1x32xf32>
    %99 = arith.subf %97, %98 : vector<1x32xf32>
    %c0_47 = arith.constant 0 : index
    %c0_48 = arith.constant 0 : index
    %100 = vector.load %arg12[%c0_47, %c0_48] : memref<1x32xf32, #tpu.memory_space<vmem>>, vector<1x32xf32>
    %cst_49 = arith.constant 9.99999974E-6 : f32
    %101 = vector.broadcast %cst_49 : f32 to vector<1x32xf32>
    %102 = arith.addf %99, %101 : vector<1x32xf32>
    %103 = math.rsqrt %102 : vector<1x32xf32>
    %104 = arith.mulf %100, %103 : vector<1x32xf32>
    %c0_50 = arith.constant 0 : index
    %c0_51 = arith.constant 0 : index
    %105 = vector.load %arg13[%c0_50, %c0_51] : memref<1x32xf32, #tpu.memory_space<vmem>>, vector<1x32xf32>
    %106 = arith.mulf %92, %104 : vector<1x32xf32>
    %107 = arith.subf %105, %106 : vector<1x32xf32>
    %108 = vector.broadcast %104 : vector<1x32xf32> to vector<8x32xf32>
    %109 = arith.mulf %88, %108 : vector<8x32xf32>
    %110 = vector.broadcast %107 : vector<1x32xf32> to vector<8x32xf32>
    %111 = arith.addf %109, %110 : vector<8x32xf32>
    %cst_52 = arith.constant 0.000000e+00 : f32
    %112 = vector.broadcast %cst_52 : f32 to vector<8x32xf32>
    %113 = arith.maximumf %111, %112 : vector<8x32xf32>
    %114 = arith.truncf %113 : vector<8x32xf32> to vector<8x32xbf16>
    %c0_53 = arith.constant 0 : index
    %c0_54 = arith.constant 0 : index
    %115 = vector.load %arg14[%c0_53, %c0_54] : memref<32x128xbf16, #tpu.memory_space<vmem>>, vector<32x128xbf16>
    %cst_55 = arith.constant dense<0.000000e+00> : vector<8x128xf32>
    %116 = tpu.matmul %114, %115, %cst_55 {dimension_numbers = #tpu.dot_dimension_numbers<[1], [0], [0], [1], [0, 0, 1, 1], [], []>} : vector<8x32xbf16>, vector<32x128xbf16>, vector<8x128xf32> -> vector<8x128xf32>
    %c0_56 = arith.constant 0 : index
    %c0_57 = arith.constant 0 : index
    %117 = vector.load %arg15[%c0_56, %c0_57] : memref<1x128xf32, #tpu.memory_space<vmem>>, vector<1x128xf32>
    %118 = vector.broadcast %117 : vector<1x128xf32> to vector<8x128xf32>
    %119 = arith.addf %116, %118 : vector<8x128xf32>
    %c0_58 = arith.constant 0 : index
    %c0_59 = arith.constant 0 : index
    %c0_60 = arith.constant 0 : index
    %120 = vector.load %arg16[%c0_58, %c0_59, %c0_60] : memref<1x8x128xf32, #tpu.memory_space<vmem>>, vector<1x8x128xf32>
    %121 = vector.shape_cast %120 : vector<1x8x128xf32> to vector<8x128xf32>
    %122 = vector.shape_cast %119 : vector<8x128xf32> to vector<1x8x128xf32>
    tpu.vector_store %arg16[%c0_58, %c0_59, %c0_60], %122 {strides = array<i32>} : memref<1x8x128xf32, #tpu.memory_space<vmem>>, vector<1x8x128xf32>,
    return
  }
  func.func @transform_0(%arg0: i32) -> (i32, i32, i32) {
    %c0_i32 = arith.constant 0 : i32
    %c0_i32_0 = arith.constant 0 : i32
    %c0_i32_1 = arith.constant 0 : i32
    return %arg0, %c0_i32, %c0_i32_0 : i32, i32, i32
  }
  func.func @transform_1(%arg0: i32) -> (i32, i32) {
    %c0_i32 = arith.constant 0 : i32
    %c0_i32_0 = arith.constant 0 : i32
    %c0_i32_1 = arith.constant 0 : i32
    return %c0_i32, %c0_i32_0 : i32, i32
  }
  func.func @transform_2(%arg0: i32) -> (i32, i32) {
    %c0_i32 = arith.constant 0 : i32
    %c0_i32_0 = arith.constant 0 : i32
    %c0_i32_1 = arith.constant 0 : i32
    return %c0_i32, %c0_i32_0 : i32, i32
  }
  func.func @transform_3(%arg0: i32) -> (i32, i32) {
    %c0_i32 = arith.constant 0 : i32
    %c0_i32_0 = arith.constant 0 : i32
    %c0_i32_1 = arith.constant 0 : i32
    return %c0_i32, %c0_i32_0 : i32, i32
  }
  func.func @transform_4(%arg0: i32) -> (i32, i32) {
    %c0_i32 = arith.constant 0 : i32
    %c0_i32_0 = arith.constant 0 : i32
    %c0_i32_1 = arith.constant 0 : i32
    return %c0_i32, %c0_i32_0 : i32, i32
  }
  func.func @transform_5(%arg0: i32) -> (i32, i32) {
    %c0_i32 = arith.constant 0 : i32
    %c0_i32_0 = arith.constant 0 : i32
    %c0_i32_1 = arith.constant 0 : i32
    return %c0_i32, %c0_i32_0 : i32, i32
  }
  func.func @transform_6(%arg0: i32) -> (i32, i32) {
    %c0_i32 = arith.constant 0 : i32
    %c0_i32_0 = arith.constant 0 : i32
    %c0_i32_1 = arith.constant 0 : i32
    return %c0_i32, %c0_i32_0 : i32, i32
  }
  func.func @transform_7(%arg0: i32) -> (i32, i32) {
    %c0_i32 = arith.constant 0 : i32
    %c0_i32_0 = arith.constant 0 : i32
    %c0_i32_1 = arith.constant 0 : i32
    return %c0_i32, %c0_i32_0 : i32, i32
  }
  func.func @transform_8(%arg0: i32) -> (i32, i32) {
    %c0_i32 = arith.constant 0 : i32
    %c0_i32_0 = arith.constant 0 : i32
    %c0_i32_1 = arith.constant 0 : i32
    return %c0_i32, %c0_i32_0 : i32, i32
  }
  func.func @transform_9(%arg0: i32) -> (i32, i32) {
    %c0_i32 = arith.constant 0 : i32
    %c0_i32_0 = arith.constant 0 : i32
    %c0_i32_1 = arith.constant 0 : i32
    return %c0_i32, %c0_i32_0 : i32, i32
  }
  func.func @transform_10(%arg0: i32) -> (i32, i32) {
    %c0_i32 = arith.constant 0 : i32
    %c0_i32_0 = arith.constant 0 : i32
    %c0_i32_1 = arith.constant 0 : i32
    return %c0_i32, %c0_i32_0 : i32, i32
  }
  func.func @transform_11(%arg0: i32) -> (i32, i32) {
    %c0_i32 = arith.constant 0 : i32
    %c0_i32_0 = arith.constant 0 : i32
    %c0_i32_1 = arith.constant 0 : i32
    return %c0_i32, %c0_i32_0 : i32, i32
  }
  func.func @transform_12(%arg0: i32) -> (i32, i32) {
    %c0_i32 = arith.constant 0 : i32
    %c0_i32_0 = arith.constant 0 : i32
    %c0_i32_1 = arith.constant 0 : i32
    return %c0_i32, %c0_i32_0 : i32, i32
  }
  func.func @transform_13(%arg0: i32) -> (i32, i32) {
    %c0_i32 = arith.constant 0 : i32
    %c0_i32_0 = arith.constant 0 : i32
    %c0_i32_1 = arith.constant 0 : i32
    return %c0_i32, %c0_i32_0 : i32, i32
  }
  func.func @transform_14(%arg0: i32) -> (i32, i32) {
    %c0_i32 = arith.constant 0 : i32
    %c0_i32_0 = arith.constant 0 : i32
    %c0_i32_1 = arith.constant 0 : i32
    return %c0_i32, %c0_i32_0 : i32, i32
  }
  func.func @transform_15(%arg0: i32) -> (i32, i32, i32) {
    %c0_i32 = arith.constant 0 : i32
    %c0_i32_0 = arith.constant 0 : i32
    %c0_i32_1 = arith.constant 0 : i32
    return %arg0, %c0_i32, %c0_i32_0 : i32, i32, i32
  }
}

</mosaic_0001>

<bundles_post_ra>
// kernel: tpu_custom_call.1
= control target key start
LH: loop header
LB: loop body
LE: loop exit
PB: predicated region body
PF: predicated region fallthrough
CT: control target
= control target key end

     0   :  { %20 = vsyncpa [#allocation3], 0  ;;  %s20289_s0 = inlined_call_operand.hbm [shape: f32[1,8,784], index: 0, kind: input, shape index: {}]   ;;  %s20290_s1 = inlined_call_operand.hbm [shape: bf16[784,2048], index: 1, kind: input, shape index: {}]   ;;  %s20291_s2 = inlined_call_operand.hbm [shape: f32[1,2048], index: 2, kind: input, shape index: {}]   ;;  %s20292_s3 = inlined_call_operand.hbm [shape: f32[1,2048], index: 3, kind: input, shape index: {}]   ;;  %s20293_s4 = inlined_call_operand.hbm [shape: bf16[2048,512], index: 4, kind: input, shape index: {}]   ;;  %s20294_s5 = inlined_call_operand.hbm [shape: f32[1,512], index: 5, kind: input, shape index: {}]   ;;  %s20295_s6 = inlined_call_operand.hbm [shape: f32[1,512], index: 6, kind: input, shape index: {}]   ;;  %s20296_s7 = inlined_call_operand.hbm [shape: bf16[512,128], index: 7, kind: input, shape index: {}]   ;;  %s20297_s8 = inlined_call_operand.hbm [shape: f32[1,128], index: 8, kind: input, shape index: {}]   ;;  %s20298_s9 = inlined_call_operand.hbm [shape: f32[1,128], index: 9, kind: input, shape index: {}]   ;;  %s20299_s10 = inlined_call_operand.vmem [shape: bf16[128,32], index: 10, kind: input, shape index: {}]   ;;  %s20300_s11 = inlined_call_operand.hbm [shape: f32[1,32], index: 11, kind: input, shape index: {}]   ;;  %s20301_s12 = inlined_call_operand.hbm [shape: f32[1,32], index: 12, kind: input, shape index: {}]   ;;  %s20302_s13 = inlined_call_operand.hbm [shape: bf16[32,128], index: 13, kind: input, shape index: {}]   ;;  %s20303_s14 = inlined_call_operand.hbm [shape: f32[1,128], index: 14, kind: input, shape index: {}]   ;;  %s20304_s15 = inlined_call_operand.hbm [shape: f32[1,8,128], index: 15, kind: output, shape index: {}]  }
   0x1   :  { %21 = vsyncpa [#allocation6], 0 }
   0x2   :  { %22 = vsyncpa [#allocation9], 0 }
   0x3   :  { %23 = vsyncpa [#allocation12], 0 }
   0x4   :  { %24 = vsyncpa [#allocation15], 0 }
   0x5   :  { %25 = vsyncpa [#allocation18], 0 }
   0x6   :  { %26 = vsyncpa [#allocation21], 0 }
   0x7   :  { %27 = vsyncpa [#allocation24], 0  ;;  %s44_s20 = sshll.u32 %s20290_s1, 4  ;;  %s45_s20 = int_to_ptr.hbm [resolvable:$true] %s44_s20 }
   0x8   :  { %28 = vsyncpa [#allocation4], 0  ;;  %s18896_s21 = smov [#allocation5]   ;;  %s69_s25 = sshll.u32 %s20292_s3, 4  ;;  %s70_s25 = int_to_ptr.hbm [resolvable:$true] %s69_s25 }
   0x9   :  { %s46_s22 = sshll.u32 %s18896_s21, 4  ;;  %s18897_s26 = smov 1024   ;;  %s47_s22 = int_to_ptr.vmem [resolvable:$true] %s46_s22 }
   0xa   :  { %s18898_s27 = smov 64   ;;  %s18899_s28 = smov [#allocation8]  }
   0xb   :  { %52 = dma.hbm_to_vmem [thread:$0]  %s45_s20, 100352, %s47_s22, [#allocation6], %s18897_s26, %s18897_s26, %s18898_s27  }
   0xc   :  { %s71_s29 = sshll.u32 %s18899_s28, 4  ;;  %s93_s1 = sshll.u32 %s20294_s5, 4  ;;  %s72_s29 = int_to_ptr.vmem [resolvable:$true] %s71_s29  ;;  %s94_s1 = int_to_ptr.hbm [resolvable:$true] %s93_s1 }
   0xd   :  { %74 = dma.hbm_to_vmem [thread:$0]  %s70_s25, 256, %s72_s29, [#allocation9]  }
   0xe   :  { %s114_s19 = sshll.u32 %s20296_s7, 4  ;;  %s18900_s21 = smov [#allocation11]   ;;  %s115_s19 = int_to_ptr.hbm [resolvable:$true] %s114_s19 }
   0xf   :  { %s95_s3 = sshll.u32 %s18900_s21, 4  ;;  %s18901_s20 = smov [#allocation14]   ;;  %s96_s3 = int_to_ptr.vmem [resolvable:$true] %s95_s3 }
  0x10   :  { %98 = dma.hbm_to_vmem [thread:$0]  %s94_s1, 64, %s96_s3, [#allocation12]  }
  0x11   :  { %s116_s22 = sshll.u32 %s18901_s20, 4  ;;  %s139_s26 = sshll.u32 %s20298_s9, 4  ;;  %s117_s22 = int_to_ptr.vmem [resolvable:$true] %s116_s22  ;;  %s140_s26 = int_to_ptr.hbm [resolvable:$true] %s139_s26 }
  0x12   :  { %s18902_s5 = smov 4   ;;  %s18903_s25 = smov [#allocation17]  }
  0x13   :  { %122 = dma.hbm_to_vmem [thread:$0]  %s115_s19, 4096, %s117_s22, [#allocation15], %s18898_s27, %s18898_s27, %s18902_s5  }
  0x14   :  { %s141_s7 = sshll.u32 %s18903_s25, 4  ;;  %s163_s30 = sshll.u32 %s20301_s12, 4  ;;  %s142_s7 = int_to_ptr.vmem [resolvable:$true] %s141_s7  ;;  %s164_s30 = int_to_ptr.hbm [resolvable:$true] %s163_s30 }
  0x15   :  { %144 = dma.hbm_to_vmem [thread:$0]  %s140_s26, 16, %s142_s7, [#allocation18]  }
  0x16   :  { %s34_s17 = sshll.u32 %s20289_s0, 4  ;;  %s18904_s9 = smov [#allocation20]   ;;  %s35_s17 = int_to_ptr.hbm [resolvable:$true] %s34_s17 }
  0x17   :  { %s165_s18 = sshll.u32 %s18904_s9, 4  ;;  %s18905_s19 = smov [#allocation2]   ;;  %s166_s18 = int_to_ptr.vmem [resolvable:$true] %s165_s18 }
  0x18   :  { %168 = dma.hbm_to_vmem [thread:$0]  %s164_s30, 16, %s166_s18, [#allocation21]  }
  0x19   :  { %s36_s21 = sshll.u32 %s18905_s19, 4  ;;  %s58_s22 = sshll.u32 %s20291_s2, 4  ;;  %s37_s21 = int_to_ptr.vmem [resolvable:$true] %s36_s21  ;;  %s59_s22 = int_to_ptr.hbm [resolvable:$true] %s58_s22 }
  0x1a   :  { %39 = dma.hbm_to_vmem [thread:$0]  %s35_s17, 896, %s37_s21, [#allocation3]  }
  0x1b   :  { %s79_s24 = sshll.u32 %s20293_s4, 4  ;;  %s18906_s26 = smov [#allocation7]   ;;  %s80_s24 = int_to_ptr.hbm [resolvable:$true] %s79_s24 }
  0x1c   :  { %s60_s0 = sshll.u32 %s18906_s26, 4  ;;  %s18907_s25 = smov [#allocation10]   ;;  %s61_s0 = int_to_ptr.vmem [resolvable:$true] %s60_s0 }
  0x1d   :  { %63 = dma.hbm_to_vmem [thread:$0]  %s59_s22, 256, %s61_s0, [#allocation6]  }
  0x1e   :  { %s81_s7 = sshll.u32 %s18907_s25, 4  ;;  %s18908_s28 = smov 256   ;;  %s82_s7 = int_to_ptr.vmem [resolvable:$true] %s81_s7 }
  0x1f   :  { %s18909_s29 = smov 16   ;;  %s104_s16 = sshll.u32 %s20295_s6, 4  ;;  %s105_s16 = int_to_ptr.hbm [resolvable:$true] %s104_s16 }
  0x20   :  { %87 = dma.hbm_to_vmem [thread:$0]  %s80_s24, 65536, %s82_s7, [#allocation9], %s18908_s28, %s18908_s28, %s18909_s29  }
  0x21   :  { %s18910_s1 = smov [#allocation13]   ;;  %s128_s18 = sshll.u32 %s20297_s8, 4  ;;  %s129_s18 = int_to_ptr.hbm [resolvable:$true] %s128_s18 }
  0x22   :  { %s106_s17 = sshll.u32 %s18910_s1, 4  ;;  %s18911_s19 = smov [#allocation16]   ;;  %s107_s17 = int_to_ptr.vmem [resolvable:$true] %s106_s17 }
  0x23   :  { %109 = dma.hbm_to_vmem [thread:$0]  %s105_s16, 64, %s107_s17, [#allocation12]  }
  0x24   :  { %s130_s21 = sshll.u32 %s18911_s19, 4  ;;  %s152_s22 = sshll.u32 %s20300_s11, 4  ;;  %s131_s21 = int_to_ptr.vmem [resolvable:$true] %s130_s21  ;;  %s153_s22 = int_to_ptr.hbm [resolvable:$true] %s152_s22 }
  0x25   :  { %133 = dma.hbm_to_vmem [thread:$0]  %s129_s18, 16, %s131_s21, [#allocation15]  }
  0x26   :  { %s173_s23 = sshll.u32 %s20302_s13, 4  ;;  %s18912_s24 = smov [#allocation19]   ;;  %s174_s23 = int_to_ptr.hbm [resolvable:$true] %s173_s23 }
  0x27   :  { %s154_s26 = sshll.u32 %s18912_s24, 4  ;;  %s18913_s8 = smov [#allocation22]   ;;  %s155_s26 = int_to_ptr.vmem [resolvable:$true] %s154_s26 }
  0x28   :  { %157 = dma.hbm_to_vmem [thread:$0]  %s153_s22, 16, %s155_s26, [#allocation18]  }
  0x29   :  { %s175_s0 = sshll.u32 %s18913_s8, 4  ;;  %s187_s28 = sshll.u32 %s20303_s14, 4  ;;  %s176_s0 = int_to_ptr.vmem [resolvable:$true] %s175_s0  ;;  %s188_s28 = int_to_ptr.hbm [resolvable:$true] %s187_s28 }
  0x2a   :  { %181 = dma.hbm_to_vmem [thread:$0]  %s174_s23, 256, %s176_s0, [#allocation21], %s18898_s27, %s18898_s27, %s18902_s5  }
  0x2b   :  { %s18914_s11 = smov [#allocation23]  }
  0x2c   :  { %s189_s29 = sshll.u32 %s18914_s11, 4  ;;  %s190_s29 = int_to_ptr.vmem [resolvable:$true] %s189_s29 }
  0x2d   :  { %192 = dma.hbm_to_vmem [thread:$0]  %s188_s28, 16, %s190_s29, [#allocation24]  }
  0x2e   :  { %18878 = dma.done.wait [#allocation3], 896  }
  0x2f   :  { %18879 = vsyncadd [#allocation3], 4294966400 }
  0x30   :  { %18880 = dma.done.wait [#allocation6], 100608  }
  0x31   :  { %18881 = vsyncadd [#allocation6], 4294866688 }
  0x32   :  { %18882 = dma.done.wait [#allocation9], 65792  }
  0x33   :  { %18883 = vsyncadd [#allocation9], 4294901504 }
  0x34   :  { %18884 = dma.done.wait [#allocation12], 128  }
  0x35   :  { %18885 = vsyncadd [#allocation12], 4294967168 }
  0x36   :  { %18886 = dma.done.wait [#allocation15], 4112  }
  0x37   :  { %18887 = vsyncadd [#allocation15], 4294963184 }
  0x38   :  { %18888 = dma.done.wait [#allocation18], 32  }
  0x39   :  { %18889 = vsyncadd [#allocation18], 4294967264 }
  0x3a   :  { %18890 = dma.done.wait [#allocation21], 272  }
  0x3b   :  { %18891 = vsyncadd [#allocation21], 4294967024 }
  0x3c   :  { %18892 = dma.done.wait [#allocation24], 16  }
  0x3d   :  { %18893 = vsyncadd [#allocation24], 4294967280  ;;  %v12196_v0 = vld [vmem:[#allocation5 + $0x380] sm:$0xf]  ;;  %vm4968_vm0 = vcmask 130048   ;;  %vm6908_vm7 = vcmask 1040384  }
  0x3e   :  { %v17235_v1 = vld [vmem:[#allocation5 + $0x3bc] sm:$0xf0]  ;;  %vm6910_vm14 = vcmask 1042434   ;;  %vm6912_vm15 = vcmask 1041408   ;;  %s11729_s23 = sshll.u32 %s20304_s15, 4  ;;  %s11730_s23 = int_to_ptr.hbm [resolvable:$true] %s11729_s23 }
  0x3f   :  { %v12708_v2 = vld [vmem:[#allocation5 + $0x780] sm:$0xf]  ;;  %v12197_v3 = vor.u32 %v17235_v1, %v12196_v0 }
  0x40   :  { %v17363_v4 = vld [vmem:[#allocation5 + $0x7bc] sm:$0xf0] }
  0x41   :  { %v13220_v5 = vld [vmem:[#allocation5 + $0xb80] sm:$0xf]  ;;  %v12709_v7 = vor.u32 %v17363_v4, %v12708_v2  ;;  %4972 = vmatpush.bf16.msra.mxu0 %v12197_v3 }
  0x42   :  { %v17491_v6 = vld [vmem:[#allocation5 + $0xbbc] sm:$0xf0] }
  0x43   :  { %v13221_v8 = vor.u32 %v17491_v6, %v13220_v5  ;;  %v13732_v9 = vld [vmem:[#allocation5 + $0xf80] sm:$0xf]  ;;  %4985 = vmatpush.bf16.msra.mxu1 %v12709_v7 }
  0x44   :  { %v17619_v10 = vld [vmem:[#allocation5 + $0xfbc] sm:$0xf0] }
  0x45   :  { %v12132_v11 = vld [vmem:[#allocation5 + $0x300] sm:$0xf]  ;;  %v13733_v12 = vor.u32 %v17619_v10, %v13732_v9  ;;  %4998 = vmatpush.bf16.msra.mxu2 %v13221_v8 }
  0x46   :  { %v17219_v13 = vld [vmem:[#allocation5 + $0x33c] sm:$0xf0] }
  0x47   :  { %v12644_v14 = vld [vmem:[#allocation5 + $0x700] sm:$0xf]  ;;  %v12133_v16 = vor.u32 %v17219_v13, %v12132_v11  ;;  %5011 = vmatpush.bf16.msra.mxu3 %v13733_v12 }
  0x48   :  { %v17347_v15 = vld [vmem:[#allocation5 + $0x73c] sm:$0xf0] }
  0x49   :  { %v12645_v17 = vor.u32 %v17347_v15, %v12644_v14  ;;  %v13156_v18 = vld [vmem:[#allocation5 + $0xb00] sm:$0xf]  ;;  %4973 = vmatpush.bf16.msra.mxu0 %v12133_v16 }
  0x4a   :  { %v17475_v19 = vld [vmem:[#allocation5 + $0xb3c] sm:$0xf0] }
  0x4b   :  { %v13668_v20 = vld [vmem:[#allocation5 + $0xf00] sm:$0xf]  ;;  %v13157_v21 = vor.u32 %v17475_v19, %v13156_v18  ;;  %4986 = vmatpush.bf16.msra.mxu1 %v12645_v17 }
  0x4c   :  { %v17603_v22 = vld [vmem:[#allocation5 + $0xf3c] sm:$0xf0] }
  0x4d   :  { %v12068_v23 = vld [vmem:[#allocation5 + $0x280] sm:$0xf]  ;;  %v13669_v25 = vor.u32 %v17603_v22, %v13668_v20  ;;  %4999 = vmatpush.bf16.msra.mxu2 %v13157_v21 }
  0x4e   :  { %v17203_v24 = vld [vmem:[#allocation5 + $0x2bc] sm:$0xf0] }
  0x4f   :  { %v12580_v26 = vld [vmem:[#allocation5 + $0x680] sm:$0xf]  ;;  %v12069_v29 = vor.u32 %v17203_v24, %v12068_v23  ;;  %5012 = vmatpush.bf16.msra.mxu3 %v13669_v25 }
  0x50   :  { %v17331_v27 = vld [vmem:[#allocation5 + $0x6bc] sm:$0xf0] }
  0x51   :  { %v13092_v28 = vld [vmem:[#allocation5 + $0xa80] sm:$0xf]  ;;  %v12581_v33 = vor.u32 %v17331_v27, %v12580_v26  ;;  %4974 = vmatpush.bf16.msra.mxu0 %v12069_v29 }
  0x52   :  { %v17459_v30 = vld [vmem:[#allocation5 + $0xabc] sm:$0xf0] }
  0x53   :  { %v13604_v31 = vld [vmem:[#allocation5 + $0xe80] sm:$0xf]  ;;  %v13093_v34 = vor.u32 %v17459_v30, %v13092_v28  ;;  %4987 = vmatpush.bf16.msra.mxu1 %v12581_v33  ;;  %v17227_v33 = vld [vmem:[#allocation5 + $0x384] sm:$0xf] }
  0x54   :  { %v17587_v32 = vld [vmem:[#allocation5 + $0xebc] sm:$0xf0] }
  0x55   :  { %v12004_v35 = vld [vmem:[#allocation5 + $0x200] sm:$0xf]  ;;  %v13605_v38 = vor.u32 %v17587_v32, %v13604_v31  ;;  %5000 = vmatpush.bf16.msra.mxu2 %v13093_v34  ;;  %v12198_v34 = vld [vmem:[#allocation5 + $0x3c0] sm:$0xf0] }
  0x56   :  { %v17187_v36 = vld [vmem:[#allocation5 + $0x23c] sm:$0xf0] }
  0x57   :  { %v12516_v37 = vld [vmem:[#allocation5 + $0x600] sm:$0xf]  ;;  %v12005_v44 = vor.u32 %v17187_v36, %v12004_v35  ;;  %5013 = vmatpush.bf16.msra.mxu3 %v13605_v38  ;;  %v252_v35 = vld [vmem:[#allocation2 + $0x10] sm:$0xff] }
  0x58   :  { %v17315_v39 = vld [vmem:[#allocation5 + $0x63c] sm:$0xf0] }
  0x59   :  { %v13028_v40 = vld [vmem:[#allocation5 + $0xa00] sm:$0xf]  ;;  %v12517_v45 = vor.u32 %v17315_v39, %v12516_v37  ;;  %4975 = vmatpush.bf16.msra.mxu0 %v12005_v44 }
  0x5a   :  { %v17443_v41 = vld [vmem:[#allocation5 + $0xa3c] sm:$0xf0] }
  0x5b   :  { %v13540_v42 = vld [vmem:[#allocation5 + $0xe00] sm:$0xf]  ;;  %v13029_v46 = vor.u32 %v17443_v41, %v13028_v40  ;;  %4988 = vmatpush.bf16.msra.mxu1 %v12517_v45  ;;  %v17355_v40 = vld [vmem:[#allocation5 + $0x784] sm:$0xf] }
  0x5c   :  { %v17571_v43 = vld [vmem:[#allocation5 + $0xe3c] sm:$0xf0] }
  0x5d   :  { %v11940_v47 = vld [vmem:[#allocation5 + $0x180] sm:$0xf]  ;;  %v13541_v50 = vor.u32 %v17571_v43, %v13540_v42  ;;  %5001 = vmatpush.bf16.msra.mxu2 %v13029_v46  ;;  %v12710_v43 = vld [vmem:[#allocation5 + $0x7c0] sm:$0xf0] }
  0x5e   :  { %v17171_v48 = vld [vmem:[#allocation5 + $0x1bc] sm:$0xf0] }
  0x5f   :  { %v12452_v49 = vld [vmem:[#allocation5 + $0x580] sm:$0xf]  ;;  %v11941_v56 = vor.u32 %v17171_v48, %v11940_v47  ;;  %5014 = vmatpush.bf16.msra.mxu3 %v13541_v50  ;;  %v12201_v47 = vor.u32 %v17227_v33, %v12198_v34  ;;  %v250_v50 = vld [vmem:[#allocation2] sm:$0xff] }
  0x60   :  { %v17299_v51 = vld [vmem:[#allocation5 + $0x5bc] sm:$0xf0] }
  0x61   :  { %v12964_v52 = vld [vmem:[#allocation5 + $0x980] sm:$0xf]  ;;  %v12453_v57 = vor.u32 %v17299_v51, %v12452_v49  ;;  %4976 = vmatpush.bf16.msra.mxu0 %v11941_v56  ;;  %v19045_v51 = vpack.c.bf16 %v252_v35, %v252_v35  ;;  %v17291_v35 = vld [vmem:[#allocation5 + $0x584] sm:$0xf] }
  0x62   :  { %v17427_v53 = vld [vmem:[#allocation5 + $0x9bc] sm:$0xf0] }
  0x63   :  { %v13476_v54 = vld [vmem:[#allocation5 + $0xd80] sm:$0xf]  ;;  %v12965_v58 = vor.u32 %v17427_v53, %v12964_v52  ;;  %4989 = vmatpush.bf16.msra.mxu1 %v12453_v57  ;;  %v17211_v53 = vld [vmem:[#allocation5 + $0x304] sm:$0xf] }
  0x64   :  { %v17555_v55 = vld [vmem:[#allocation5 + $0xdbc] sm:$0xf0] }
  0x65   :  { %v11876_v59 = vld [vmem:[#allocation5 + $0x100] sm:$0xf]  ;;  %v13477_v62 = vor.u32 %v17555_v55, %v13476_v54  ;;  %5002 = vmatpush.bf16.msra.mxu2 %v12965_v58  ;;  %v12134_v54 = vld [vmem:[#allocation5 + $0x340] sm:$0xf0]  ;;  %v19047_v55 = vpack.c.bf16 %v250_v50, %v250_v50  ;;  %v251_v58 = vld [vmem:[#allocation2 + $0x8] sm:$0xff] }
  0x66   :  { %v17155_v60 = vld [vmem:[#allocation5 + $0x13c] sm:$0xf0] }
  0x67   :  { %v12388_v61 = vld [vmem:[#allocation5 + $0x500] sm:$0xf]  ;;  %v11877_v4 = vor.u32 %v17155_v60, %v11876_v59  ;;  %5015 = vmatpush.bf16.msra.mxu3 %v13477_v62  ;;  %v12713_v59 = vor.u32 %v17355_v40, %v12710_v43  ;;  %v12646_v62 = vld [vmem:[#allocation5 + $0x740] sm:$0xf0] }
  0x68   :  { %v17283_v63 = vld [vmem:[#allocation5 + $0x53c] sm:$0xf0]  ;;  %v17147_v43 = vld [vmem:[#allocation5 + $0x104] sm:$0xf] }
  0x69   :  { %v12900_v0 = vld [vmem:[#allocation5 + $0x900] sm:$0xf]  ;;  %v12389_v5 = vor.u32 %v17283_v63, %v12388_v61  ;;  %4977 = vmatpush.bf16.msra.mxu0 %v11877_v4  ;;  %v17339_v61 = vld [vmem:[#allocation5 + $0x704] sm:$0xf] }
  0x6a   :  { %v17411_v1 = vld [vmem:[#allocation5 + $0x93c] sm:$0xf0] }
  0x6b   :  { %v13412_v2 = vld [vmem:[#allocation5 + $0xd00] sm:$0xf]  ;;  %v12901_v6 = vor.u32 %v17411_v1, %v12900_v0  ;;  %4990 = vmatpush.bf16.msra.mxu1 %v12389_v5  ;;  %v12137_v0 = vor.u32 %v17211_v53, %v12134_v54  ;;  %v17195_v5 = vld [vmem:[#allocation5 + $0x284] sm:$0xf] }
  0x6c   :  { %v17539_v3 = vld [vmem:[#allocation5 + $0xd3c] sm:$0xf0] }
  0x6d   :  { %v11812_v7 = vld [vmem:[#allocation5 + $0x80] sm:$0xf]  ;;  %v13413_v10 = vor.u32 %v17539_v3, %v13412_v2  ;;  %5003 = vmatpush.bf16.msra.mxu2 %v12901_v6  ;;  %v12070_v6 = vld [vmem:[#allocation5 + $0x2c0] sm:$0xf0] }
  0x6e   :  { %v17139_v8 = vld [vmem:[#allocation5 + $0xbc] sm:$0xf0] }
  0x6f   :  { %v12324_v9 = vld [vmem:[#allocation5 + $0x480] sm:$0xf]  ;;  %v11813_v16 = vor.u32 %v17139_v8, %v11812_v7  ;;  %5016 = vmatpush.bf16.msra.mxu3 %v13413_v10  ;;  %v19053_v7 = vpack.c.bf16 %v251_v58, %v251_v58  ;;  %v12649_v8 = vor.u32 %v17339_v61, %v12646_v62  ;;  %v17323_v10 = vld [vmem:[#allocation5 + $0x684] sm:$0xf] }
  0x70   :  { %v17267_v11 = vld [vmem:[#allocation5 + $0x4bc] sm:$0xf0] }
  0x71   :  { %v12836_v12 = vld [vmem:[#allocation5 + $0x880] sm:$0xf]  ;;  %v12325_v20 = vor.u32 %v17267_v11, %v12324_v9  ;;  %4978 = vmatpush.bf16.msra.mxu0 %v11813_v16  ;;  %v12582_v11 = vld [vmem:[#allocation5 + $0x6c0] sm:$0xf0] }
  0x72   :  { %v17395_v13 = vld [vmem:[#allocation5 + $0x8bc] sm:$0xf0] }
  0x73   :  { %v13348_v14 = vld [vmem:[#allocation5 + $0xc80] sm:$0xf]  ;;  %v12837_v21 = vor.u32 %v17395_v13, %v12836_v12  ;;  %4991 = vmatpush.bf16.msra.mxu1 %v12325_v20  ;;  %v12073_v13 = vor.u32 %v17195_v5, %v12070_v6  ;;  %v12585_v20 = vor.u32 %v17323_v10, %v12582_v11  ;;  %v17483_v10 = vld [vmem:[#allocation5 + $0xb84] sm:$0xf] }
  0x74   :  { %v17523_v15 = vld [vmem:[#allocation5 + $0xcbc] sm:$0xf0]  ;;  %v13222_v11 = vld [vmem:[#allocation5 + $0xbc0] sm:$0xf0] }
  0x75   :  { %v11748_v17 = vld [vmem:[#allocation5] sm:$0xf]  ;;  %v13349_v25 = vor.u32 %v17523_v15, %v13348_v14  ;;  %5004 = vmatpush.bf16.msra.mxu2 %v12837_v21 }
  0x76   :  { %v17123_v18 = vld [vmem:[#allocation5 + $0x3c] sm:$0xf0] }
  0x77   :  { %v12260_v19 = vld [vmem:[#allocation5 + $0x400] sm:$0xf]  ;;  %v11749_v32 = vor.u32 %v17123_v18, %v11748_v17  ;;  %5017 = vmatpush.bf16.msra.mxu3 %v13349_v25  ;;  %v17179_v18 = vld [vmem:[#allocation5 + $0x204] sm:$0xf] }
  0x78   :  { %v17251_v22 = vld [vmem:[#allocation5 + $0x43c] sm:$0xf0] }
  0x79   :  { %v12772_v23 = vld [vmem:[#allocation5 + $0x800] sm:$0xf]  ;;  %v12261_v36 = vor.u32 %v17251_v22, %v12260_v19  ;;  %4979 = vmatpush.bf16.msra.mxu0 %v11749_v32  ;;  %v12006_v19 = vld [vmem:[#allocation5 + $0x240] sm:$0xf0]  ;;  %v256_v32 = vld [vmem:[#allocation2 + $0x30] sm:$0xff] }
  0x7a   :  { %v17379_v24 = vld [vmem:[#allocation5 + $0x83c] sm:$0xf0]  ;;  %v17307_v22 = vld [vmem:[#allocation5 + $0x604] sm:$0xf]  ;;  %v12009_v25 = vor.u32 %v17179_v18, %v12006_v19  ;;  %v254_v18 = vld [vmem:[#allocation2 + $0x20] sm:$0xff] }
  0x7b   :  { %v13284_v26 = vld [vmem:[#allocation5 + $0xc00] sm:$0xf]  ;;  %v12773_v37 = vor.u32 %v17379_v24, %v12772_v23  ;;  %4992 = vmatpush.bf16.msra.mxu1 %v12261_v36  ;;  %v12518_v23 = vld [vmem:[#allocation5 + $0x640] sm:$0xf0] }
  0x7c   :  { %v17507_v27 = vld [vmem:[#allocation5 + $0xc3c] sm:$0xf0]  ;;  %4980 = vmatmul.bf16.vlgmr.msra.gmra.mxu0 %v19047_v55  ;;  %v12521_v33 = vor.u32 %v17307_v22, %v12518_v23  ;;  %v12454_v36 = vld [vmem:[#allocation5 + $0x5c0] sm:$0xf0]  ;;  %v255_v23 = vld [vmem:[#allocation2 + $0x28] sm:$0xff] }
  0x7d   :  { %v14244_v28 = vld [vmem:[#allocation5 + $0x1380] sm:$0xf]  ;;  %v13285_v41 = vor.u32 %v17507_v27, %v13284_v26  ;;  %5005 = vmatpush.bf16.msra.mxu2 %v12773_v37  ;;  %v12262_v22 = vld [vmem:[#allocation5 + $0x440] sm:$0xf0] }
  0x7e   :  { %v17747_v29 = vld [vmem:[#allocation5 + $0x13bc] sm:$0xf0]  ;;  %4993 = vmatmul.bf16.vlgmr.msra.gmra.mxu1 %v19053_v7 }
  0x7f   :  { %v14756_v30 = vld [vmem:[#allocation5 + $0x1780] sm:$0xf]  ;;  %v14245_v42 = vor.u32 %v17747_v29, %v14244_v28  ;;  %5018 = vmatpush.bf16.msra.mxu3 %v13285_v41 }
  0x80   :  { %v17875_v31 = vld [vmem:[#allocation5 + $0x17bc] sm:$0xf0]  ;;  %5006 = vmatmul.bf16.vlgmr.msra.gmra.mxu2 %v19045_v51 }
  0x81   :  { %v14820_v38 = vld [vmem:[#allocation5 + $0x1800] sm:$0xf]  ;;  %v14757_v46 = vor.u32 %v17875_v31, %v14756_v30  ;;  %5024 = vmatpush.bf16.msrb.mxu0 %v14245_v42  ;;  %v17163_v30 = vld [vmem:[#allocation5 + $0x184] sm:$0xf] }
  0x82   :  { %v17891_v39 = vld [vmem:[#allocation5 + $0x183c] sm:$0xf0]  ;;  %v11942_v31 = vld [vmem:[#allocation5 + $0x1c0] sm:$0xf0] }
  0x83   :  { %v14180_v44 = vld [vmem:[#allocation5 + $0x1300] sm:$0xf]  ;;  %v14821_v56 = vor.u32 %v17891_v39, %v14820_v38  ;;  %5037 = vmatpush.bf16.msrb.mxu1 %v14757_v46  ;;  %5063 = vmatpush.bf16.msrb.mxu3 %v12201_v47  ;;  %v11945_v38 = vor.u32 %v17163_v30, %v11942_v31  ;;  %v12457_v46 = vor.u32 %v17291_v35, %v12454_v36  ;;  %v13158_v31 = vld [vmem:[#allocation5 + $0xb40] sm:$0xf0] }
  0x84   :  { %v253_v45 = vld [vmem:[#allocation2 + $0x18] sm:$0xff]  ;;  %v19061_v30 = vpack.c.bf16 %v254_v18, %v254_v18  ;;  %v19063_v35 = vpack.c.bf16 %v255_v23, %v255_v23 }
  0x85   :  { %v17731_v48 = vld [vmem:[#allocation5 + $0x133c] sm:$0xf0]  ;;  %v19049_v57 = vpack.c.bf16 %v253_v45, %v253_v45  ;;  %5057 = vmatpush.bf16.msrb.mxu2 %v14821_v56  ;;  %v19057_v45 = vpack.c.bf16 %v256_v32, %v256_v32  ;;  %v17595_v32 = vld [vmem:[#allocation5 + $0xf04] sm:$0xf] }
  0x86   :  { %v14692_v49 = vld [vmem:[#allocation5 + $0x1700] sm:$0xf]  ;;  %v14181_v60 = vor.u32 %v17731_v48, %v14180_v44  ;;  %v11878_v44 = vld [vmem:[#allocation5 + $0x140] sm:$0xf0] }
  0x87   :  { %v17859_v52 = vld [vmem:[#allocation5 + $0x173c] sm:$0xf0]  ;;  %5019 = vmatmul.bf16.vlgmr.msra.gmra.mxu3 %v19049_v57  ;;  %v17275_v48 = vld [vmem:[#allocation5 + $0x504] sm:$0xf] }
  0x88   :  { %v14693_v63 = vor.u32 %v17859_v52, %v14692_v49  ;;  %v14116_v1 = vld [vmem:[#allocation5 + $0x1280] sm:$0xf]  ;;  %5025 = vmatpush.bf16.msrb.mxu0 %v14181_v60  ;;  %5064 = vmatpush.bf16.msrb.mxu3 %v12137_v0  ;;  %v12390_v49 = vld [vmem:[#allocation5 + $0x540] sm:$0xf0]  ;;  %v11881_v52 = vor.u32 %v17147_v43, %v11878_v44 }
  0x89   :  { %v17715_v2 = vld [vmem:[#allocation5 + $0x12bc] sm:$0xf0]  ;;  %5076 = vmatpush.bf16.msra.mxu2 %v12713_v59  ;;  %v17131_v59 = vld [vmem:[#allocation5 + $0x84] sm:$0xf]  ;;  %v12393_v61 = vor.u32 %v17275_v48, %v12390_v49 }
  0x8a   :  { %v14628_v3 = vld [vmem:[#allocation5 + $0x1680] sm:$0xf]  ;;  %v14117_v9 = vor.u32 %v17715_v2, %v14116_v1  ;;  %5038 = vmatpush.bf16.msrb.mxu1 %v14693_v63  ;;  %v11814_v60 = vld [vmem:[#allocation5 + $0xc0] sm:$0xf0] }
  0x8b   :  { %v17843_v4 = vld [vmem:[#allocation5 + $0x16bc] sm:$0xf0]  ;;  %v17259_v63 = vld [vmem:[#allocation5 + $0x484] sm:$0xf] }
  0x8c   :  { %v14629_v12 = vor.u32 %v17843_v4, %v14628_v3  ;;  %v14052_v14 = vld [vmem:[#allocation5 + $0x1200] sm:$0xf]  ;;  %5026 = vmatpush.bf16.msrb.mxu0 %v14117_v9  ;;  %5065 = vmatpush.bf16.msrb.mxu3 %v12073_v13  ;;  %v12326_v0 = vld [vmem:[#allocation5 + $0x4c0] sm:$0xf0]  ;;  %v11817_v3 = vor.u32 %v17131_v59, %v11814_v60 }
  0x8d   :  { %v17699_v15 = vld [vmem:[#allocation5 + $0x123c] sm:$0xf0]  ;;  %5077 = vmatpush.bf16.msra.mxu2 %v12649_v8  ;;  %v17115_v8 = vld [vmem:[#allocation5 + $0x4] sm:$0xf] }
  0x8e   :  { %v14564_v16 = vld [vmem:[#allocation5 + $0x1600] sm:$0xf]  ;;  %v14053_v21 = vor.u32 %v17699_v15, %v14052_v14  ;;  %5039 = vmatpush.bf16.msrb.mxu1 %v14629_v12  ;;  %v11750_v9 = vld [vmem:[#allocation5 + $0x40] sm:$0xf0]  ;;  %v12329_v14 = vor.u32 %v17259_v63, %v12326_v0 }
  0x8f   :  { %v17827_v17 = vld [vmem:[#allocation5 + $0x163c] sm:$0xf0]  ;;  %v17611_v12 = vld [vmem:[#allocation5 + $0xf84] sm:$0xf] }
  0x90   :  { %v14565_v24 = vor.u32 %v17827_v17, %v14564_v16  ;;  %v13988_v26 = vld [vmem:[#allocation5 + $0x1180] sm:$0xf]  ;;  %5027 = vmatpush.bf16.msrb.mxu0 %v14053_v21  ;;  %5066 = vmatpush.bf16.msrb.mxu3 %v12009_v25  ;;  %v13734_v13 = vld [vmem:[#allocation5 + $0xfc0] sm:$0xf0] }
  0x91   :  { %v17683_v27 = vld [vmem:[#allocation5 + $0x11bc] sm:$0xf0]  ;;  %5078 = vmatpush.bf16.msra.mxu2 %v12585_v20  ;;  %v17739_v16 = vld [vmem:[#allocation5 + $0x1384] sm:$0xf]  ;;  %v11753_v20 = vor.u32 %v17115_v8, %v11750_v9  ;;  %v13737_v25 = vor.u32 %v17611_v12, %v13734_v13 }
  0x92   :  { %v14500_v28 = vld [vmem:[#allocation5 + $0x1580] sm:$0xf]  ;;  %v13989_v34 = vor.u32 %v17683_v27, %v13988_v26  ;;  %5040 = vmatpush.bf16.msrb.mxu1 %v14565_v24  ;;  %14882 = vmatmul.msk.bf16.vlgmr.msrb.gmra.mxu2 %vm4968_vm0, %v19057_v45  ;;  %v14246_v17 = vld [vmem:[#allocation5 + $0x13c0] sm:$0xf0]  ;;  %v13225_v24 = vor.u32 %v17483_v10, %v13222_v11 }
  0x93   :  { %v17811_v29 = vld [vmem:[#allocation5 + $0x15bc] sm:$0xf0]  ;;  %v17243_v21 = vld [vmem:[#allocation5 + $0x404] sm:$0xf] }
  0x94   :  { %v14501_v37 = vor.u32 %v17811_v29, %v14500_v28  ;;  %v13924_v39 = vld [vmem:[#allocation5 + $0x1100] sm:$0xf]  ;;  %5028 = vmatpush.bf16.msrb.mxu0 %v13989_v34  ;;  %5067 = vmatpush.bf16.msrb.mxu3 %v11945_v38  ;;  %v17867_v26 = vld [vmem:[#allocation5 + $0x1784] sm:$0xf]  ;;  %v14249_v29 = vor.u32 %v17739_v16, %v14246_v17  ;;  %v12265_v34 = vor.u32 %v17243_v21, %v12262_v22 }
  0x95   :  { %v17667_v40 = vld [vmem:[#allocation5 + $0x113c] sm:$0xf0]  ;;  %5079 = vmatpush.bf16.msra.mxu2 %v12521_v33  ;;  %v14758_v27 = vld [vmem:[#allocation5 + $0x17c0] sm:$0xf0] }
  0x96   :  { %v14436_v41 = vld [vmem:[#allocation5 + $0x1500] sm:$0xf]  ;;  %v13925_v47 = vor.u32 %v17667_v40, %v13924_v39  ;;  %5041 = vmatpush.bf16.msrb.mxu1 %v14501_v37  ;;  %v17467_v28 = vld [vmem:[#allocation5 + $0xb04] sm:$0xf]  ;;  %v14761_v38 = vor.u32 %v17867_v26, %v14758_v27 }
  0x97   :  { %v17795_v42 = vld [vmem:[#allocation5 + $0x153c] sm:$0xf0]  ;;  %v13670_v33 = vld [vmem:[#allocation5 + $0xf40] sm:$0xf0]  ;;  %v13161_v39 = vor.u32 %v17467_v28, %v13158_v31 }
  0x98   :  { %v14437_v50 = vor.u32 %v17795_v42, %v14436_v41  ;;  %v13860_v53 = vld [vmem:[#allocation5 + $0x1080] sm:$0xf]  ;;  %5029 = vmatpush.bf16.msrb.mxu0 %v13925_v47  ;;  %5068 = vmatpush.bf16.msrb.mxu3 %v11881_v52  ;;  %v17723_v36 = vld [vmem:[#allocation5 + $0x1304] sm:$0xf]  ;;  %v13673_v40 = vor.u32 %v17595_v32, %v13670_v33 }
  0x99   :  { %v17651_v54 = vld [vmem:[#allocation5 + $0x10bc] sm:$0xf0]  ;;  %5080 = vmatpush.bf16.msra.mxu2 %v12457_v46  ;;  %v14182_v37 = vld [vmem:[#allocation5 + $0x1340] sm:$0xf0] }
  0x9a   :  { %v14372_v56 = vld [vmem:[#allocation5 + $0x1480] sm:$0xf]  ;;  %v13861_v62 = vor.u32 %v17651_v54, %v13860_v53  ;;  %5042 = vmatpush.bf16.msrb.mxu1 %v14437_v50  ;;  %v17851_v41 = vld [vmem:[#allocation5 + $0x1704] sm:$0xf]  ;;  %v14185_v44 = vor.u32 %v17723_v36, %v14182_v37 }
  0x9b   :  { %v17779_v58 = vld [vmem:[#allocation5 + $0x14bc] sm:$0xf0]  ;;  %v14694_v42 = vld [vmem:[#allocation5 + $0x1740] sm:$0xf0] }
  0x9c   :  { %v13796_v1 = vld [vmem:[#allocation5 + $0x1000] sm:$0xf]  ;;  %v14373_v2 = vor.u32 %v17779_v58, %v14372_v56  ;;  %5030 = vmatpush.bf16.msrb.mxu0 %v13861_v62  ;;  %5069 = vmatpush.bf16.msrb.mxu3 %v11817_v3  ;;  %v17451_v43 = vld [vmem:[#allocation5 + $0xa84] sm:$0xf]  ;;  %v14697_v52 = vor.u32 %v17851_v41, %v14694_v42 }
  0x9d   :  { %v17635_v4 = vld [vmem:[#allocation5 + $0x103c] sm:$0xf0]  ;;  %5081 = vmatpush.bf16.msra.mxu2 %v12393_v61  ;;  %v13094_v46 = vld [vmem:[#allocation5 + $0xac0] sm:$0xf0] }
  0x9e   :  { %v14308_v5 = vld [vmem:[#allocation5 + $0x1400] sm:$0xf]  ;;  %v13797_v15 = vor.u32 %v17635_v4, %v13796_v1  ;;  %5043 = vmatpush.bf16.msrb.mxu1 %v14373_v2  ;;  %v17579_v47 = vld [vmem:[#allocation5 + $0xe84] sm:$0xf]  ;;  %v13097_v53 = vor.u32 %v17451_v43, %v13094_v46 }
  0x9f   :  { %v17763_v6 = vld [vmem:[#allocation5 + $0x143c] sm:$0xf0]  ;;  %v13606_v48 = vld [vmem:[#allocation5 + $0xec0] sm:$0xf0] }
  0xa0   :  { %v14309_v19 = vor.u32 %v17763_v6, %v14308_v5  ;;  %5031 = vmatpush.bf16.msrb.mxu0 %v13797_v15  ;;  %5070 = vmatpush.bf16.msrb.mxu3 %v11753_v20  ;;  %v17707_v49 = vld [vmem:[#allocation5 + $0x1284] sm:$0xf]  ;;  %v13609_v54 = vor.u32 %v17579_v47, %v13606_v48 }
  0xa1   :  { %5082 = vmatpush.bf16.msra.mxu2 %v12329_v14  ;;  %v14118_v50 = vld [vmem:[#allocation5 + $0x12c0] sm:$0xf0] }
  0xa2   :  { %5044 = vmatpush.bf16.msrb.mxu1 %v14309_v19  ;;  %v17835_v56 = vld [vmem:[#allocation5 + $0x1684] sm:$0xf]  ;;  %v14121_v60 = vor.u32 %v17707_v49, %v14118_v50 }
  0xa3   :  { %5032 = vmatmul.bf16.vlgmr.msrb.gmra.mxu0 %v19061_v30  ;;  %5071 = vmatmul.bf16.vlgmr.msrb.gmra.mxu3 %v19047_v55  ;;  %v14630_v58 = vld [vmem:[#allocation5 + $0x16c0] sm:$0xf0] }
  0xa4   :  { %5089 = vmatpush.bf16.msra.mxu0 %v13225_v24  ;;  %5115 = vmatpush.bf16.msra.mxu3 %v14249_v29  ;;  %v17435_v59 = vld [vmem:[#allocation5 + $0xa04] sm:$0xf]  ;;  %v14633_v2 = vor.u32 %v17835_v56, %v14630_v58  ;;  %v12204_v56 = vld [vmem:[#allocation5 + $0x388] sm:$0xf] }
  0xa5   :  { %5083 = vmatpush.bf16.msra.mxu2 %v12265_v34  ;;  %5045 = vmatmul.bf16.vlgmr.msrb.gmra.mxu1 %v19063_v35  ;;  %v13030_v61 = vld [vmem:[#allocation5 + $0xa40] sm:$0xf0]  ;;  %v17236_v58 = vld [vmem:[#allocation5 + $0x3c4] sm:$0xf0] }
  0xa6   :  { %5102 = vmatpush.bf16.msra.mxu1 %v13737_v25  ;;  %v17563_v62 = vld [vmem:[#allocation5 + $0xe04] sm:$0xf]  ;;  %v13033_v3 = vor.u32 %v17435_v59, %v13030_v61  ;;  %v12716_v59 = vld [vmem:[#allocation5 + $0x788] sm:$0xf] }
  0xa7   :  { %v13542_v63 = vld [vmem:[#allocation5 + $0xe40] sm:$0xf0]  ;;  %v17364_v61 = vld [vmem:[#allocation5 + $0x7c4] sm:$0xf0] }
  0xa8   :  { %5090 = vmatpush.bf16.msra.mxu0 %v13161_v39  ;;  %5116 = vmatpush.bf16.msra.mxu3 %v14185_v44  ;;  %v17691_v0 = vld [vmem:[#allocation5 + $0x1204] sm:$0xf]  ;;  %v13545_v4 = vor.u32 %v17563_v62, %v13542_v63 }
  0xa9   :  { %5128 = vmatpush.bf16.msrb.mxu2 %v14761_v38  ;;  %v14054_v1 = vld [vmem:[#allocation5 + $0x1240] sm:$0xf0] }
  0xaa   :  { %5103 = vmatpush.bf16.msra.mxu1 %v13673_v40  ;;  %5084 = vmatmul.bf16.vlgmr.msra.gmra.mxu2 %v19053_v7  ;;  %v17819_v5 = vld [vmem:[#allocation5 + $0x1604] sm:$0xf]  ;;  %v14057_v9 = vor.u32 %v17691_v0, %v14054_v1 }
  0xab   :  { %v14566_v6 = vld [vmem:[#allocation5 + $0x1640] sm:$0xf0] }
  0xac   :  { %5091 = vmatpush.bf16.msra.mxu0 %v13097_v53  ;;  %v17419_v8 = vld [vmem:[#allocation5 + $0x984] sm:$0xf]  ;;  %5117 = vmatpush.bf16.msra.mxu3 %v14121_v60  ;;  %v14569_v15 = vor.u32 %v17819_v5, %v14566_v6  ;;  %v12205_v6 = vor.u32 %v17236_v58, %v12204_v56  ;;  %v17172_v56 = vld [vmem:[#allocation5 + $0x1c4] sm:$0xf0] }
  0xad   :  { %5129 = vmatpush.bf16.msrb.mxu2 %v14697_v52  ;;  %v12966_v10 = vld [vmem:[#allocation5 + $0x9c0] sm:$0xf0]  ;;  %v12460_v58 = vld [vmem:[#allocation5 + $0x588] sm:$0xf] }
  0xae   :  { %5104 = vmatpush.bf16.msra.mxu1 %v13609_v54  ;;  %v17547_v11 = vld [vmem:[#allocation5 + $0xd84] sm:$0xf]  ;;  %v12969_v16 = vor.u32 %v17419_v8, %v12966_v10  ;;  %v17492_v8 = vld [vmem:[#allocation5 + $0xbc4] sm:$0xf0] }
  0xaf   :  { %v13478_v12 = vld [vmem:[#allocation5 + $0xdc0] sm:$0xf0]  ;;  %v17620_v10 = vld [vmem:[#allocation5 + $0xfc4] sm:$0xf0] }
  0xb0   :  { %v17675_v13 = vld [vmem:[#allocation5 + $0x1184] sm:$0xf]  ;;  %5092 = vmatpush.bf16.msra.mxu0 %v13033_v3  ;;  %v13481_v17 = vor.u32 %v17547_v11, %v13478_v12  ;;  %5118 = vmatpush.bf16.msra.mxu3 %v14057_v9  ;;  %v13740_v9 = vld [vmem:[#allocation5 + $0xf88] sm:$0xf]  ;;  %v12717_v11 = vor.u32 %v17364_v61, %v12716_v59 }
  0xb1   :  { %v13990_v14 = vld [vmem:[#allocation5 + $0x11c0] sm:$0xf0]  ;;  %5130 = vmatpush.bf16.msrb.mxu2 %v14633_v2  ;;  %v17300_v59 = vld [vmem:[#allocation5 + $0x5c4] sm:$0xf0] }
  0xb2   :  { %5105 = vmatpush.bf16.msra.mxu1 %v13545_v4  ;;  %v17803_v18 = vld [vmem:[#allocation5 + $0x1584] sm:$0xf]  ;;  %v13993_v21 = vor.u32 %v17675_v13, %v13990_v14  ;;  %v13228_v4 = vld [vmem:[#allocation5 + $0xb88] sm:$0xf] }
  0xb3   :  { %v14502_v19 = vld [vmem:[#allocation5 + $0x15c0] sm:$0xf0]  ;;  %v12140_v13 = vld [vmem:[#allocation5 + $0x308] sm:$0xf] }
  0xb4   :  { %v17403_v20 = vld [vmem:[#allocation5 + $0x904] sm:$0xf]  ;;  %v14505_v27 = vor.u32 %v17803_v18, %v14502_v19  ;;  %5093 = vmatpush.bf16.msra.mxu0 %v12969_v16  ;;  %5119 = vmatpush.bf16.msra.mxu3 %v13993_v21  ;;  %v17220_v14 = vld [vmem:[#allocation5 + $0x344] sm:$0xf0]  ;;  %v13229_v18 = vor.u32 %v17492_v8, %v13228_v4  ;;  %v13741_v19 = vor.u32 %v17620_v10, %v13740_v9 }
  0xb5   :  { %v12902_v22 = vld [vmem:[#allocation5 + $0x940] sm:$0xf0]  ;;  %5131 = vmatpush.bf16.msrb.mxu2 %v14569_v15  ;;  %v12652_v16 = vld [vmem:[#allocation5 + $0x708] sm:$0xf]  ;;  %v12141_v21 = vor.u32 %v17220_v14, %v12140_v13 }
  0xb6   :  { %v17531_v23 = vld [vmem:[#allocation5 + $0xd04] sm:$0xf]  ;;  %5106 = vmatpush.bf16.msra.mxu1 %v13481_v17  ;;  %v12905_v28 = vor.u32 %v17403_v20, %v12902_v22  ;;  %v17348_v17 = vld [vmem:[#allocation5 + $0x744] sm:$0xf0] }
  0xb7   :  { %v13414_v24 = vld [vmem:[#allocation5 + $0xd40] sm:$0xf0]  ;;  %v13164_v20 = vld [vmem:[#allocation5 + $0xb08] sm:$0xf] }
  0xb8   :  { %v17659_v25 = vld [vmem:[#allocation5 + $0x1104] sm:$0xf]  ;;  %v13417_v29 = vor.u32 %v17531_v23, %v13414_v24  ;;  %5094 = vmatpush.bf16.msra.mxu0 %v12905_v28  ;;  %v17476_v22 = vld [vmem:[#allocation5 + $0xb44] sm:$0xf0] }
  0xb9   :  { %v13926_v26 = vld [vmem:[#allocation5 + $0x1140] sm:$0xf0]  ;;  %5132 = vmatpush.bf16.msrb.mxu2 %v14505_v27  ;;  %v13676_v23 = vld [vmem:[#allocation5 + $0xf08] sm:$0xf] }
  0xba   :  { %v17787_v31 = vld [vmem:[#allocation5 + $0x1504] sm:$0xf]  ;;  %v13929_v34 = vor.u32 %v17659_v25, %v13926_v26  ;;  %5107 = vmatpush.bf16.msra.mxu1 %v13417_v29  ;;  %v17604_v24 = vld [vmem:[#allocation5 + $0xf44] sm:$0xf0]  ;;  %v12653_v25 = vor.u32 %v17348_v17, %v12652_v16 }
  0xbb   :  { %v14438_v32 = vld [vmem:[#allocation5 + $0x1540] sm:$0xf0]  ;;  %v12076_v26 = vld [vmem:[#allocation5 + $0x288] sm:$0xf] }
  0xbc   :  { %v17387_v33 = vld [vmem:[#allocation5 + $0x884] sm:$0xf]  ;;  %v14441_v41 = vor.u32 %v17787_v31, %v14438_v32  ;;  %5120 = vmatpush.bf16.msra.mxu3 %v13929_v34  ;;  %v17204_v27 = vld [vmem:[#allocation5 + $0x2c4] sm:$0xf0]  ;;  %v13165_v31 = vor.u32 %v17476_v22, %v13164_v20  ;;  %v13677_v32 = vor.u32 %v17604_v24, %v13676_v23 }
  0xbd   :  { %v12838_v36 = vld [vmem:[#allocation5 + $0x8c0] sm:$0xf0]  ;;  %v12588_v28 = vld [vmem:[#allocation5 + $0x688] sm:$0xf]  ;;  %v12077_v34 = vor.u32 %v17204_v27, %v12076_v26 }
  0xbe   :  { %v17515_v37 = vld [vmem:[#allocation5 + $0xc84] sm:$0xf]  ;;  %v12841_v44 = vor.u32 %v17387_v33, %v12838_v36  ;;  %5133 = vmatpush.bf16.msrb.mxu2 %v14441_v41  ;;  %v17332_v29 = vld [vmem:[#allocation5 + $0x6c4] sm:$0xf0] }
  0xbf   :  { %v13350_v38 = vld [vmem:[#allocation5 + $0xcc0] sm:$0xf0]  ;;  %v13100_v33 = vld [vmem:[#allocation5 + $0xa88] sm:$0xf] }
  0xc0   :  { %v17643_v39 = vld [vmem:[#allocation5 + $0x1084] sm:$0xf]  ;;  %v13353_v46 = vor.u32 %v17515_v37, %v13350_v38  ;;  %5095 = vmatpush.bf16.msra.mxu0 %v12841_v44  ;;  %v17460_v36 = vld [vmem:[#allocation5 + $0xac4] sm:$0xf0] }
  0xc1   :  { %v13862_v40 = vld [vmem:[#allocation5 + $0x10c0] sm:$0xf0]  ;;  %v13612_v37 = vld [vmem:[#allocation5 + $0xe88] sm:$0xf]  ;;  %v13101_v44 = vor.u32 %v17460_v36, %v13100_v33 }
  0xc2   :  { %v17771_v42 = vld [vmem:[#allocation5 + $0x1484] sm:$0xf]  ;;  %v13865_v50 = vor.u32 %v17643_v39, %v13862_v40  ;;  %5108 = vmatpush.bf16.msra.mxu1 %v13353_v46  ;;  %v17588_v38 = vld [vmem:[#allocation5 + $0xec4] sm:$0xf0]  ;;  %v12589_v39 = vor.u32 %v17332_v29, %v12588_v28 }
  0xc3   :  { %v14374_v43 = vld [vmem:[#allocation5 + $0x14c0] sm:$0xf0]  ;;  %v12012_v40 = vld [vmem:[#allocation5 + $0x208] sm:$0xf]  ;;  %v13613_v46 = vor.u32 %v17588_v38, %v13612_v37 }
  0xc4   :  { %v17371_v47 = vld [vmem:[#allocation5 + $0x804] sm:$0xf]  ;;  %v14377_v60 = vor.u32 %v17771_v42, %v14374_v43  ;;  %5121 = vmatpush.bf16.msra.mxu3 %v13865_v50  ;;  %v17188_v41 = vld [vmem:[#allocation5 + $0x244] sm:$0xf0] }
  0xc5   :  { %v12774_v48 = vld [vmem:[#allocation5 + $0x840] sm:$0xf0]  ;;  %v12524_v42 = vld [vmem:[#allocation5 + $0x608] sm:$0xf] }
  0xc6   :  { %v17499_v49 = vld [vmem:[#allocation5 + $0xc04] sm:$0xf]  ;;  %v12777_v0 = vor.u32 %v17371_v47, %v12774_v48  ;;  %5134 = vmatpush.bf16.msrb.mxu2 %v14377_v60  ;;  %v17316_v43 = vld [vmem:[#allocation5 + $0x644] sm:$0xf0]  ;;  %v12013_v48 = vor.u32 %v17188_v41, %v12012_v40 }
  0xc7   :  { %v13286_v52 = vld [vmem:[#allocation5 + $0xc40] sm:$0xf0]  ;;  %v13036_v47 = vld [vmem:[#allocation5 + $0xa08] sm:$0xf] }
  0xc8   :  { %v17627_v53 = vld [vmem:[#allocation5 + $0x1004] sm:$0xf]  ;;  %v13289_v1 = vor.u32 %v17499_v49, %v13286_v52  ;;  %5096 = vmatpush.bf16.msra.mxu0 %v12777_v0  ;;  %v17444_v49 = vld [vmem:[#allocation5 + $0xa44] sm:$0xf0] }
  0xc9   :  { %v13798_v54 = vld [vmem:[#allocation5 + $0x1040] sm:$0xf0]  ;;  %v13548_v50 = vld [vmem:[#allocation5 + $0xe08] sm:$0xf]  ;;  %v13037_v60 = vor.u32 %v17444_v49, %v13036_v47  ;;  %v17228_v47 = vld [vmem:[#allocation5 + $0x38c] sm:$0xf] }
  0xca   :  { %v17883_v62 = vld [vmem:[#allocation5 + $0x1804] sm:$0xf]  ;;  %v13801_v5 = vor.u32 %v17627_v53, %v13798_v54  ;;  %5109 = vmatpush.bf16.msra.mxu1 %v13289_v1  ;;  %v17572_v52 = vld [vmem:[#allocation5 + $0xe44] sm:$0xf0]  ;;  %v12525_v53 = vor.u32 %v17316_v43, %v12524_v42 }
  0xcb   :  { %v14822_v63 = vld [vmem:[#allocation5 + $0x1840] sm:$0xf0]  ;;  %5097 = vmatmul.bf16.vlgmr.msra.gmra.mxu0 %v19045_v51  ;;  %v11948_v54 = vld [vmem:[#allocation5 + $0x188] sm:$0xf]  ;;  %v13549_v61 = vor.u32 %v17572_v52, %v13548_v50  ;;  %v12206_v50 = vld [vmem:[#allocation5 + $0x3c8] sm:$0xf0] }
  0xcc   :  { %v17755_v2 = vld [vmem:[#allocation5 + $0x1404] sm:$0xf]  ;;  %v14825_v12 = vor.u32 %v17883_v62, %v14822_v63  ;;  %5122 = vmatpush.bf16.msra.mxu3 %v13801_v5  ;;  %v12972_v62 = vld [vmem:[#allocation5 + $0x988] sm:$0xf]  ;;  %v11949_v63 = vor.u32 %v17172_v56, %v11948_v54 }
  0xcd   :  { %v14310_v3 = vld [vmem:[#allocation5 + $0x1440] sm:$0xf0]  ;;  %5110 = vmatmul.bf16.vlgmr.msra.gmra.mxu1 %v19049_v57  ;;  %v17428_v0 = vld [vmem:[#allocation5 + $0x9c4] sm:$0xf0] }
  0xce   :  { %v14313_v15 = vor.u32 %v17755_v2, %v14310_v3  ;;  %5154 = vmatpush.bf16.msrb.mxu1 %v12205_v6  ;;  %5148 = vmatpush.bf16.msrb.mxu0 %v14825_v12  ;;  %v13484_v1 = vld [vmem:[#allocation5 + $0xd88] sm:$0xf]  ;;  %v12461_v3 = vor.u32 %v17300_v59, %v12460_v58  ;;  %v12973_v9 = vor.u32 %v17428_v0, %v12972_v62 }
  0xcf   :  { %5123 = vmatmul.bf16.vlgmr.msra.gmra.mxu3 %v19061_v30  ;;  %v17556_v2 = vld [vmem:[#allocation5 + $0xdc4] sm:$0xf0] }
  0xd0   :  { %5167 = vmatpush.bf16.msrb.mxu3 %v12717_v11  ;;  %5135 = vmatpush.bf16.msrb.mxu2 %v14313_v15  ;;  %v11884_v4 = vld [vmem:[#allocation5 + $0x108] sm:$0xf]  ;;  %v13485_v10 = vor.u32 %v17556_v2, %v13484_v1  ;;  %v17356_v1 = vld [vmem:[#allocation5 + $0x78c] sm:$0xf] }
  0xd1   :  { %v17156_v5 = vld [vmem:[#allocation5 + $0x144] sm:$0xf0]  ;;  %v12718_v2 = vld [vmem:[#allocation5 + $0x7c8] sm:$0xf0] }
  0xd2   :  { %5180 = vmatpush.bf16.msra.mxu0 %v13229_v18  ;;  %5155 = vmatpush.bf16.msrb.mxu1 %v12141_v21  ;;  %v12396_v6 = vld [vmem:[#allocation5 + $0x508] sm:$0xf]  ;;  %v11885_v12 = vor.u32 %v17156_v5, %v11884_v4  ;;  %v17212_v4 = vld [vmem:[#allocation5 + $0x30c] sm:$0xf] }
  0xd3   :  { %5136 = vmatmul.bf16.vlgmr.msrb.gmra.mxu2 %v19063_v35  ;;  %v17284_v8 = vld [vmem:[#allocation5 + $0x544] sm:$0xf0]  ;;  %v12142_v5 = vld [vmem:[#allocation5 + $0x348] sm:$0xf0] }
  0xd4   :  { %5193 = vmatpush.bf16.msra.mxu2 %v13741_v19  ;;  %5168 = vmatpush.bf16.msrb.mxu3 %v12653_v25  ;;  %v12908_v11 = vld [vmem:[#allocation5 + $0x908] sm:$0xf]  ;;  %v12397_v16 = vor.u32 %v17284_v8, %v12396_v6 }
  0xd5   :  { %v17412_v13 = vld [vmem:[#allocation5 + $0x944] sm:$0xf0] }
  0xd6   :  { %5181 = vmatpush.bf16.msra.mxu0 %v13165_v31  ;;  %5156 = vmatpush.bf16.msrb.mxu1 %v12077_v34  ;;  %v13420_v14 = vld [vmem:[#allocation5 + $0xd08] sm:$0xf]  ;;  %v12909_v21 = vor.u32 %v17412_v13, %v12908_v11  ;;  %v12145_v13 = vor.u32 %v17212_v4, %v12142_v5  ;;  %v17276_v4 = vld [vmem:[#allocation5 + $0x50c] sm:$0xf] }
  0xd7   :  { %v17540_v15 = vld [vmem:[#allocation5 + $0xd44] sm:$0xf0]  ;;  %v12398_v5 = vld [vmem:[#allocation5 + $0x548] sm:$0xf0] }
  0xd8   :  { %5194 = vmatpush.bf16.msra.mxu2 %v13677_v32  ;;  %5169 = vmatpush.bf16.msrb.mxu3 %v12589_v39  ;;  %v11820_v17 = vld [vmem:[#allocation5 + $0x88] sm:$0xf]  ;;  %v13421_v22 = vor.u32 %v17540_v15, %v13420_v14  ;;  %v17340_v14 = vld [vmem:[#allocation5 + $0x70c] sm:$0xf] }
  0xd9   :  { %v17140_v18 = vld [vmem:[#allocation5 + $0xc4] sm:$0xf0]  ;;  %v12654_v15 = vld [vmem:[#allocation5 + $0x748] sm:$0xf0] }
  0xda   :  { %5182 = vmatpush.bf16.msra.mxu0 %v13101_v44  ;;  %5157 = vmatpush.bf16.msrb.mxu1 %v12013_v48  ;;  %v12332_v19 = vld [vmem:[#allocation5 + $0x488] sm:$0xf]  ;;  %v11821_v25 = vor.u32 %v17140_v18, %v11820_v17  ;;  %v17196_v17 = vld [vmem:[#allocation5 + $0x28c] sm:$0xf] }
  0xdb   :  { %14883 = vmatmul.msk.bf16.vlgmr.msrb.gmra.mxu0 %vm4968_vm0, %v19057_v45  ;;  %v17268_v20 = vld [vmem:[#allocation5 + $0x4c4] sm:$0xf0]  ;;  %v12078_v18 = vld [vmem:[#allocation5 + $0x2c8] sm:$0xf0] }
  0xdc   :  { %5195 = vmatpush.bf16.msra.mxu2 %v13613_v46  ;;  %5170 = vmatpush.bf16.msrb.mxu3 %v12525_v53  ;;  %v12844_v23 = vld [vmem:[#allocation5 + $0x888] sm:$0xf]  ;;  %v12333_v29 = vor.u32 %v17268_v20, %v12332_v19 }
  0xdd   :  { %v17396_v24 = vld [vmem:[#allocation5 + $0x8c4] sm:$0xf0] }
  0xde   :  { %5183 = vmatpush.bf16.msra.mxu0 %v13037_v60  ;;  %5158 = vmatpush.bf16.msrb.mxu1 %v11949_v63  ;;  %v13356_v26 = vld [vmem:[#allocation5 + $0xc88] sm:$0xf]  ;;  %v12845_v38 = vor.u32 %v17396_v24, %v12844_v23  ;;  %v12209_v63 = vor.u32 %v17228_v47, %v12206_v50 }
  0xdf   :  { %v17524_v27 = vld [vmem:[#allocation5 + $0xcc4] sm:$0xf0] }
  0xe0   :  { %5196 = vmatpush.bf16.msra.mxu2 %v13549_v61  ;;  %5171 = vmatpush.bf16.msrb.mxu3 %v12461_v3  ;;  %v11756_v28 = vld [vmem:[#allocation5 + $0x8] sm:$0xf]  ;;  %v13357_v39 = vor.u32 %v17524_v27, %v13356_v26  ;;  %v17324_v26 = vld [vmem:[#allocation5 + $0x68c] sm:$0xf] }
  0xe1   :  { %v17124_v31 = vld [vmem:[#allocation5 + $0x44] sm:$0xf0]  ;;  %v12590_v27 = vld [vmem:[#allocation5 + $0x6c8] sm:$0xf0] }
  0xe2   :  { %5184 = vmatpush.bf16.msra.mxu0 %v12973_v9  ;;  %5159 = vmatpush.bf16.msrb.mxu1 %v11885_v12  ;;  %v12268_v32 = vld [vmem:[#allocation5 + $0x408] sm:$0xf]  ;;  %v11757_v43 = vor.u32 %v17124_v31, %v11756_v28  ;;  %v12014_v31 = vld [vmem:[#allocation5 + $0x248] sm:$0xf0] }
  0xe3   :  { %v17252_v33 = vld [vmem:[#allocation5 + $0x444] sm:$0xf0] }
  0xe4   :  { %5197 = vmatpush.bf16.msra.mxu2 %v13485_v10  ;;  %5172 = vmatpush.bf16.msrb.mxu3 %v12397_v16  ;;  %v14252_v34 = vld [vmem:[#allocation5 + $0x1388] sm:$0xf]  ;;  %v12269_v48 = vor.u32 %v17252_v33, %v12268_v32  ;;  %v12721_v10 = vor.u32 %v17356_v1, %v12718_v2 }
  0xe5   :  { %v17748_v36 = vld [vmem:[#allocation5 + $0x13c4] sm:$0xf0] }
  0xe6   :  { %v14764_v37 = vld [vmem:[#allocation5 + $0x1788] sm:$0xf]  ;;  %5185 = vmatpush.bf16.msra.mxu0 %v12909_v21  ;;  %5160 = vmatpush.bf16.msrb.mxu1 %v11821_v25  ;;  %v14253_v49 = vor.u32 %v17748_v36, %v14252_v34  ;;  %v12081_v25 = vor.u32 %v17196_v17, %v12078_v18  ;;  %v12593_v36 = vor.u32 %v17324_v26, %v12590_v27  ;;  %v13230_v17 = vld [vmem:[#allocation5 + $0xbc8] sm:$0xf0] }
  0xe7   :  { %v17876_v40 = vld [vmem:[#allocation5 + $0x17c4] sm:$0xf0]  ;;  %v17612_v18 = vld [vmem:[#allocation5 + $0xf8c] sm:$0xf] }
  0xe8   :  { %5198 = vmatpush.bf16.msra.mxu2 %v13421_v22  ;;  %v12780_v41 = vld [vmem:[#allocation5 + $0x808] sm:$0xf]  ;;  %5173 = vmatpush.bf16.msrb.mxu3 %v12333_v29  ;;  %v14765_v54 = vor.u32 %v17876_v40, %v14764_v37  ;;  %v12657_v22 = vor.u32 %v17340_v14, %v12654_v15  ;;  %v17180_v29 = vld [vmem:[#allocation5 + $0x20c] sm:$0xf]  ;;  %v12401_v15 = vor.u32 %v17276_v4, %v12398_v5 }
  0xe9   :  { %v17380_v42 = vld [vmem:[#allocation5 + $0x844] sm:$0xf0]  ;;  %v17308_v40 = vld [vmem:[#allocation5 + $0x60c] sm:$0xf] }
  0xea   :  { %v13292_v44 = vld [vmem:[#allocation5 + $0xc08] sm:$0xf]  ;;  %5186 = vmatpush.bf16.msra.mxu0 %v12845_v38  ;;  %v12781_v59 = vor.u32 %v17380_v42, %v12780_v41  ;;  %5161 = vmatpush.bf16.msrb.mxu1 %v11757_v43  ;;  %v12526_v41 = vld [vmem:[#allocation5 + $0x648] sm:$0xf0] }
  0xeb   :  { %v17508_v46 = vld [vmem:[#allocation5 + $0xc44] sm:$0xf0]  ;;  %v17164_v43 = vld [vmem:[#allocation5 + $0x18c] sm:$0xf] }
  0xec   :  { %v14828_v52 = vld [vmem:[#allocation5 + $0x1808] sm:$0xf]  ;;  %5199 = vmatpush.bf16.msra.mxu2 %v13357_v39  ;;  %v13293_v60 = vor.u32 %v17508_v46, %v13292_v44  ;;  %5174 = vmatpush.bf16.msrb.mxu3 %v12269_v48  ;;  %v12017_v39 = vor.u32 %v17180_v29, %v12014_v31  ;;  %v11950_v44 = vld [vmem:[#allocation5 + $0x1c8] sm:$0xf0] }
  0xed   :  { %v17892_v53 = vld [vmem:[#allocation5 + $0x1844] sm:$0xf0]  ;;  %5162 = vmatmul.bf16.vlgmr.msrb.gmra.mxu1 %v19047_v55  ;;  %v14254_v29 = vld [vmem:[#allocation5 + $0x13c8] sm:$0xf0] }
  0xee   :  { %v14188_v56 = vld [vmem:[#allocation5 + $0x1308] sm:$0xf]  ;;  %v14829_v0 = vor.u32 %v17892_v53, %v14828_v52  ;;  %5206 = vmatpush.bf16.msra.mxu1 %v14253_v49  ;;  %5187 = vmatpush.bf16.msra.mxu0 %v12781_v59  ;;  %v12529_v49 = vor.u32 %v17308_v40, %v12526_v41  ;;  %v11953_v53 = vor.u32 %v17164_v43, %v11950_v44  ;;  %v17148_v59 = vld [vmem:[#allocation5 + $0x10c] sm:$0xf] }
  0xef   :  { %v17732_v58 = vld [vmem:[#allocation5 + $0x1344] sm:$0xf0]  ;;  %5175 = vmatmul.bf16.vlgmr.msrb.gmra.mxu3 %v19053_v7  ;;  %v12270_v40 = vld [vmem:[#allocation5 + $0x448] sm:$0xf0] }
  0xf0   :  { %v14700_v61 = vld [vmem:[#allocation5 + $0x1708] sm:$0xf]  ;;  %v14189_v3 = vor.u32 %v17732_v58, %v14188_v56  ;;  %5219 = vmatpush.bf16.msra.mxu3 %v14765_v54  ;;  %5200 = vmatpush.bf16.msra.mxu2 %v13293_v60  ;;  %v17292_v54 = vld [vmem:[#allocation5 + $0x58c] sm:$0xf] }
  0xf1   :  { %v17860_v62 = vld [vmem:[#allocation5 + $0x1744] sm:$0xf0]  ;;  %5188 = vmatmul.bf16.vlgmr.msra.gmra.mxu0 %v19045_v51  ;;  %v12462_v56 = vld [vmem:[#allocation5 + $0x5c8] sm:$0xf0] }
  0xf2   :  { %v14701_v6 = vor.u32 %v17860_v62, %v14700_v61  ;;  %v14124_v8 = vld [vmem:[#allocation5 + $0x1288] sm:$0xf]  ;;  %5239 = vmatpush.bf16.msrb.mxu0 %v14829_v0  ;;  %5207 = vmatpush.bf16.msra.mxu1 %v14189_v3  ;;  %v11886_v60 = vld [vmem:[#allocation5 + $0x148] sm:$0xf0]  ;;  %v12465_v0 = vor.u32 %v17292_v54, %v12462_v56 }
  0xf3   :  { %v17716_v9 = vld [vmem:[#allocation5 + $0x12c4] sm:$0xf0]  ;;  %5201 = vmatmul.bf16.vlgmr.msra.gmra.mxu2 %v19049_v57  ;;  %v11889_v3 = vor.u32 %v17148_v59, %v11886_v60  ;;  %v14766_v43 = vld [vmem:[#allocation5 + $0x17c8] sm:$0xf0] }
  0xf4   :  { %v14636_v11 = vld [vmem:[#allocation5 + $0x1688] sm:$0xf]  ;;  %5245 = vmatpush.bf16.msrb.mxu2 %v12209_v63  ;;  %v14125_v16 = vor.u32 %v17716_v9, %v14124_v8  ;;  %5220 = vmatpush.bf16.msra.mxu3 %v14701_v6  ;;  %v17132_v8 = vld [vmem:[#allocation5 + $0x8c] sm:$0xf] }
  0xf5   :  { %v17844_v12 = vld [vmem:[#allocation5 + $0x16c4] sm:$0xf0]  ;;  %v11822_v9 = vld [vmem:[#allocation5 + $0xc8] sm:$0xf0] }
  0xf6   :  { %v14637_v19 = vor.u32 %v17844_v12, %v14636_v11  ;;  %v14060_v20 = vld [vmem:[#allocation5 + $0x1208] sm:$0xf]  ;;  %5258 = vmatpush.bf16.msra.mxu0 %v12721_v10  ;;  %5208 = vmatpush.bf16.msra.mxu1 %v14125_v16  ;;  %v17484_v16 = vld [vmem:[#allocation5 + $0xb8c] sm:$0xf] }
  0xf7   :  { %v17700_v21 = vld [vmem:[#allocation5 + $0x1244] sm:$0xf0]  ;;  %v13233_v27 = vor.u32 %v17484_v16, %v13230_v17  ;;  %v17580_v54 = vld [vmem:[#allocation5 + $0xe8c] sm:$0xf] }
  0xf8   :  { %v14572_v23 = vld [vmem:[#allocation5 + $0x1608] sm:$0xf]  ;;  %5246 = vmatpush.bf16.msrb.mxu2 %v12145_v13  ;;  %v14061_v28 = vor.u32 %v17700_v21, %v14060_v20  ;;  %5221 = vmatpush.bf16.msra.mxu3 %v14637_v19  ;;  %v11825_v19 = vor.u32 %v17132_v8, %v11822_v9  ;;  %v13742_v20 = vld [vmem:[#allocation5 + $0xfc8] sm:$0xf0] }
  0xf9   :  { %v17828_v24 = vld [vmem:[#allocation5 + $0x1644] sm:$0xf0]  ;;  %v17260_v21 = vld [vmem:[#allocation5 + $0x48c] sm:$0xf]  ;;  %v13745_v31 = vor.u32 %v17612_v18, %v13742_v20 }
  0xfa   :  { %v14573_v32 = vor.u32 %v17828_v24, %v14572_v23  ;;  %v13996_v33 = vld [vmem:[#allocation5 + $0x1188] sm:$0xf]  ;;  %5259 = vmatpush.bf16.msra.mxu0 %v12657_v22  ;;  %5209 = vmatpush.bf16.msra.mxu1 %v14061_v28  ;;  %v12334_v22 = vld [vmem:[#allocation5 + $0x4c8] sm:$0xf0] }
  0xfb   :  { %v17684_v34 = vld [vmem:[#allocation5 + $0x11c4] sm:$0xf0]  ;;  %v17116_v24 = vld [vmem:[#allocation5 + $0xc] sm:$0xf] }
  0xfc   :  { %v14508_v37 = vld [vmem:[#allocation5 + $0x1588] sm:$0xf]  ;;  %5247 = vmatpush.bf16.msrb.mxu2 %v12081_v25  ;;  %v13997_v42 = vor.u32 %v17684_v34, %v13996_v33  ;;  %5222 = vmatpush.bf16.msra.mxu3 %v14573_v32  ;;  %v11758_v25 = vld [vmem:[#allocation5 + $0x48] sm:$0xf0]  ;;  %v12337_v32 = vor.u32 %v17260_v21, %v12334_v22 }
  0xfd   :  { %v17812_v38 = vld [vmem:[#allocation5 + $0x15c4] sm:$0xf0]  ;;  %v17740_v28 = vld [vmem:[#allocation5 + $0x138c] sm:$0xf] }
  0xfe   :  { %v14509_v46 = vor.u32 %v17812_v38, %v14508_v37  ;;  %v13932_v47 = vld [vmem:[#allocation5 + $0x1108] sm:$0xf]  ;;  %5260 = vmatpush.bf16.msra.mxu0 %v12593_v36  ;;  %5210 = vmatpush.bf16.msra.mxu1 %v13997_v42  ;;  %v17468_v33 = vld [vmem:[#allocation5 + $0xb0c] sm:$0xf]  ;;  %v11761_v37 = vor.u32 %v17116_v24, %v11758_v25  ;;  %v14257_v41 = vor.u32 %v17740_v28, %v14254_v29 }
  0xff   :  { %v17668_v48 = vld [vmem:[#allocation5 + $0x1144] sm:$0xf0]  ;;  %v13166_v34 = vld [vmem:[#allocation5 + $0xb48] sm:$0xf0] }
 0x100   :  { %v14444_v50 = vld [vmem:[#allocation5 + $0x1508] sm:$0xf]  ;;  %5248 = vmatpush.bf16.msrb.mxu2 %v12017_v39  ;;  %v13933_v58 = vor.u32 %v17668_v48, %v13932_v47  ;;  %5223 = vmatpush.bf16.msra.mxu3 %v14509_v46  ;;  %v17596_v36 = vld [vmem:[#allocation5 + $0xf0c] sm:$0xf]  ;;  %v13169_v44 = vor.u32 %v17468_v33, %v13166_v34 }
 0x101   :  { %v17796_v52 = vld [vmem:[#allocation5 + $0x1544] sm:$0xf0]  ;;  %14884 = vmatmul.msk.bf16.vlgmr.msrb.gmra.mxu0 %vm4968_vm0, %v19057_v45  ;;  %v13678_v38 = vld [vmem:[#allocation5 + $0xf48] sm:$0xf0] }
 0x102   :  { %v14445_v61 = vor.u32 %v17796_v52, %v14444_v50  ;;  %v13868_v62 = vld [vmem:[#allocation5 + $0x1088] sm:$0xf]  ;;  %5261 = vmatpush.bf16.msra.mxu0 %v12529_v49  ;;  %5211 = vmatpush.bf16.msra.mxu1 %v13933_v58  ;;  %v17244_v39 = vld [vmem:[#allocation5 + $0x40c] sm:$0xf]  ;;  %v13681_v48 = vor.u32 %v17596_v36, %v13678_v38 }
 0x103   :  { %v17652_v63 = vld [vmem:[#allocation5 + $0x10c4] sm:$0xf0]  ;;  %v17868_v42 = vld [vmem:[#allocation5 + $0x178c] sm:$0xf]  ;;  %v12273_v49 = vor.u32 %v17244_v39, %v12270_v40  ;;  %v5007_v39 = vpop.f32.mrf.mxu2 }
 0x104   :  { %v14380_v1 = vld [vmem:[#allocation5 + $0x1488] sm:$0xf]  ;;  %5249 = vmatpush.bf16.msrb.mxu2 %v11953_v53  ;;  %v13869_v6 = vor.u32 %v17652_v63, %v13868_v62  ;;  %5224 = vmatpush.bf16.msra.mxu3 %v14445_v61  ;;  %v17724_v46 = vld [vmem:[#allocation5 + $0x130c] sm:$0xf]  ;;  %v14769_v53 = vor.u32 %v17868_v42, %v14766_v43 }
 0x105   :  { %v17780_v2 = vld [vmem:[#allocation5 + $0x14c4] sm:$0xf0]  ;;  %v14190_v47 = vld [vmem:[#allocation5 + $0x1348] sm:$0xf0] }
 0x106   :  { %v13804_v10 = vld [vmem:[#allocation5 + $0x1008] sm:$0xf]  ;;  %v14381_v11 = vor.u32 %v17780_v2, %v14380_v1  ;;  %5262 = vmatpush.bf16.msra.mxu0 %v12465_v0  ;;  %5212 = vmatpush.bf16.msra.mxu1 %v13869_v6  ;;  %v17452_v50 = vld [vmem:[#allocation5 + $0xa8c] sm:$0xf]  ;;  %v14193_v58 = vor.u32 %v17724_v46, %v14190_v47 }
 0x107   :  { %v17636_v12 = vld [vmem:[#allocation5 + $0x1044] sm:$0xf0]  ;;  %v13102_v52 = vld [vmem:[#allocation5 + $0xac8] sm:$0xf0] }
 0x108   :  { %v14316_v13 = vld [vmem:[#allocation5 + $0x1408] sm:$0xf]  ;;  %5250 = vmatpush.bf16.msrb.mxu2 %v11889_v3  ;;  %v13805_v23 = vor.u32 %v17636_v12, %v13804_v10  ;;  %5225 = vmatpush.bf16.msra.mxu3 %v14381_v11  ;;  %v13614_v56 = vld [vmem:[#allocation5 + $0xec8] sm:$0xf0]  ;;  %v13105_v61 = vor.u32 %v17452_v50, %v13102_v52 }
 0x109   :  { %v17764_v14 = vld [vmem:[#allocation5 + $0x1444] sm:$0xf0]  ;;  %v17852_v59 = vld [vmem:[#allocation5 + $0x170c] sm:$0xf]  ;;  %v13617_v0 = vor.u32 %v17580_v54, %v13614_v56 }
 0x10a   :  { %v14317_v26 = vor.u32 %v17764_v14, %v14316_v13  ;;  %5263 = vmatpush.bf16.msra.mxu0 %v12401_v15  ;;  %5213 = vmatpush.bf16.msra.mxu1 %v13805_v23  ;;  %v14702_v60 = vld [vmem:[#allocation5 + $0x1748] sm:$0xf0]  ;;  %v5020_v46 = vpop.f32.mrf.mxu3 }
 0x10b   :  { %v17708_v62 = vld [vmem:[#allocation5 + $0x128c] sm:$0xf]  ;;  %v14705_v3 = vor.u32 %v17852_v59, %v14702_v60 }
 0x10c   :  { %5251 = vmatpush.bf16.msrb.mxu2 %v11825_v19  ;;  %5226 = vmatpush.bf16.msra.mxu3 %v14317_v26  ;;  %v14126_v63 = vld [vmem:[#allocation5 + $0x12c8] sm:$0xf0]  ;;  %v4981_v19 = vpop.f32.mrf.mxu0 }
 0x10d   :  { %5214 = vmatmul.bf16.vlgmr.msra.gmra.mxu1 %v19061_v30  ;;  %v17436_v1 = vld [vmem:[#allocation5 + $0xa0c] sm:$0xf]  ;;  %v14129_v6 = vor.u32 %v17708_v62, %v14126_v63 }
 0x10e   :  { %5271 = vmatpush.bf16.msrb.mxu1 %v13233_v27  ;;  %5264 = vmatpush.bf16.msra.mxu0 %v12337_v32  ;;  %v13038_v2 = vld [vmem:[#allocation5 + $0xa48] sm:$0xf0] }
 0x10f   :  { %5227 = vmatmul.bf16.vlgmr.msra.gmra.mxu3 %v19063_v35  ;;  %v17564_v4 = vld [vmem:[#allocation5 + $0xe0c] sm:$0xf]  ;;  %v13041_v10 = vor.u32 %v17436_v1, %v13038_v2 }
 0x110   :  { %5284 = vmatpush.bf16.msrb.mxu3 %v13745_v31  ;;  %5252 = vmatpush.bf16.msrb.mxu2 %v11761_v37  ;;  %v13550_v5 = vld [vmem:[#allocation5 + $0xe48] sm:$0xf0]  ;;  %v4994_v31 = vpop.f32.mrf.mxu1 }
 0x111   :  { %v17836_v8 = vld [vmem:[#allocation5 + $0x168c] sm:$0xf]  ;;  %v13553_v13 = vor.u32 %v17564_v4, %v13550_v5  ;;  %v4995_v34 = vadd.f32 %v4994_v31, %v4981_v19  ;;  %v12212_v5 = vld [vmem:[#allocation5 + $0x390] sm:$0xf] }
 0x112   :  { %5272 = vmatpush.bf16.msrb.mxu1 %v13169_v44  ;;  %5265 = vmatpush.bf16.msra.mxu0 %v12273_v49  ;;  %v14638_v9 = vld [vmem:[#allocation5 + $0x16c8] sm:$0xf0] }
 0x113   :  { %5253 = vmatmul.bf16.vlgmr.msrb.gmra.mxu2 %v19047_v55  ;;  %v17692_v11 = vld [vmem:[#allocation5 + $0x120c] sm:$0xf]  ;;  %v14641_v16 = vor.u32 %v17836_v8, %v14638_v9  ;;  %v5008_v44 = vadd.f32 %v5007_v39, %v4995_v34  ;;  %v13748_v34 = vld [vmem:[#allocation5 + $0xf90] sm:$0xf] }
 0x114   :  { %5297 = vmatpush.bf16.msra.mxu2 %v14257_v41  ;;  %5285 = vmatpush.bf16.msrb.mxu3 %v13681_v48  ;;  %v14062_v12 = vld [vmem:[#allocation5 + $0x1248] sm:$0xf0]  ;;  %v17349_v39 = vld [vmem:[#allocation5 + $0x74c] sm:$0xf0] }
 0x115   :  { %5266 = vmatmul.bf16.vlgmr.msra.gmra.mxu0 %v19053_v7  ;;  %v17420_v14 = vld [vmem:[#allocation5 + $0x98c] sm:$0xf]  ;;  %v14065_v20 = vor.u32 %v17692_v11, %v14062_v12  ;;  %v19085_v54 = vadd.f32 %v5020_v46, %v5008_v44  ;;  %v17237_v11 = vld [vmem:[#allocation5 + $0x3cc] sm:$0xf0] }
 0x116   :  { %5310 = vmatpush.bf16.msrb.mxu0 %v14769_v53  ;;  %5273 = vmatpush.bf16.msrb.mxu1 %v13105_v61  ;;  %v12974_v15 = vld [vmem:[#allocation5 + $0x9c8] sm:$0xf0]  ;;  %v4983_v53 = vpop.f32.mrf.mxu0  ;;  %v12084_v44 = vld [vmem:[#allocation5 + $0x290] sm:$0xf] }
 0x117   :  { %v17548_v17 = vld [vmem:[#allocation5 + $0xd8c] sm:$0xf]  ;;  %v12977_v23 = vor.u32 %v17420_v14, %v12974_v15  ;;  %v5009_v14 = vpop.f32.mrf.mxu2  ;;  %v17205_v46 = vld [vmem:[#allocation5 + $0x2cc] sm:$0xf0] }
 0x118   :  { %5298 = vmatpush.bf16.msra.mxu2 %v14193_v58  ;;  %5286 = vmatpush.bf16.msrb.mxu3 %v13617_v0  ;;  %v13486_v18 = vld [vmem:[#allocation5 + $0xdc8] sm:$0xf0]  ;;  %v4996_v9 = vpop.f32.mrf.mxu1  ;;  %v17605_v53 = vld [vmem:[#allocation5 + $0xf4c] sm:$0xf0] }
 0x119   :  { %v17820_v21 = vld [vmem:[#allocation5 + $0x160c] sm:$0xf]  ;;  %v13489_v26 = vor.u32 %v17548_v17, %v13486_v18  ;;  %v13044_v9 = vld [vmem:[#allocation5 + $0xa10] sm:$0xf] }
 0x11a   :  { %5311 = vmatpush.bf16.msrb.mxu0 %v14705_v3  ;;  %v14574_v22 = vld [vmem:[#allocation5 + $0x1648] sm:$0xf0]  ;;  %5274 = vmatpush.bf16.msrb.mxu1 %v13041_v10 }
 0x11b   :  { %v17676_v24 = vld [vmem:[#allocation5 + $0x118c] sm:$0xf]  ;;  %v14577_v29 = vor.u32 %v17820_v21, %v14574_v22  ;;  %v17365_v21 = vld [vmem:[#allocation5 + $0x7cc] sm:$0xf0]  ;;  %v5022_v22 = vpop.f32.mrf.mxu3 }
 0x11c   :  { %5299 = vmatpush.bf16.msra.mxu2 %v14129_v6  ;;  %v13998_v25 = vld [vmem:[#allocation5 + $0x11c8] sm:$0xf0]  ;;  %5287 = vmatpush.bf16.msrb.mxu3 %v13553_v13  ;;  %v12468_v22 = vld [vmem:[#allocation5 + $0x590] sm:$0xf] }
 0x11d   :  { %v17404_v27 = vld [vmem:[#allocation5 + $0x90c] sm:$0xf]  ;;  %v14001_v36 = vor.u32 %v17676_v24, %v13998_v25  ;;  %v13236_v25 = vld [vmem:[#allocation5 + $0xb90] sm:$0xf] }
 0x11e   :  { %v12910_v28 = vld [vmem:[#allocation5 + $0x948] sm:$0xf0]  ;;  %5312 = vmatpush.bf16.msrb.mxu0 %v14641_v16  ;;  %5275 = vmatpush.bf16.msrb.mxu1 %v12977_v23  ;;  %v12213_v23 = vor.u32 %v17237_v11, %v12212_v5  ;;  %v12532_v5 = vld [vmem:[#allocation5 + $0x610] sm:$0xf] }
 0x11f   :  { %v17532_v32 = vld [vmem:[#allocation5 + $0xd0c] sm:$0xf]  ;;  %v12913_v40 = vor.u32 %v17404_v27, %v12910_v28  ;;  %v12148_v28 = vld [vmem:[#allocation5 + $0x310] sm:$0xf] }
 0x120   :  { %v13422_v33 = vld [vmem:[#allocation5 + $0xd48] sm:$0xf0]  ;;  %5300 = vmatpush.bf16.msra.mxu2 %v14065_v20  ;;  %5288 = vmatpush.bf16.msrb.mxu3 %v13489_v26  ;;  %v12724_v20 = vld [vmem:[#allocation5 + $0x790] sm:$0xf]  ;;  %v5033_v11 = vpop.f32.mrf.mxu0 }
 0x121   :  { %v17804_v37 = vld [vmem:[#allocation5 + $0x158c] sm:$0xf]  ;;  %v13425_v43 = vor.u32 %v17532_v32, %v13422_v33  ;;  %v17493_v26 = vld [vmem:[#allocation5 + $0xbcc] sm:$0xf0]  ;;  %v12725_v31 = vor.u32 %v17365_v21, %v12724_v20  ;;  %v5034_v14 = vadd.f32 %v5033_v11, %v19085_v54 }
 0x122   :  { %v14510_v38 = vld [vmem:[#allocation5 + $0x15c8] sm:$0xf0]  ;;  %5313 = vmatpush.bf16.msrb.mxu0 %v14577_v29  ;;  %5276 = vmatpush.bf16.msrb.mxu1 %v12913_v40  ;;  %v17221_v29 = vld [vmem:[#allocation5 + $0x34c] sm:$0xf0] }
 0x123   :  { %v17660_v41 = vld [vmem:[#allocation5 + $0x110c] sm:$0xf]  ;;  %v14513_v49 = vor.u32 %v17804_v37, %v14510_v38  ;;  %v17621_v37 = vld [vmem:[#allocation5 + $0xfcc] sm:$0xf0]  ;;  %v12149_v40 = vor.u32 %v17221_v29, %v12148_v28 }
 0x124   :  { %v13934_v42 = vld [vmem:[#allocation5 + $0x1148] sm:$0xf0]  ;;  %5301 = vmatpush.bf16.msra.mxu2 %v14001_v36  ;;  %5289 = vmatpush.bf16.msrb.mxu3 %v13425_v43  ;;  %v13237_v36 = vor.u32 %v17493_v26, %v13236_v25  ;;  %v12660_v38 = vld [vmem:[#allocation5 + $0x710] sm:$0xf] }
 0x125   :  { %v17388_v47 = vld [vmem:[#allocation5 + $0x88c] sm:$0xf]  ;;  %v13937_v56 = vor.u32 %v17660_v41, %v13934_v42  ;;  %v13172_v41 = vld [vmem:[#allocation5 + $0xb10] sm:$0xf] }
 0x126   :  { %v12846_v48 = vld [vmem:[#allocation5 + $0x8c8] sm:$0xf0]  ;;  %5314 = vmatpush.bf16.msrb.mxu0 %v14513_v49  ;;  %v17477_v42 = vld [vmem:[#allocation5 + $0xb4c] sm:$0xf0] }
 0x127   :  { %v17516_v50 = vld [vmem:[#allocation5 + $0xc8c] sm:$0xf]  ;;  %v12849_v60 = vor.u32 %v17388_v47, %v12846_v48  ;;  %v13749_v47 = vor.u32 %v17621_v37, %v13748_v34  ;;  %v12661_v48 = vor.u32 %v17349_v39, %v12660_v38  ;;  %v13684_v49 = vld [vmem:[#allocation5 + $0xf10] sm:$0xf] }
 0x128   :  { %v13358_v52 = vld [vmem:[#allocation5 + $0xcc8] sm:$0xf0]  ;;  %5302 = vmatpush.bf16.msra.mxu2 %v13937_v56  ;;  %v12596_v56 = vld [vmem:[#allocation5 + $0x690] sm:$0xf] }
 0x129   :  { %v17788_v58 = vld [vmem:[#allocation5 + $0x150c] sm:$0xf]  ;;  %v13361_v0 = vor.u32 %v17516_v50, %v13358_v52  ;;  %5277 = vmatpush.bf16.msrb.mxu1 %v12849_v60  ;;  %v5059_v50 = vpop.f32.mrf.mxu2  ;;  %v13173_v52 = vor.u32 %v17477_v42, %v13172_v41  ;;  %v13108_v60 = vld [vmem:[#allocation5 + $0xa90] sm:$0xf] }
 0x12a   :  { %v14446_v59 = vld [vmem:[#allocation5 + $0x1548] sm:$0xf0]  ;;  %v17573_v21 = vld [vmem:[#allocation5 + $0xe4c] sm:$0xf0] }
 0x12b   :  { %v17644_v61 = vld [vmem:[#allocation5 + $0x108c] sm:$0xf]  ;;  %v14449_v4 = vor.u32 %v17788_v58, %v14446_v59  ;;  %5290 = vmatpush.bf16.msrb.mxu3 %v13361_v0  ;;  %v17333_v58 = vld [vmem:[#allocation5 + $0x6cc] sm:$0xf0]  ;;  %v12085_v59 = vor.u32 %v17205_v46, %v12084_v44  ;;  %v13685_v0 = vor.u32 %v17605_v53, %v13684_v49  ;;  %v5035_v44 = vpop.f32.mrf.mxu0  ;;  %v5072_v46 = vpop.f32.mrf.mxu3 }
 0x12c   :  { %v13870_v62 = vld [vmem:[#allocation5 + $0x10c8] sm:$0xf0]  ;;  %v12980_v26 = vld [vmem:[#allocation5 + $0x990] sm:$0xf] }
 0x12d   :  { %v17372_v63 = vld [vmem:[#allocation5 + $0x80c] sm:$0xf]  ;;  %v13873_v10 = vor.u32 %v17644_v61, %v13870_v62  ;;  %5315 = vmatpush.bf16.msrb.mxu0 %v14449_v4  ;;  %v17461_v61 = vld [vmem:[#allocation5 + $0xacc] sm:$0xf0] }
 0x12e   :  { %v12782_v1 = vld [vmem:[#allocation5 + $0x848] sm:$0xf0]  ;;  %v12020_v62 = vld [vmem:[#allocation5 + $0x210] sm:$0xf] }
 0x12f   :  { %v17500_v2 = vld [vmem:[#allocation5 + $0xc0c] sm:$0xf]  ;;  %v12785_v15 = vor.u32 %v17372_v63, %v12782_v1  ;;  %5303 = vmatpush.bf16.msra.mxu2 %v13873_v10  ;;  %v17189_v63 = vld [vmem:[#allocation5 + $0x24c] sm:$0xf0]  ;;  %v12597_v1 = vor.u32 %v17333_v58, %v12596_v56 }
 0x130   :  { %v13294_v3 = vld [vmem:[#allocation5 + $0xc48] sm:$0xf0]  ;;  %v17589_v4 = vld [vmem:[#allocation5 + $0xecc] sm:$0xf0] }
 0x131   :  { %v17884_v6 = vld [vmem:[#allocation5 + $0x180c] sm:$0xf]  ;;  %v13297_v18 = vor.u32 %v17500_v2, %v13294_v3  ;;  %5278 = vmatpush.bf16.msrb.mxu1 %v12785_v15  ;;  %v13620_v2 = vld [vmem:[#allocation5 + $0xe90] sm:$0xf]  ;;  %v13109_v3 = vor.u32 %v17461_v61, %v13108_v60  ;;  %v5046_v15 = vpop.f32.mrf.mxu1 }
 0x132   :  { %v14830_v8 = vld [vmem:[#allocation5 + $0x1848] sm:$0xf0]  ;;  %v17445_v10 = vld [vmem:[#allocation5 + $0xa4c] sm:$0xf0] }
 0x133   :  { %v17772_v12 = vld [vmem:[#allocation5 + $0x148c] sm:$0xf]  ;;  %v14833_v19 = vor.u32 %v17884_v6, %v14830_v8  ;;  %5291 = vmatpush.bf16.msrb.mxu3 %v13297_v18  ;;  %v17317_v6 = vld [vmem:[#allocation5 + $0x64c] sm:$0xf0]  ;;  %v12021_v8 = vor.u32 %v17189_v63, %v12020_v62  ;;  %v13045_v20 = vor.u32 %v17445_v10, %v13044_v9 }
 0x134   :  { %v14382_v13 = vld [vmem:[#allocation5 + $0x14c8] sm:$0xf0]  ;;  %5279 = vmatmul.bf16.vlgmr.msrb.gmra.mxu1 %v19045_v51  ;;  %v13556_v18 = vld [vmem:[#allocation5 + $0xe10] sm:$0xf] }
 0x135   :  { %v17628_v16 = vld [vmem:[#allocation5 + $0x100c] sm:$0xf]  ;;  %v14385_v24 = vor.u32 %v17772_v12, %v14382_v13  ;;  %5330 = vmatpush.bf16.msra.mxu1 %v14833_v19  ;;  %v11956_v12 = vld [vmem:[#allocation5 + $0x190] sm:$0xf]  ;;  %v5061_v19 = vpop.f32.mrf.mxu2  ;;  %v13557_v54 = vor.u32 %v17573_v21, %v13556_v18 }
 0x136   :  { %v13806_v17 = vld [vmem:[#allocation5 + $0x1048] sm:$0xf0]  ;;  %5292 = vmatmul.bf16.vlgmr.msrb.gmra.mxu3 %v19049_v57  ;;  %v17173_v13 = vld [vmem:[#allocation5 + $0x1cc] sm:$0xf0] }
 0x137   :  { %v13809_v27 = vor.u32 %v17628_v16, %v13806_v17  ;;  %v17756_v32 = vld [vmem:[#allocation5 + $0x140c] sm:$0xf]  ;;  %5336 = vmatpush.bf16.msra.mxu3 %v12213_v23  ;;  %5316 = vmatpush.bf16.msrb.mxu0 %v14385_v24  ;;  %v13621_v16 = vor.u32 %v17589_v4, %v13620_v2  ;;  %v12533_v17 = vor.u32 %v17317_v6, %v12532_v5  ;;  %v17301_v23 = vld [vmem:[#allocation5 + $0x5cc] sm:$0xf0] }
 0x138   :  { %v14318_v33 = vld [vmem:[#allocation5 + $0x1448] sm:$0xf0]  ;;  %v5047_v24 = vadd.f32 %v5046_v15, %v5034_v14  ;;  %v11957_v25 = vor.u32 %v17173_v13, %v11956_v12  ;;  %v11892_v28 = vld [vmem:[#allocation5 + $0x110] sm:$0xf] }
 0x139   :  { %5304 = vmatpush.bf16.msra.mxu2 %v13809_v27  ;;  %v14321_v43 = vor.u32 %v17756_v32, %v14318_v33  ;;  %5349 = vmatpush.bf16.msrb.mxu1 %v12725_v31  ;;  %v17429_v27 = vld [vmem:[#allocation5 + $0x9cc] sm:$0xf0]  ;;  %v12469_v32 = vor.u32 %v17301_v23, %v12468_v22  ;;  %v5074_v22 = vpop.f32.mrf.mxu3 }
 0x13a   :  { %v17157_v29 = vld [vmem:[#allocation5 + $0x14c] sm:$0xf0]  ;;  %v19092_v31 = vadd.f32 %v5059_v50, %v5047_v24  ;;  %v12981_v34 = vor.u32 %v17429_v27, %v12980_v26  ;;  %v5048_v50 = vpop.f32.mrf.mxu1 }
 0x13b   :  { %5337 = vmatpush.bf16.msra.mxu3 %v12149_v40  ;;  %5317 = vmatpush.bf16.msrb.mxu0 %v14321_v43  ;;  %v13492_v33 = vld [vmem:[#allocation5 + $0xd90] sm:$0xf]  ;;  %v11893_v39 = vor.u32 %v17157_v29, %v11892_v28 }
 0x13c   :  { %5305 = vmatmul.bf16.vlgmr.msra.gmra.mxu2 %v19061_v30  ;;  %v12404_v37 = vld [vmem:[#allocation5 + $0x510] sm:$0xf]  ;;  %v6428_v4 = vrot.slane %v19092_v31, 4  ;;  %v6540_v5 = vmul.f32 %v19092_v31, %v19092_v31 }
 0x13d   :  { %5362 = vmatpush.bf16.msrb.mxu2 %v13237_v36  ;;  %5350 = vmatpush.bf16.msrb.mxu1 %v12661_v48  ;;  %v17557_v36 = vld [vmem:[#allocation5 + $0xdcc] sm:$0xf0] }
 0x13e   :  { %5318 = vmatmul.bf16.vlgmr.msrb.gmra.mxu0 %v19063_v35  ;;  %v17285_v38 = vld [vmem:[#allocation5 + $0x54c] sm:$0xf0]  ;;  %v6429_v23 = vadd.f32 %v6428_v4, %v19092_v31  ;;  %v6556_v24 = vrot.slane %v6540_v5, 4 }
 0x13f   :  { %5375 = vmatpush.bf16.msra.mxu0 %v13749_v47  ;;  %5338 = vmatpush.bf16.msra.mxu3 %v12085_v59  ;;  %v12916_v40 = vld [vmem:[#allocation5 + $0x910] sm:$0xf]  ;;  %v13493_v47 = vor.u32 %v17557_v36, %v13492_v33  ;;  %v12405_v48 = vor.u32 %v17285_v38, %v12404_v37  ;;  %v5085_v59 = vpop.f32.mrf.mxu2  ;;  %v12214_v38 = vld [vmem:[#allocation5 + $0x3d0] sm:$0xf0] }
 0x140   :  { %v17413_v41 = vld [vmem:[#allocation5 + $0x94c] sm:$0xf0]  ;;  %v6430_v44 = vrot.slane %v6429_v23, 2 }
 0x141   :  { %5363 = vmatpush.bf16.msrb.mxu2 %v13173_v52  ;;  %5351 = vmatpush.bf16.msrb.mxu1 %v12597_v1  ;;  %v11828_v42 = vld [vmem:[#allocation5 + $0x90] sm:$0xf]  ;;  %v12917_v52 = vor.u32 %v17413_v41, %v12916_v40  ;;  %v12726_v40 = vld [vmem:[#allocation5 + $0x7d0] sm:$0xf0] }
 0x142   :  { %v17141_v43 = vld [vmem:[#allocation5 + $0xcc] sm:$0xf0] }
 0x143   :  { %5376 = vmatpush.bf16.msra.mxu0 %v13685_v0  ;;  %5339 = vmatpush.bf16.msra.mxu3 %v12021_v8  ;;  %v13428_v49 = vld [vmem:[#allocation5 + $0xd10] sm:$0xf]  ;;  %v11829_v60 = vor.u32 %v17141_v43, %v11828_v42  ;;  %v19096_v0 = vadd.f32 %v5085_v59, %v5072_v46  ;;  %v6557_v46 = vadd.f32 %v6556_v24, %v6540_v5  ;;  %v17341_v59 = vld [vmem:[#allocation5 + $0x714] sm:$0xf] }
 0x144   :  { %14885 = vmatmul.msk.bf16.vlgmr.msra.gmra.mxu1 %vm4968_vm0, %v19057_v45  ;;  %v17541_v53 = vld [vmem:[#allocation5 + $0xd4c] sm:$0xf0] }
 0x145   :  { %5364 = vmatpush.bf16.msrb.mxu2 %v13109_v3  ;;  %5352 = vmatpush.bf16.msrb.mxu1 %v12533_v17  ;;  %v12340_v56 = vld [vmem:[#allocation5 + $0x490] sm:$0xf]  ;;  %v13429_v6 = vor.u32 %v17541_v53, %v13428_v49  ;;  %v17213_v53 = vld [vmem:[#allocation5 + $0x314] sm:$0xf] }
 0x146   :  { %v17269_v58 = vld [vmem:[#allocation5 + $0x4cc] sm:$0xf0] }
 0x147   :  { %5377 = vmatpush.bf16.msra.mxu0 %v13621_v16  ;;  %5340 = vmatpush.bf16.msra.mxu3 %v11957_v25  ;;  %v12852_v61 = vld [vmem:[#allocation5 + $0x890] sm:$0xf]  ;;  %v12341_v8 = vor.u32 %v17269_v58, %v12340_v56  ;;  %v5087_v36 = vpop.f32.mrf.mxu2  ;;  %v12150_v58 = vld [vmem:[#allocation5 + $0x350] sm:$0xf0] }
 0x148   :  { %v17397_v62 = vld [vmem:[#allocation5 + $0x8cc] sm:$0xf0]  ;;  %v12153_v5 = vor.u32 %v17213_v53, %v12150_v58 }
 0x149   :  { %5365 = vmatpush.bf16.msrb.mxu2 %v13045_v20  ;;  %5353 = vmatpush.bf16.msrb.mxu1 %v12469_v32  ;;  %v11764_v63 = vld [vmem:[#allocation5 + $0x10] sm:$0xf]  ;;  %v12853_v11 = vor.u32 %v17397_v62, %v12852_v61 }
 0x14a   :  { %v17125_v1 = vld [vmem:[#allocation5 + $0x4c] sm:$0xf0] }
 0x14b   :  { %5378 = vmatpush.bf16.msra.mxu0 %v13557_v54  ;;  %5341 = vmatpush.bf16.msra.mxu3 %v11893_v39  ;;  %v14260_v2 = vld [vmem:[#allocation5 + $0x1390] sm:$0xf]  ;;  %v11765_v15 = vor.u32 %v17125_v1, %v11764_v63  ;;  %v17357_v39 = vld [vmem:[#allocation5 + $0x794] sm:$0xf]  ;;  %v6431_v1 = vadd.f32 %v6430_v44, %v6429_v23 }
 0x14c   :  { %v17749_v3 = vld [vmem:[#allocation5 + $0x13cc] sm:$0xf0]  ;;  %v17181_v23 = vld [vmem:[#allocation5 + $0x214] sm:$0xf] }
 0x14d   :  { %5366 = vmatpush.bf16.msrb.mxu2 %v12981_v34  ;;  %5354 = vmatpush.bf16.msrb.mxu1 %v12405_v48  ;;  %v13364_v9 = vld [vmem:[#allocation5 + $0xc90] sm:$0xf]  ;;  %v14261_v19 = vor.u32 %v17749_v3, %v14260_v2  ;;  %v17229_v34 = vld [vmem:[#allocation5 + $0x394] sm:$0xf]  ;;  %v6558_v2 = vrot.slane %v6557_v46, 2 }
 0x14e   :  { %v17525_v10 = vld [vmem:[#allocation5 + $0xccc] sm:$0xf0]  ;;  %v12217_v50 = vor.u32 %v17229_v34, %v12214_v38  ;;  %v17293_v44 = vld [vmem:[#allocation5 + $0x594] sm:$0xf] }
 0x14f   :  { %5379 = vmatpush.bf16.msra.mxu0 %v13493_v47  ;;  %v12276_v12 = vld [vmem:[#allocation5 + $0x410] sm:$0xf]  ;;  %5342 = vmatpush.bf16.msra.mxu3 %v11829_v60  ;;  %v13365_v25 = vor.u32 %v17525_v10, %v13364_v9  ;;  %v12662_v60 = vld [vmem:[#allocation5 + $0x750] sm:$0xf0] }
 0x150   :  { %v17253_v13 = vld [vmem:[#allocation5 + $0x44c] sm:$0xf0]  ;;  %v12086_v10 = vld [vmem:[#allocation5 + $0x2d0] sm:$0xf0] }
 0x151   :  { %5367 = vmatpush.bf16.msrb.mxu2 %v12917_v52  ;;  %v12788_v14 = vld [vmem:[#allocation5 + $0x810] sm:$0xf]  ;;  %5355 = vmatpush.bf16.msrb.mxu1 %v12341_v8  ;;  %v12277_v26 = vor.u32 %v17253_v13, %v12276_v12  ;;  %v12729_v52 = vor.u32 %v17357_v39, %v12726_v40  ;;  %v17197_v8 = vld [vmem:[#allocation5 + $0x294] sm:$0xf]  ;;  %v5111_v40 = vpop.f32.mrf.mxu1 }
 0x152   :  { %v17381_v16 = vld [vmem:[#allocation5 + $0x84c] sm:$0xf0]  ;;  %v12598_v12 = vld [vmem:[#allocation5 + $0x6d0] sm:$0xf0] }
 0x153   :  { %v14772_v17 = vld [vmem:[#allocation5 + $0x1790] sm:$0xf]  ;;  %5380 = vmatpush.bf16.msra.mxu0 %v13429_v6  ;;  %v12789_v29 = vor.u32 %v17381_v16, %v12788_v14  ;;  %5343 = vmatpush.bf16.msra.mxu3 %v11765_v15  ;;  %v12665_v6 = vor.u32 %v17341_v59, %v12662_v60  ;;  %v6432_v16 = vrot.slane %v6431_v1, 1 }
 0x154   :  { %v17877_v18 = vld [vmem:[#allocation5 + $0x17cc] sm:$0xf0] }
 0x155   :  { %v14836_v20 = vld [vmem:[#allocation5 + $0x1810] sm:$0xf]  ;;  %5368 = vmatpush.bf16.msrb.mxu2 %v12853_v11  ;;  %v14773_v54 = vor.u32 %v17877_v18, %v14772_v17  ;;  %5356 = vmatpush.bf16.msrb.mxu1 %v12277_v26  ;;  %v17325_v11 = vld [vmem:[#allocation5 + $0x694] sm:$0xf]  ;;  %v6559_v17 = vadd.f32 %v6558_v2, %v6557_v46 }
 0x156   :  { %v17893_v21 = vld [vmem:[#allocation5 + $0x184c] sm:$0xf0]  ;;  %5344 = vmatmul.bf16.vlgmr.msra.gmra.mxu3 %v19047_v55  ;;  %v12601_v22 = vor.u32 %v17325_v11, %v12598_v12  ;;  %v12022_v26 = vld [vmem:[#allocation5 + $0x250] sm:$0xf0]  ;;  %v5137_v2 = vpop.f32.mrf.mxu2 }
 0x157   :  { %v14196_v27 = vld [vmem:[#allocation5 + $0x1310] sm:$0xf]  ;;  %v14837_v37 = vor.u32 %v17893_v21, %v14836_v20  ;;  %5388 = vmatpush.bf16.msrb.mxu3 %v14261_v19  ;;  %5381 = vmatpush.bf16.msra.mxu0 %v13365_v25  ;;  %v5098_v20 = vpop.f32.mrf.mxu0  ;;  %v12089_v21 = vor.u32 %v17197_v8, %v12086_v10  ;;  %v6560_v34 = vrot.slane %v6559_v17, 1  ;;  %v12025_v38 = vor.u32 %v17181_v23, %v12022_v26  ;;  %v12470_v46 = vld [vmem:[#allocation5 + $0x5d0] sm:$0xf0] }
 0x158   :  { %v17733_v28 = vld [vmem:[#allocation5 + $0x134c] sm:$0xf0]  ;;  %5357 = vmatmul.bf16.vlgmr.msrb.gmra.mxu1 %v19053_v7  ;;  %v5099_v24 = vadd.f32 %v5098_v20, %v19096_v0  ;;  %v12473_v60 = vor.u32 %v17293_v44, %v12470_v46  ;;  %v17261_v23 = vld [vmem:[#allocation5 + $0x494] sm:$0xf] }
 0x159   :  { %v13300_v32 = vld [vmem:[#allocation5 + $0xc10] sm:$0xf]  ;;  %v14197_v41 = vor.u32 %v17733_v28, %v14196_v27  ;;  %5369 = vmatpush.bf16.msrb.mxu2 %v12789_v29  ;;  %5401 = vmatpush.bf16.msra.mxu1 %v14773_v54  ;;  %v17309_v27 = vld [vmem:[#allocation5 + $0x614] sm:$0xf]  ;;  %v5113_v20 = vpop.f32.mrf.mxu1 }
 0x15a   :  { %v17509_v33 = vld [vmem:[#allocation5 + $0xc4c] sm:$0xf0]  ;;  %v12534_v28 = vld [vmem:[#allocation5 + $0x650] sm:$0xf0] }
 0x15b   :  { %v14708_v42 = vld [vmem:[#allocation5 + $0x1710] sm:$0xf]  ;;  %v13301_v47 = vor.u32 %v17509_v33, %v13300_v32  ;;  %5389 = vmatpush.bf16.msrb.mxu3 %v14197_v41  ;;  %v6433_v33 = vadd.f32 %v6432_v16, %v6431_v1  ;;  %v12537_v39 = vor.u32 %v17309_v27, %v12534_v28  ;;  %v17165_v41 = vld [vmem:[#allocation5 + $0x194] sm:$0xf] }
 0x15c   :  { %v17861_v43 = vld [vmem:[#allocation5 + $0x174c] sm:$0xf0]  ;;  %5370 = vmatmul.bf16.vlgmr.msrb.gmra.mxu2 %v19045_v51  ;;  %v17613_v28 = vld [vmem:[#allocation5 + $0xf94] sm:$0xf] }
 0x15d   :  { %v14132_v48 = vld [vmem:[#allocation5 + $0x1290] sm:$0xf]  ;;  %5421 = vmatpush.bf16.msra.mxu2 %v14837_v37  ;;  %v14709_v56 = vor.u32 %v17861_v43, %v14708_v42  ;;  %5382 = vmatpush.bf16.msra.mxu0 %v13301_v47  ;;  %v5112_v42 = vadd.f32 %v5111_v40, %v5099_v24  ;;  %v11958_v43 = vld [vmem:[#allocation5 + $0x1d0] sm:$0xf0] }
 0x15e   :  { %v17717_v49 = vld [vmem:[#allocation5 + $0x12cc] sm:$0xf0]  ;;  %v11961_v59 = vor.u32 %v17165_v41, %v11958_v43  ;;  %v12342_v24 = vld [vmem:[#allocation5 + $0x4d0] sm:$0xf0] }
 0x15f   :  { %v14133_v61 = vor.u32 %v17717_v49, %v14132_v48  ;;  %v14644_v62 = vld [vmem:[#allocation5 + $0x1690] sm:$0xf]  ;;  %5402 = vmatpush.bf16.msra.mxu1 %v14709_v56  ;;  %v5100_v58 = vpop.f32.mrf.mxu0  ;;  %v11766_v40 = vld [vmem:[#allocation5 + $0x50] sm:$0xf0] }
 0x160   :  { %v17845_v63 = vld [vmem:[#allocation5 + $0x16cc] sm:$0xf0]  ;;  %5383 = vmatmul.bf16.vlgmr.msra.gmra.mxu0 %v19049_v57  ;;  %v17245_v41 = vld [vmem:[#allocation5 + $0x414] sm:$0xf] }
 0x161   :  { %v14068_v3 = vld [vmem:[#allocation5 + $0x1210] sm:$0xf]  ;;  %5427 = vmatpush.bf16.msrb.mxu0 %v12217_v50  ;;  %5440 = vmatpush.bf16.msrb.mxu2 %v12729_v52  ;;  %v14645_v9 = vor.u32 %v17845_v63, %v14644_v62  ;;  %v19107_v50 = vmul.f32 0.125, %v6433_v33  ;;  %v6561_v52 = vadd.f32 %v6560_v34, %v6559_v17  ;;  %v17149_v62 = vld [vmem:[#allocation5 + $0x114] sm:$0xf] }
 0x162   :  { %v17701_v4 = vld [vmem:[#allocation5 + $0x124c] sm:$0xf0]  ;;  %5390 = vmatpush.bf16.msrb.mxu3 %v14133_v61  ;;  %v5124_v61 = vpop.f32.mrf.mxu3  ;;  %v17485_v17 = vld [vmem:[#allocation5 + $0xb94] sm:$0xf] }
 0x163   :  { %v14069_v13 = vor.u32 %v17701_v4, %v14068_v3  ;;  %v14580_v14 = vld [vmem:[#allocation5 + $0x1610] sm:$0xf]  ;;  %5403 = vmatpush.bf16.msra.mxu1 %v14645_v9  ;;  %v5125_v63 = vadd.f32 %v5124_v61, %v5112_v42  ;;  %v11894_v3 = vld [vmem:[#allocation5 + $0x150] sm:$0xf0]  ;;  %v6652_v10 = vmul.f32 0.125, %v6561_v52  ;;  %v6668_v11 = vmul.f32 %v19107_v50, %v19107_v50 }
 0x164   :  { %v17829_v15 = vld [vmem:[#allocation5 + $0x164c] sm:$0xf0]  ;;  %v17277_v4 = vld [vmem:[#allocation5 + $0x514] sm:$0xf] }
 0x165   :  { %v14004_v18 = vld [vmem:[#allocation5 + $0x1190] sm:$0xf]  ;;  %5428 = vmatpush.bf16.msrb.mxu0 %v12153_v5  ;;  %5441 = vmatpush.bf16.msrb.mxu2 %v12665_v6  ;;  %v14581_v25 = vor.u32 %v17829_v15, %v14580_v14  ;;  %v12406_v5 = vld [vmem:[#allocation5 + $0x550] sm:$0xf0]  ;;  %v5138_v12 = vadd.f32 %v5137_v2, %v5125_v63  ;;  %v11897_v15 = vor.u32 %v17149_v62, %v11894_v3 }
 0x166   :  { %v17685_v19 = vld [vmem:[#allocation5 + $0x11cc] sm:$0xf0]  ;;  %5391 = vmatpush.bf16.msrb.mxu3 %v14069_v13  ;;  %v12409_v16 = vor.u32 %v17277_v4, %v12406_v5  ;;  %v17469_v33 = vld [vmem:[#allocation5 + $0xb14] sm:$0xf] }
 0x167   :  { %v14005_v29 = vor.u32 %v17685_v19, %v14004_v18  ;;  %v14516_v54 = vld [vmem:[#allocation5 + $0x1590] sm:$0xf]  ;;  %5404 = vmatpush.bf16.msra.mxu1 %v14581_v25  ;;  %v13238_v18 = vld [vmem:[#allocation5 + $0xbd0] sm:$0xf0] }
 0x168   :  { %v17813_v32 = vld [vmem:[#allocation5 + $0x15cc] sm:$0xf0]  ;;  %v17133_v19 = vld [vmem:[#allocation5 + $0x94] sm:$0xf] }
 0x169   :  { %v13940_v36 = vld [vmem:[#allocation5 + $0x1110] sm:$0xf]  ;;  %5429 = vmatpush.bf16.msrb.mxu0 %v12089_v21  ;;  %5442 = vmatpush.bf16.msrb.mxu2 %v12601_v22  ;;  %v14517_v0 = vor.u32 %v17813_v32, %v14516_v54  ;;  %v11830_v22 = vld [vmem:[#allocation5 + $0xd0] sm:$0xf0]  ;;  %v13241_v54 = vor.u32 %v17485_v17, %v13238_v18 }
 0x16a   :  { %v17669_v37 = vld [vmem:[#allocation5 + $0x114c] sm:$0xf0]  ;;  %5392 = vmatpush.bf16.msrb.mxu3 %v14005_v29  ;;  %v6684_v29 = vsub.f32 %v6652_v10, %v6668_v11  ;;  %v13750_v32 = vld [vmem:[#allocation5 + $0xfd0] sm:$0xf0] }
 0x16b   :  { %v13941_v47 = vor.u32 %v17669_v37, %v13940_v36  ;;  %v14452_v48 = vld [vmem:[#allocation5 + $0x1510] sm:$0xf]  ;;  %5405 = vmatpush.bf16.msra.mxu1 %v14517_v0  ;;  %v13174_v34 = vld [vmem:[#allocation5 + $0xb50] sm:$0xf0]  ;;  %v5150_v36 = vpop.f32.mrf.mxu0  ;;  %v11833_v37 = vor.u32 %v17133_v19, %v11830_v22  ;;  %v5126_v0 = vpop.f32.mrf.mxu3 }
 0x16c   :  { %v17797_v49 = vld [vmem:[#allocation5 + $0x154c] sm:$0xf0]  ;;  %14886 = vmatmul.msk.bf16.vlgmr.msra.gmra.mxu2 %vm4968_vm0, %v19057_v45  ;;  %v19113_v42 = vadd.f32 %v5150_v36, %v5138_v12  ;;  %v12278_v44 = vld [vmem:[#allocation5 + $0x450] sm:$0xf0]  ;;  %v19115_v58 = vadd.f32 1e-05, %v6684_v29  ;;  %v13177_v61 = vor.u32 %v17469_v33, %v13174_v34 }
 0x16d   :  { %v13876_v53 = vld [vmem:[#allocation5 + $0x1090] sm:$0xf]  ;;  %5430 = vmatpush.bf16.msrb.mxu0 %v12025_v38  ;;  %5443 = vmatpush.bf16.msrb.mxu2 %v12537_v39  ;;  %v14453_v1 = vor.u32 %v17797_v49, %v14452_v48  ;;  %v12345_v38 = vor.u32 %v17261_v23, %v12342_v24  ;;  %v17117_v39 = vld [vmem:[#allocation5 + $0x14] sm:$0xf]  ;;  %v5139_v48 = vpop.f32.mrf.mxu2  ;;  %v13753_v49 = vor.u32 %v17613_v28, %v13750_v32 }
 0x16e   :  { %v17653_v56 = vld [vmem:[#allocation5 + $0x10cc] sm:$0xf0]  ;;  %5393 = vmatpush.bf16.msrb.mxu3 %v13941_v47  ;;  %v17741_v46 = vld [vmem:[#allocation5 + $0x1394] sm:$0xf]  ;;  %v11769_v63 = vor.u32 %v17117_v39, %v11766_v40  ;;  %18474 = vrsqrt.f32 %v19115_v58  ;;  %vm6724_vm4 = vweird.f32 %v19115_v58 }
 0x16f   :  { %v13877_v6 = vor.u32 %v17653_v56, %v13876_v53  ;;  %v14388_v8 = vld [vmem:[#allocation5 + $0x1490] sm:$0xf]  ;;  %5406 = vmatpush.bf16.msra.mxu1 %v14453_v1  ;;  %v14262_v47 = vld [vmem:[#allocation5 + $0x13d0] sm:$0xf0]  ;;  %v12281_v1 = vor.u32 %v17245_v41, %v12278_v44 }
 0x170   :  { %v17781_v9 = vld [vmem:[#allocation5 + $0x14cc] sm:$0xf0]  ;;  %v17869_v52 = vld [vmem:[#allocation5 + $0x1794] sm:$0xf] }
 0x171   :  { %v13812_v13 = vld [vmem:[#allocation5 + $0x1010] sm:$0xf]  ;;  %5431 = vmatpush.bf16.msrb.mxu0 %v11961_v59  ;;  %5444 = vmatpush.bf16.msrb.mxu2 %v12473_v60  ;;  %v14389_v21 = vor.u32 %v17781_v9, %v14388_v8  ;;  %v14774_v53 = vld [vmem:[#allocation5 + $0x17d0] sm:$0xf0]  ;;  %v6434_v59 = vrot.slane %v19113_v42, 4  ;;  %v6541_v60 = vmul.f32 %v19113_v42, %v19113_v42 }
 0x172   :  { %v17637_v14 = vld [vmem:[#allocation5 + $0x104c] sm:$0xf0]  ;;  %5394 = vmatpush.bf16.msrb.mxu3 %v13877_v6  ;;  %v17597_v56 = vld [vmem:[#allocation5 + $0xf14] sm:$0xf]  ;;  %v14265_v6 = vor.u32 %v17741_v46, %v14262_v47  ;;  %v14777_v8 = vor.u32 %v17869_v52, %v14774_v53 }
 0x173   :  { %v13813_v25 = vor.u32 %v17637_v14, %v13812_v13  ;;  %v14324_v26 = vld [vmem:[#allocation5 + $0x1410] sm:$0xf]  ;;  %5407 = vmatpush.bf16.msra.mxu1 %v14389_v21  ;;  %v13686_v62 = vld [vmem:[#allocation5 + $0xf50] sm:$0xf0]  ;;  %v6435_v4 = vadd.f32 %v6434_v59, %v19113_v42  ;;  %v6562_v5 = vrot.slane %v6541_v60, 4  ;;  %v5152_v19 = vpop.f32.mrf.mxu0 }
 0x174   :  { %v17765_v27 = vld [vmem:[#allocation5 + $0x144c] sm:$0xf0]  ;;  %v17453_v2 = vld [vmem:[#allocation5 + $0xa94] sm:$0xf]  ;;  %v13689_v10 = vor.u32 %v17597_v56, %v13686_v62  ;;  %v19126_v40 = vpop.eup %18474 }
 0x175   :  { %5432 = vmatpush.bf16.msrb.mxu0 %v11897_v15  ;;  %5445 = vmatpush.bf16.msrb.mxu2 %v12409_v16  ;;  %v14325_v43 = vor.u32 %v17765_v27, %v14324_v26  ;;  %v13110_v3 = vld [vmem:[#allocation5 + $0xad0] sm:$0xf0]  ;;  %v6436_v14 = vrot.slane %v6435_v4, 2  ;;  %v6563_v15 = vadd.f32 %v6562_v5, %v6541_v60  ;;  %v6719_v62 = vmul.f32 %v19126_v40, %v19115_v58 }
 0x176   :  { %5395 = vmatpush.bf16.msrb.mxu3 %v13813_v25  ;;  %v17725_v9 = vld [vmem:[#allocation5 + $0x1314] sm:$0xf]  ;;  %v13113_v16 = vor.u32 %v17453_v2, %v13110_v3  ;;  %vm6725_vm2 = vweird.f32 %v19126_v40 }
 0x177   :  { %5408 = vmatpush.bf16.msra.mxu1 %v14325_v43  ;;  %v14198_v11 = vld [vmem:[#allocation5 + $0x1350] sm:$0xf0]  ;;  %v6437_v22 = vadd.f32 %v6436_v14, %v6435_v4  ;;  %v6564_v23 = vrot.slane %v6563_v15, 2  ;;  %vm19165_vm6 = vmor %vm6724_vm4, %vm6725_vm2 }
 0x178   :  { %v17853_v12 = vld [vmem:[#allocation5 + $0x1714] sm:$0xf]  ;;  %v14201_v24 = vor.u32 %v17725_v9, %v14198_v11 }
 0x179   :  { %5433 = vmatpush.bf16.msrb.mxu0 %v11833_v37  ;;  %5446 = vmatpush.bf16.msrb.mxu2 %v12345_v38  ;;  %v14710_v13 = vld [vmem:[#allocation5 + $0x1750] sm:$0xf0]  ;;  %v6438_v32 = vrot.slane %v6437_v22, 1  ;;  %v6565_v33 = vadd.f32 %v6564_v23, %v6563_v15 }
 0x17a   :  { %5453 = vmatpush.bf16.msra.mxu3 %v13241_v54  ;;  %v17581_v17 = vld [vmem:[#allocation5 + $0xe94] sm:$0xf]  ;;  %v14713_v25 = vor.u32 %v17853_v12, %v14710_v13  ;;  %5409 = vmatmul.bf16.vlgmr.msra.gmra.mxu1 %v19063_v35 }
 0x17b   :  { %5396 = vmatmul.bf16.vlgmr.msrb.gmra.mxu3 %v19061_v30  ;;  %5466 = vmatpush.bf16.msrb.mxu1 %v13753_v49  ;;  %v13622_v18 = vld [vmem:[#allocation5 + $0xed0] sm:$0xf0]  ;;  %v6439_v41 = vadd.f32 %v6438_v32, %v6437_v22  ;;  %v6566_v0 = vrot.slane %v6565_v33, 1  ;;  %v5176_v22 = vpop.f32.mrf.mxu3 }
 0x17c   :  { %v17437_v20 = vld [vmem:[#allocation5 + $0xa14] sm:$0xf]  ;;  %v13625_v27 = vor.u32 %v17581_v17, %v13622_v18  ;;  %v6720_v18 = vmul.f32 %v19126_v40, %v6719_v62 }
 0x17d   :  { %5434 = vmatpush.bf16.msrb.mxu0 %v11769_v63  ;;  %5447 = vmatpush.bf16.msrb.mxu2 %v12281_v1  ;;  %v13046_v21 = vld [vmem:[#allocation5 + $0xa50] sm:$0xf0]  ;;  %v19128_v53 = vmul.f32 0.125, %v6439_v41  ;;  %v6567_v56 = vadd.f32 %v6566_v0, %v6565_v33  ;;  %v5189_v63 = vpop.f32.mrf.mxu0  ;;  %v5202_v33 = vpop.f32.mrf.mxu2 }
 0x17e   :  { %5454 = vmatpush.bf16.msra.mxu3 %v13177_v61  ;;  %v17709_v26 = vld [vmem:[#allocation5 + $0x1294] sm:$0xf]  ;;  %v13049_v34 = vor.u32 %v17437_v20, %v13046_v21 }
 0x17f   :  { %5467 = vmatpush.bf16.msrb.mxu1 %v13689_v10  ;;  %v14134_v28 = vld [vmem:[#allocation5 + $0x12d0] sm:$0xf0]  ;;  %v6653_v3 = vmul.f32 0.125, %v6567_v56  ;;  %v6669_v4 = vmul.f32 %v19128_v53, %v19128_v53  ;;  %v5163_v10 = vpop.f32.mrf.mxu1 }
 0x180   :  { %v17837_v29 = vld [vmem:[#allocation5 + $0x1694] sm:$0xf]  ;;  %5448 = vmatmul.bf16.vlgmr.msrb.gmra.mxu2 %v19053_v7  ;;  %5435 = vmatmul.bf16.vlgmr.msrb.gmra.mxu0 %v19047_v55  ;;  %v14137_v43 = vor.u32 %v17709_v26, %v14134_v28  ;;  %v5177_v26 = vadd.f32 %v5176_v22, %v5163_v10 }
 0x181   :  { %5479 = vmatpush.bf16.msra.mxu0 %v14265_v6  ;;  %5492 = vmatpush.bf16.msra.mxu2 %v14777_v8  ;;  %v14646_v54 = vld [vmem:[#allocation5 + $0x16d0] sm:$0xf0]  ;;  %v6685_v14 = vsub.f32 %v6653_v3, %v6669_v4  ;;  %v17238_v4 = vld [vmem:[#allocation5 + $0x3d4] sm:$0xf0] }
 0x182   :  { %5455 = vmatpush.bf16.msra.mxu3 %v13113_v16  ;;  %v17565_v36 = vld [vmem:[#allocation5 + $0xe14] sm:$0xf]  ;;  %v14649_v44 = vor.u32 %v17837_v29, %v14646_v54 }
 0x183   :  { %v13558_v37 = vld [vmem:[#allocation5 + $0xe50] sm:$0xf0]  ;;  %5468 = vmatpush.bf16.msrb.mxu1 %v13625_v27  ;;  %v19135_v21 = vadd.f32 1e-05, %v6685_v14  ;;  %v5178_v14 = vpop.f32.mrf.mxu3 }
 0x184   :  { %v17421_v38 = vld [vmem:[#allocation5 + $0x994] sm:$0xf]  ;;  %v13561_v47 = vor.u32 %v17565_v36, %v13558_v37  ;;  %v19138_v37 = vmul.f32 0.5, %v6720_v18  ;;  %v13244_v18 = vld [vmem:[#allocation5 + $0xb98] sm:$0xf] }
 0x185   :  { %v12982_v39 = vld [vmem:[#allocation5 + $0x9d0] sm:$0xf0]  ;;  %5480 = vmatpush.bf16.msra.mxu0 %v14201_v24  ;;  %5493 = vmatpush.bf16.msra.mxu2 %v14713_v25  ;;  %18476 = vrsqrt.f32 %v19135_v21  ;;  %vm6734_vm3 = vweird.f32 %v19135_v21  ;;  %v17318_v14 = vld [vmem:[#allocation5 + $0x654] sm:$0xf0] }
 0x186   :  { %v17693_v46 = vld [vmem:[#allocation5 + $0x1214] sm:$0xf]  ;;  %5456 = vmatpush.bf16.msra.mxu3 %v13049_v34  ;;  %v12985_v59 = vor.u32 %v17421_v38, %v12982_v39  ;;  %v5191_v38 = vpop.f32.mrf.mxu0  ;;  %v5190_v39 = vadd.f32 %v5189_v63, %v5177_v26  ;;  %v5204_v26 = vpop.f32.mrf.mxu2 }
 0x187   :  { %v14070_v48 = vld [vmem:[#allocation5 + $0x1250] sm:$0xf0]  ;;  %5469 = vmatpush.bf16.msrb.mxu1 %v13561_v47  ;;  %v13180_v38 = vld [vmem:[#allocation5 + $0xb18] sm:$0xf] }
 0x188   :  { %v17821_v49 = vld [vmem:[#allocation5 + $0x1614] sm:$0xf]  ;;  %v14073_v5 = vor.u32 %v17693_v46, %v14070_v48  ;;  %v17446_v26 = vld [vmem:[#allocation5 + $0xa54] sm:$0xf0] }
 0x189   :  { %v14582_v52 = vld [vmem:[#allocation5 + $0x1650] sm:$0xf0]  ;;  %5481 = vmatpush.bf16.msra.mxu0 %v14137_v43  ;;  %5494 = vmatpush.bf16.msra.mxu2 %v14649_v44 }
 0x18a   :  { %v17549_v60 = vld [vmem:[#allocation5 + $0xd94] sm:$0xf]  ;;  %v14585_v6 = vor.u32 %v17821_v49, %v14582_v52  ;;  %5457 = vmatpush.bf16.msra.mxu3 %v12985_v59  ;;  %v19140_v49 = vadd.f32 %v5202_v33, %v5190_v39  ;;  %v6722_v33 = vsub.f32 1.5, %v19138_v37  ;;  %v17206_v37 = vld [vmem:[#allocation5 + $0x2d4] sm:$0xf0] }
 0x18b   :  { %v13494_v61 = vld [vmem:[#allocation5 + $0xdd0] sm:$0xf0] }
 0x18c   :  { %v17405_v1 = vld [vmem:[#allocation5 + $0x914] sm:$0xf]  ;;  %v13497_v9 = vor.u32 %v17549_v60, %v13494_v61  ;;  %v5165_v61 = vpop.f32.mrf.mxu1 }
 0x18d   :  { %v12918_v2 = vld [vmem:[#allocation5 + $0x950] sm:$0xf0]  ;;  %5482 = vmatpush.bf16.msra.mxu0 %v14073_v5  ;;  %5495 = vmatpush.bf16.msra.mxu2 %v14585_v6  ;;  %v12732_v5 = vld [vmem:[#allocation5 + $0x798] sm:$0xf]  ;;  %v6723_v61 = vmul.f32 %v19126_v40, %v6722_v33 }
 0x18e   :  { %v17677_v8 = vld [vmem:[#allocation5 + $0x1194] sm:$0xf]  ;;  %v12921_v15 = vor.u32 %v17405_v1, %v12918_v2  ;;  %5470 = vmatpush.bf16.msrb.mxu1 %v13497_v9  ;;  %v12220_v2 = vld [vmem:[#allocation5 + $0x398] sm:$0xf] }
 0x18f   :  { %v14006_v11 = vld [vmem:[#allocation5 + $0x11d0] sm:$0xf0]  ;;  %v17366_v6 = vld [vmem:[#allocation5 + $0x7d4] sm:$0xf0] }
 0x190   :  { %v17805_v12 = vld [vmem:[#allocation5 + $0x1594] sm:$0xf]  ;;  %v14009_v23 = vor.u32 %v17677_v8, %v14006_v11  ;;  %5458 = vmatpush.bf16.msra.mxu3 %v12921_v15  ;;  %v19142_v8 = vpop.eup %18476  ;;  %v12733_v22 = vor.u32 %v17366_v6, %v12732_v5  ;;  %v17590_v5 = vld [vmem:[#allocation5 + $0xed4] sm:$0xf0] }
 0x191   :  { %v14518_v13 = vld [vmem:[#allocation5 + $0x15d0] sm:$0xf0]  ;;  %v6729_v15 = vmul.f32 %v19142_v8, %v19135_v21  ;;  %vm6735_vm1 = vweird.f32 %v19142_v8  ;;  %v12028_v21 = vld [vmem:[#allocation5 + $0x218] sm:$0xf] }
 0x192   :  { %v17533_v16 = vld [vmem:[#allocation5 + $0xd14] sm:$0xf]  ;;  %v14521_v24 = vor.u32 %v17805_v12, %v14518_v13  ;;  %5483 = vmatpush.bf16.msra.mxu0 %v14009_v23  ;;  %v13756_v23 = vld [vmem:[#allocation5 + $0xf98] sm:$0xf]  ;;  %vm19159_vm5 = vmor %vm6734_vm3, %vm6735_vm1 }
 0x193   :  { %v13430_v17 = vld [vmem:[#allocation5 + $0xd50] sm:$0xf0]  ;;  %v17302_v33 = vld [vmem:[#allocation5 + $0x5d4] sm:$0xf0] }
 0x194   :  { %v17389_v19 = vld [vmem:[#allocation5 + $0x894] sm:$0xf]  ;;  %v13433_v27 = vor.u32 %v17533_v16, %v13430_v17  ;;  %5496 = vmatpush.bf16.msra.mxu2 %v14521_v24  ;;  %v17622_v24 = vld [vmem:[#allocation5 + $0xfd4] sm:$0xf0] }
 0x195   :  { %v12854_v20 = vld [vmem:[#allocation5 + $0x8d0] sm:$0xf0]  ;;  %v11836_v6 = vld [vmem:[#allocation5 + $0x98] sm:$0xf] }
 0x196   :  { %v17661_v25 = vld [vmem:[#allocation5 + $0x1114] sm:$0xf]  ;;  %v12857_v32 = vor.u32 %v17389_v19, %v12854_v20  ;;  %5471 = vmatpush.bf16.msrb.mxu1 %v13433_v27  ;;  %v17494_v19 = vld [vmem:[#allocation5 + $0xbd4] sm:$0xf0]  ;;  %v12221_v20 = vor.u32 %v17238_v4, %v12220_v2  ;;  %v6730_v27 = vmul.f32 %v19142_v8, %v6729_v15 }
 0x197   :  { %v13942_v28 = vld [vmem:[#allocation5 + $0x1150] sm:$0xf0]  ;;  %v13628_v4 = vld [vmem:[#allocation5 + $0xe98] sm:$0xf] }
 0x198   :  { %v17789_v29 = vld [vmem:[#allocation5 + $0x1514] sm:$0xf]  ;;  %v13945_v43 = vor.u32 %v17661_v25, %v13942_v28  ;;  %5459 = vmatpush.bf16.msra.mxu3 %v12857_v32  ;;  %v12156_v25 = vld [vmem:[#allocation5 + $0x318] sm:$0xf]  ;;  %v19147_v32 = vpop.f32.mrf.mxu0  ;;  %v6731_v39 = vmul.f32 0.5, %v6730_v27 }
 0x199   :  { %v14454_v54 = vld [vmem:[#allocation5 + $0x1550] sm:$0xf0]  ;;  %v17222_v28 = vld [vmem:[#allocation5 + $0x354] sm:$0xf0] }
 0x19a   :  { %v17517_v34 = vld [vmem:[#allocation5 + $0xc94] sm:$0xf]  ;;  %v14457_v44 = vor.u32 %v17789_v29, %v14454_v54  ;;  %5484 = vmatpush.bf16.msra.mxu0 %v13945_v43  ;;  %v12668_v29 = vld [vmem:[#allocation5 + $0x718] sm:$0xf] }
 0x19b   :  { %v13366_v36 = vld [vmem:[#allocation5 + $0xcd0] sm:$0xf0]  ;;  %v17350_v54 = vld [vmem:[#allocation5 + $0x754] sm:$0xf0] }
 0x19c   :  { %v17373_v41 = vld [vmem:[#allocation5 + $0x814] sm:$0xf]  ;;  %v13369_v52 = vor.u32 %v17517_v34, %v13366_v36  ;;  %5497 = vmatpush.bf16.msra.mxu2 %v14457_v44  ;;  %v17478_v43 = vld [vmem:[#allocation5 + $0xb54] sm:$0xf0] }
 0x19d   :  { %v12790_v0 = vld [vmem:[#allocation5 + $0x850] sm:$0xf0]  ;;  %v13692_v44 = vld [vmem:[#allocation5 + $0xf18] sm:$0xf] }
 0x19e   :  { %v17645_v46 = vld [vmem:[#allocation5 + $0x1094] sm:$0xf]  ;;  %v12793_v62 = vor.u32 %v17373_v41, %v12790_v0  ;;  %5472 = vmatpush.bf16.msrb.mxu1 %v13369_v52  ;;  %v13245_v41 = vor.u32 %v17494_v19, %v13244_v18  ;;  %v13757_v0 = vor.u32 %v17622_v24, %v13756_v23  ;;  %v12092_v52 = vld [vmem:[#allocation5 + $0x298] sm:$0xf]  ;;  %v5215_v18 = vpop.f32.mrf.mxu1 }
 0x19f   :  { %v17885_v47 = vld [vmem:[#allocation5 + $0x1814] sm:$0xf]  ;;  %v5216_v23 = vadd.f32 %v5215_v18, %v19140_v49  ;;  %v17574_v27 = vld [vmem:[#allocation5 + $0xe54] sm:$0xf0] }
 0x1a0   :  { %v14838_v48 = vld [vmem:[#allocation5 + $0x1850] sm:$0xf0]  ;;  %5460 = vmatpush.bf16.msra.mxu3 %v12793_v62  ;;  %v13116_v62 = vld [vmem:[#allocation5 + $0xa98] sm:$0xf]  ;;  %v5243_v15 = vpop.f32.mrf.mxu0 }
 0x1a1   :  { %v13878_v56 = vld [vmem:[#allocation5 + $0x10d0] sm:$0xf0]  ;;  %v14841_v3 = vor.u32 %v17885_v47, %v14838_v48  ;;  %v12669_v47 = vor.u32 %v17350_v54, %v12668_v29  ;;  %v17606_v48 = vld [vmem:[#allocation5 + $0xf54] sm:$0xf0] }
 0x1a2   :  { %v17773_v59 = vld [vmem:[#allocation5 + $0x1494] sm:$0xf]  ;;  %v13881_v9 = vor.u32 %v17645_v46, %v13878_v56  ;;  %v12157_v46 = vor.u32 %v17222_v28, %v12156_v25  ;;  %v6732_v56 = vsub.f32 1.5, %v6731_v39  ;;  %v13693_v2 = vor.u32 %v17606_v48, %v13692_v44  ;;  %v13052_v25 = vld [vmem:[#allocation5 + $0xa18] sm:$0xf]  ;;  %v5228_v48 = vpop.f32.mrf.mxu3 }
 0x1a3   :  { %v14390_v60 = vld [vmem:[#allocation5 + $0x14d0] sm:$0xf0]  ;;  %5461 = vmatmul.bf16.vlgmr.msra.gmra.mxu3 %v19045_v51  ;;  %v11964_v28 = vld [vmem:[#allocation5 + $0x198] sm:$0xf] }
 0x1a4   :  { %v17501_v63 = vld [vmem:[#allocation5 + $0xc14] sm:$0xf]  ;;  %v14393_v10 = vor.u32 %v17773_v59, %v14390_v60  ;;  %5512 = vmatpush.bf16.msrb.mxu3 %v14841_v3  ;;  %5485 = vmatpush.bf16.msra.mxu0 %v13881_v9  ;;  %v12604_v59 = vld [vmem:[#allocation5 + $0x698] sm:$0xf]  ;;  %v12093_v9 = vor.u32 %v17206_v37, %v12092_v52 }
 0x1a5   :  { %v13302_v1 = vld [vmem:[#allocation5 + $0xc50] sm:$0xf0]  ;;  %v17334_v60 = vld [vmem:[#allocation5 + $0x6d4] sm:$0xf0] }
 0x1a6   :  { %v17629_v11 = vld [vmem:[#allocation5 + $0x1014] sm:$0xf]  ;;  %v13305_v16 = vor.u32 %v17501_v63, %v13302_v1  ;;  %5498 = vmatpush.bf16.msra.mxu2 %v14393_v10  ;;  %v6733_v63 = vmul.f32 %v19142_v8, %v6732_v56  ;;  %v13181_v1 = vor.u32 %v17478_v43, %v13180_v38  ;;  %v17462_v3 = vld [vmem:[#allocation5 + $0xad4] sm:$0xf0]  ;;  %v12605_v10 = vor.u32 %v17334_v60, %v12604_v59  ;;  %v5217_v60 = vpop.f32.mrf.mxu1 }
 0x1a7   :  { %v13814_v12 = vld [vmem:[#allocation5 + $0x1050] sm:$0xf0]  ;;  %v13117_v19 = vor.u32 %v17462_v3, %v13116_v62  ;;  %v17174_v29 = vld [vmem:[#allocation5 + $0x1d4] sm:$0xf0]  ;;  %v5229_v56 = vadd.f32 %v5228_v48, %v5216_v23 }
 0x1a8   :  { %v17757_v13 = vld [vmem:[#allocation5 + $0x1414] sm:$0xf]  ;;  %v13817_v34 = vor.u32 %v17629_v11, %v13814_v12  ;;  %5473 = vmatpush.bf16.msrb.mxu1 %v13305_v16  ;;  %5531 = vmatpush.bf16.msra.mxu3 %v12733_v22  ;;  %v17190_v11 = vld [vmem:[#allocation5 + $0x254] sm:$0xf0]  ;;  %v6737_v58 = vsel %vm19159_vm5, %v19142_v8, %v6733_v63  ;;  %v6727_v16 = vsel %vm19165_vm6, %v19126_v40, %v6723_v61 }
 0x1a9   :  { %v14326_v17 = vld [vmem:[#allocation5 + $0x1450] sm:$0xf0]  ;;  %v13629_v8 = vor.u32 %v17590_v5, %v13628_v4  ;;  %v13564_v40 = vld [vmem:[#allocation5 + $0xe18] sm:$0xf]  ;;  %v11965_v38 = vor.u32 %v17174_v29, %v11964_v28  ;;  %v19185_v3 = vadd.f32 %v19147_v32, %v5229_v56 }
 0x1aa   :  { %v14329_v36 = vor.u32 %v17757_v13, %v14326_v17  ;;  %5486 = vmatpush.bf16.msra.mxu0 %v13817_v34  ;;  %v12540_v13 = vld [vmem:[#allocation5 + $0x618] sm:$0xf]  ;;  %v6894_v17 = vrot.slane %v6737_v58, 7  ;;  %v13053_v34 = vor.u32 %v17446_v26, %v13052_v25 }
 0x1ab   :  { %5474 = vmatmul.bf16.vlgmr.msrb.gmra.mxu1 %v19049_v57  ;;  %v12541_v24 = vor.u32 %v17318_v14, %v12540_v13  ;;  %v12476_v54 = vld [vmem:[#allocation5 + $0x598] sm:$0xf]  ;;  %v6440_v13 = vrot.slane %v19185_v3, 4  ;;  %v6542_v14 = vmul.f32 %v19185_v3, %v19185_v3 }
 0x1ac   :  { %5518 = vmatpush.bf16.msra.mxu1 %v12221_v20  ;;  %5499 = vmatpush.bf16.msra.mxu2 %v14329_v36  ;;  %v12029_v20 = vor.u32 %v17190_v11, %v12028_v21  ;;  %v19179_v22 = vsel %vm6908_vm7, %v6727_v16, %v6894_v17  ;;  %v13565_v36 = vor.u32 %v17574_v27, %v13564_v40  ;;  %v12988_v39 = vld [vmem:[#allocation5 + $0x998] sm:$0xf] }
 0x1ad   :  { %5532 = vmatpush.bf16.msra.mxu3 %v12669_v47  ;;  %5487 = vmatmul.bf16.vlgmr.msra.gmra.mxu0 %v19061_v30  ;;  %v17430_v49 = vld [vmem:[#allocation5 + $0x9d4] sm:$0xf0]  ;;  %v5267_v47 = vpop.f32.mrf.mxu0  ;;  %v6441_v23 = vadd.f32 %v6440_v13, %v19185_v3 }
 0x1ae   :  { %5544 = vmatpush.bf16.msrb.mxu0 %v13245_v41  ;;  %v13500_v41 = vld [vmem:[#allocation5 + $0xd98] sm:$0xf]  ;;  %v12989_v59 = vor.u32 %v17430_v49, %v12988_v39 }
 0x1af   :  { %5500 = vmatmul.bf16.vlgmr.msra.gmra.mxu2 %v19063_v35  ;;  %v17558_v43 = vld [vmem:[#allocation5 + $0xdd4] sm:$0xf0] }
 0x1b0   :  { %5557 = vmatpush.bf16.msrb.mxu2 %v13757_v0  ;;  %5519 = vmatpush.bf16.msra.mxu1 %v12157_v46  ;;  %v12477_v0 = vor.u32 %v17302_v33, %v12476_v54  ;;  %v11900_v44 = vld [vmem:[#allocation5 + $0x118] sm:$0xf]  ;;  %v13501_v61 = vor.u32 %v17558_v43, %v13500_v41  ;;  %v5230_v33 = vpop.f32.mrf.mxu3 }
 0x1b1   :  { %5533 = vmatpush.bf16.msra.mxu3 %v12605_v10  ;;  %v17158_v46 = vld [vmem:[#allocation5 + $0x154] sm:$0xf0]  ;;  %v5254_v10 = vpop.f32.mrf.mxu2 }
 0x1b2   :  { %5545 = vmatpush.bf16.msrb.mxu0 %v13181_v1  ;;  %v12412_v52 = vld [vmem:[#allocation5 + $0x518] sm:$0xf]  ;;  %v11901_v62 = vor.u32 %v17158_v46, %v11900_v44  ;;  %v19187_v58 = vadd.f32 %v5267_v47, %v5254_v10  ;;  %v17230_v44 = vld [vmem:[#allocation5 + $0x39c] sm:$0xf]  ;;  %v6442_v46 = vrot.slane %v6441_v23, 2 }
 0x1b3   :  { %v17286_v37 = vld [vmem:[#allocation5 + $0x554] sm:$0xf0]  ;;  %14887 = vmatmul.msk.bf16.vlgmr.msrb.gmra.mxu3 %vm4968_vm0, %v19057_v45  ;;  %v12734_v10 = vld [vmem:[#allocation5 + $0x7d8] sm:$0xf0] }
 0x1b4   :  { %5558 = vmatpush.bf16.msrb.mxu2 %v13693_v2  ;;  %5520 = vmatpush.bf16.msra.mxu1 %v12093_v9  ;;  %v12924_v63 = vld [vmem:[#allocation5 + $0x918] sm:$0xf]  ;;  %v12413_v4 = vor.u32 %v17286_v37, %v12412_v52 }
 0x1b5   :  { %5534 = vmatpush.bf16.msra.mxu3 %v12541_v24  ;;  %v17414_v1 = vld [vmem:[#allocation5 + $0x954] sm:$0xf0]  ;;  %v6568_v24 = vrot.slane %v6542_v14, 4  ;;  %v5269_v27 = vpop.f32.mrf.mxu0 }
 0x1b6   :  { %5546 = vmatpush.bf16.msrb.mxu0 %v13117_v19  ;;  %v13436_v2 = vld [vmem:[#allocation5 + $0xd18] sm:$0xf]  ;;  %v12925_v15 = vor.u32 %v17414_v1, %v12924_v63  ;;  %v17198_v27 = vld [vmem:[#allocation5 + $0x29c] sm:$0xf] }
 0x1b7   :  { %v17542_v5 = vld [vmem:[#allocation5 + $0xd54] sm:$0xf0]  ;;  %v6569_v47 = vadd.f32 %v6568_v24, %v6542_v14  ;;  %v17214_v14 = vld [vmem:[#allocation5 + $0x31c] sm:$0xf] }
 0x1b8   :  { %5559 = vmatpush.bf16.msrb.mxu2 %v13629_v8  ;;  %5521 = vmatpush.bf16.msra.mxu1 %v12029_v20  ;;  %v17142_v9 = vld [vmem:[#allocation5 + $0xd4] sm:$0xf0]  ;;  %v13437_v17 = vor.u32 %v17542_v5, %v13436_v2 }
 0x1b9   :  { %5535 = vmatpush.bf16.msra.mxu3 %v12477_v0  ;;  %v12348_v21 = vld [vmem:[#allocation5 + $0x498] sm:$0xf]  ;;  %v11837_v18 = vor.u32 %v17142_v9, %v11836_v6  ;;  %v17358_v9 = vld [vmem:[#allocation5 + $0x79c] sm:$0xf] }
 0x1ba   :  { %5547 = vmatpush.bf16.msrb.mxu0 %v13053_v34  ;;  %v17270_v11 = vld [vmem:[#allocation5 + $0x4d4] sm:$0xf0] }
 0x1bb   :  { %v12860_v12 = vld [vmem:[#allocation5 + $0x898] sm:$0xf]  ;;  %v12349_v25 = vor.u32 %v17270_v11, %v12348_v21  ;;  %v6443_v21 = vadd.f32 %v6442_v46, %v6441_v23  ;;  %v6570_v11 = vrot.slane %v6569_v47, 2  ;;  %v12670_v23 = vld [vmem:[#allocation5 + $0x758] sm:$0xf0] }
 0x1bc   :  { %5560 = vmatpush.bf16.msrb.mxu2 %v13565_v36  ;;  %5522 = vmatpush.bf16.msra.mxu1 %v11965_v38  ;;  %v17398_v32 = vld [vmem:[#allocation5 + $0x8d4] sm:$0xf0] }
 0x1bd   :  { %v13372_v16 = vld [vmem:[#allocation5 + $0xc98] sm:$0xf]  ;;  %5536 = vmatpush.bf16.msra.mxu3 %v12413_v4  ;;  %v12861_v34 = vor.u32 %v17398_v32, %v12860_v12  ;;  %v12158_v32 = vld [vmem:[#allocation5 + $0x358] sm:$0xf0]  ;;  %v6444_v24 = vrot.slane %v6443_v21, 1 }
 0x1be   :  { %5548 = vmatpush.bf16.msrb.mxu0 %v12989_v59  ;;  %v17526_v19 = vld [vmem:[#allocation5 + $0xcd4] sm:$0xf0]  ;;  %v5256_v59 = vpop.f32.mrf.mxu2 }
 0x1bf   :  { %v11772_v8 = vld [vmem:[#allocation5 + $0x18] sm:$0xf]  ;;  %v13373_v49 = vor.u32 %v17526_v19, %v13372_v16 }
 0x1c0   :  { %5561 = vmatpush.bf16.msrb.mxu2 %v13501_v61  ;;  %5523 = vmatpush.bf16.msra.mxu1 %v11901_v62  ;;  %v17126_v20 = vld [vmem:[#allocation5 + $0x54] sm:$0xf0]  ;;  %v12222_v61 = vld [vmem:[#allocation5 + $0x3d8] sm:$0xf0] }
 0x1c1   :  { %v12284_v26 = vld [vmem:[#allocation5 + $0x418] sm:$0xf]  ;;  %v11773_v41 = vor.u32 %v17126_v20, %v11772_v8  ;;  %5537 = vmatpush.bf16.msra.mxu3 %v12349_v25  ;;  %v12225_v12 = vor.u32 %v17230_v44, %v12222_v61  ;;  %v17342_v20 = vld [vmem:[#allocation5 + $0x71c] sm:$0xf]  ;;  %v6571_v25 = vadd.f32 %v6570_v11, %v6569_v47 }
 0x1c2   :  { %v17254_v40 = vld [vmem:[#allocation5 + $0x454] sm:$0xf0]  ;;  %5549 = vmatpush.bf16.msrb.mxu0 %v12925_v15 }
 0x1c3   :  { %v14268_v28 = vld [vmem:[#allocation5 + $0x1398] sm:$0xf]  ;;  %v12285_v48 = vor.u32 %v17254_v40, %v12284_v26  ;;  %v12161_v26 = vor.u32 %v17214_v14, %v12158_v32  ;;  %v6572_v44 = vrot.slane %v6571_v25, 1  ;;  %v5319_v14 = vpop.f32.mrf.mxu0 }
 0x1c4   :  { %v17750_v29 = vld [vmem:[#allocation5 + $0x13d4] sm:$0xf0]  ;;  %5562 = vmatpush.bf16.msrb.mxu2 %v13437_v17  ;;  %5524 = vmatpush.bf16.msra.mxu1 %v11837_v18  ;;  %v12737_v18 = vor.u32 %v17358_v9, %v12734_v10  ;;  %v11966_v10 = vld [vmem:[#allocation5 + $0x1d8] sm:$0xf0] }
 0x1c5   :  { %v14780_v54 = vld [vmem:[#allocation5 + $0x1798] sm:$0xf]  ;;  %v14269_v52 = vor.u32 %v17750_v29, %v14268_v28  ;;  %5538 = vmatpush.bf16.msra.mxu3 %v12285_v48  ;;  %v12094_v28 = vld [vmem:[#allocation5 + $0x2d8] sm:$0xf0] }
 0x1c6   :  { %v17878_v36 = vld [vmem:[#allocation5 + $0x17d4] sm:$0xf0]  ;;  %5550 = vmatpush.bf16.msrb.mxu0 %v12861_v34  ;;  %v12673_v34 = vor.u32 %v17342_v20, %v12670_v23  ;;  %v17182_v48 = vld [vmem:[#allocation5 + $0x21c] sm:$0xf]  ;;  %v5306_v23 = vpop.f32.mrf.mxu2 }
 0x1c7   :  { %v12796_v38 = vld [vmem:[#allocation5 + $0x818] sm:$0xf]  ;;  %v14781_v60 = vor.u32 %v17878_v36, %v14780_v54 }
 0x1c8   :  { %v17382_v39 = vld [vmem:[#allocation5 + $0x854] sm:$0xf0]  ;;  %5563 = vmatpush.bf16.msrb.mxu2 %v13373_v49  ;;  %5525 = vmatpush.bf16.msra.mxu1 %v11773_v41  ;;  %v12097_v49 = vor.u32 %v17198_v27, %v12094_v28  ;;  %v17326_v41 = vld [vmem:[#allocation5 + $0x69c] sm:$0xf] }
 0x1c9   :  { %v13308_v0 = vld [vmem:[#allocation5 + $0xc18] sm:$0xf]  ;;  %v12797_v1 = vor.u32 %v17382_v39, %v12796_v38  ;;  %5583 = vmatpush.bf16.msrb.mxu3 %v14781_v60  ;;  %v5280_v39 = vpop.f32.mrf.mxu1  ;;  %v11902_v28 = vld [vmem:[#allocation5 + $0x158] sm:$0xf0] }
 0x1ca   :  { %v17510_v43 = vld [vmem:[#allocation5 + $0xc54] sm:$0xf0]  ;;  %5539 = vmatmul.bf16.vlgmr.msra.gmra.mxu3 %v19053_v7  ;;  %v5281_v46 = vadd.f32 %v5280_v39, %v19187_v58  ;;  %v17278_v39 = vld [vmem:[#allocation5 + $0x51c] sm:$0xf] }
 0x1cb   :  { %v14844_v37 = vld [vmem:[#allocation5 + $0x1818] sm:$0xf]  ;;  %v13309_v5 = vor.u32 %v17510_v43, %v13308_v0  ;;  %5551 = vmatpush.bf16.msrb.mxu0 %v12797_v1  ;;  %5526 = vmatmul.bf16.vlgmr.msra.gmra.mxu1 %v19047_v55  ;;  %v12606_v0 = vld [vmem:[#allocation5 + $0x6d8] sm:$0xf0]  ;;  %v6445_v43 = vadd.f32 %v6444_v24, %v6443_v21 }
 0x1cc   :  { %v17894_v56 = vld [vmem:[#allocation5 + $0x1854] sm:$0xf0]  ;;  %5570 = vmatpush.bf16.msrb.mxu1 %v14269_v52  ;;  %v12609_v60 = vor.u32 %v17326_v41, %v12606_v0  ;;  %v12542_v1 = vld [vmem:[#allocation5 + $0x658] sm:$0xf0] }
 0x1cd   :  { %v14204_v62 = vld [vmem:[#allocation5 + $0x1318] sm:$0xf]  ;;  %v14845_v6 = vor.u32 %v17894_v56, %v14844_v37  ;;  %5564 = vmatpush.bf16.msrb.mxu2 %v13309_v5  ;;  %v12030_v37 = vld [vmem:[#allocation5 + $0x258] sm:$0xf0] }
 0x1ce   :  { %v17734_v63 = vld [vmem:[#allocation5 + $0x1354] sm:$0xf0]  ;;  %5552 = vmatmul.bf16.vlgmr.msrb.gmra.mxu0 %v19045_v51  ;;  %v12033_v58 = vor.u32 %v17182_v48, %v12030_v37 }
 0x1cf   :  { %v14716_v2 = vld [vmem:[#allocation5 + $0x1718] sm:$0xf]  ;;  %v14205_v13 = vor.u32 %v17734_v63, %v14204_v62  ;;  %5603 = vmatpush.bf16.msra.mxu0 %v14845_v6  ;;  %v17310_v63 = vld [vmem:[#allocation5 + $0x61c] sm:$0xf] }
 0x1d0   :  { %v17862_v4 = vld [vmem:[#allocation5 + $0x1754] sm:$0xf0]  ;;  %5565 = vmatmul.bf16.vlgmr.msrb.gmra.mxu2 %v19049_v57  ;;  %v17166_v6 = vld [vmem:[#allocation5 + $0x19c] sm:$0xf] }
 0x1d1   :  { %v14717_v15 = vor.u32 %v17862_v4, %v14716_v2  ;;  %v14140_v16 = vld [vmem:[#allocation5 + $0x1298] sm:$0xf]  ;;  %5609 = vmatpush.bf16.msra.mxu2 %v12225_v12  ;;  %5571 = vmatpush.bf16.msrb.mxu1 %v14205_v13  ;;  %v19198_v2 = vmul.f32 0.125, %v6445_v43  ;;  %v6573_v4 = vadd.f32 %v6572_v44, %v6571_v25  ;;  %v5293_v12 = vpop.f32.mrf.mxu3  ;;  %v12545_v13 = vor.u32 %v17310_v63, %v12542_v1  ;;  %v17134_v44 = vld [vmem:[#allocation5 + $0x9c] sm:$0xf]  ;;  %v5321_v1 = vpop.f32.mrf.mxu0 }
 0x1d2   :  { %v17718_v17 = vld [vmem:[#allocation5 + $0x12d4] sm:$0xf0]  ;;  %v11969_v24 = vor.u32 %v17166_v6, %v11966_v10  ;;  %v12350_v6 = vld [vmem:[#allocation5 + $0x4d8] sm:$0xf0] }
 0x1d3   :  { %v14652_v19 = vld [vmem:[#allocation5 + $0x1698] sm:$0xf]  ;;  %v14141_v40 = vor.u32 %v17718_v17, %v14140_v16  ;;  %5584 = vmatpush.bf16.msrb.mxu3 %v14717_v15  ;;  %5622 = vmatpush.bf16.msrb.mxu0 %v12737_v18  ;;  %v5294_v16 = vadd.f32 %v5293_v12, %v5281_v46  ;;  %v5282_v17 = vpop.f32.mrf.mxu1  ;;  %v17294_v18 = vld [vmem:[#allocation5 + $0x59c] sm:$0xf]  ;;  %v6670_v20 = vmul.f32 %v19198_v2, %v19198_v2 }
 0x1d4   :  { %v17846_v8 = vld [vmem:[#allocation5 + $0x16d4] sm:$0xf0]  ;;  %v11838_v46 = vld [vmem:[#allocation5 + $0xd8] sm:$0xf0] }
 0x1d5   :  { %v14653_v29 = vor.u32 %v17846_v8, %v14652_v19  ;;  %v14076_v54 = vld [vmem:[#allocation5 + $0x1218] sm:$0xf]  ;;  %5610 = vmatpush.bf16.msra.mxu2 %v12161_v26  ;;  %5572 = vmatpush.bf16.msrb.mxu1 %v14141_v40  ;;  %v12478_v19 = vld [vmem:[#allocation5 + $0x5d8] sm:$0xf0]  ;;  %v6654_v8 = vmul.f32 0.125, %v6573_v4  ;;  %v5307_v40 = vadd.f32 %v5306_v23, %v5294_v16 }
 0x1d6   :  { %v17702_v33 = vld [vmem:[#allocation5 + $0x1254] sm:$0xf0]  ;;  %v17150_v26 = vld [vmem:[#allocation5 + $0x11c] sm:$0xf] }
 0x1d7   :  { %v14588_v36 = vld [vmem:[#allocation5 + $0x1618] sm:$0xf]  ;;  %v14077_v47 = vor.u32 %v17702_v33, %v14076_v54  ;;  %5585 = vmatpush.bf16.msrb.mxu3 %v14653_v29  ;;  %5623 = vmatpush.bf16.msrb.mxu0 %v12673_v34  ;;  %v12481_v33 = vor.u32 %v17294_v18, %v12478_v19  ;;  %v6686_v41 = vsub.f32 %v6654_v8, %v6670_v20  ;;  %v17118_v12 = vld [vmem:[#allocation5 + $0x1c] sm:$0xf] }
 0x1d8   :  { %v17830_v38 = vld [vmem:[#allocation5 + $0x1654] sm:$0xf0]  ;;  %v11905_v0 = vor.u32 %v17150_v26, %v11902_v28  ;;  %v17742_v16 = vld [vmem:[#allocation5 + $0x139c] sm:$0xf] }
 0x1d9   :  { %v14589_v52 = vor.u32 %v17830_v38, %v14588_v36  ;;  %v14012_v56 = vld [vmem:[#allocation5 + $0x1198] sm:$0xf]  ;;  %5611 = vmatpush.bf16.msra.mxu2 %v12097_v49  ;;  %5573 = vmatpush.bf16.msrb.mxu1 %v14077_v47  ;;  %v5320_v38 = vadd.f32 %v5319_v14, %v5307_v40  ;;  %v12414_v49 = vld [vmem:[#allocation5 + $0x558] sm:$0xf0]  ;;  %v5295_v63 = vpop.f32.mrf.mxu3  ;;  %v5308_v14 = vpop.f32.mrf.mxu2 }
 0x1da   :  { %v17686_v59 = vld [vmem:[#allocation5 + $0x11d4] sm:$0xf0]  ;;  %v14270_v17 = vld [vmem:[#allocation5 + $0x13d8] sm:$0xf0] }
 0x1db   :  { %v14524_v61 = vld [vmem:[#allocation5 + $0x1598] sm:$0xf]  ;;  %v14013_v5 = vor.u32 %v17686_v59, %v14012_v56  ;;  %5586 = vmatpush.bf16.msrb.mxu3 %v14589_v52  ;;  %5624 = vmatpush.bf16.msrb.mxu0 %v12609_v60  ;;  %v12417_v59 = vor.u32 %v17278_v39, %v12414_v49  ;;  %v17486_v60 = vld [vmem:[#allocation5 + $0xb9c] sm:$0xf]  ;;  %v5332_v4 = vpop.f32.mrf.mxu1 }
 0x1dc   :  { %v17814_v62 = vld [vmem:[#allocation5 + $0x15d4] sm:$0xf0]  ;;  %v19206_v10 = vadd.f32 %v5332_v4, %v5320_v38  ;;  %v17470_v18 = vld [vmem:[#allocation5 + $0xb1c] sm:$0xf] }
 0x1dd   :  { %v14525_v9 = vor.u32 %v17814_v62, %v14524_v61  ;;  %v13948_v21 = vld [vmem:[#allocation5 + $0x1118] sm:$0xf]  ;;  %5612 = vmatpush.bf16.msra.mxu2 %v12033_v58  ;;  %5574 = vmatpush.bf16.msrb.mxu1 %v14013_v5  ;;  %v13246_v61 = vld [vmem:[#allocation5 + $0xbd8] sm:$0xf0] }
 0x1de   :  { %v17670_v11 = vld [vmem:[#allocation5 + $0x1154] sm:$0xf0]  ;;  %14888 = vmatmul.msk.bf16.vlgmr.msra.gmra.mxu0 %vm4968_vm0, %v19057_v45  ;;  %v17614_v62 = vld [vmem:[#allocation5 + $0xf9c] sm:$0xf]  ;;  %v6446_v19 = vrot.slane %v19206_v10, 4  ;;  %v6543_v8 = vmul.f32 %v19206_v10, %v19206_v10 }
 0x1df   :  { %v14460_v15 = vld [vmem:[#allocation5 + $0x1518] sm:$0xf]  ;;  %v13949_v25 = vor.u32 %v17670_v11, %v13948_v21  ;;  %5587 = vmatpush.bf16.msrb.mxu3 %v14525_v9  ;;  %5625 = vmatpush.bf16.msrb.mxu0 %v12545_v13  ;;  %v13758_v58 = vld [vmem:[#allocation5 + $0xfd8] sm:$0xf0]  ;;  %v19204_v9 = vadd.f32 1e-05, %v6686_v41  ;;  %v11841_v21 = vor.u32 %v17134_v44, %v11838_v46 }
 0x1e0   :  { %v17798_v32 = vld [vmem:[#allocation5 + $0x1554] sm:$0xf0]  ;;  %v17262_v5 = vld [vmem:[#allocation5 + $0x49c] sm:$0xf]  ;;  %v13761_v20 = vor.u32 %v17614_v62, %v13758_v58  ;;  %v6447_v28 = vadd.f32 %v6446_v19, %v19206_v10 }
 0x1e1   :  { %v14461_v27 = vor.u32 %v17798_v32, %v14460_v15  ;;  %v13884_v29 = vld [vmem:[#allocation5 + $0x1098] sm:$0xf]  ;;  %5613 = vmatpush.bf16.msra.mxu2 %v11969_v24  ;;  %5575 = vmatpush.bf16.msrb.mxu1 %v13949_v25  ;;  %v11774_v13 = vld [vmem:[#allocation5 + $0x58] sm:$0xf0]  ;;  %v13249_v32 = vor.u32 %v17486_v60, %v13246_v61  ;;  %v12353_v23 = vor.u32 %v17262_v5, %v12350_v6  ;;  %18478 = vrsqrt.f32 %v19204_v9 }
 0x1e2   :  { %v17654_v54 = vld [vmem:[#allocation5 + $0x10d4] sm:$0xf0]  ;;  %v13182_v24 = vld [vmem:[#allocation5 + $0xb58] sm:$0xf0]  ;;  %v6448_v41 = vrot.slane %v6447_v28, 2  ;;  %vm6744_vm9 = vweird.f32 %v19204_v9 }
 0x1e3   :  { %v14396_v34 = vld [vmem:[#allocation5 + $0x1498] sm:$0xf]  ;;  %v13885_v43 = vor.u32 %v17654_v54, %v13884_v29  ;;  %5588 = vmatpush.bf16.msrb.mxu3 %v14461_v27  ;;  %5626 = vmatpush.bf16.msrb.mxu0 %v12481_v33  ;;  %v17598_v25 = vld [vmem:[#allocation5 + $0xf1c] sm:$0xf]  ;;  %v6574_v29 = vrot.slane %v6543_v8, 4  ;;  %v11777_v54 = vor.u32 %v17118_v12, %v11774_v13  ;;  %v13185_v38 = vor.u32 %v17470_v18, %v13182_v24 }
 0x1e4   :  { %v17782_v36 = vld [vmem:[#allocation5 + $0x14d4] sm:$0xf0]  ;;  %v13694_v26 = vld [vmem:[#allocation5 + $0xf58] sm:$0xf0] }
 0x1e5   :  { %v13820_v47 = vld [vmem:[#allocation5 + $0x1018] sm:$0xf]  ;;  %v14397_v48 = vor.u32 %v17782_v36, %v14396_v34  ;;  %5614 = vmatpush.bf16.msra.mxu2 %v11905_v0  ;;  %5576 = vmatpush.bf16.msrb.mxu1 %v13885_v43  ;;  %v17246_v40 = vld [vmem:[#allocation5 + $0x41c] sm:$0xf]  ;;  %v14273_v36 = vor.u32 %v17742_v16, %v14270_v17  ;;  %v6575_v0 = vadd.f32 %v6574_v29, %v6543_v8 }
 0x1e6   :  { %v17638_v52 = vld [vmem:[#allocation5 + $0x1054] sm:$0xf0]  ;;  %v12286_v27 = vld [vmem:[#allocation5 + $0x458] sm:$0xf0]  ;;  %v13697_v43 = vor.u32 %v17598_v25, %v13694_v26 }
 0x1e7   :  { %v14332_v37 = vld [vmem:[#allocation5 + $0x1418] sm:$0xf]  ;;  %v13821_v11 = vor.u32 %v17638_v52, %v13820_v47  ;;  %5589 = vmatpush.bf16.msrb.mxu3 %v14397_v48  ;;  %5627 = vmatpush.bf16.msrb.mxu0 %v12417_v59  ;;  %v17870_v33 = vld [vmem:[#allocation5 + $0x179c] sm:$0xf]  ;;  %v12289_v44 = vor.u32 %v17246_v40, %v12286_v27  ;;  %v6449_v59 = vadd.f32 %v6448_v41, %v6447_v28  ;;  %v6576_v60 = vrot.slane %v6575_v0, 2  ;;  %v19215_v5 = vpop.eup %18478 }
 0x1e8   :  { %v17766_v56 = vld [vmem:[#allocation5 + $0x1454] sm:$0xf0]  ;;  %v14782_v34 = vld [vmem:[#allocation5 + $0x17d8] sm:$0xf0]  ;;  %v6739_v8 = vmul.f32 %v19215_v5, %v19204_v9  ;;  %vm6745_vm8 = vweird.f32 %v19215_v5 }
 0x1e9   :  { %v14333_v15 = vor.u32 %v17766_v56, %v14332_v37  ;;  %5615 = vmatpush.bf16.msra.mxu2 %v11841_v21  ;;  %5577 = vmatpush.bf16.msrb.mxu1 %v13821_v11  ;;  %v17726_v39 = vld [vmem:[#allocation5 + $0x131c] sm:$0xf]  ;;  %v14785_v48 = vor.u32 %v17870_v33, %v14782_v34  ;;  %v5334_v56 = vpop.f32.mrf.mxu1  ;;  %v6450_v6 = vrot.slane %v6449_v59, 1  ;;  %v6577_v21 = vadd.f32 %v6576_v60, %v6575_v0  ;;  %vm19241_vm10 = vmor %vm6744_vm9, %vm6745_vm8 }
 0x1ea   :  { %v14206_v49 = vld [vmem:[#allocation5 + $0x1358] sm:$0xf0]  ;;  %v6740_v0 = vmul.f32 %v19215_v5, %v6739_v8 }
 0x1eb   :  { %5590 = vmatpush.bf16.msrb.mxu3 %v14333_v15  ;;  %5628 = vmatpush.bf16.msrb.mxu0 %v12353_v23  ;;  %v17454_v46 = vld [vmem:[#allocation5 + $0xa9c] sm:$0xf]  ;;  %v14209_v63 = vor.u32 %v17726_v39, %v14206_v49  ;;  %v6451_v16 = vadd.f32 %v6450_v6, %v6449_v59  ;;  %v6578_v17 = vrot.slane %v6577_v21, 1 }
 0x1ec   :  { %v13118_v47 = vld [vmem:[#allocation5 + $0xad8] sm:$0xf0]  ;;  %5578 = vmatmul.bf16.vlgmr.msrb.gmra.mxu1 %v19061_v30  ;;  %v6741_v6 = vmul.f32 0.5, %v6740_v0  ;;  %v12228_v0 = vld [vmem:[#allocation5 + $0x3a0] sm:$0xf] }
 0x1ed   :  { %5635 = vmatpush.bf16.msra.mxu1 %v13249_v32  ;;  %v17582_v52 = vld [vmem:[#allocation5 + $0xe9c] sm:$0xf]  ;;  %5616 = vmatpush.bf16.msra.mxu2 %v11777_v54  ;;  %v13121_v1 = vor.u32 %v17454_v46, %v13118_v47  ;;  %v19220_v26 = vmul.f32 0.125, %v6451_v16  ;;  %v6579_v40 = vadd.f32 %v6578_v17, %v6577_v21 }
 0x1ee   :  { %v13630_v37 = vld [vmem:[#allocation5 + $0xed8] sm:$0xf0]  ;;  %5591 = vmatmul.bf16.vlgmr.msrb.gmra.mxu3 %v19063_v35 }
 0x1ef   :  { %5648 = vmatpush.bf16.msra.mxu3 %v13761_v20  ;;  %v17854_v61 = vld [vmem:[#allocation5 + $0x171c] sm:$0xf]  ;;  %5629 = vmatpush.bf16.msrb.mxu0 %v12289_v44  ;;  %v13633_v11 = vor.u32 %v17582_v52, %v13630_v37  ;;  %v6671_v39 = vmul.f32 %v19220_v26, %v19220_v26 }
 0x1f0   :  { %v14718_v62 = vld [vmem:[#allocation5 + $0x1758] sm:$0xf0]  ;;  %5617 = vmatmul.bf16.vlgmr.msra.gmra.mxu2 %v19047_v55 }
 0x1f1   :  { %5661 = vmatpush.bf16.msrb.mxu2 %v14273_v36  ;;  %5636 = vmatpush.bf16.msra.mxu1 %v13185_v38  ;;  %v17710_v4 = vld [vmem:[#allocation5 + $0x129c] sm:$0xf]  ;;  %v14721_v14 = vor.u32 %v17854_v61, %v14718_v62  ;;  %v5358_v36 = vpop.f32.mrf.mxu1  ;;  %v6655_v38 = vmul.f32 0.125, %v6579_v40  ;;  %v5384_v62 = vpop.f32.mrf.mxu0 }
 0x1f2   :  { %v14142_v58 = vld [vmem:[#allocation5 + $0x12d8] sm:$0xf0]  ;;  %5630 = vmatmul.bf16.vlgmr.msrb.gmra.mxu0 %v19053_v7 }
 0x1f3   :  { %5649 = vmatpush.bf16.msra.mxu3 %v13697_v43  ;;  %v17438_v12 = vld [vmem:[#allocation5 + $0xa1c] sm:$0xf]  ;;  %5674 = vmatpush.bf16.msra.mxu0 %v14785_v48  ;;  %v14145_v20 = vor.u32 %v17710_v4, %v14142_v58  ;;  %v6687_v47 = vsub.f32 %v6655_v38, %v6671_v39 }
 0x1f4   :  { %v13054_v13 = vld [vmem:[#allocation5 + $0xa58] sm:$0xf0] }
 0x1f5   :  { %v17566_v15 = vld [vmem:[#allocation5 + $0xe1c] sm:$0xf]  ;;  %5662 = vmatpush.bf16.msrb.mxu2 %v14209_v63  ;;  %5637 = vmatpush.bf16.msra.mxu1 %v13121_v1  ;;  %v13057_v23 = vor.u32 %v17438_v12, %v13054_v13  ;;  %v19226_v63 = vadd.f32 1e-05, %v6687_v47  ;;  %v5345_v1 = vpop.f32.mrf.mxu3 }
 0x1f6   :  { %v13566_v32 = vld [vmem:[#allocation5 + $0xe58] sm:$0xf0]  ;;  %v5359_v21 = vadd.f32 %v5358_v36, %v5345_v1 }
 0x1f7   :  { %v17838_v18 = vld [vmem:[#allocation5 + $0x169c] sm:$0xf]  ;;  %5650 = vmatpush.bf16.msra.mxu3 %v13633_v11  ;;  %v13569_v27 = vor.u32 %v17566_v15, %v13566_v32  ;;  %5675 = vmatpush.bf16.msra.mxu0 %v14721_v14  ;;  %18480 = vrsqrt.f32 %v19226_v63  ;;  %v5371_v14 = vpop.f32.mrf.mxu2  ;;  %vm6754_vm12 = vweird.f32 %v19226_v63 }
 0x1f8   :  { %v14654_v19 = vld [vmem:[#allocation5 + $0x16d8] sm:$0xf0] }
 0x1f9   :  { %v17694_v24 = vld [vmem:[#allocation5 + $0x121c] sm:$0xf]  ;;  %v14657_v54 = vor.u32 %v17838_v18, %v14654_v19  ;;  %5663 = vmatpush.bf16.msrb.mxu2 %v14145_v20  ;;  %5638 = vmatpush.bf16.msra.mxu1 %v13057_v23  ;;  %v5372_v19 = vadd.f32 %v5371_v14, %v5359_v21  ;;  %v5360_v23 = vpop.f32.mrf.mxu1 }
 0x1fa   :  { %v14078_v25 = vld [vmem:[#allocation5 + $0x1258] sm:$0xf0] }
 0x1fb   :  { %v17422_v28 = vld [vmem:[#allocation5 + $0x99c] sm:$0xf]  ;;  %v14081_v43 = vor.u32 %v17694_v24, %v14078_v25  ;;  %5651 = vmatpush.bf16.msra.mxu3 %v13569_v27  ;;  %5676 = vmatpush.bf16.msra.mxu0 %v14657_v54  ;;  %v6742_v27 = vsub.f32 1.5, %v6741_v6 }
 0x1fc   :  { %v12990_v29 = vld [vmem:[#allocation5 + $0x9d8] sm:$0xf0] }
 0x1fd   :  { %v17550_v33 = vld [vmem:[#allocation5 + $0xd9c] sm:$0xf]  ;;  %v12993_v44 = vor.u32 %v17422_v28, %v12990_v29  ;;  %5664 = vmatpush.bf16.msrb.mxu2 %v14081_v43  ;;  %v19229_v28 = vadd.f32 %v5384_v62, %v5372_v19  ;;  %v19231_v47 = vpop.eup %18480  ;;  %v6743_v1 = vmul.f32 %v19215_v5, %v6742_v27 }
 0x1fe   :  { %v13502_v34 = vld [vmem:[#allocation5 + $0xdd8] sm:$0xf0]  ;;  %vm6755_vm11 = vweird.f32 %v19231_v47 }
 0x1ff   :  { %v17822_v49 = vld [vmem:[#allocation5 + $0x161c] sm:$0xf]  ;;  %v13505_v48 = vor.u32 %v17550_v33, %v13502_v34  ;;  %5639 = vmatpush.bf16.msra.mxu1 %v12993_v44  ;;  %v6747_v27 = vsel %vm19241_vm10, %v19215_v5, %v6743_v1  ;;  %v17207_v5 = vld [vmem:[#allocation5 + $0x2dc] sm:$0xf0]  ;;  %vm6756_vm13 = vmor %vm6754_vm12, %vm6755_vm11  ;;  %vm6914_vm11 = vcmask 1044484  }
 0x200   :  { %v14590_v41 = vld [vmem:[#allocation5 + $0x1658] sm:$0xf0]  ;;  %v17463_v1 = vld [vmem:[#allocation5 + $0xadc] sm:$0xf0] }
 0x201   :  { %v17678_v46 = vld [vmem:[#allocation5 + $0x119c] sm:$0xf]  ;;  %v14593_v59 = vor.u32 %v17822_v49, %v14590_v41  ;;  %5652 = vmatpush.bf16.msra.mxu3 %v13505_v48  ;;  %v17239_v48 = vld [vmem:[#allocation5 + $0x3dc] sm:$0xf0] }
 0x202   :  { %v14014_v52 = vld [vmem:[#allocation5 + $0x11d8] sm:$0xf0]  ;;  %v12229_v14 = vor.u32 %v17239_v48, %v12228_v0  ;;  %v12100_v0 = vld [vmem:[#allocation5 + $0x2a0] sm:$0xf]  ;;  %v6895_v48 = vrot.slane %v6747_v27, 6 }
 0x203   :  { %v17406_v37 = vld [vmem:[#allocation5 + $0x91c] sm:$0xf]  ;;  %v14017_v11 = vor.u32 %v17678_v46, %v14014_v52  ;;  %5677 = vmatpush.bf16.msra.mxu0 %v14593_v59  ;;  %v5386_v46 = vpop.f32.mrf.mxu0  ;;  %v6749_v59 = vmul.f32 %v19231_v47, %v19226_v63  ;;  %v12101_v63 = vor.u32 %v17207_v5, %v12100_v0  ;;  %v13508_v5 = vld [vmem:[#allocation5 + $0xda0] sm:$0xf] }
 0x204   :  { %v12926_v56 = vld [vmem:[#allocation5 + $0x958] sm:$0xf0]  ;;  %v17607_v46 = vld [vmem:[#allocation5 + $0xf5c] sm:$0xf0] }
 0x205   :  { %v17534_v60 = vld [vmem:[#allocation5 + $0xd1c] sm:$0xf]  ;;  %v12929_v12 = vor.u32 %v17406_v37, %v12926_v56  ;;  %5665 = vmatpush.bf16.msrb.mxu2 %v14017_v11  ;;  %v5347_v56 = vpop.f32.mrf.mxu3  ;;  %v12740_v11 = vld [vmem:[#allocation5 + $0x7a0] sm:$0xf] }
 0x206   :  { %v13438_v61 = vld [vmem:[#allocation5 + $0xd58] sm:$0xf0]  ;;  %v12612_v56 = vld [vmem:[#allocation5 + $0x6a0] sm:$0xf] }
 0x207   :  { %v17806_v4 = vld [vmem:[#allocation5 + $0x159c] sm:$0xf]  ;;  %v13441_v15 = vor.u32 %v17534_v60, %v13438_v61  ;;  %5640 = vmatpush.bf16.msra.mxu1 %v12929_v12  ;;  %v17367_v12 = vld [vmem:[#allocation5 + $0x7dc] sm:$0xf0] }
 0x208   :  { %v14526_v58 = vld [vmem:[#allocation5 + $0x15d8] sm:$0xf0]  ;;  %v12741_v9 = vor.u32 %v17367_v12, %v12740_v11  ;;  %v13636_v11 = vld [vmem:[#allocation5 + $0xea0] sm:$0xf] }
 0x209   :  { %v17662_v13 = vld [vmem:[#allocation5 + $0x111c] sm:$0xf]  ;;  %v14529_v18 = vor.u32 %v17806_v4, %v14526_v58  ;;  %5653 = vmatpush.bf16.msra.mxu3 %v13441_v15  ;;  %v5373_v4 = vpop.f32.mrf.mxu2  ;;  %v17591_v12 = vld [vmem:[#allocation5 + $0xedc] sm:$0xf0] }
 0x20a   :  { %v13950_v32 = vld [vmem:[#allocation5 + $0x1158] sm:$0xf0] }
 0x20b   :  { %v17390_v16 = vld [vmem:[#allocation5 + $0x89c] sm:$0xf]  ;;  %v13953_v29 = vor.u32 %v17662_v13, %v13950_v32  ;;  %5678 = vmatpush.bf16.msra.mxu0 %v14529_v18  ;;  %v6750_v13 = vmul.f32 %v19231_v47, %v6749_v59  ;;  %v13252_v32 = vld [vmem:[#allocation5 + $0xba0] sm:$0xf] }
 0x20c   :  { %v12862_v17 = vld [vmem:[#allocation5 + $0x8d8] sm:$0xf0]  ;;  %v17223_v18 = vld [vmem:[#allocation5 + $0x35c] sm:$0xf0] }
 0x20d   :  { %v17518_v8 = vld [vmem:[#allocation5 + $0xc9c] sm:$0xf]  ;;  %v12865_v54 = vor.u32 %v17390_v16, %v12862_v17  ;;  %5666 = vmatpush.bf16.msrb.mxu2 %v13953_v29  ;;  %v17495_v16 = vld [vmem:[#allocation5 + $0xbdc] sm:$0xf0]  ;;  %v6751_v23 = vmul.f32 0.5, %v6750_v13 }
 0x20e   :  { %v13374_v20 = vld [vmem:[#allocation5 + $0xcd8] sm:$0xf0]  ;;  %v12164_v17 = vld [vmem:[#allocation5 + $0x320] sm:$0xf]  ;;  %v13253_v29 = vor.u32 %v17495_v16, %v13252_v32 }
 0x20f   :  { %v17790_v24 = vld [vmem:[#allocation5 + $0x151c] sm:$0xf]  ;;  %v13377_v36 = vor.u32 %v17518_v8, %v13374_v20  ;;  %5641 = vmatpush.bf16.msra.mxu1 %v12865_v54  ;;  %v12676_v54 = vld [vmem:[#allocation5 + $0x720] sm:$0xf] }
 0x210   :  { %v14462_v25 = vld [vmem:[#allocation5 + $0x1558] sm:$0xf0]  ;;  %v17319_v16 = vld [vmem:[#allocation5 + $0x65c] sm:$0xf0] }
 0x211   :  { %v17646_v40 = vld [vmem:[#allocation5 + $0x109c] sm:$0xf]  ;;  %v14465_v41 = vor.u32 %v17790_v24, %v14462_v25  ;;  %5654 = vmatpush.bf16.msra.mxu3 %v13377_v36  ;;  %v13764_v25 = vld [vmem:[#allocation5 + $0xfa0] sm:$0xf]  ;;  %v12165_v36 = vor.u32 %v17223_v18, %v12164_v17  ;;  %v19255_v59 = vpop.f32.mrf.mxu2 }
 0x212   :  { %v13886_v33 = vld [vmem:[#allocation5 + $0x10d8] sm:$0xf0]  ;;  %v13060_v17 = vld [vmem:[#allocation5 + $0xa20] sm:$0xf] }
 0x213   :  { %v17374_v34 = vld [vmem:[#allocation5 + $0x81c] sm:$0xf]  ;;  %v13889_v60 = vor.u32 %v17646_v40, %v13886_v33  ;;  %5679 = vmatpush.bf16.msra.mxu0 %v14465_v41  ;;  %v17623_v40 = vld [vmem:[#allocation5 + $0xfdc] sm:$0xf0] }
 0x214   :  { %v12798_v38 = vld [vmem:[#allocation5 + $0x858] sm:$0xf0]  ;;  %v17351_v33 = vld [vmem:[#allocation5 + $0x75c] sm:$0xf0]  ;;  %v13765_v41 = vor.u32 %v17623_v40, %v13764_v25 }
 0x215   :  { %v17502_v39 = vld [vmem:[#allocation5 + $0xc1c] sm:$0xf]  ;;  %v12801_v61 = vor.u32 %v17374_v34, %v12798_v38  ;;  %5667 = vmatpush.bf16.msrb.mxu2 %v13889_v60  ;;  %v6752_v34 = vsub.f32 1.5, %v6751_v23  ;;  %v17447_v18 = vld [vmem:[#allocation5 + $0xa5c] sm:$0xf0] }
 0x216   :  { %v13310_v49 = vld [vmem:[#allocation5 + $0xc58] sm:$0xf0]  ;;  %v11972_v20 = vld [vmem:[#allocation5 + $0x1a0] sm:$0xf]  ;;  %v13061_v27 = vor.u32 %v17447_v18, %v13060_v17 }
 0x217   :  { %v17886_v43 = vld [vmem:[#allocation5 + $0x181c] sm:$0xf]  ;;  %v13313_v58 = vor.u32 %v17502_v39, %v13310_v49  ;;  %5642 = vmatpush.bf16.msra.mxu1 %v12801_v61  ;;  %v13188_v39 = vld [vmem:[#allocation5 + $0xb20] sm:$0xf] }
 0x218   :  { %v14846_v44 = vld [vmem:[#allocation5 + $0x1858] sm:$0xf0]  ;;  %v17479_v49 = vld [vmem:[#allocation5 + $0xb5c] sm:$0xf0] }
 0x219   :  { %v17774_v52 = vld [vmem:[#allocation5 + $0x149c] sm:$0xf]  ;;  %v14849_v21 = vor.u32 %v17886_v43, %v14846_v44  ;;  %5655 = vmatpush.bf16.msra.mxu3 %v13313_v58  ;;  %v6753_v43 = vmul.f32 %v19231_v47, %v6752_v34  ;;  %v13700_v44 = vld [vmem:[#allocation5 + $0xf20] sm:$0xf] }
 0x21a   :  { %v14398_v37 = vld [vmem:[#allocation5 + $0x14d8] sm:$0xf0]  ;;  %5643 = vmatmul.bf16.vlgmr.msra.gmra.mxu1 %v19045_v51  ;;  %v17335_v61 = vld [vmem:[#allocation5 + $0x6dc] sm:$0xf0]  ;;  %v13701_v58 = vor.u32 %v17607_v46, %v13700_v44  ;;  %v5436_v44 = vpop.f32.mrf.mxu0 }
 0x21b   :  { %v17630_v62 = vld [vmem:[#allocation5 + $0x101c] sm:$0xf]  ;;  %v14401_v15 = vor.u32 %v17774_v52, %v14398_v37  ;;  %5694 = vmatpush.bf16.msrb.mxu1 %v14849_v21  ;;  %v12677_v52 = vor.u32 %v17351_v33, %v12676_v54  ;;  %v13189_v37 = vor.u32 %v17479_v49, %v13188_v39  ;;  %v6757_v60 = vsel %vm6756_vm13, %v19231_v47, %v6753_v43  ;;  %v17191_v21 = vld [vmem:[#allocation5 + $0x25c] sm:$0xf0] }
 0x21c   :  { %v13822_v6 = vld [vmem:[#allocation5 + $0x1058] sm:$0xf0]  ;;  %5656 = vmatmul.bf16.vlgmr.msra.gmra.mxu3 %v19049_v57  ;;  %v6896_v4 = vrot.slane %v6757_v60, 5  ;;  %v12613_v47 = vor.u32 %v17335_v61, %v12612_v56  ;;  %v17175_v23 = vld [vmem:[#allocation5 + $0x1dc] sm:$0xf0] }
 0x21d   :  { %v17758_v19 = vld [vmem:[#allocation5 + $0x141c] sm:$0xf]  ;;  %v13825_v24 = vor.u32 %v17630_v62, %v13822_v6  ;;  %5700 = vmatpush.bf16.msrb.mxu3 %v12229_v14  ;;  %5680 = vmatpush.bf16.msra.mxu0 %v14401_v15  ;;  %v13124_v62 = vld [vmem:[#allocation5 + $0xaa0] sm:$0xf]  ;;  %v11973_v54 = vor.u32 %v17175_v23, %v11972_v20 }
 0x21e   :  { %v14334_v8 = vld [vmem:[#allocation5 + $0x1458] sm:$0xf0]  ;;  %v12036_v6 = vld [vmem:[#allocation5 + $0x220] sm:$0xf]  ;;  %v6911_v13 = vsel %vm6910_vm14, %v6895_v48, %v6896_v4  ;;  %v13125_v14 = vor.u32 %v17463_v1, %v13124_v62 }
 0x21f   :  { %v14337_v38 = vor.u32 %v17758_v19, %v14334_v8  ;;  %5668 = vmatpush.bf16.msrb.mxu2 %v13825_v24  ;;  %5713 = vmatpush.bf16.msra.mxu1 %v12741_v9  ;;  %v12548_v15 = vld [vmem:[#allocation5 + $0x620] sm:$0xf]  ;;  %v12037_v32 = vor.u32 %v17191_v21, %v12036_v6  ;;  %v19263_v19 = vsel %vm6912_vm15, %v19179_v22, %v6911_v13  ;;  %v5410_v22 = vpop.f32.mrf.mxu1 }
 0x220   :  { %v13637_v8 = vor.u32 %v17591_v12, %v13636_v11  ;;  %v13572_v24 = vld [vmem:[#allocation5 + $0xe20] sm:$0xf]  ;;  %v12549_v40 = vor.u32 %v17319_v16, %v12548_v15 }
 0x221   :  { %5701 = vmatpush.bf16.msrb.mxu3 %v12165_v36  ;;  %5681 = vmatpush.bf16.msra.mxu0 %v14337_v38  ;;  %v17575_v25 = vld [vmem:[#allocation5 + $0xe5c] sm:$0xf0]  ;;  %v5397_v38 = vpop.f32.mrf.mxu3 }
 0x222   :  { %5669 = vmatmul.bf16.vlgmr.msrb.gmra.mxu2 %v19061_v30  ;;  %v12484_v9 = vld [vmem:[#allocation5 + $0x5a0] sm:$0xf]  ;;  %v13573_v39 = vor.u32 %v17575_v25, %v13572_v24  ;;  %v5398_v0 = vadd.f32 %v5397_v38, %v19229_v28 }
 0x223   :  { %5726 = vmatpush.bf16.msra.mxu2 %v13253_v29  ;;  %5714 = vmatpush.bf16.msra.mxu1 %v12677_v52  ;;  %v5425_v29 = vpop.f32.mrf.mxu2  ;;  %v17303_v33 = vld [vmem:[#allocation5 + $0x5dc] sm:$0xf0] }
 0x224   :  { %5682 = vmatmul.bf16.vlgmr.msra.gmra.mxu0 %v19063_v35  ;;  %v12996_v34 = vld [vmem:[#allocation5 + $0x9a0] sm:$0xf]  ;;  %v12485_v46 = vor.u32 %v17303_v33, %v12484_v9 }
 0x225   :  { %5739 = vmatpush.bf16.msrb.mxu0 %v13765_v41  ;;  %5702 = vmatpush.bf16.msrb.mxu3 %v12101_v63  ;;  %v17431_v36 = vld [vmem:[#allocation5 + $0x9dc] sm:$0xf0] }
 0x226   :  { %v11908_v49 = vld [vmem:[#allocation5 + $0x120] sm:$0xf]  ;;  %v12997_v48 = vor.u32 %v17431_v36, %v12996_v34 }
 0x227   :  { %5727 = vmatpush.bf16.msra.mxu2 %v13189_v37  ;;  %5715 = vmatpush.bf16.msra.mxu1 %v12613_v47  ;;  %v17159_v41 = vld [vmem:[#allocation5 + $0x15c] sm:$0xf0]  ;;  %v5411_v37 = vadd.f32 %v5410_v22, %v5398_v0  ;;  %v5412_v20 = vpop.f32.mrf.mxu1 }
 0x228   :  { %v17559_v43 = vld [vmem:[#allocation5 + $0xddc] sm:$0xf0]  ;;  %v11909_v56 = vor.u32 %v17159_v41, %v11908_v49 }
 0x229   :  { %5740 = vmatpush.bf16.msrb.mxu0 %v13701_v58  ;;  %5703 = vmatpush.bf16.msrb.mxu3 %v12037_v32  ;;  %v12420_v52 = vld [vmem:[#allocation5 + $0x520] sm:$0xf]  ;;  %v13509_v62 = vor.u32 %v17559_v43, %v13508_v5  ;;  %v19269_v4 = vadd.f32 %v19255_v59, %v5411_v37  ;;  %v5399_v59 = vpop.f32.mrf.mxu3 }
 0x22a   :  { %v17287_v60 = vld [vmem:[#allocation5 + $0x55c] sm:$0xf0]  ;;  %14889 = vmatmul.msk.bf16.vlgmr.msrb.gmra.mxu1 %vm4968_vm0, %v19057_v45 }
 0x22b   :  { %5728 = vmatpush.bf16.msra.mxu2 %v13125_v14  ;;  %5716 = vmatpush.bf16.msra.mxu1 %v12549_v40  ;;  %v12932_v63 = vld [vmem:[#allocation5 + $0x920] sm:$0xf]  ;;  %v12421_v21 = vor.u32 %v17287_v60, %v12420_v52  ;;  %v5449_v32 = vpop.f32.mrf.mxu2  ;;  %v12230_v60 = vld [vmem:[#allocation5 + $0x3e0] sm:$0xf0] }
 0x22c   :  { %v17415_v61 = vld [vmem:[#allocation5 + $0x95c] sm:$0xf0]  ;;  %v19271_v23 = vadd.f32 %v5449_v32, %v5436_v44  ;;  %v12166_v32 = vld [vmem:[#allocation5 + $0x360] sm:$0xf0] }
 0x22d   :  { %5741 = vmatpush.bf16.msrb.mxu0 %v13637_v8  ;;  %5704 = vmatpush.bf16.msrb.mxu3 %v11973_v54  ;;  %v11844_v28 = vld [vmem:[#allocation5 + $0xa0] sm:$0xf]  ;;  %v12933_v11 = vor.u32 %v17415_v61, %v12932_v63 }
 0x22e   :  { %v17143_v1 = vld [vmem:[#allocation5 + $0xdc] sm:$0xf0] }
 0x22f   :  { %5729 = vmatpush.bf16.msra.mxu2 %v13061_v27  ;;  %v13444_v58 = vld [vmem:[#allocation5 + $0xd20] sm:$0xf]  ;;  %5717 = vmatpush.bf16.msra.mxu1 %v12485_v46  ;;  %v11845_v13 = vor.u32 %v17143_v1, %v11844_v28  ;;  %v5438_v27 = vpop.f32.mrf.mxu0  ;;  %v12742_v28 = vld [vmem:[#allocation5 + $0x7e0] sm:$0xf0] }
 0x230   :  { %v17543_v6 = vld [vmem:[#allocation5 + $0xd5c] sm:$0xf0] }
 0x231   :  { %5742 = vmatpush.bf16.msrb.mxu0 %v13573_v39  ;;  %v12356_v12 = vld [vmem:[#allocation5 + $0x4a0] sm:$0xf]  ;;  %5705 = vmatpush.bf16.msrb.mxu3 %v11909_v56  ;;  %v13445_v16 = vor.u32 %v17543_v6, %v13444_v58  ;;  %v17231_v56 = vld [vmem:[#allocation5 + $0x3a4] sm:$0xf] }
 0x232   :  { %v17271_v47 = vld [vmem:[#allocation5 + $0x4dc] sm:$0xf0] }
 0x233   :  { %5730 = vmatpush.bf16.msra.mxu2 %v12997_v48  ;;  %v12868_v14 = vld [vmem:[#allocation5 + $0x8a0] sm:$0xf]  ;;  %5718 = vmatpush.bf16.msra.mxu1 %v12421_v21  ;;  %v12357_v9 = vor.u32 %v17271_v47, %v12356_v12  ;;  %v5451_v1 = vpop.f32.mrf.mxu2  ;;  %v12233_v12 = vor.u32 %v17231_v56, %v12230_v60  ;;  %v5462_v60 = vpop.f32.mrf.mxu3 }
 0x234   :  { %v17399_v15 = vld [vmem:[#allocation5 + $0x8dc] sm:$0xf0]  ;;  %v5463_v1 = vadd.f32 %v5462_v60, %v19271_v23 }
 0x235   :  { %5743 = vmatpush.bf16.msrb.mxu0 %v13509_v62  ;;  %v11780_v17 = vld [vmem:[#allocation5 + $0x20] sm:$0xf]  ;;  %v12869_v29 = vor.u32 %v17399_v15, %v12868_v14  ;;  %5706 = vmatpush.bf16.msrb.mxu3 %v11845_v13  ;;  %v17359_v62 = vld [vmem:[#allocation5 + $0x7a4] sm:$0xf] }
 0x236   :  { %v17127_v18 = vld [vmem:[#allocation5 + $0x5c] sm:$0xf0]  ;;  %v12745_v14 = vor.u32 %v17359_v62, %v12742_v28  ;;  %v17215_v15 = vld [vmem:[#allocation5 + $0x324] sm:$0xf]  ;;  %v5475_v28 = vpop.f32.mrf.mxu1 }
 0x237   :  { %v14276_v8 = vld [vmem:[#allocation5 + $0x13a0] sm:$0xf]  ;;  %5731 = vmatpush.bf16.msra.mxu2 %v12933_v11  ;;  %v11781_v36 = vor.u32 %v17127_v18, %v11780_v17  ;;  %5719 = vmatpush.bf16.msra.mxu1 %v12357_v9  ;;  %v17343_v17 = vld [vmem:[#allocation5 + $0x724] sm:$0xf] }
 0x238   :  { %v17751_v24 = vld [vmem:[#allocation5 + $0x13dc] sm:$0xf0]  ;;  %v12678_v18 = vld [vmem:[#allocation5 + $0x760] sm:$0xf0] }
 0x239   :  { %v13380_v25 = vld [vmem:[#allocation5 + $0xca0] sm:$0xf]  ;;  %5744 = vmatpush.bf16.msrb.mxu0 %v13445_v16  ;;  %v14277_v49 = vor.u32 %v17751_v24, %v14276_v8  ;;  %5707 = vmatpush.bf16.msrb.mxu3 %v11781_v36  ;;  %v12169_v24 = vor.u32 %v17215_v15, %v12166_v32  ;;  %v12681_v27 = vor.u32 %v17343_v17, %v12678_v18  ;;  %v17199_v9 = vld [vmem:[#allocation5 + $0x2a4] sm:$0xf] }
 0x23a   :  { %v17527_v40 = vld [vmem:[#allocation5 + $0xcdc] sm:$0xf0]  ;;  %v5476_v15 = vadd.f32 %v5475_v28, %v5463_v1  ;;  %v13766_v1 = vld [vmem:[#allocation5 + $0xfe0] sm:$0xf0] }
 0x23b   :  { %v12292_v54 = vld [vmem:[#allocation5 + $0x420] sm:$0xf]  ;;  %v13381_v41 = vor.u32 %v17527_v40, %v13380_v25  ;;  %5732 = vmatpush.bf16.msra.mxu2 %v12869_v29  ;;  %v12102_v29 = vld [vmem:[#allocation5 + $0x2e0] sm:$0xf0] }
 0x23c   :  { %v17255_v33 = vld [vmem:[#allocation5 + $0x45c] sm:$0xf0]  ;;  %5708 = vmatmul.bf16.vlgmr.msrb.gmra.mxu3 %v19047_v55 }
 0x23d   :  { %v12804_v34 = vld [vmem:[#allocation5 + $0x820] sm:$0xf]  ;;  %v12293_v52 = vor.u32 %v17255_v33, %v12292_v54  ;;  %5752 = vmatpush.bf16.msra.mxu3 %v14277_v49  ;;  %5745 = vmatpush.bf16.msrb.mxu0 %v13381_v41  ;;  %v17327_v33 = vld [vmem:[#allocation5 + $0x6a4] sm:$0xf] }
 0x23e   :  { %v17383_v38 = vld [vmem:[#allocation5 + $0x85c] sm:$0xf0] }
 0x23f   :  { %v14788_v22 = vld [vmem:[#allocation5 + $0x17a0] sm:$0xf]  ;;  %v12805_v37 = vor.u32 %v17383_v38, %v12804_v34  ;;  %5720 = vmatpush.bf16.msra.mxu1 %v12293_v52  ;;  %v12614_v34 = vld [vmem:[#allocation5 + $0x6e0] sm:$0xf0] }
 0x240   :  { %v17879_v39 = vld [vmem:[#allocation5 + $0x17dc] sm:$0xf0] }
 0x241   :  { %v14212_v0 = vld [vmem:[#allocation5 + $0x1320] sm:$0xf]  ;;  %v14789_v63 = vor.u32 %v17879_v39, %v14788_v22  ;;  %5733 = vmatpush.bf16.msra.mxu2 %v12805_v37  ;;  %v12105_v39 = vor.u32 %v17199_v9, %v12102_v29  ;;  %v12422_v9 = vld [vmem:[#allocation5 + $0x560] sm:$0xf0] }
 0x242   :  { %v14852_v5 = vld [vmem:[#allocation5 + $0x1820] sm:$0xf]  ;;  %5721 = vmatmul.bf16.vlgmr.msra.gmra.mxu1 %v19053_v7 }
 0x243   :  { %v17895_v43 = vld [vmem:[#allocation5 + $0x185c] sm:$0xf0]  ;;  %5765 = vmatpush.bf16.msrb.mxu1 %v14789_v63 }
 0x244   :  { %v17735_v44 = vld [vmem:[#allocation5 + $0x135c] sm:$0xf0]  ;;  %v14853_v61 = vor.u32 %v17895_v43, %v14852_v5  ;;  %5734 = vmatmul.bf16.vlgmr.msra.gmra.mxu2 %v19045_v51  ;;  %v17183_v5 = vld [vmem:[#allocation5 + $0x224] sm:$0xf] }
 0x245   :  { %v13316_v46 = vld [vmem:[#allocation5 + $0xc20] sm:$0xf]  ;;  %v14213_v58 = vor.u32 %v17735_v44, %v14212_v0  ;;  %v12617_v0 = vor.u32 %v17327_v33, %v12614_v34  ;;  %v12038_v43 = vld [vmem:[#allocation5 + $0x260] sm:$0xf0] }
 0x246   :  { %v17511_v48 = vld [vmem:[#allocation5 + $0xc5c] sm:$0xf0]  ;;  %5785 = vmatpush.bf16.msrb.mxu2 %v14853_v61  ;;  %v12041_v63 = vor.u32 %v17183_v5, %v12038_v43  ;;  %v13254_v5 = vld [vmem:[#allocation5 + $0xbe0] sm:$0xf0] }
 0x247   :  { %v13317_v6 = vor.u32 %v17511_v48, %v13316_v46  ;;  %v14724_v21 = vld [vmem:[#allocation5 + $0x1720] sm:$0xf]  ;;  %5753 = vmatpush.bf16.msra.mxu3 %v14213_v58  ;;  %v17311_v46 = vld [vmem:[#allocation5 + $0x624] sm:$0xf] }
 0x248   :  { %v17863_v11 = vld [vmem:[#allocation5 + $0x175c] sm:$0xf0]  ;;  %v12550_v48 = vld [vmem:[#allocation5 + $0x660] sm:$0xf0] }
 0x249   :  { %v14148_v13 = vld [vmem:[#allocation5 + $0x12a0] sm:$0xf]  ;;  %v14725_v16 = vor.u32 %v17863_v11, %v14724_v21  ;;  %5746 = vmatpush.bf16.msrb.mxu0 %v13317_v6  ;;  %v12553_v58 = vor.u32 %v17311_v46, %v12550_v48  ;;  %v17167_v6 = vld [vmem:[#allocation5 + $0x1a4] sm:$0xf]  ;;  %v5488_v11 = vpop.f32.mrf.mxu0 }
 0x24a   :  { %v17719_v47 = vld [vmem:[#allocation5 + $0x12dc] sm:$0xf0]  ;;  %5804 = vmatpush.bf16.msra.mxu2 %v12745_v14  ;;  %v11974_v21 = vld [vmem:[#allocation5 + $0x1e0] sm:$0xf0] }
 0x24b   :  { %v14149_v8 = vor.u32 %v17719_v47, %v14148_v13  ;;  %v14660_v59 = vld [vmem:[#allocation5 + $0x16a0] sm:$0xf]  ;;  %5766 = vmatpush.bf16.msrb.mxu1 %v14725_v16  ;;  %v17295_v13 = vld [vmem:[#allocation5 + $0x5a4] sm:$0xf]  ;;  %v11977_v17 = vor.u32 %v17167_v6, %v11974_v21 }
 0x24c   :  { %v17847_v20 = vld [vmem:[#allocation5 + $0x16dc] sm:$0xf0]  ;;  %5747 = vmatmul.bf16.vlgmr.msrb.gmra.mxu0 %v19049_v57  ;;  %v12486_v47 = vld [vmem:[#allocation5 + $0x5e0] sm:$0xf0] }
 0x24d   :  { %5791 = vmatpush.bf16.msra.mxu0 %v12233_v12  ;;  %v14084_v25 = vld [vmem:[#allocation5 + $0x1220] sm:$0xf]  ;;  %v14661_v54 = vor.u32 %v17847_v20, %v14660_v59  ;;  %5754 = vmatpush.bf16.msra.mxu3 %v14149_v8  ;;  %v12489_v23 = vor.u32 %v17295_v13, %v12486_v47  ;;  %v5489_v59 = vadd.f32 %v5488_v11, %v5476_v15  ;;  %v17151_v20 = vld [vmem:[#allocation5 + $0x124] sm:$0xf] }
 0x24e   :  { %v17703_v40 = vld [vmem:[#allocation5 + $0x125c] sm:$0xf0]  ;;  %5805 = vmatpush.bf16.msra.mxu2 %v12681_v27  ;;  %v17279_v27 = vld [vmem:[#allocation5 + $0x524] sm:$0xf] }
 0x24f   :  { %v14085_v36 = vor.u32 %v17703_v40, %v14084_v25  ;;  %v14596_v38 = vld [vmem:[#allocation5 + $0x1620] sm:$0xf]  ;;  %5767 = vmatpush.bf16.msrb.mxu1 %v14661_v54  ;;  %v5501_v40 = vpop.f32.mrf.mxu2  ;;  %v17135_v43 = vld [vmem:[#allocation5 + $0xa4] sm:$0xf] }
 0x250   :  { %v17831_v22 = vld [vmem:[#allocation5 + $0x165c] sm:$0xf0]  ;;  %v5502_v54 = vadd.f32 %v5501_v40, %v5489_v59  ;;  %v13190_v6 = vld [vmem:[#allocation5 + $0xb60] sm:$0xf0] }
 0x251   :  { %5792 = vmatpush.bf16.msra.mxu0 %v12169_v24  ;;  %v14020_v49 = vld [vmem:[#allocation5 + $0x11a0] sm:$0xf]  ;;  %v14597_v44 = vor.u32 %v17831_v22, %v14596_v38  ;;  %5755 = vmatpush.bf16.msra.mxu3 %v14085_v36  ;;  %v11910_v24 = vld [vmem:[#allocation5 + $0x160] sm:$0xf0]  ;;  %v5464_v36 = vpop.f32.mrf.mxu3  ;;  %v5490_v46 = vpop.f32.mrf.mxu0 }
 0x252   :  { %v17687_v41 = vld [vmem:[#allocation5 + $0x11dc] sm:$0xf0]  ;;  %5806 = vmatpush.bf16.msra.mxu2 %v12617_v0  ;;  %v11913_v38 = vor.u32 %v17151_v20, %v11910_v24  ;;  %v12425_v0 = vor.u32 %v17279_v27, %v12422_v9  ;;  %v17119_v11 = vld [vmem:[#allocation5 + $0x24] sm:$0xf] }
 0x253   :  { %v14021_v52 = vor.u32 %v17687_v41, %v14020_v49  ;;  %v14532_v37 = vld [vmem:[#allocation5 + $0x15a0] sm:$0xf]  ;;  %5768 = vmatpush.bf16.msrb.mxu1 %v14597_v44  ;;  %v17487_v49 = vld [vmem:[#allocation5 + $0xba4] sm:$0xf]  ;;  %v5477_v41 = vpop.f32.mrf.mxu1 }
 0x254   :  { %v17815_v56 = vld [vmem:[#allocation5 + $0x15dc] sm:$0xf0]  ;;  %14890 = vmatmul.msk.bf16.vlgmr.msrb.gmra.mxu2 %vm4968_vm0, %v19057_v45  ;;  %v11846_v44 = vld [vmem:[#allocation5 + $0xe0] sm:$0xf0] }
 0x255   :  { %5793 = vmatpush.bf16.msra.mxu0 %v12105_v39  ;;  %v13956_v61 = vld [vmem:[#allocation5 + $0x1120] sm:$0xf]  ;;  %v14533_v12 = vor.u32 %v17815_v56, %v14532_v37  ;;  %5756 = vmatpush.bf16.msra.mxu3 %v14021_v52  ;;  %v17263_v52 = vld [vmem:[#allocation5 + $0x4a4] sm:$0xf]  ;;  %v11849_v28 = vor.u32 %v17135_v43, %v11846_v44 }
 0x256   :  { %v17671_v62 = vld [vmem:[#allocation5 + $0x115c] sm:$0xf0]  ;;  %5807 = vmatpush.bf16.msra.mxu2 %v12553_v58  ;;  %v12358_v37 = vld [vmem:[#allocation5 + $0x4e0] sm:$0xf0] }
 0x257   :  { %v13957_v14 = vor.u32 %v17671_v62, %v13956_v61  ;;  %v14468_v32 = vld [vmem:[#allocation5 + $0x1520] sm:$0xf]  ;;  %5769 = vmatpush.bf16.msrb.mxu1 %v14533_v12  ;;  %v17615_v61 = vld [vmem:[#allocation5 + $0xfa4] sm:$0xf]  ;;  %v13257_v62 = vor.u32 %v17487_v49, %v13254_v5  ;;  %v12361_v21 = vor.u32 %v17263_v52, %v12358_v37 }
 0x258   :  { %v17799_v16 = vld [vmem:[#allocation5 + $0x155c] sm:$0xf0]  ;;  %v17471_v58 = vld [vmem:[#allocation5 + $0xb24] sm:$0xf] }
 0x259   :  { %5794 = vmatpush.bf16.msra.mxu0 %v12041_v63  ;;  %v13892_v18 = vld [vmem:[#allocation5 + $0x10a0] sm:$0xf]  ;;  %v14469_v25 = vor.u32 %v17799_v16, %v14468_v32  ;;  %5757 = vmatpush.bf16.msra.mxu3 %v13957_v14  ;;  %v11782_v12 = vld [vmem:[#allocation5 + $0x60] sm:$0xf0]  ;;  %v5503_v16 = vpop.f32.mrf.mxu2  ;;  %v13193_v59 = vor.u32 %v17471_v58, %v13190_v6 }
 0x25a   :  { %v17655_v8 = vld [vmem:[#allocation5 + $0x10dc] sm:$0xf0]  ;;  %5808 = vmatpush.bf16.msra.mxu2 %v12489_v23  ;;  %v17247_v13 = vld [vmem:[#allocation5 + $0x424] sm:$0xf]  ;;  %v5514_v23 = vpop.f32.mrf.mxu3  ;;  %v11785_v20 = vor.u32 %v17119_v11, %v11782_v12 }
 0x25b   :  { %v13893_v29 = vor.u32 %v17655_v8, %v13892_v18  ;;  %v14404_v33 = vld [vmem:[#allocation5 + $0x14a0] sm:$0xf]  ;;  %5770 = vmatpush.bf16.msrb.mxu1 %v14469_v25  ;;  %v12294_v14 = vld [vmem:[#allocation5 + $0x460] sm:$0xf0]  ;;  %v19280_v40 = vadd.f32 %v5514_v23, %v5502_v54 }
 0x25c   :  { %v17783_v34 = vld [vmem:[#allocation5 + $0x14dc] sm:$0xf0]  ;;  %v17743_v15 = vld [vmem:[#allocation5 + $0x13a4] sm:$0xf]  ;;  %v12297_v27 = vor.u32 %v17247_v13, %v12294_v14  ;;  %v5527_v13 = vpop.f32.mrf.mxu1 }
 0x25d   :  { %5795 = vmatpush.bf16.msra.mxu0 %v11977_v17  ;;  %v13828_v22 = vld [vmem:[#allocation5 + $0x1020] sm:$0xf]  ;;  %v14405_v48 = vor.u32 %v17783_v34, %v14404_v33  ;;  %5758 = vmatpush.bf16.msra.mxu3 %v13893_v29  ;;  %v14278_v32 = vld [vmem:[#allocation5 + $0x13e0] sm:$0xf0]  ;;  %v13769_v17 = vor.u32 %v17615_v61, %v13766_v1 }
 0x25e   :  { %v17639_v39 = vld [vmem:[#allocation5 + $0x105c] sm:$0xf0]  ;;  %5809 = vmatpush.bf16.msra.mxu2 %v12425_v0  ;;  %v17871_v18 = vld [vmem:[#allocation5 + $0x17a4] sm:$0xf]  ;;  %v14281_v9 = vor.u32 %v17743_v15, %v14278_v32 }
 0x25f   :  { %v13829_v56 = vor.u32 %v17639_v39, %v13828_v22  ;;  %v14340_v60 = vld [vmem:[#allocation5 + $0x1420] sm:$0xf]  ;;  %5771 = vmatpush.bf16.msrb.mxu1 %v14405_v48  ;;  %v14790_v8 = vld [vmem:[#allocation5 + $0x17e0] sm:$0xf0] }
 0x260   :  { %v17767_v63 = vld [vmem:[#allocation5 + $0x145c] sm:$0xf0]  ;;  %v17599_v24 = vld [vmem:[#allocation5 + $0xf24] sm:$0xf]  ;;  %v14793_v34 = vor.u32 %v17871_v18, %v14790_v8  ;;  %v5553_v18 = vpop.f32.mrf.mxu0 }
 0x261   :  { %5796 = vmatpush.bf16.msra.mxu0 %v11913_v38  ;;  %v14341_v47 = vor.u32 %v17767_v63, %v14340_v60  ;;  %5759 = vmatpush.bf16.msra.mxu3 %v13829_v56  ;;  %v13702_v25 = vld [vmem:[#allocation5 + $0xf60] sm:$0xf0] }
 0x262   :  { %5810 = vmatpush.bf16.msra.mxu2 %v12361_v21  ;;  %v17455_v29 = vld [vmem:[#allocation5 + $0xaa4] sm:$0xf]  ;;  %v13705_v22 = vor.u32 %v17599_v24, %v13702_v25  ;;  %v5516_v61 = vpop.f32.mrf.mxu3 }
 0x263   :  { %v13126_v33 = vld [vmem:[#allocation5 + $0xae0] sm:$0xf0]  ;;  %5772 = vmatpush.bf16.msrb.mxu1 %v14341_v47  ;;  %v5566_v61 = vpop.f32.mrf.mxu2 }
 0x264   :  { %5760 = vmatmul.bf16.vlgmr.msra.gmra.mxu3 %v19061_v30  ;;  %v17727_v36 = vld [vmem:[#allocation5 + $0x1324] sm:$0xf]  ;;  %v13129_v41 = vor.u32 %v17455_v29, %v13126_v33 }
 0x265   :  { %5817 = vmatpush.bf16.msrb.mxu3 %v13257_v62  ;;  %5797 = vmatpush.bf16.msra.mxu0 %v11849_v28  ;;  %v14214_v38 = vld [vmem:[#allocation5 + $0x1360] sm:$0xf0] }
 0x266   :  { %v17855_v39 = vld [vmem:[#allocation5 + $0x1724] sm:$0xf]  ;;  %5811 = vmatpush.bf16.msra.mxu2 %v12297_v27  ;;  %v14217_v5 = vor.u32 %v17727_v36, %v14214_v38  ;;  %5773 = vmatmul.bf16.vlgmr.msrb.gmra.mxu1 %v19063_v35 }
 0x267   :  { %5830 = vmatpush.bf16.msra.mxu1 %v13769_v17  ;;  %v14726_v49 = vld [vmem:[#allocation5 + $0x1760] sm:$0xf0] }
 0x268   :  { %v17583_v54 = vld [vmem:[#allocation5 + $0xea4] sm:$0xf]  ;;  %v14729_v46 = vor.u32 %v17855_v39, %v14726_v49 }
 0x269   :  { %5818 = vmatpush.bf16.msrb.mxu3 %v13193_v59  ;;  %5798 = vmatpush.bf16.msra.mxu0 %v11785_v20  ;;  %v13638_v0 = vld [vmem:[#allocation5 + $0xee0] sm:$0xf0] }
 0x26a   :  { %v17439_v43 = vld [vmem:[#allocation5 + $0xa24] sm:$0xf]  ;;  %5856 = vmatpush.bf16.msrb.mxu2 %v14793_v34  ;;  %v13641_v37 = vor.u32 %v17583_v54, %v13638_v0  ;;  %v5529_v0 = vpop.f32.mrf.mxu1 }
 0x26b   :  { %v13062_v44 = vld [vmem:[#allocation5 + $0xa60] sm:$0xf0]  ;;  %5831 = vmatpush.bf16.msra.mxu1 %v13705_v22  ;;  %5812 = vmatmul.bf16.vlgmr.msra.gmra.mxu2 %v19053_v7  ;;  %v13772_v0 = vld [vmem:[#allocation5 + $0xfa8] sm:$0xf] }
 0x26c   :  { %v17711_v48 = vld [vmem:[#allocation5 + $0x12a4] sm:$0xf]  ;;  %5799 = vmatmul.bf16.vlgmr.msra.gmra.mxu0 %v19047_v55  ;;  %v13065_v63 = vor.u32 %v17439_v43, %v13062_v44 }
 0x26d   :  { %5843 = vmatpush.bf16.msrb.mxu0 %v14281_v9  ;;  %v14150_v52 = vld [vmem:[#allocation5 + $0x12e0] sm:$0xf0]  ;;  %5819 = vmatpush.bf16.msrb.mxu3 %v13129_v41 }
 0x26e   :  { %v17839_v56 = vld [vmem:[#allocation5 + $0x16a4] sm:$0xf]  ;;  %v14153_v1 = vor.u32 %v17711_v48, %v14150_v52  ;;  %5857 = vmatpush.bf16.msrb.mxu2 %v14729_v46  ;;  %v6452_v46 = vrot.slane %v19269_v4, 4  ;;  %v5540_v48 = vpop.f32.mrf.mxu3 }
 0x26f   :  { %v14662_v60 = vld [vmem:[#allocation5 + $0x16e0] sm:$0xf0]  ;;  %5832 = vmatpush.bf16.msra.mxu1 %v13641_v37 }
 0x270   :  { %v17567_v62 = vld [vmem:[#allocation5 + $0xe24] sm:$0xf]  ;;  %v14665_v21 = vor.u32 %v17839_v56, %v14662_v60  ;;  %v5541_v60 = vadd.f32 %v5540_v48, %v5527_v13  ;;  %v17224_v48 = vld [vmem:[#allocation5 + $0x364] sm:$0xf0] }
 0x271   :  { %v13574_v28 = vld [vmem:[#allocation5 + $0xe60] sm:$0xf0]  ;;  %5844 = vmatpush.bf16.msrb.mxu0 %v14217_v5  ;;  %5820 = vmatpush.bf16.msrb.mxu3 %v13065_v63  ;;  %v5555_v63 = vpop.f32.mrf.mxu0 }
 0x272   :  { %v17423_v58 = vld [vmem:[#allocation5 + $0x9a4] sm:$0xf]  ;;  %v13577_v47 = vor.u32 %v17567_v62, %v13574_v28  ;;  %5858 = vmatpush.bf16.msrb.mxu2 %v14665_v21 }
 0x273   :  { %v12998_v6 = vld [vmem:[#allocation5 + $0x9e0] sm:$0xf0] }
 0x274   :  { %v17695_v11 = vld [vmem:[#allocation5 + $0x1224] sm:$0xf]  ;;  %v13001_v32 = vor.u32 %v17423_v58, %v12998_v6  ;;  %5833 = vmatpush.bf16.msra.mxu1 %v13577_v47  ;;  %v5554_v47 = vadd.f32 %v5553_v18, %v5541_v60  ;;  %v6544_v18 = vmul.f32 %v19269_v4, %v19269_v4  ;;  %v5568_v60 = vpop.f32.mrf.mxu2 }
 0x275   :  { %v14086_v12 = vld [vmem:[#allocation5 + $0x1260] sm:$0xf0]  ;;  %5845 = vmatpush.bf16.msrb.mxu0 %v14153_v1  ;;  %v13580_v60 = vld [vmem:[#allocation5 + $0xe28] sm:$0xf] }
 0x276   :  { %v17823_v14 = vld [vmem:[#allocation5 + $0x1624] sm:$0xf]  ;;  %v14089_v8 = vor.u32 %v17695_v11, %v14086_v12  ;;  %5821 = vmatpush.bf16.msrb.mxu3 %v13001_v32 }
 0x277   :  { %v14598_v15 = vld [vmem:[#allocation5 + $0x1660] sm:$0xf0] }
 0x278   :  { %v17551_v16 = vld [vmem:[#allocation5 + $0xda4] sm:$0xf]  ;;  %v14601_v20 = vor.u32 %v17823_v14, %v14598_v15 }
 0x279   :  { %v13510_v17 = vld [vmem:[#allocation5 + $0xde0] sm:$0xf0]  ;;  %5846 = vmatpush.bf16.msrb.mxu0 %v14089_v8  ;;  %v12236_v8 = vld [vmem:[#allocation5 + $0x3a8] sm:$0xf] }
 0x27a   :  { %v17407_v23 = vld [vmem:[#allocation5 + $0x924] sm:$0xf]  ;;  %v13513_v27 = vor.u32 %v17551_v16, %v13510_v17  ;;  %5859 = vmatpush.bf16.msrb.mxu2 %v14601_v20 }
 0x27b   :  { %v12934_v59 = vld [vmem:[#allocation5 + $0x960] sm:$0xf0] }
 0x27c   :  { %v17679_v24 = vld [vmem:[#allocation5 + $0x11a4] sm:$0xf]  ;;  %v12937_v33 = vor.u32 %v17407_v23, %v12934_v59  ;;  %5834 = vmatpush.bf16.msra.mxu1 %v13513_v27  ;;  %v19287_v23 = vadd.f32 %v5566_v61, %v5554_v47  ;;  %v17368_v27 = vld [vmem:[#allocation5 + $0x7e4] sm:$0xf0]  ;;  %v6580_v61 = vrot.slane %v6544_v18, 4 }
 0x27d   :  { %v14022_v25 = vld [vmem:[#allocation5 + $0x11e0] sm:$0xf0]  ;;  %v17608_v47 = vld [vmem:[#allocation5 + $0xf64] sm:$0xf0] }
 0x27e   :  { %v17807_v9 = vld [vmem:[#allocation5 + $0x15a4] sm:$0xf]  ;;  %v14025_v38 = vor.u32 %v17679_v24, %v14022_v25  ;;  %5822 = vmatpush.bf16.msrb.mxu3 %v12937_v33  ;;  %v17240_v24 = vld [vmem:[#allocation5 + $0x3e4] sm:$0xf0] }
 0x27f   :  { %v14534_v29 = vld [vmem:[#allocation5 + $0x15e0] sm:$0xf0]  ;;  %v12748_v25 = vld [vmem:[#allocation5 + $0x7a8] sm:$0xf] }
 0x280   :  { %v17535_v34 = vld [vmem:[#allocation5 + $0xd24] sm:$0xf]  ;;  %v14537_v49 = vor.u32 %v17807_v9, %v14534_v29  ;;  %5847 = vmatpush.bf16.msrb.mxu0 %v14025_v38  ;;  %v6453_v9 = vadd.f32 %v6452_v46, %v19269_v4 }
 0x281   :  { %v13446_v36 = vld [vmem:[#allocation5 + $0xd60] sm:$0xf0] }
 0x282   :  { %v17391_v22 = vld [vmem:[#allocation5 + $0x8a4] sm:$0xf]  ;;  %v13449_v5 = vor.u32 %v17535_v34, %v13446_v36  ;;  %5860 = vmatpush.bf16.msrb.mxu2 %v14537_v49  ;;  %v17496_v49 = vld [vmem:[#allocation5 + $0xbe4] sm:$0xf0]  ;;  %v6454_v63 = vrot.slane %v6453_v9, 2 }
 0x283   :  { %v12870_v39 = vld [vmem:[#allocation5 + $0x8e0] sm:$0xf0] }
 0x284   :  { %v17663_v41 = vld [vmem:[#allocation5 + $0x1124] sm:$0xf]  ;;  %v12873_v52 = vor.u32 %v17391_v22, %v12870_v39  ;;  %5835 = vmatpush.bf16.msra.mxu1 %v13449_v5  ;;  %v13260_v39 = vld [vmem:[#allocation5 + $0xba8] sm:$0xf] }
 0x285   :  { %v13958_v54 = vld [vmem:[#allocation5 + $0x1160] sm:$0xf0]  ;;  %v17624_v5 = vld [vmem:[#allocation5 + $0xfe4] sm:$0xf0] }
 0x286   :  { %v17791_v43 = vld [vmem:[#allocation5 + $0x1524] sm:$0xf]  ;;  %v13961_v62 = vor.u32 %v17663_v41, %v13958_v54  ;;  %5823 = vmatpush.bf16.msrb.mxu3 %v12873_v52  ;;  %v12237_v41 = vor.u32 %v17240_v24, %v12236_v8  ;;  %v12749_v54 = vor.u32 %v17368_v27, %v12748_v25  ;;  %v12684_v52 = vld [vmem:[#allocation5 + $0x728] sm:$0xf] }
 0x287   :  { %v14470_v44 = vld [vmem:[#allocation5 + $0x1560] sm:$0xf0]  ;;  %v13132_v24 = vld [vmem:[#allocation5 + $0xaa8] sm:$0xf] }
 0x288   :  { %v17519_v37 = vld [vmem:[#allocation5 + $0xca4] sm:$0xf]  ;;  %v14473_v6 = vor.u32 %v17791_v43, %v14470_v44  ;;  %5848 = vmatpush.bf16.msrb.mxu0 %v13961_v62  ;;  %v12172_v43 = vld [vmem:[#allocation5 + $0x328] sm:$0xf]  ;;  %v5542_v44 = vpop.f32.mrf.mxu3 }
 0x289   :  { %v13382_v56 = vld [vmem:[#allocation5 + $0xce0] sm:$0xf0]  ;;  %v17464_v25 = vld [vmem:[#allocation5 + $0xae4] sm:$0xf0] }
 0x28a   :  { %v17375_v28 = vld [vmem:[#allocation5 + $0x824] sm:$0xf]  ;;  %v13385_v14 = vor.u32 %v17519_v37, %v13382_v56  ;;  %5861 = vmatpush.bf16.msrb.mxu2 %v14473_v6  ;;  %v17352_v37 = vld [vmem:[#allocation5 + $0x764] sm:$0xf0]  ;;  %v19292_v56 = vpop.f32.mrf.mxu0 }
 0x28b   :  { %v12806_v1 = vld [vmem:[#allocation5 + $0x860] sm:$0xf0]  ;;  %v17480_v6 = vld [vmem:[#allocation5 + $0xb64] sm:$0xf0] }
 0x28c   :  { %v17647_v58 = vld [vmem:[#allocation5 + $0x10a4] sm:$0xf]  ;;  %v12809_v16 = vor.u32 %v17375_v28, %v12806_v1  ;;  %5836 = vmatpush.bf16.msra.mxu1 %v13385_v14  ;;  %v13261_v28 = vor.u32 %v17496_v49, %v13260_v39  ;;  %v13773_v1 = vor.u32 %v17624_v5, %v13772_v0  ;;  %v12108_v14 = vld [vmem:[#allocation5 + $0x2a8] sm:$0xf]  ;;  %v6545_v0 = vmul.f32 %v19280_v40, %v19280_v40  ;;  %v5579_v5 = vpop.f32.mrf.mxu1 }
 0x28d   :  { %v13894_v21 = vld [vmem:[#allocation5 + $0x10e0] sm:$0xf0]  ;;  %v13068_v44 = vld [vmem:[#allocation5 + $0xa28] sm:$0xf] }
 0x28e   :  { %v17887_v11 = vld [vmem:[#allocation5 + $0x1824] sm:$0xf]  ;;  %v13897_v59 = vor.u32 %v17647_v58, %v13894_v21  ;;  %5824 = vmatpush.bf16.msrb.mxu3 %v12809_v16  ;;  %v13196_v58 = vld [vmem:[#allocation5 + $0xb28] sm:$0xf]  ;;  %v12173_v21 = vor.u32 %v17224_v48, %v12172_v43  ;;  %v5580_v48 = vadd.f32 %v5579_v5, %v19287_v23 }
 0x28f   :  { %v14854_v12 = vld [vmem:[#allocation5 + $0x1860] sm:$0xf0]  ;;  %v17336_v16 = vld [vmem:[#allocation5 + $0x6e4] sm:$0xf0]  ;;  %v13197_v8 = vor.u32 %v17480_v6, %v13196_v58 }
 0x290   :  { %v17775_v15 = vld [vmem:[#allocation5 + $0x14a4] sm:$0xf]  ;;  %v14857_v20 = vor.u32 %v17887_v11, %v14854_v12  ;;  %5849 = vmatpush.bf16.msrb.mxu0 %v13897_v59  ;;  %v12685_v11 = vor.u32 %v17352_v37, %v12684_v52  ;;  %v13708_v12 = vld [vmem:[#allocation5 + $0xf28] sm:$0xf]  ;;  %v6458_v59 = vrot.slane %v19280_v40, 4 }
 0x291   :  { %v14406_v32 = vld [vmem:[#allocation5 + $0x14e0] sm:$0xf0]  ;;  %5825 = vmatmul.bf16.vlgmr.msrb.gmra.mxu3 %v19045_v51  ;;  %v13004_v23 = vld [vmem:[#allocation5 + $0x9a8] sm:$0xf] }
 0x292   :  { %v17503_v13 = vld [vmem:[#allocation5 + $0xc24] sm:$0xf]  ;;  %v14409_v29 = vor.u32 %v17775_v15, %v14406_v32  ;;  %5876 = vmatpush.bf16.msra.mxu3 %v14857_v20  ;;  %v17208_v15 = vld [vmem:[#allocation5 + $0x2e4] sm:$0xf0]  ;;  %v13709_v20 = vor.u32 %v17608_v47, %v13708_v12  ;;  %v6586_v12 = vrot.slane %v6545_v0, 4 }
 0x293   :  { %v13318_v17 = vld [vmem:[#allocation5 + $0xc60] sm:$0xf0]  ;;  %v12620_v32 = vld [vmem:[#allocation5 + $0x6a8] sm:$0xf]  ;;  %v12109_v27 = vor.u32 %v17208_v15, %v12108_v14 }
 0x294   :  { %v17631_v33 = vld [vmem:[#allocation5 + $0x1024] sm:$0xf]  ;;  %v13321_v38 = vor.u32 %v17503_v13, %v13318_v17  ;;  %5862 = vmatpush.bf16.msrb.mxu2 %v14409_v29  ;;  %v6455_v13 = vadd.f32 %v6454_v63, %v6453_v9  ;;  %v6581_v17 = vadd.f32 %v6580_v61, %v6544_v18  ;;  %v12621_v29 = vor.u32 %v17336_v16, %v12620_v32  ;;  %v17192_v9 = vld [vmem:[#allocation5 + $0x264] sm:$0xf0] }
 0x295   :  { %v13830_v34 = vld [vmem:[#allocation5 + $0x1060] sm:$0xf0]  ;;  %v12556_v18 = vld [vmem:[#allocation5 + $0x628] sm:$0xf] }
 0x296   :  { %v17759_v36 = vld [vmem:[#allocation5 + $0x1424] sm:$0xf]  ;;  %v13833_v46 = vor.u32 %v17631_v33, %v13830_v34  ;;  %5837 = vmatpush.bf16.msra.mxu1 %v13321_v38  ;;  %5895 = vmatpush.bf16.msrb.mxu3 %v12749_v54  ;;  %v13644_v33 = vld [vmem:[#allocation5 + $0xea8] sm:$0xf]  ;;  %v6456_v39 = vrot.slane %v6455_v13, 1  ;;  %v6582_v49 = vrot.slane %v6581_v17, 2  ;;  %v6459_v54 = vadd.f32 %v6458_v59, %v19280_v40 }
 0x297   :  { %v14342_v22 = vld [vmem:[#allocation5 + $0x1460] sm:$0xf0]  ;;  %v17592_v34 = vld [vmem:[#allocation5 + $0xee4] sm:$0xf0] }
 0x298   :  { %v14345_v62 = vor.u32 %v17759_v36, %v14342_v22  ;;  %5850 = vmatpush.bf16.msrb.mxu0 %v13833_v46  ;;  %v12044_v36 = vld [vmem:[#allocation5 + $0x228] sm:$0xf]  ;;  %v5607_v22 = vpop.f32.mrf.mxu0  ;;  %v13645_v43 = vor.u32 %v17592_v34, %v13644_v33  ;;  %v6457_v58 = vadd.f32 %v6456_v39, %v6455_v13  ;;  %v19303_v6 = vadd.f32 %v6582_v49, %v6581_v17 }
 0x299   :  { %5838 = vmatmul.bf16.vlgmr.msra.gmra.mxu1 %v19049_v57  ;;  %v17320_v38 = vld [vmem:[#allocation5 + $0x664] sm:$0xf0]  ;;  %v12045_v52 = vor.u32 %v17192_v9, %v12044_v36  ;;  %v6587_v34 = vadd.f32 %v6586_v12, %v6545_v0 }
 0x29a   :  { %5882 = vmatpush.bf16.msrb.mxu1 %v12237_v41  ;;  %5863 = vmatpush.bf16.msrb.mxu2 %v14345_v62  ;;  %v13133_v41 = vor.u32 %v17464_v25, %v13132_v24  ;;  %v17448_v46 = vld [vmem:[#allocation5 + $0xa64] sm:$0xf0]  ;;  %v12557_v37 = vor.u32 %v17320_v38, %v12556_v18  ;;  %v19305_v17 = vmul.f32 0.125, %v6457_v58  ;;  %v6584_v25 = vrot.slane %v19303_v6, 1  ;;  %v5581_v18 = vpop.f32.mrf.mxu1 }
 0x29b   :  { %5896 = vmatpush.bf16.msrb.mxu3 %v12685_v11  ;;  %5851 = vmatmul.bf16.vlgmr.msrb.gmra.mxu0 %v19061_v30  ;;  %v17576_v63 = vld [vmem:[#allocation5 + $0xe64] sm:$0xf0]  ;;  %v6460_v11 = vrot.slane %v6459_v54, 2  ;;  %v6588_v58 = vrot.slane %v6587_v34, 2 }
 0x29c   :  { %5908 = vmatpush.bf16.msra.mxu0 %v13261_v28  ;;  %v11980_v61 = vld [vmem:[#allocation5 + $0x1a8] sm:$0xf]  ;;  %v13581_v47 = vor.u32 %v17576_v63, %v13580_v60  ;;  %v5618_v60 = vpop.f32.mrf.mxu2 }
 0x29d   :  { %5864 = vmatmul.bf16.vlgmr.msrb.gmra.mxu2 %v19063_v35  ;;  %v17176_v62 = vld [vmem:[#allocation5 + $0x1e4] sm:$0xf0]  ;;  %v6589_v18 = vadd.f32 %v6588_v58, %v6587_v34  ;;  %v6585_v34 = vadd.f32 %v6584_v25, %v19303_v6 }
 0x29e   :  { %5921 = vmatpush.bf16.msra.mxu2 %v13773_v1  ;;  %5883 = vmatpush.bf16.msrb.mxu1 %v12173_v21  ;;  %v12492_v28 = vld [vmem:[#allocation5 + $0x5a8] sm:$0xf]  ;;  %v13069_v21 = vor.u32 %v17448_v46, %v13068_v44  ;;  %v11981_v15 = vor.u32 %v17176_v62, %v11980_v61  ;;  %v19310_v46 = vadd.f32 %v6460_v11, %v6459_v54 }
 0x29f   :  { %5897 = vmatpush.bf16.msrb.mxu3 %v12621_v29  ;;  %v17304_v1 = vld [vmem:[#allocation5 + $0x5e4] sm:$0xf0] }
 0x2a0   :  { %5909 = vmatpush.bf16.msra.mxu0 %v13197_v8  ;;  %v17432_v14 = vld [vmem:[#allocation5 + $0x9e4] sm:$0xf0]  ;;  %v12493_v32 = vor.u32 %v17304_v1, %v12492_v28  ;;  %v5631_v33 = vpop.f32.mrf.mxu0 }
 0x2a1   :  { %v13516_v16 = vld [vmem:[#allocation5 + $0xda8] sm:$0xf]  ;;  %v13005_v29 = vor.u32 %v17432_v14, %v13004_v23  ;;  %14891 = vmatmul.msk.bf16.vlgmr.msra.gmra.mxu3 %vm4968_vm0, %v19057_v45  ;;  %v19315_v1 = vadd.f32 %v5631_v33, %v5618_v60 }
 0x2a2   :  { %5922 = vmatpush.bf16.msra.mxu2 %v13709_v20  ;;  %5884 = vmatpush.bf16.msrb.mxu1 %v12109_v27  ;;  %v17560_v8 = vld [vmem:[#allocation5 + $0xde4] sm:$0xf0]  ;;  %v5592_v27 = vpop.f32.mrf.mxu3 }
 0x2a3   :  { %5898 = vmatpush.bf16.msrb.mxu3 %v12557_v37  ;;  %v11916_v59 = vld [vmem:[#allocation5 + $0x128] sm:$0xf]  ;;  %v5593_v36 = vadd.f32 %v5592_v27, %v5580_v48  ;;  %v13517_v9 = vor.u32 %v17560_v8, %v13516_v16  ;;  %v6462_v16 = vrot.slane %v19310_v46, 1 }
 0x2a4   :  { %5910 = vmatpush.bf16.msra.mxu0 %v13133_v41  ;;  %v17160_v20 = vld [vmem:[#allocation5 + $0x164] sm:$0xf0] }
 0x2a5   :  { %v12428_v24 = vld [vmem:[#allocation5 + $0x528] sm:$0xf]  ;;  %v11917_v49 = vor.u32 %v17160_v20, %v11916_v59  ;;  %v19313_v0 = vadd.f32 %v19292_v56, %v5593_v36 }
 0x2a6   :  { %5923 = vmatpush.bf16.msra.mxu2 %v13645_v43  ;;  %5885 = vmatpush.bf16.msrb.mxu1 %v12045_v52  ;;  %v17288_v13 = vld [vmem:[#allocation5 + $0x564] sm:$0xf0] }
 0x2a7   :  { %v12940_v38 = vld [vmem:[#allocation5 + $0x928] sm:$0xf]  ;;  %5899 = vmatpush.bf16.msrb.mxu3 %v12493_v32  ;;  %v12429_v41 = vor.u32 %v17288_v13, %v12428_v24  ;;  %v6546_v54 = vmul.f32 %v19313_v0, %v19313_v0 }
 0x2a8   :  { %5911 = vmatpush.bf16.msra.mxu0 %v13069_v21  ;;  %v17416_v22 = vld [vmem:[#allocation5 + $0x964] sm:$0xf0]  ;;  %v6464_v21 = vrot.slane %v19313_v0, 4 }
 0x2a9   :  { %v13452_v39 = vld [vmem:[#allocation5 + $0xd28] sm:$0xf]  ;;  %v12941_v63 = vor.u32 %v17416_v22, %v12940_v38  ;;  %v6592_v59 = vrot.slane %v6546_v54, 4 }
 0x2aa   :  { %5924 = vmatpush.bf16.msra.mxu2 %v13581_v47  ;;  %5886 = vmatpush.bf16.msrb.mxu1 %v11981_v15  ;;  %v17544_v5 = vld [vmem:[#allocation5 + $0xd64] sm:$0xf0]  ;;  %v6465_v8 = vadd.f32 %v6464_v21, %v19313_v0  ;;  %v5594_v36 = vpop.f32.mrf.mxu3 }
 0x2ab   :  { %v11852_v43 = vld [vmem:[#allocation5 + $0xa8] sm:$0xf]  ;;  %v13453_v56 = vor.u32 %v17544_v5, %v13452_v39  ;;  %5900 = vmatpush.bf16.msrb.mxu3 %v12429_v41  ;;  %v6593_v22 = vadd.f32 %v6592_v59, %v6546_v54  ;;  %v5620_v36 = vpop.f32.mrf.mxu2  ;;  %v17216_v59 = vld [vmem:[#allocation5 + $0x32c] sm:$0xf] }
 0x2ac   :  { %v17144_v44 = vld [vmem:[#allocation5 + $0xe4] sm:$0xf0]  ;;  %5912 = vmatpush.bf16.msra.mxu0 %v13005_v29  ;;  %v6466_v38 = vrot.slane %v6465_v8, 2 }
 0x2ad   :  { %v12364_v48 = vld [vmem:[#allocation5 + $0x4a8] sm:$0xf]  ;;  %v11853_v47 = vor.u32 %v17144_v44, %v11852_v43  ;;  %v17232_v44 = vld [vmem:[#allocation5 + $0x3ac] sm:$0xf] }
 0x2ae   :  { %v17272_v52 = vld [vmem:[#allocation5 + $0x4e4] sm:$0xf0]  ;;  %5925 = vmatpush.bf16.msra.mxu2 %v13517_v9  ;;  %5887 = vmatpush.bf16.msrb.mxu1 %v11917_v49  ;;  %v5633_v9 = vpop.f32.mrf.mxu0 }
 0x2af   :  { %v12876_v37 = vld [vmem:[#allocation5 + $0x8a8] sm:$0xf]  ;;  %v12365_v23 = vor.u32 %v17272_v52, %v12364_v48 }
 0x2b0   :  { %v17400_v61 = vld [vmem:[#allocation5 + $0x8e4] sm:$0xf0]  ;;  %5913 = vmatpush.bf16.msra.mxu0 %v12941_v63  ;;  %v12238_v63 = vld [vmem:[#allocation5 + $0x3e8] sm:$0xf0] }
 0x2b1   :  { %v13388_v62 = vld [vmem:[#allocation5 + $0xca8] sm:$0xf]  ;;  %v12877_v13 = vor.u32 %v17400_v61, %v12876_v37  ;;  %5901 = vmatpush.bf16.msrb.mxu3 %v12365_v23 }
 0x2b2   :  { %v17528_v28 = vld [vmem:[#allocation5 + $0xce4] sm:$0xf0]  ;;  %5926 = vmatpush.bf16.msra.mxu2 %v13453_v56  ;;  %5888 = vmatpush.bf16.msrb.mxu1 %v11853_v47 }
 0x2b3   :  { %v11788_v11 = vld [vmem:[#allocation5 + $0x28] sm:$0xf]  ;;  %v13389_v39 = vor.u32 %v17528_v28, %v13388_v62  ;;  %v6467_v62 = vadd.f32 %v6466_v38, %v6465_v8  ;;  %v6594_v28 = vrot.slane %v6593_v22, 2  ;;  %v12174_v8 = vld [vmem:[#allocation5 + $0x368] sm:$0xf0] }
 0x2b4   :  { %v17128_v12 = vld [vmem:[#allocation5 + $0x64] sm:$0xf0]  ;;  %5914 = vmatpush.bf16.msra.mxu0 %v12877_v13  ;;  %v6656_v13 = vmul.f32 0.125, %v6585_v34 }
 0x2b5   :  { %v12300_v14 = vld [vmem:[#allocation5 + $0x428] sm:$0xf]  ;;  %v11789_v5 = vor.u32 %v17128_v12, %v11788_v11  ;;  %v6463_v11 = vadd.f32 %v6462_v16, %v19310_v46  ;;  %v6590_v12 = vrot.slane %v6589_v18, 1  ;;  %v6595_v46 = vadd.f32 %v6594_v28, %v6593_v22 }
 0x2b6   :  { %v17256_v15 = vld [vmem:[#allocation5 + $0x464] sm:$0xf0]  ;;  %5927 = vmatpush.bf16.msra.mxu2 %v13389_v39 }
 0x2b7   :  { %v14284_v32 = vld [vmem:[#allocation5 + $0x13a8] sm:$0xf]  ;;  %v12301_v43 = vor.u32 %v17256_v15, %v12300_v14  ;;  %5889 = vmatpush.bf16.msrb.mxu1 %v11789_v5  ;;  %v12241_v14 = vor.u32 %v17232_v44, %v12238_v63  ;;  %v17360_v15 = vld [vmem:[#allocation5 + $0x7ac] sm:$0xf]  ;;  %v19328_v9 = vmul.f32 0.125, %v6463_v11  ;;  %v6591_v38 = vadd.f32 %v6590_v12, %v6589_v18 }
 0x2b8   :  { %v17752_v20 = vld [vmem:[#allocation5 + $0x13e4] sm:$0xf0]  ;;  %v12686_v5 = vld [vmem:[#allocation5 + $0x768] sm:$0xf0]  ;;  %v6596_v63 = vrot.slane %v6595_v46, 1 }
 0x2b9   :  { %v14796_v24 = vld [vmem:[#allocation5 + $0x17a8] sm:$0xf]  ;;  %v14285_v37 = vor.u32 %v17752_v20, %v14284_v32  ;;  %5902 = vmatpush.bf16.msrb.mxu3 %v12301_v43  ;;  %v12750_v32 = vld [vmem:[#allocation5 + $0x7e8] sm:$0xf0]  ;;  %v6657_v36 = vmul.f32 0.125, %v6591_v38  ;;  %v6673_v28 = vmul.f32 %v19328_v9, %v19328_v9 }
 0x2ba   :  { %v17880_v27 = vld [vmem:[#allocation5 + $0x17e4] sm:$0xf0]  ;;  %v12753_v39 = vor.u32 %v17360_v15, %v12750_v32  ;;  %v17200_v43 = vld [vmem:[#allocation5 + $0x2ac] sm:$0xf]  ;;  %5890 = vmatmul.bf16.vlgmr.msrb.gmra.mxu1 %v19047_v55 }
 0x2bb   :  { %v12812_v29 = vld [vmem:[#allocation5 + $0x828] sm:$0xf]  ;;  %v14797_v60 = vor.u32 %v17880_v27, %v14796_v24  ;;  %5934 = vmatpush.bf16.msra.mxu1 %v14285_v37  ;;  %v6468_v27 = vrot.slane %v6467_v62, 1  ;;  %v17184_v11 = vld [vmem:[#allocation5 + $0x22c] sm:$0xf] }
 0x2bc   :  { %v17384_v33 = vld [vmem:[#allocation5 + $0x864] sm:$0xf0]  ;;  %5903 = vmatmul.bf16.vlgmr.msrb.gmra.mxu3 %v19053_v7 }
 0x2bd   :  { %v13324_v49 = vld [vmem:[#allocation5 + $0xc28] sm:$0xf]  ;;  %v12813_v58 = vor.u32 %v17384_v33, %v12812_v29  ;;  %5947 = vmatpush.bf16.msra.mxu3 %v14797_v60  ;;  %v6672_v33 = vmul.f32 %v19305_v17, %v19305_v17  ;;  %v6469_v60 = vadd.f32 %v6468_v27, %v6467_v62  ;;  %v17328_v62 = vld [vmem:[#allocation5 + $0x6ac] sm:$0xf] }
 0x2be   :  { %v17512_v41 = vld [vmem:[#allocation5 + $0xc64] sm:$0xf0] }
 0x2bf   :  { %v14860_v48 = vld [vmem:[#allocation5 + $0x1828] sm:$0xf]  ;;  %v13325_v47 = vor.u32 %v17512_v41, %v13324_v49  ;;  %5915 = vmatpush.bf16.msra.mxu0 %v12813_v58  ;;  %v12177_v49 = vor.u32 %v17216_v59, %v12174_v8  ;;  %v17344_v41 = vld [vmem:[#allocation5 + $0x72c] sm:$0xf]  ;;  %v5644_v58 = vpop.f32.mrf.mxu1  ;;  %v19337_v59 = vmul.f32 0.125, %v6469_v60 }
 0x2c0   :  { %v17896_v52 = vld [vmem:[#allocation5 + $0x1864] sm:$0xf0]  ;;  %v12689_v34 = vor.u32 %v17344_v41, %v12686_v5  ;;  %v5645_v12 = vadd.f32 %v5644_v58, %v19315_v1  ;;  %v17312_v1 = vld [vmem:[#allocation5 + $0x62c] sm:$0xf] }
 0x2c1   :  { %v14220_v61 = vld [vmem:[#allocation5 + $0x1328] sm:$0xf]  ;;  %v14861_v23 = vor.u32 %v17896_v52, %v14860_v48  ;;  %5928 = vmatpush.bf16.msra.mxu2 %v13325_v47  ;;  %v12110_v48 = vld [vmem:[#allocation5 + $0x2e8] sm:$0xf0]  ;;  %v6674_v5 = vmul.f32 %v19337_v59, %v19337_v59 }
 0x2c2   :  { %v17736_v21 = vld [vmem:[#allocation5 + $0x1364] sm:$0xf0]  ;;  %5916 = vmatmul.bf16.vlgmr.msra.gmra.mxu0 %v19045_v51  ;;  %v11918_v58 = vld [vmem:[#allocation5 + $0x168] sm:$0xf0] }
 0x2c3   :  { %v14732_v54 = vld [vmem:[#allocation5 + $0x1728] sm:$0xf]  ;;  %v14221_v6 = vor.u32 %v17736_v21, %v14220_v61  ;;  %5967 = vmatpush.bf16.msrb.mxu0 %v14861_v23  ;;  %v6688_v21 = vsub.f32 %v6656_v13, %v6672_v33  ;;  %v6689_v13 = vsub.f32 %v6657_v36, %v6673_v28  ;;  %v17152_v28 = vld [vmem:[#allocation5 + $0x12c] sm:$0xf] }
 0x2c4   :  { %v17864_v56 = vld [vmem:[#allocation5 + $0x1764] sm:$0xf0]  ;;  %5929 = vmatmul.bf16.vlgmr.msra.gmra.mxu2 %v19049_v57 }
 0x2c5   :  { %v14733_v25 = vor.u32 %v17864_v56, %v14732_v54  ;;  %v14156_v20 = vld [vmem:[#allocation5 + $0x12a8] sm:$0xf]  ;;  %5973 = vmatpush.bf16.msrb.mxu2 %v12241_v14  ;;  %5935 = vmatpush.bf16.msra.mxu1 %v14221_v6  ;;  %v12113_v54 = vor.u32 %v17200_v43, %v12110_v48  ;;  %v12622_v56 = vld [vmem:[#allocation5 + $0x6e8] sm:$0xf0]  ;;  %v6597_v6 = vadd.f32 %v6596_v63, %v6595_v46 }
 0x2c6   :  { %v17720_v24 = vld [vmem:[#allocation5 + $0x12e4] sm:$0xf0]  ;;  %v12046_v14 = vld [vmem:[#allocation5 + $0x268] sm:$0xf0] }
 0x2c7   :  { %v14668_v16 = vld [vmem:[#allocation5 + $0x16a8] sm:$0xf]  ;;  %5948 = vmatpush.bf16.msra.mxu3 %v14733_v25  ;;  %v14157_v22 = vor.u32 %v17720_v24, %v14156_v20  ;;  %5986 = vmatpush.bf16.msra.mxu0 %v12753_v39  ;;  %v19339_v20 = vadd.f32 1e-05, %v6688_v21  ;;  %v12625_v24 = vor.u32 %v17328_v62, %v12622_v56  ;;  %v12049_v27 = vor.u32 %v17184_v11, %v12046_v14  ;;  %v11982_v39 = vld [vmem:[#allocation5 + $0x1e8] sm:$0xf0]  ;;  %v5646_v63 = vpop.f32.mrf.mxu1  ;;  %v5670_v56 = vpop.f32.mrf.mxu2 }
 0x2c8   :  { %v17848_v29 = vld [vmem:[#allocation5 + $0x16e4] sm:$0xf0]  ;;  %v6658_v46 = vmul.f32 0.125, %v6597_v6  ;;  %v12494_v21 = vld [vmem:[#allocation5 + $0x5e8] sm:$0xf0] }
 0x2c9   :  { %v14669_v44 = vor.u32 %v17848_v29, %v14668_v16  ;;  %v14092_v52 = vld [vmem:[#allocation5 + $0x1228] sm:$0xf]  ;;  %5974 = vmatpush.bf16.msrb.mxu2 %v12177_v49  ;;  %5936 = vmatpush.bf16.msra.mxu1 %v14157_v22  ;;  %v12558_v16 = vld [vmem:[#allocation5 + $0x668] sm:$0xf0]  ;;  %18482 = vrsqrt.f32 %v19339_v20  ;;  %vm6764_vm2 = vweird.f32 %v19339_v20 }
 0x2ca   :  { %v17704_v37 = vld [vmem:[#allocation5 + $0x1264] sm:$0xf0]  ;;  %v17168_v29 = vld [vmem:[#allocation5 + $0x1ac] sm:$0xf]  ;;  %v12561_v48 = vor.u32 %v17312_v1, %v12558_v16  ;;  %v6690_v62 = vsub.f32 %v6658_v46, %v6674_v5 }
 0x2cb   :  { %v14604_v18 = vld [vmem:[#allocation5 + $0x1628] sm:$0xf]  ;;  %5949 = vmatpush.bf16.msra.mxu3 %v14669_v44  ;;  %v14093_v47 = vor.u32 %v17704_v37, %v14092_v52  ;;  %5987 = vmatpush.bf16.msra.mxu0 %v12689_v34  ;;  %v5657_v44 = vpop.f32.mrf.mxu3  ;;  %v5683_v52 = vpop.f32.mrf.mxu0  ;;  %v19344_v37 = vadd.f32 1e-05, %v6689_v13  ;;  %v12430_v6 = vld [vmem:[#allocation5 + $0x568] sm:$0xf0] }
 0x2cc   :  { %v17832_v61 = vld [vmem:[#allocation5 + $0x1664] sm:$0xf0]  ;;  %v5658_v60 = vadd.f32 %v5657_v44, %v5645_v12  ;;  %v13262_v46 = vld [vmem:[#allocation5 + $0xbe8] sm:$0xf0] }
 0x2cd   :  { %v14605_v23 = vor.u32 %v17832_v61, %v14604_v18  ;;  %v14028_v15 = vld [vmem:[#allocation5 + $0x11a8] sm:$0xf]  ;;  %5975 = vmatpush.bf16.msrb.mxu2 %v12113_v54  ;;  %5937 = vmatpush.bf16.msra.mxu1 %v14093_v47  ;;  %v11985_v18 = vor.u32 %v17168_v29, %v11982_v39  ;;  %v17296_v61 = vld [vmem:[#allocation5 + $0x5ac] sm:$0xf]  ;;  %18484 = vrsqrt.f32 %v19344_v37  ;;  %vm6774_vm5 = vweird.f32 %v19344_v37 }
 0x2ce   :  { %v17688_v32 = vld [vmem:[#allocation5 + $0x11e4] sm:$0xf0]  ;;  %v5671_v14 = vadd.f32 %v5670_v56, %v5658_v60  ;;  %v12497_v12 = vor.u32 %v17296_v61, %v12494_v21  ;;  %v17616_v5 = vld [vmem:[#allocation5 + $0xfac] sm:$0xf] }
 0x2cf   :  { %v14540_v25 = vld [vmem:[#allocation5 + $0x15a8] sm:$0xf]  ;;  %5950 = vmatpush.bf16.msra.mxu3 %v14605_v23  ;;  %v14029_v33 = vor.u32 %v17688_v32, %v14028_v15  ;;  %5988 = vmatpush.bf16.msra.mxu0 %v12625_v24  ;;  %v17280_v15 = vld [vmem:[#allocation5 + $0x52c] sm:$0xf]  ;;  %v11921_v32 = vor.u32 %v17152_v28, %v11918_v58  ;;  %v19346_v24 = vpop.eup %18482 }
 0x2d0   :  { %v17816_v8 = vld [vmem:[#allocation5 + $0x15e4] sm:$0xf0]  ;;  %v5684_v13 = vadd.f32 %v5683_v52, %v5671_v14  ;;  %v5696_v52 = vpop.f32.mrf.mxu1  ;;  %v17264_v63 = vld [vmem:[#allocation5 + $0x4ac] sm:$0xf]  ;;  %vm6765_vm1 = vweird.f32 %v19346_v24 }
 0x2d1   :  { %v14541_v38 = vor.u32 %v17816_v8, %v14540_v25  ;;  %v13964_v49 = vld [vmem:[#allocation5 + $0x1128] sm:$0xf]  ;;  %5976 = vmatpush.bf16.msrb.mxu2 %v12049_v27  ;;  %5938 = vmatpush.bf16.msra.mxu1 %v14029_v33  ;;  %v17136_v25 = vld [vmem:[#allocation5 + $0xac] sm:$0xf]  ;;  %vm19386_vm3 = vmor %vm6764_vm2, %vm6765_vm1  ;;  %vm6916_vm2 = vcmask 1046534  }
 0x2d2   :  { %v17672_v41 = vld [vmem:[#allocation5 + $0x1164] sm:$0xf0]  ;;  %v11854_v8 = vld [vmem:[#allocation5 + $0xe8] sm:$0xf0]  ;;  %14892 = vmatmul.msk.bf16.vlgmr.msrb.gmra.mxu0 %vm4968_vm0, %v19057_v45  ;;  %v19355_v61 = vadd.f32 %v5696_v52, %v5684_v13 }
 0x2d3   :  { %v14476_v43 = vld [vmem:[#allocation5 + $0x1528] sm:$0xf]  ;;  %5951 = vmatpush.bf16.msra.mxu3 %v14541_v38  ;;  %v13965_v36 = vor.u32 %v17672_v41, %v13964_v49  ;;  %5989 = vmatpush.bf16.msra.mxu0 %v12561_v48  ;;  %v19349_v38 = vadd.f32 1e-05, %v6690_v62  ;;  %v17488_v49 = vld [vmem:[#allocation5 + $0xbac] sm:$0xf]  ;;  %v12433_v41 = vor.u32 %v17280_v15, %v12430_v6  ;;  %v5685_v44 = vpop.f32.mrf.mxu0  ;;  %v6759_v48 = vmul.f32 %v19346_v24, %v19339_v20 }
 0x2d4   :  { %v17800_v22 = vld [vmem:[#allocation5 + $0x1564] sm:$0xf0]  ;;  %v11857_v60 = vor.u32 %v17136_v25, %v11854_v8  ;;  %v11790_v28 = vld [vmem:[#allocation5 + $0x68] sm:$0xf0]  ;;  %v13265_v58 = vor.u32 %v17488_v49, %v13262_v46  ;;  %v6470_v14 = vrot.slane %v19355_v61, 4 }
 0x2d5   :  { %v14477_v34 = vor.u32 %v17800_v22, %v14476_v43  ;;  %v13900_v54 = vld [vmem:[#allocation5 + $0x10a8] sm:$0xf]  ;;  %5977 = vmatpush.bf16.msrb.mxu2 %v11985_v18  ;;  %5939 = vmatpush.bf16.msra.mxu1 %v13965_v36  ;;  %v13774_v43 = vld [vmem:[#allocation5 + $0xfe8] sm:$0xf0]  ;;  %v5659_v22 = vpop.f32.mrf.mxu3  ;;  %18486 = vrsqrt.f32 %v19349_v38  ;;  %vm6784_vm9 = vweird.f32 %v19349_v38 }
 0x2d6   :  { %v17656_v11 = vld [vmem:[#allocation5 + $0x10e4] sm:$0xf0]  ;;  %v12366_v18 = vld [vmem:[#allocation5 + $0x4e8] sm:$0xf0] }
 0x2d7   :  { %v14412_v47 = vld [vmem:[#allocation5 + $0x14a8] sm:$0xf]  ;;  %5952 = vmatpush.bf16.msra.mxu3 %v14477_v34  ;;  %v13901_v27 = vor.u32 %v17656_v11, %v13900_v54  ;;  %5990 = vmatpush.bf16.msra.mxu0 %v12497_v12  ;;  %v17120_v34 = vld [vmem:[#allocation5 + $0x2c] sm:$0xf]  ;;  %v13777_v54 = vor.u32 %v17616_v5, %v13774_v43  ;;  %v6547_v12 = vmul.f32 %v19355_v61, %v19355_v61 }
 0x2d8   :  { %v17784_v23 = vld [vmem:[#allocation5 + $0x14e4] sm:$0xf0]  ;;  %v17744_v62 = vld [vmem:[#allocation5 + $0x13ac] sm:$0xf]  ;;  %v12369_v15 = vor.u32 %v17264_v63, %v12366_v18 }
 0x2d9   :  { %v14413_v1 = vor.u32 %v17784_v23, %v14412_v47  ;;  %v13836_v16 = vld [vmem:[#allocation5 + $0x1028] sm:$0xf]  ;;  %5978 = vmatpush.bf16.msrb.mxu2 %v11921_v32  ;;  %5940 = vmatpush.bf16.msra.mxu1 %v13901_v27  ;;  %v14286_v56 = vld [vmem:[#allocation5 + $0x13e8] sm:$0xf0]  ;;  %v5672_v47 = vpop.f32.mrf.mxu2  ;;  %v19358_v23 = vpop.eup %18484  ;;  %v6760_v27 = vmul.f32 %v19346_v24, %v6759_v48 }
 0x2da   :  { %v17640_v29 = vld [vmem:[#allocation5 + $0x1064] sm:$0xf0]  ;;  %v17472_v11 = vld [vmem:[#allocation5 + $0xb2c] sm:$0xf]  ;;  %v6769_v49 = vmul.f32 %v19358_v23, %v19344_v37  ;;  %vm6775_vm4 = vweird.f32 %v19358_v23 }
 0x2db   :  { %v14348_v33 = vld [vmem:[#allocation5 + $0x1428] sm:$0xf]  ;;  %5953 = vmatpush.bf16.msra.mxu3 %v14413_v1  ;;  %v13837_v21 = vor.u32 %v17640_v29, %v13836_v16  ;;  %5991 = vmatpush.bf16.msra.mxu0 %v12433_v41  ;;  %v13198_v32 = vld [vmem:[#allocation5 + $0xb68] sm:$0xf0]  ;;  %v6471_v1 = vadd.f32 %v6470_v14, %v19355_v61  ;;  %v6598_v16 = vrot.slane %v6547_v12, 4  ;;  %v11793_v29 = vor.u32 %v17120_v34, %v11790_v28  ;;  %v19367_v18 = vpop.eup %18486  ;;  %v5698_v28 = vpop.f32.mrf.mxu1  ;;  %vm19403_vm6 = vmor %vm6774_vm5, %vm6775_vm4 }
 0x2dc   :  { %v17768_v39 = vld [vmem:[#allocation5 + $0x1464] sm:$0xf0]  ;;  %v17600_v6 = vld [vmem:[#allocation5 + $0xf2c] sm:$0xf]  ;;  %v14289_v41 = vor.u32 %v17744_v62, %v14286_v56  ;;  %v13201_v46 = vor.u32 %v17472_v11, %v13198_v32  ;;  %v6770_v47 = vmul.f32 %v19358_v23, %v6769_v49  ;;  %vm6785_vm8 = vweird.f32 %v19367_v18 }
 0x2dd   :  { %v14349_v36 = vor.u32 %v17768_v39, %v14348_v33  ;;  %5979 = vmatpush.bf16.msrb.mxu2 %v11857_v60  ;;  %v13710_v25 = vld [vmem:[#allocation5 + $0xf68] sm:$0xf0]  ;;  %5941 = vmatpush.bf16.msra.mxu1 %v13837_v21  ;;  %v6472_v22 = vrot.slane %v6471_v1, 2  ;;  %v6599_v44 = vadd.f32 %v6598_v16, %v6547_v12  ;;  %vm19421_vm10 = vmor %vm6784_vm9, %vm6785_vm8  ;;  %vm6920_vm4 = vcmask 1043456  }
 0x2de   :  { %v17248_v8 = vld [vmem:[#allocation5 + $0x42c] sm:$0xf]  ;;  %v13713_v48 = vor.u32 %v17600_v6, %v13710_v25  ;;  %v6779_v6 = vmul.f32 %v19367_v18, %v19349_v38 }
 0x2df   :  { %v12302_v13 = vld [vmem:[#allocation5 + $0x468] sm:$0xf0]  ;;  %5954 = vmatpush.bf16.msra.mxu3 %v14349_v36  ;;  %5992 = vmatpush.bf16.msra.mxu0 %v12369_v15  ;;  %v6600_v62 = vrot.slane %v6599_v44, 2 }
 0x2e0   :  { %v17872_v33 = vld [vmem:[#allocation5 + $0x17ac] sm:$0xf]  ;;  %v12305_v52 = vor.u32 %v17248_v8, %v12302_v13  ;;  %5942 = vmatmul.bf16.vlgmr.msra.gmra.mxu1 %v19061_v30 }
 0x2e1   :  { %v14798_v39 = vld [vmem:[#allocation5 + $0x17e8] sm:$0xf0]  ;;  %5999 = vmatpush.bf16.msrb.mxu1 %v13265_v58  ;;  %v6761_v58 = vmul.f32 0.5, %v6760_v27  ;;  %5980 = vmatpush.bf16.msrb.mxu2 %v11793_v29  ;;  %v6601_v8 = vadd.f32 %v6600_v62, %v6599_v44 }
 0x2e2   :  { %v17728_v5 = vld [vmem:[#allocation5 + $0x132c] sm:$0xf]  ;;  %5955 = vmatmul.bf16.vlgmr.msra.gmra.mxu3 %v19063_v35  ;;  %v14801_v21 = vor.u32 %v17872_v33, %v14798_v39 }
 0x2e3   :  { %6012 = vmatpush.bf16.msrb.mxu3 %v13777_v54  ;;  %v14222_v43 = vld [vmem:[#allocation5 + $0x1368] sm:$0xf0]  ;;  %v6473_v54 = vadd.f32 %v6472_v22, %v6471_v1  ;;  %5993 = vmatpush.bf16.msra.mxu0 %v12305_v52  ;;  %v6762_v39 = vsub.f32 1.5, %v6761_v58 }
 0x2e4   :  { %v17456_v60 = vld [vmem:[#allocation5 + $0xaac] sm:$0xf]  ;;  %v14225_v14 = vor.u32 %v17728_v5, %v14222_v43  ;;  %5981 = vmatmul.bf16.vlgmr.msrb.gmra.mxu2 %v19047_v55  ;;  %v6771_v43 = vmul.f32 0.5, %v6770_v47 }
 0x2e5   :  { %v13134_v63 = vld [vmem:[#allocation5 + $0xae8] sm:$0xf0]  ;;  %6025 = vmatpush.bf16.msra.mxu2 %v14289_v41  ;;  %6000 = vmatpush.bf16.msrb.mxu1 %v13201_v46  ;;  %v6474_v25 = vrot.slane %v6473_v54, 1  ;;  %v6602_v41 = vrot.slane %v6601_v8, 1 }
 0x2e6   :  { %v17584_v36 = vld [vmem:[#allocation5 + $0xeac] sm:$0xf]  ;;  %v13137_v12 = vor.u32 %v17456_v60, %v13134_v63  ;;  %v6780_v60 = vmul.f32 %v19367_v18, %v6779_v6  ;;  %5994 = vmatmul.bf16.vlgmr.msra.gmra.mxu0 %v19053_v7 }
 0x2e7   :  { %v13646_v34 = vld [vmem:[#allocation5 + $0xee8] sm:$0xf0]  ;;  %6013 = vmatpush.bf16.msrb.mxu3 %v13713_v48  ;;  %6038 = vmatpush.bf16.msrb.mxu0 %v14801_v21  ;;  %v6475_v49 = vadd.f32 %v6474_v25, %v6473_v54  ;;  %v6603_v21 = vadd.f32 %v6602_v41, %v6601_v8  ;;  %v5722_v41 = vpop.f32.mrf.mxu1 }
 0x2e8   :  { %v17856_v56 = vld [vmem:[#allocation5 + $0x172c] sm:$0xf]  ;;  %v13649_v13 = vor.u32 %v17584_v36, %v13646_v34 }
 0x2e9   :  { %v14734_v11 = vld [vmem:[#allocation5 + $0x1768] sm:$0xf0]  ;;  %6026 = vmatpush.bf16.msra.mxu2 %v14225_v14  ;;  %6001 = vmatpush.bf16.msrb.mxu1 %v13137_v12  ;;  %v19376_v63 = vmul.f32 0.125, %v6475_v49 }
 0x2ea   :  { %v17712_v15 = vld [vmem:[#allocation5 + $0x12ac] sm:$0xf]  ;;  %v14737_v16 = vor.u32 %v17856_v56, %v14734_v11  ;;  %v6763_v56 = vmul.f32 %v19346_v24, %v6762_v39  ;;  %v6659_v11 = vmul.f32 0.125, %v6603_v21 }
 0x2eb   :  { %v14158_v32 = vld [vmem:[#allocation5 + $0x12e8] sm:$0xf0]  ;;  %6014 = vmatpush.bf16.msrb.mxu3 %v13649_v13  ;;  %v6675_v47 = vmul.f32 %v19376_v63, %v19376_v63  ;;  %v6781_v13 = vmul.f32 0.5, %v6780_v60 }
 0x2ec   :  { %v17440_v27 = vld [vmem:[#allocation5 + $0xa2c] sm:$0xf]  ;;  %v14161_v22 = vor.u32 %v17712_v15, %v14158_v32  ;;  %6039 = vmatpush.bf16.msrb.mxu0 %v14737_v16  ;;  %v6772_v15 = vsub.f32 1.5, %v6771_v43  ;;  %v6767_v20 = vsel %vm19386_vm3, %v19346_v24, %v6763_v56  ;;  %vm6918_vm3 = vcmask 1045508  }
 0x2ed   :  { %v13070_v1 = vld [vmem:[#allocation5 + $0xa68] sm:$0xf0] }
 0x2ee   :  { %v17568_v29 = vld [vmem:[#allocation5 + $0xe2c] sm:$0xf]  ;;  %v13073_v44 = vor.u32 %v17440_v27, %v13070_v1  ;;  %6027 = vmatpush.bf16.msra.mxu2 %v14161_v22  ;;  %v6691_v27 = vsub.f32 %v6659_v11, %v6675_v47 }
 0x2ef   :  { %v13582_v33 = vld [vmem:[#allocation5 + $0xe68] sm:$0xf0] }
 0x2f0   :  { %v17840_v46 = vld [vmem:[#allocation5 + $0x16ac] sm:$0xf]  ;;  %v13585_v36 = vor.u32 %v17568_v29, %v13582_v33  ;;  %6002 = vmatpush.bf16.msrb.mxu1 %v13073_v44  ;;  %v5748_v33 = vpop.f32.mrf.mxu0  ;;  %v19393_v43 = vadd.f32 1e-05, %v6691_v27 }
 0x2f1   :  { %v14670_v5 = vld [vmem:[#allocation5 + $0x16e8] sm:$0xf0] }
 0x2f2   :  { %v17696_v48 = vld [vmem:[#allocation5 + $0x122c] sm:$0xf]  ;;  %v14673_v58 = vor.u32 %v17840_v46, %v14670_v5  ;;  %6015 = vmatpush.bf16.msrb.mxu3 %v13585_v36  ;;  %18488 = vrsqrt.f32 %v19393_v43  ;;  %vm6794_vm13 = vweird.f32 %v19393_v43 }
 0x2f3   :  { %v14094_v52 = vld [vmem:[#allocation5 + $0x1268] sm:$0xf0] }
 0x2f4   :  { %v17424_v34 = vld [vmem:[#allocation5 + $0x9ac] sm:$0xf]  ;;  %v14097_v32 = vor.u32 %v17696_v48, %v14094_v52  ;;  %6040 = vmatpush.bf16.msrb.mxu0 %v14673_v58  ;;  %v6773_v48 = vmul.f32 %v19358_v23, %v6772_v15 }
 0x2f5   :  { %v13006_v28 = vld [vmem:[#allocation5 + $0x9e8] sm:$0xf0] }
 0x2f6   :  { %v17552_v54 = vld [vmem:[#allocation5 + $0xdac] sm:$0xf]  ;;  %v13009_v6 = vor.u32 %v17424_v34, %v13006_v28  ;;  %6028 = vmatpush.bf16.msra.mxu2 %v14097_v32  ;;  %v6782_v34 = vsub.f32 1.5, %v6781_v13  ;;  %v5735_v28 = vpop.f32.mrf.mxu2  ;;  %v6777_v37 = vsel %vm19403_vm6, %v19358_v23, %v6773_v48  ;;  %v5724_v48 = vpop.f32.mrf.mxu1 }
 0x2f7   :  { %v13518_v62 = vld [vmem:[#allocation5 + $0xde8] sm:$0xf0]  ;;  %v13204_v48 = vld [vmem:[#allocation5 + $0xb30] sm:$0xf] }
 0x2f8   :  { %v17824_v14 = vld [vmem:[#allocation5 + $0x162c] sm:$0xf]  ;;  %v13521_v1 = vor.u32 %v17552_v54, %v13518_v62  ;;  %6003 = vmatpush.bf16.msrb.mxu1 %v13009_v6  ;;  %v5709_v62 = vpop.f32.mrf.mxu3 }
 0x2f9   :  { %v14606_v12 = vld [vmem:[#allocation5 + $0x1668] sm:$0xf0]  ;;  %v5723_v15 = vadd.f32 %v5722_v41, %v5709_v62 }
 0x2fa   :  { %v17680_v25 = vld [vmem:[#allocation5 + $0x11ac] sm:$0xf]  ;;  %v14609_v49 = vor.u32 %v17824_v14, %v14606_v12  ;;  %6016 = vmatpush.bf16.msrb.mxu3 %v13521_v1  ;;  %v19399_v14 = vrot.slane %v6767_v20, 4  ;;  %v12244_v20 = vld [vmem:[#allocation5 + $0x3b0] sm:$0xf] }
 0x2fb   :  { %v14030_v8 = vld [vmem:[#allocation5 + $0x11e8] sm:$0xf0] }
 0x2fc   :  { %v17408_v16 = vld [vmem:[#allocation5 + $0x92c] sm:$0xf]  ;;  %v14033_v52 = vor.u32 %v17680_v25, %v14030_v8  ;;  %6041 = vmatpush.bf16.msrb.mxu0 %v14609_v49 }
 0x2fd   :  { %v12942_v29 = vld [vmem:[#allocation5 + $0x968] sm:$0xf0] }
 0x2fe   :  { %v17536_v46 = vld [vmem:[#allocation5 + $0xd2c] sm:$0xf]  ;;  %v12945_v60 = vor.u32 %v17408_v16, %v12942_v29  ;;  %6029 = vmatpush.bf16.msra.mxu2 %v14033_v52  ;;  %v6783_v16 = vmul.f32 %v19367_v18, %v6782_v34  ;;  %v5736_v29 = vadd.f32 %v5735_v28, %v5723_v15  ;;  %v19412_v52 = vpop.eup %18488  ;;  %v19417_v28 = vrot.slane %v6777_v37, 3  ;;  %v12756_v15 = vld [vmem:[#allocation5 + $0x7b0] sm:$0xf] }
 0x2ff   :  { %v13454_v5 = vld [vmem:[#allocation5 + $0xd68] sm:$0xf0]  ;;  %vm6795_vm12 = vweird.f32 %v19412_v52 }
 0x300   :  { %v17808_v22 = vld [vmem:[#allocation5 + $0x15ac] sm:$0xf]  ;;  %v13457_v24 = vor.u32 %v17536_v46, %v13454_v5  ;;  %6004 = vmatpush.bf16.msrb.mxu1 %v12945_v60  ;;  %v5750_v5 = vpop.f32.mrf.mxu0  ;;  %v19415_v60 = vadd.f32 %v5748_v33, %v5736_v29  ;;  %v6787_v62 = vsel %vm19421_vm10, %v19367_v18, %v6783_v16  ;;  %v17225_v29 = vld [vmem:[#allocation5 + $0x36c] sm:$0xf0]  ;;  %vm19448_vm1 = vmor %vm6794_vm13, %vm6795_vm12 }
 0x301   :  { %v14542_v44 = vld [vmem:[#allocation5 + $0x15e8] sm:$0xf0]  ;;  %v19431_v16 = vrot.slane %v6787_v62, 2  ;;  %v17625_v5 = vld [vmem:[#allocation5 + $0xfec] sm:$0xf0] }
 0x302   :  { %v17664_v21 = vld [vmem:[#allocation5 + $0x112c] sm:$0xf]  ;;  %v14545_v56 = vor.u32 %v17808_v22, %v14542_v44  ;;  %6017 = vmatpush.bf16.msrb.mxu3 %v13457_v24  ;;  %v17481_v24 = vld [vmem:[#allocation5 + $0xb6c] sm:$0xf0] }
 0x303   :  { %v13966_v36 = vld [vmem:[#allocation5 + $0x1168] sm:$0xf0]  ;;  %v17609_v62 = vld [vmem:[#allocation5 + $0xf6c] sm:$0xf0] }
 0x304   :  { %v17392_v58 = vld [vmem:[#allocation5 + $0x8ac] sm:$0xf]  ;;  %v13969_v25 = vor.u32 %v17664_v21, %v13966_v36  ;;  %6042 = vmatpush.bf16.msrb.mxu0 %v14545_v56  ;;  %v17241_v21 = vld [vmem:[#allocation5 + $0x3ec] sm:$0xf0]  ;;  %v5737_v56 = vpop.f32.mrf.mxu2 }
 0x305   :  { %v12878_v54 = vld [vmem:[#allocation5 + $0x8e8] sm:$0xf0]  ;;  %v12245_v37 = vor.u32 %v17241_v21, %v12244_v20 }
 0x306   :  { %v17520_v11 = vld [vmem:[#allocation5 + $0xcac] sm:$0xf]  ;;  %v12881_v8 = vor.u32 %v17392_v58, %v12878_v54  ;;  %v6789_v58 = vmul.f32 %v19412_v52, %v19393_v43  ;;  %6030 = vmatpush.bf16.msra.mxu2 %v13969_v25 }
 0x307   :  { %v13390_v47 = vld [vmem:[#allocation5 + $0xce8] sm:$0xf0] }
 0x308   :  { %v17792_v32 = vld [vmem:[#allocation5 + $0x152c] sm:$0xf]  ;;  %v13393_v39 = vor.u32 %v17520_v11, %v13390_v47  ;;  %6005 = vmatpush.bf16.msrb.mxu1 %v12881_v8  ;;  %v13268_v8 = vld [vmem:[#allocation5 + $0xbb0] sm:$0xf] }
 0x309   :  { %v14478_v6 = vld [vmem:[#allocation5 + $0x1568] sm:$0xf0] }
 0x30a   :  { %v17648_v13 = vld [vmem:[#allocation5 + $0x10ac] sm:$0xf]  ;;  %v14481_v23 = vor.u32 %v17792_v32, %v14478_v6  ;;  %6018 = vmatpush.bf16.msrb.mxu3 %v13393_v39  ;;  %v17369_v32 = vld [vmem:[#allocation5 + $0x7ec] sm:$0xf0]  ;;  %v6790_v6 = vmul.f32 %v19412_v52, %v6789_v58 }
 0x30b   :  { %v13902_v27 = vld [vmem:[#allocation5 + $0x10e8] sm:$0xf0]  ;;  %v12116_v58 = vld [vmem:[#allocation5 + $0x2b0] sm:$0xf] }
 0x30c   :  { %v17376_v1 = vld [vmem:[#allocation5 + $0x82c] sm:$0xf]  ;;  %v13905_v54 = vor.u32 %v17648_v13, %v13902_v27  ;;  %6043 = vmatpush.bf16.msrb.mxu0 %v14481_v23  ;;  %v17497_v13 = vld [vmem:[#allocation5 + $0xbec] sm:$0xf0]  ;;  %v6791_v39 = vmul.f32 0.5, %v6790_v6  ;;  %v12757_v23 = vor.u32 %v17369_v32, %v12756_v15  ;;  %v13205_v6 = vor.u32 %v17481_v24, %v13204_v48 }
 0x30d   :  { %v12814_v49 = vld [vmem:[#allocation5 + $0x868] sm:$0xf0]  ;;  %v12180_v27 = vld [vmem:[#allocation5 + $0x330] sm:$0xf]  ;;  %v13269_v20 = vor.u32 %v17497_v13, %v13268_v8  ;;  %v19456_v8 = vpop.f32.mrf.mxu2 }
 0x30e   :  { %v17504_v41 = vld [vmem:[#allocation5 + $0xc2c] sm:$0xf]  ;;  %v12817_v38 = vor.u32 %v17376_v1, %v12814_v49  ;;  %v5711_v1 = vpop.f32.mrf.mxu3  ;;  %6031 = vmatpush.bf16.msra.mxu2 %v13905_v54  ;;  %v6792_v21 = vsub.f32 1.5, %v6791_v39  ;;  %v17465_v15 = vld [vmem:[#allocation5 + $0xaec] sm:$0xf0] }
 0x30f   :  { %v13326_v46 = vld [vmem:[#allocation5 + $0xc68] sm:$0xf0]  ;;  %v19458_v13 = vld [vmem:[#allocation5 + $0xeb0] sm:$0xf] }
 0x310   :  { %v17888_v22 = vld [vmem:[#allocation5 + $0x182c] sm:$0xf]  ;;  %v13329_v11 = vor.u32 %v17504_v41, %v13326_v46  ;;  %6006 = vmatpush.bf16.msrb.mxu1 %v12817_v38  ;;  %v13780_v46 = vld [vmem:[#allocation5 + $0xfb0] sm:$0xf]  ;;  %v6793_v56 = vmul.f32 %v19412_v52, %v6792_v21  ;;  %v6915_v21 = vsel %vm6914_vm11, %v19399_v14, %v19417_v28 }
 0x311   :  { %v14862_v44 = vld [vmem:[#allocation5 + $0x1868] sm:$0xf0]  ;;  %v13781_v54 = vor.u32 %v17625_v5, %v13780_v46  ;;  %v17209_v38 = vld [vmem:[#allocation5 + $0x2ec] sm:$0xf0] }
 0x312   :  { %v17776_v36 = vld [vmem:[#allocation5 + $0x14ac] sm:$0xf]  ;;  %v14865_v12 = vor.u32 %v17888_v22, %v14862_v44  ;;  %6019 = vmatpush.bf16.msrb.mxu3 %v13329_v11  ;;  %v12692_v22 = vld [vmem:[#allocation5 + $0x730] sm:$0xf]  ;;  %v6797_v1 = vsel %vm19448_vm1, %v19412_v52, %v6793_v56 }
 0x313   :  { %v14414_v34 = vld [vmem:[#allocation5 + $0x14e8] sm:$0xf0]  ;;  %v17353_v44 = vld [vmem:[#allocation5 + $0x76c] sm:$0xf0]  ;;  %6007 = vmatmul.bf16.vlgmr.msrb.gmra.mxu1 %v19045_v51 }
 0x314   :  { %v17632_v33 = vld [vmem:[#allocation5 + $0x102c] sm:$0xf]  ;;  %v14417_v25 = vor.u32 %v17776_v36, %v14414_v34  ;;  %6058 = vmatpush.bf16.msra.mxu1 %v14865_v12  ;;  %v12181_v36 = vor.u32 %v17225_v29, %v12180_v27  ;;  %v19440_v11 = vld [vmem:[#allocation5 + $0x6b0] sm:$0xf]  ;;  %v12693_v43 = vor.u32 %v17353_v44, %v12692_v22  ;;  %v12117_v29 = vor.u32 %v17209_v38, %v12116_v58 }
 0x315   :  { %v13838_v47 = vld [vmem:[#allocation5 + $0x1068] sm:$0xf0]  ;;  %6020 = vmatmul.bf16.vlgmr.msrb.gmra.mxu3 %v19049_v57  ;;  %v19444_v12 = vld [vmem:[#allocation5 + $0xab0] sm:$0xf] }
 0x316   :  { %v17760_v49 = vld [vmem:[#allocation5 + $0x142c] sm:$0xf]  ;;  %v13841_v41 = vor.u32 %v17632_v33, %v13838_v47  ;;  %6064 = vmatpush.bf16.msra.mxu3 %v12245_v37  ;;  %6044 = vmatpush.bf16.msrb.mxu0 %v14417_v25  ;;  %v19435_v33 = vld [vmem:[#allocation5 + $0xf30] sm:$0xf]  ;;  %v13141_v38 = vor.u32 %v17465_v15, %v19444_v12 }
 0x317   :  { %v14350_v18 = vld [vmem:[#allocation5 + $0x1468] sm:$0xf0]  ;;  %v19442_v47 = vld [vmem:[#allocation5 + $0x6ec] sm:$0xf0]  ;;  %v13717_v52 = vor.u32 %v17609_v62, %v19435_v33 }
 0x318   :  { %v14353_v34 = vor.u32 %v17760_v49, %v14350_v18  ;;  %6032 = vmatpush.bf16.msra.mxu2 %v13841_v41  ;;  %6077 = vmatpush.bf16.msrb.mxu1 %v12757_v23  ;;  %v19452_v37 = vld [vmem:[#allocation5 + $0x230] sm:$0xf]  ;;  %v6700_v23 = vld [vmem:[#allocation7] sm:$0xff] }
 0x319   :  { %v19454_v25 = vld [vmem:[#allocation5 + $0x26c] sm:$0xf0] }
 0x31a   :  { %v19460_v27 = vld [vmem:[#allocation5 + $0xeec] sm:$0xf0]  ;;  %6065 = vmatpush.bf16.msra.mxu3 %v12181_v36  ;;  %6045 = vmatpush.bf16.msrb.mxu0 %v14353_v34  ;;  %v12053_v56 = vor.u32 %v19454_v25, %v19452_v37 }
 0x31b   :  { %v19465_v49 = vld [vmem:[#allocation5 + $0x630] sm:$0xf]  ;;  %6033 = vmatmul.bf16.vlgmr.msra.gmra.mxu2 %v19061_v30 }
 0x31c   :  { %6090 = vmatpush.bf16.msrb.mxu2 %v13269_v20  ;;  %v19467_v18 = vld [vmem:[#allocation5 + $0x66c] sm:$0xf0]  ;;  %v6900_v20 = vrot.slane %v6797_v1, 1  ;;  %6078 = vmatpush.bf16.msrb.mxu1 %v12693_v43 }
 0x31d   :  { %v19469_v39 = vld [vmem:[#allocation5 + $0xa30] sm:$0xf]  ;;  %6046 = vmatmul.bf16.vlgmr.msrb.gmra.mxu0 %v19063_v35  ;;  %v12565_v32 = vor.u32 %v19467_v18, %v19465_v49 }
 0x31e   :  { %v19471_v41 = vld [vmem:[#allocation5 + $0xa6c] sm:$0xf0]  ;;  %6103 = vmatpush.bf16.msra.mxu0 %v13781_v54  ;;  %v6917_v58 = vsel %vm6916_vm2, %v19431_v16, %v6900_v20  ;;  %v12629_v54 = vor.u32 %v19442_v47, %v19440_v11  ;;  %6066 = vmatpush.bf16.msra.mxu3 %v12117_v29  ;;  %v13653_v16 = vor.u32 %v19460_v27, %v19458_v13  ;;  %v5774_v27 = vpop.f32.mrf.mxu1  ;;  %v5789_v29 = vpop.f32.mrf.mxu2 }
 0x31f   :  { %v19473_v46 = vld [vmem:[#allocation5 + $0x1b0] sm:$0xf]  ;;  %v6919_v28 = vsel %vm6918_vm3, %v6915_v21, %v6917_v58  ;;  %v13077_v43 = vor.u32 %v19471_v41, %v19469_v39 }
 0x320   :  { %v19475_v5 = vld [vmem:[#allocation5 + $0x1ec] sm:$0xf0]  ;;  %6091 = vmatpush.bf16.msrb.mxu2 %v13205_v6  ;;  %v6921_v15 = vsel %vm6920_vm4, %v19263_v19, %v6919_v28  ;;  %6079 = vmatpush.bf16.msrb.mxu1 %v12629_v54 }
 0x321   :  { %v19479_v22 = vld [vmem:[#allocation5 + $0xe30] sm:$0xf]  ;;  %v11989_v6 = vor.u32 %v19475_v5, %v19473_v46  ;;  %v19525_v37 = vmul.f32 %v6921_v15, %v6700_v23  ;;  %v5800_v23 = vpop.f32.mrf.mxu0 }
 0x322   :  { %v19481_v44 = vld [vmem:[#allocation5 + $0xe6c] sm:$0xf0]  ;;  %6104 = vmatpush.bf16.msra.mxu0 %v13717_v52  ;;  %6067 = vmatpush.bf16.msra.mxu3 %v12053_v56 }
 0x323   :  { %v19483_v48 = vld [vmem:[#allocation5 + $0x5b0] sm:$0xf]  ;;  %v13589_v25 = vor.u32 %v19481_v44, %v19479_v22  ;;  %v6937_v39 = vperm.slane %v19525_v37, 0  ;;  %v6938_v41 = vperm.slane %v19525_v37, 1  ;;  %v6939_v46 = vperm.slane %v19525_v37, 2  ;;  %14893 = vmatmul.msk.bf16.vlgmr.msra.gmra.mxu1 %vm4968_vm0, %v19057_v45 }
 0x324   :  { %v19488_v36 = vld [vmem:[#allocation5 + $0x5ec] sm:$0xf0]  ;;  %6092 = vmatpush.bf16.msrb.mxu2 %v13141_v38  ;;  %v6940_v5 = vperm.slane %v19525_v37, 3  ;;  %v6941_v20 = vperm.slane %v19525_v37, 4  ;;  %v6942_v52 = vperm.slane %v19525_v37, 5  ;;  %v6943_v22 = vperm.slane %v19525_v37, 6  ;;  %6080 = vmatpush.bf16.msrb.mxu1 %v12565_v32 }
 0x325   :  { %v19490_v34 = vld [vmem:[#allocation5 + $0x9b0] sm:$0xf]  ;;  %v12501_v13 = vor.u32 %v19488_v36, %v19483_v48  ;;  %v6944_v44 = vperm.slane %v19525_v37, 7  ;;  %v5761_v48 = vpop.f32.mrf.mxu3  ;;  %v6969_v21 = vmul.f32 %v6937_v39, %v19107_v50  ;;  %v6970_v36 = vmul.f32 %v6938_v41, %v19128_v53 }
 0x326   :  { %v19492_v24 = vld [vmem:[#allocation5 + $0x9ec] sm:$0xf0]  ;;  %6105 = vmatpush.bf16.msra.mxu0 %v13653_v16  ;;  %v6973_v58 = vmul.f32 %v6941_v20, %v19305_v17  ;;  %v6974_v50 = vmul.f32 %v6942_v52, %v19328_v9  ;;  %v6975_v53 = vmul.f32 %v6943_v22, %v19337_v59  ;;  %6068 = vmatpush.bf16.msra.mxu3 %v11989_v6 }
 0x327   :  { %v19499_v33 = vld [vmem:[#allocation5 + $0x130] sm:$0xf]  ;;  %v13013_v19 = vor.u32 %v19492_v24, %v19490_v34  ;;  %v6971_v34 = vmul.f32 %v6939_v46, %v19198_v2  ;;  %v6972_v24 = vmul.f32 %v6940_v5, %v19220_v26  ;;  %v6976_v54 = vmul.f32 %v6944_v44, %v19376_v63 }
 0x328   :  { %v19501_v62 = vld [vmem:[#allocation5 + $0x16c] sm:$0xf0]  ;;  %v19570_v56 = vmul.f32 %v6944_v44, %v19355_v61  ;;  %6093 = vmatpush.bf16.msrb.mxu2 %v13077_v43  ;;  %v7004_v9 = vrot.slane %v6973_v58, 4  ;;  %v7005_v16 = vrot.slane %v6974_v50, 3  ;;  %v7006_v15 = vrot.slane %v6975_v53, 2  ;;  %6081 = vmatpush.bf16.msrb.mxu1 %v12501_v13  ;;  %v5813_v53 = vpop.f32.mrf.mxu2 }
 0x329   :  { %v19503_v14 = vld [vmem:[#allocation5 + $0xdb0] sm:$0xf]  ;;  %v11925_v1 = vor.u32 %v19501_v62, %v19499_v33  ;;  %v7001_v62 = vrot.slane %v6970_v36, 7  ;;  %v7002_v26 = vrot.slane %v6971_v34, 6  ;;  %v7003_v28 = vrot.slane %v6972_v24, 5 }
 0x32a   :  { %v19511_v11 = vld [vmem:[#allocation5 + $0xdec] sm:$0xf0]  ;;  %v7007_v29 = vrot.slane %v6976_v54, 1  ;;  %6106 = vmatpush.bf16.msra.mxu0 %v13589_v25  ;;  %v5762_v32 = vadd.f32 %v5761_v48, %v19415_v60  ;;  %v7018_v34 = vsel %vm6914_vm11, %v7004_v9, %v7005_v16  ;;  %v5776_v25 = vpop.f32.mrf.mxu1 }
 0x32b   :  { %v19513_v47 = vld [vmem:[#allocation5 + $0x530] sm:$0xf]  ;;  %v13525_v49 = vor.u32 %v19511_v11, %v19503_v14  ;;  %v7015_v59 = vsel %vm6908_vm7, %v6969_v21, %v7001_v62  ;;  %v7016_v63 = vsel %vm6910_vm14, %v7002_v26, %v7003_v28  ;;  %6069 = vmatpush.bf16.msra.mxu3 %v11925_v1  ;;  %v5802_v62 = vpop.f32.mrf.mxu0 }
 0x32c   :  { %v19515_v12 = vld [vmem:[#allocation5 + $0x56c] sm:$0xf0]  ;;  %v7017_v6 = vsel %vm6912_vm15, %v7015_v59, %v7016_v63  ;;  %v7019_v24 = vsel %vm6916_vm2, %v7006_v15, %v7007_v29  ;;  %v5775_v54 = vadd.f32 %v5774_v27, %v5762_v32  ;;  %6094 = vmatpush.bf16.msrb.mxu2 %v13013_v19 }
 0x32d   :  { %v12437_v18 = vor.u32 %v19515_v12, %v19513_v47  ;;  %v12948_v2 = vld [vmem:[#allocation5 + $0x930] sm:$0xf]  ;;  %v7020_v21 = vsel %vm6918_vm3, %v7018_v34, %v7019_v24  ;;  %v5763_v9 = vpop.f32.mrf.mxu3  ;;  %v7033_v47 = vmul.f32 %v6937_v39, %v19092_v31  ;;  %v19602_v12 = vmul.f32 %v6938_v41, %v19113_v42 }
 0x32e   :  { %v17417_v38 = vld [vmem:[#allocation5 + $0x96c] sm:$0xf0]  ;;  %v7021_v26 = vsel %vm6920_vm4, %v7017_v6, %v7020_v21  ;;  %6107 = vmatpush.bf16.msra.mxu0 %v13525_v49  ;;  %v19590_v19 = vadd.f32 %v19456_v8, %v5775_v54  ;;  %v12246_v21 = vld [vmem:[#allocation5 + $0x3f0] sm:$0xf0]  ;;  %v19610_v31 = vmul.f32 %v6939_v46, %v19185_v3  ;;  %v19615_v42 = vmul.f32 %v6940_v5, %v19206_v10 }
 0x32f   :  { %v11860_v33 = vld [vmem:[#allocation5 + $0xb0] sm:$0xf]  ;;  %v12949_v36 = vor.u32 %v17417_v38, %v12948_v2  ;;  %v19581_v38 = vadd.f32 %v5813_v53, %v5800_v23  ;;  %6082 = vmatpush.bf16.msrb.mxu1 %v12437_v18  ;;  %v17233_v53 = vld [vmem:[#allocation5 + $0x3b4] sm:$0xf] }
 0x330   :  { %v17145_v17 = vld [vmem:[#allocation5 + $0xec] sm:$0xf0]  ;;  %v5815_v54 = vpop.f32.mrf.mxu2  ;;  %v6476_v3 = vrot.slane %v19590_v19, 4  ;;  %v6548_v46 = vmul.f32 %v19590_v19, %v19590_v19  ;;  %v12249_v10 = vor.u32 %v17233_v53, %v12246_v21 }
 0x331   :  { %v13460_v61 = vld [vmem:[#allocation5 + $0xd30] sm:$0xf]  ;;  %v11861_v58 = vor.u32 %v17145_v17, %v11860_v33  ;;  %6095 = vmatpush.bf16.msrb.mxu2 %v12949_v36 }
 0x332   :  { %v17545_v44 = vld [vmem:[#allocation5 + $0xd6c] sm:$0xf0] }
 0x333   :  { %v6933_v43 = vld [vmem:[#allocation8] sm:$0xff]  ;;  %v13461_v13 = vor.u32 %v17545_v44, %v13460_v61  ;;  %6070 = vmatpush.bf16.msra.mxu3 %v11861_v58 }
 0x334   :  { %v12372_v50 = vld [vmem:[#allocation5 + $0x4b0] sm:$0xf]  ;;  %v19587_v27 = vsub.f32 %v6933_v43, %v7021_v26 }
 0x335   :  { %v17273_v60 = vld [vmem:[#allocation5 + $0x4ec] sm:$0xf0]  ;;  %6108 = vmatpush.bf16.msra.mxu0 %v13461_v13 }
 0x336   :  { %v12884_v48 = vld [vmem:[#allocation5 + $0x8b0] sm:$0xf]  ;;  %v12373_v15 = vor.u32 %v17273_v60, %v12372_v50  ;;  %v7058_v29 = vperm.slane %v19587_v27, 7 }
 0x337   :  { %v17401_v2 = vld [vmem:[#allocation5 + $0x8ec] sm:$0xf0] }
 0x338   :  { %v11796_v33 = vld [vmem:[#allocation5 + $0x30] sm:$0xf]  ;;  %v12885_v59 = vor.u32 %v17401_v2, %v12884_v48  ;;  %v19605_v18 = vadd.f32 %v7058_v29, %v19570_v56  ;;  %6083 = vmatpush.bf16.msrb.mxu1 %v12373_v15  ;;  %v17361_v56 = vld [vmem:[#allocation5 + $0x7b4] sm:$0xf]  ;;  %v6477_v29 = vadd.f32 %v6476_v3, %v19590_v19 }
 0x339   :  { %v17129_v28 = vld [vmem:[#allocation5 + $0x6c] sm:$0xf0]  ;;  %v12758_v2 = vld [vmem:[#allocation5 + $0x7f0] sm:$0xf0] }
 0x33a   :  { %v14292_v17 = vld [vmem:[#allocation5 + $0x13b0] sm:$0xf]  ;;  %v11797_v63 = vor.u32 %v17129_v28, %v11796_v33  ;;  %6096 = vmatpush.bf16.msrb.mxu2 %v12885_v59  ;;  %v17217_v28 = vld [vmem:[#allocation5 + $0x334] sm:$0xf]  ;;  %v12761_v9 = vor.u32 %v17361_v56, %v12758_v2  ;;  %v6604_v59 = vrot.slane %v6548_v46, 4  ;;  %v6478_v56 = vrot.slane %v6477_v29, 2 }
 0x33b   :  { %v17753_v1 = vld [vmem:[#allocation5 + $0x13ec] sm:$0xf0]  ;;  %v17313_v3 = vld [vmem:[#allocation5 + $0x634] sm:$0xf] }
 0x33c   :  { %v13396_v23 = vld [vmem:[#allocation5 + $0xcb0] sm:$0xf]  ;;  %v14293_v61 = vor.u32 %v17753_v1, %v14292_v17  ;;  %6071 = vmatpush.bf16.msra.mxu3 %v11797_v63  ;;  %v12182_v17 = vld [vmem:[#allocation5 + $0x370] sm:$0xf0] }
 0x33d   :  { %v17529_v16 = vld [vmem:[#allocation5 + $0xcec] sm:$0xf0]  ;;  %v12185_v63 = vor.u32 %v17217_v28, %v12182_v17  ;;  %v5839_v17 = vpop.f32.mrf.mxu1 }
 0x33e   :  { %v12308_v14 = vld [vmem:[#allocation5 + $0x430] sm:$0xf]  ;;  %v13397_v44 = vor.u32 %v17529_v16, %v13396_v23  ;;  %v17345_v23 = vld [vmem:[#allocation5 + $0x734] sm:$0xf]  ;;  %v7051_v16 = vperm.slane %v19587_v27, 0 }
 0x33f   :  { %v17257_v11 = vld [vmem:[#allocation5 + $0x46c] sm:$0xf0]  ;;  %6072 = vmatmul.bf16.vlgmr.msra.gmra.mxu3 %v19047_v55 }
 0x340   :  { %v12820_v49 = vld [vmem:[#allocation5 + $0x830] sm:$0xf]  ;;  %v12309_v50 = vor.u32 %v17257_v11, %v12308_v14  ;;  %6116 = vmatpush.bf16.msrb.mxu3 %v14293_v61  ;;  %6109 = vmatpush.bf16.msra.mxu0 %v13397_v44  ;;  %v12694_v14 = vld [vmem:[#allocation5 + $0x770] sm:$0xf0] }
 0x341   :  { %v17385_v32 = vld [vmem:[#allocation5 + $0x86c] sm:$0xf0]  ;;  %v17201_v61 = vld [vmem:[#allocation5 + $0x2b4] sm:$0xf] }
 0x342   :  { %v14804_v8 = vld [vmem:[#allocation5 + $0x17b0] sm:$0xf]  ;;  %v12821_v39 = vor.u32 %v17385_v32, %v12820_v49  ;;  %6084 = vmatpush.bf16.msrb.mxu1 %v12309_v50  ;;  %v12118_v44 = vld [vmem:[#allocation5 + $0x2f0] sm:$0xf0] }
 0x343   :  { %v17881_v43 = vld [vmem:[#allocation5 + $0x17ec] sm:$0xf0]  ;;  %v12630_v50 = vld [vmem:[#allocation5 + $0x6f0] sm:$0xf0] }
 0x344   :  { %v14228_v6 = vld [vmem:[#allocation5 + $0x1330] sm:$0xf]  ;;  %v14805_v41 = vor.u32 %v17881_v43, %v14804_v8  ;;  %6097 = vmatpush.bf16.msrb.mxu2 %v12821_v39  ;;  %v19625_v43 = vadd.f32 %v7051_v16, %v7033_v47  ;;  %v6479_v16 = vadd.f32 %v6478_v56, %v6477_v29  ;;  %v17297_v29 = vld [vmem:[#allocation5 + $0x5b4] sm:$0xf] }
 0x345   :  { %v17737_v34 = vld [vmem:[#allocation5 + $0x136c] sm:$0xf0]  ;;  %6085 = vmatmul.bf16.vlgmr.msrb.gmra.mxu1 %v19053_v7  ;;  %v5841_v37 = vpop.f32.mrf.mxu1 }
 0x346   :  { %v13332_v36 = vld [vmem:[#allocation5 + $0xc30] sm:$0xf]  ;;  %v14229_v60 = vor.u32 %v17737_v34, %v14228_v6  ;;  %6129 = vmatpush.bf16.msra.mxu1 %v14805_v41  ;;  %v7052_v6 = vperm.slane %v19587_v27, 1  ;;  %v7053_v34 = vperm.slane %v19587_v27, 2 }
 0x347   :  { %v17513_v24 = vld [vmem:[#allocation5 + $0xc6c] sm:$0xf0]  ;;  %6098 = vmatmul.bf16.vlgmr.msrb.gmra.mxu2 %v19045_v51 }
 0x348   :  { %v14868_v58 = vld [vmem:[#allocation5 + $0x1830] sm:$0xf]  ;;  %v13333_v48 = vor.u32 %v17513_v24, %v13332_v36  ;;  %6117 = vmatpush.bf16.msrb.mxu3 %v14229_v60  ;;  %v12697_v36 = vor.u32 %v17345_v23, %v12694_v14  ;;  %v19632_v47 = vadd.f32 %v7052_v6, %v19602_v12  ;;  %v19635_v41 = vadd.f32 %v7053_v34, %v19610_v31  ;;  %v11990_v23 = vld [vmem:[#allocation5 + $0x1f0] sm:$0xf0]  ;;  %v5826_v14 = vpop.f32.mrf.mxu3 }
 0x349   :  { %v17897_v25 = vld [vmem:[#allocation5 + $0x186c] sm:$0xf0]  ;;  %v6605_v60 = vadd.f32 %v6604_v59, %v6548_v46  ;;  %v12502_v6 = vld [vmem:[#allocation5 + $0x5f0] sm:$0xf0] }
 0x34a   :  { %v14740_v62 = vld [vmem:[#allocation5 + $0x1730] sm:$0xf]  ;;  %v14869_v13 = vor.u32 %v17897_v25, %v14868_v58  ;;  %6110 = vmatpush.bf16.msra.mxu0 %v13333_v48  ;;  %v17329_v58 = vld [vmem:[#allocation5 + $0x6b4] sm:$0xf]  ;;  %v7054_v25 = vperm.slane %v19587_v27, 3  ;;  %v12121_v48 = vor.u32 %v17201_v61, %v12118_v44 }
 0x34b   :  { %v17865_v26 = vld [vmem:[#allocation5 + $0x176c] sm:$0xf0] }
 0x34c   :  { %v14164_v5 = vld [vmem:[#allocation5 + $0x12b0] sm:$0xf]  ;;  %v14741_v1 = vor.u32 %v17865_v26, %v14740_v62  ;;  %6149 = vmatpush.bf16.msra.mxu2 %v14869_v13  ;;  %v17185_v62 = vld [vmem:[#allocation5 + $0x234] sm:$0xf] }
 0x34d   :  { %v17721_v33 = vld [vmem:[#allocation5 + $0x12ec] sm:$0xf0]  ;;  %6111 = vmatmul.bf16.vlgmr.msra.gmra.mxu0 %v19049_v57  ;;  %v12054_v26 = vld [vmem:[#allocation5 + $0x270] sm:$0xf0] }
 0x34e   :  { %v14165_v15 = vor.u32 %v17721_v33, %v14164_v5  ;;  %v14676_v11 = vld [vmem:[#allocation5 + $0x16b0] sm:$0xf]  ;;  %6155 = vmatpush.bf16.msrb.mxu0 %v12249_v10  ;;  %6130 = vmatpush.bf16.msra.mxu1 %v14741_v1  ;;  %v12566_v13 = vld [vmem:[#allocation5 + $0x670] sm:$0xf0]  ;;  %v19638_v10 = vadd.f32 %v7054_v25, %v19615_v42  ;;  %v12633_v5 = vor.u32 %v17329_v58, %v12630_v50  ;;  %v5852_v42 = vpop.f32.mrf.mxu0  ;;  %v6480_v50 = vrot.slane %v6479_v16, 1 }
 0x34f   :  { %v17849_v49 = vld [vmem:[#allocation5 + $0x16ec] sm:$0xf0]  ;;  %v17169_v1 = vld [vmem:[#allocation5 + $0x1b4] sm:$0xf]  ;;  %v12569_v59 = vor.u32 %v17313_v3, %v12566_v13 }
 0x350   :  { %v14100_v32 = vld [vmem:[#allocation5 + $0x1230] sm:$0xf]  ;;  %6168 = vmatpush.bf16.msrb.mxu2 %v12761_v9  ;;  %v14677_v24 = vor.u32 %v17849_v49, %v14676_v11  ;;  %6118 = vmatpush.bf16.msrb.mxu3 %v14165_v15  ;;  %v6606_v15 = vrot.slane %v6605_v60, 2  ;;  %v12057_v11 = vor.u32 %v17185_v62, %v12054_v26  ;;  %v5827_v49 = vadd.f32 %v5826_v14, %v19581_v38  ;;  %v12438_v26 = vld [vmem:[#allocation5 + $0x570] sm:$0xf0] }
 0x351   :  { %v17705_v8 = vld [vmem:[#allocation5 + $0x126c] sm:$0xf0]  ;;  %v11993_v44 = vor.u32 %v17169_v1, %v11990_v23  ;;  %v13270_v1 = vld [vmem:[#allocation5 + $0xbf0] sm:$0xf0] }
 0x352   :  { %v14101_v53 = vor.u32 %v17705_v8, %v14100_v32  ;;  %v14612_v21 = vld [vmem:[#allocation5 + $0x1630] sm:$0xf]  ;;  %6156 = vmatpush.bf16.msrb.mxu0 %v12185_v63  ;;  %6131 = vmatpush.bf16.msra.mxu1 %v14677_v24  ;;  %v7037_v63 = vmul.f32 %v6941_v20, %v19269_v4  ;;  %v7055_v32 = vperm.slane %v19587_v27, 4  ;;  %v5840_v34 = vadd.f32 %v5839_v17, %v5827_v49  ;;  %v17137_v23 = vld [vmem:[#allocation5 + $0xb4] sm:$0xf] }
 0x353   :  { %v17833_v54 = vld [vmem:[#allocation5 + $0x166c] sm:$0xf0]  ;;  %v7038_v4 = vmul.f32 %v6942_v52, %v19280_v40  ;;  %v7039_v20 = vmul.f32 %v6943_v22, %v19313_v0  ;;  %v6607_v25 = vadd.f32 %v6606_v15, %v6605_v60  ;;  %v5865_v40 = vpop.f32.mrf.mxu2  ;;  %v17281_v52 = vld [vmem:[#allocation5 + $0x534] sm:$0xf] }
 0x354   :  { %v14036_v39 = vld [vmem:[#allocation5 + $0x11b0] sm:$0xf]  ;;  %6169 = vmatpush.bf16.msrb.mxu2 %v12697_v36  ;;  %v14613_v12 = vor.u32 %v17833_v54, %v14612_v21  ;;  %6119 = vmatpush.bf16.msrb.mxu3 %v14101_v53  ;;  %v19645_v38 = vadd.f32 %v7055_v32, %v7037_v63  ;;  %v7056_v21 = vperm.slane %v19587_v27, 5  ;;  %v7057_v54 = vperm.slane %v19587_v27, 6  ;;  %v11862_v15 = vld [vmem:[#allocation5 + $0xf0] sm:$0xf0] }
 0x355   :  { %v17689_v2 = vld [vmem:[#allocation5 + $0x11ec] sm:$0xf0]  ;;  %v5853_v56 = vadd.f32 %v5852_v42, %v5840_v34  ;;  %v12441_v14 = vor.u32 %v17281_v52, %v12438_v26  ;;  %v17265_v42 = vld [vmem:[#allocation5 + $0x4b4] sm:$0xf] }
 0x356   :  { %v14548_v33 = vld [vmem:[#allocation5 + $0x15b0] sm:$0xf]  ;;  %v14037_v46 = vor.u32 %v17689_v2, %v14036_v39  ;;  %6157 = vmatpush.bf16.msrb.mxu0 %v12121_v48  ;;  %6132 = vmatpush.bf16.msra.mxu1 %v14613_v12  ;;  %v12505_v39 = vor.u32 %v17297_v29, %v12502_v6  ;;  %v17153_v48 = vld [vmem:[#allocation5 + $0x134] sm:$0xf]  ;;  %v19655_v0 = vadd.f32 %v7056_v21, %v7038_v4 }
 0x357   :  { %v17817_v28 = vld [vmem:[#allocation5 + $0x15ec] sm:$0xf0]  ;;  %v11926_v2 = vld [vmem:[#allocation5 + $0x170] sm:$0xf0]  ;;  %v19657_v22 = vadd.f32 %v7057_v54, %v7039_v20  ;;  %v5866_v3 = vadd.f32 %v5865_v40, %v5853_v56  ;;  %v6481_v12 = vadd.f32 %v6480_v50, %v6479_v16  ;;  %14894 = vmatmul.msk.bf16.vlgmr.msra.gmra.mxu2 %vm4968_vm0, %v19057_v45 }
 0x358   :  { %v13972_v31 = vld [vmem:[#allocation5 + $0x1130] sm:$0xf]  ;;  %6170 = vmatpush.bf16.msrb.mxu2 %v12633_v5  ;;  %v14549_v8 = vor.u32 %v17817_v28, %v14548_v33  ;;  %6120 = vmatpush.bf16.msrb.mxu3 %v14037_v46  ;;  %v6608_v33 = vrot.slane %v6607_v25, 1  ;;  %v5828_v28 = vpop.f32.mrf.mxu3  ;;  %v17489_v46 = vld [vmem:[#allocation5 + $0xbb4] sm:$0xf] }
 0x359   :  { %v17673_v9 = vld [vmem:[#allocation5 + $0x116c] sm:$0xf0]  ;;  %v12374_v49 = vld [vmem:[#allocation5 + $0x4f0] sm:$0xf0]  ;;  %v19661_v32 = vmul.f32 0.125, %v6481_v12 }
 0x35a   :  { %v13973_v61 = vor.u32 %v17673_v9, %v13972_v31  ;;  %v14484_v36 = vld [vmem:[#allocation5 + $0x1530] sm:$0xf]  ;;  %6158 = vmatpush.bf16.msrb.mxu0 %v12057_v11  ;;  %6133 = vmatpush.bf16.msra.mxu1 %v14549_v8  ;;  %v11929_v31 = vor.u32 %v17153_v48, %v11926_v2  ;;  %v5854_v9 = vpop.f32.mrf.mxu0  ;;  %v6609_v8 = vadd.f32 %v6608_v33, %v6607_v25  ;;  %v17617_v29 = vld [vmem:[#allocation5 + $0xfb4] sm:$0xf] }
 0x35b   :  { %v17801_v24 = vld [vmem:[#allocation5 + $0x156c] sm:$0xf0]  ;;  %v13782_v6 = vld [vmem:[#allocation5 + $0xff0] sm:$0xf0]  ;;  %v6676_v48 = vmul.f32 %v19661_v32, %v19661_v32 }
 0x35c   :  { %v13908_v58 = vld [vmem:[#allocation5 + $0x10b0] sm:$0xf]  ;;  %6171 = vmatpush.bf16.msrb.mxu2 %v12569_v59  ;;  %v14485_v62 = vor.u32 %v17801_v24, %v14484_v36  ;;  %6121 = vmatpush.bf16.msrb.mxu3 %v13973_v61  ;;  %v13273_v61 = vor.u32 %v17489_v46, %v13270_v1  ;;  %v17473_v34 = vld [vmem:[#allocation5 + $0xb34] sm:$0xf]  ;;  %v6660_v56 = vmul.f32 0.125, %v6609_v8 }
 0x35d   :  { %v17657_v53 = vld [vmem:[#allocation5 + $0x10ec] sm:$0xf0]  ;;  %v13206_v36 = vld [vmem:[#allocation5 + $0xb70] sm:$0xf0] }
 0x35e   :  { %v13909_v60 = vor.u32 %v17657_v53, %v13908_v58  ;;  %v14420_v13 = vld [vmem:[#allocation5 + $0x14b0] sm:$0xf]  ;;  %6159 = vmatpush.bf16.msrb.mxu0 %v11993_v44  ;;  %6134 = vmatpush.bf16.msra.mxu1 %v14485_v62  ;;  %v11865_v44 = vor.u32 %v17137_v23, %v11862_v15  ;;  %v17121_v24 = vld [vmem:[#allocation5 + $0x34] sm:$0xf]  ;;  %v12377_v58 = vor.u32 %v17265_v42, %v12374_v49  ;;  %v5867_v53 = vpop.f32.mrf.mxu2 }
 0x35f   :  { %v17785_v27 = vld [vmem:[#allocation5 + $0x14ec] sm:$0xf0]  ;;  %v11798_v4 = vld [vmem:[#allocation5 + $0x70] sm:$0xf0]  ;;  %v13785_v62 = vor.u32 %v17617_v29, %v13782_v6  ;;  %v13209_v40 = vor.u32 %v17473_v34, %v13206_v36  ;;  %v6692_v1 = vsub.f32 %v6660_v56, %v6676_v48 }
 0x360   :  { %v13844_v5 = vld [vmem:[#allocation5 + $0x1030] sm:$0xf]  ;;  %6172 = vmatpush.bf16.msrb.mxu2 %v12505_v39  ;;  %v14421_v11 = vor.u32 %v17785_v27, %v14420_v13  ;;  %6122 = vmatpush.bf16.msrb.mxu3 %v13909_v60  ;;  %v17249_v20 = vld [vmem:[#allocation5 + $0x434] sm:$0xf]  ;;  %v5878_v2 = vpop.f32.mrf.mxu3  ;;  %v11801_v60 = vor.u32 %v17121_v24, %v11798_v4 }
 0x361   :  { %v17641_v17 = vld [vmem:[#allocation5 + $0x106c] sm:$0xf0]  ;;  %v12310_v50 = vld [vmem:[#allocation5 + $0x470] sm:$0xf0]  ;;  %v19665_v37 = vadd.f32 %v5878_v2, %v5866_v3 }
 0x362   :  { %v13845_v16 = vor.u32 %v17641_v17, %v13844_v5  ;;  %v14356_v59 = vld [vmem:[#allocation5 + $0x1430] sm:$0xf]  ;;  %6160 = vmatpush.bf16.msrb.mxu0 %v11929_v31  ;;  %6135 = vmatpush.bf16.msra.mxu1 %v14421_v11  ;;  %v17745_v54 = vld [vmem:[#allocation5 + $0x13b4] sm:$0xf]  ;;  %v12313_v12 = vor.u32 %v17249_v20, %v12310_v50 }
 0x363   :  { %v17769_v63 = vld [vmem:[#allocation5 + $0x146c] sm:$0xf0]  ;;  %v14294_v39 = vld [vmem:[#allocation5 + $0x13f0] sm:$0xf0]  ;;  %v6482_v31 = vrot.slane %v19665_v37, 4  ;;  %v6549_v17 = vmul.f32 %v19665_v37, %v19665_v37 }
 0x364   :  { %6173 = vmatpush.bf16.msrb.mxu2 %v12441_v14  ;;  %6123 = vmatpush.bf16.msrb.mxu3 %v13845_v16  ;;  %v14357_v21 = vor.u32 %v17769_v63, %v14356_v59  ;;  %v17873_v25 = vld [vmem:[#allocation5 + $0x17b4] sm:$0xf]  ;;  %v14297_v33 = vor.u32 %v17745_v54, %v14294_v39 }
 0x365   :  { %v14806_v52 = vld [vmem:[#allocation5 + $0x17f0] sm:$0xf0]  ;;  %v6483_v16 = vadd.f32 %v6482_v31, %v19665_v37  ;;  %v6610_v49 = vrot.slane %v6549_v17, 4 }
 0x366   :  { %6161 = vmatpush.bf16.msrb.mxu0 %v11865_v44  ;;  %v17601_v26 = vld [vmem:[#allocation5 + $0xf34] sm:$0xf]  ;;  %6136 = vmatpush.bf16.msra.mxu1 %v14357_v21  ;;  %v14809_v46 = vor.u32 %v17873_v25, %v14806_v52 }
 0x367   :  { %v13718_v13 = vld [vmem:[#allocation5 + $0xf70] sm:$0xf0]  ;;  %6124 = vmatmul.bf16.vlgmr.msrb.gmra.mxu3 %v19061_v30  ;;  %v6484_v29 = vrot.slane %v6483_v16, 2  ;;  %v6611_v6 = vadd.f32 %v6610_v49, %v6549_v17  ;;  %v5917_v17 = vpop.f32.mrf.mxu0 }
 0x368   :  { %6181 = vmatpush.bf16.msra.mxu3 %v13273_v61  ;;  %v17457_v27 = vld [vmem:[#allocation5 + $0xab4] sm:$0xf]  ;;  %6174 = vmatpush.bf16.msrb.mxu2 %v12377_v58  ;;  %v13721_v23 = vor.u32 %v17601_v26, %v13718_v13  ;;  %v19673_v58 = vadd.f32 1e-05, %v6692_v1  ;;  %v5880_v50 = vpop.f32.mrf.mxu3  ;;  %v5891_v1 = vpop.f32.mrf.mxu1 }
 0x369   :  { %v13142_v5 = vld [vmem:[#allocation5 + $0xaf0] sm:$0xf0]  ;;  %6137 = vmatmul.bf16.vlgmr.msra.gmra.mxu1 %v19063_v35  ;;  %v6485_v54 = vadd.f32 %v6484_v29, %v6483_v16  ;;  %v6612_v39 = vrot.slane %v6611_v6, 2 }
 0x36a   :  { %v17729_v28 = vld [vmem:[#allocation5 + $0x1334] sm:$0xf]  ;;  %6194 = vmatpush.bf16.msrb.mxu1 %v13785_v62  ;;  %v13145_v15 = vor.u32 %v17457_v27, %v13142_v5  ;;  %6162 = vmatpush.bf16.msrb.mxu0 %v11801_v60  ;;  %18490 = vrsqrt.f32 %v19673_v58  ;;  %vm6804_vm10 = vweird.f32 %v19673_v58 }
 0x36b   :  { %v14230_v9 = vld [vmem:[#allocation5 + $0x1370] sm:$0xf0]  ;;  %v6486_v62 = vrot.slane %v6485_v54, 1 }
 0x36c   :  { %v17857_v3 = vld [vmem:[#allocation5 + $0x1734] sm:$0xf]  ;;  %6182 = vmatpush.bf16.msra.mxu3 %v13209_v40  ;;  %6175 = vmatpush.bf16.msrb.mxu2 %v12313_v12  ;;  %v14233_v8 = vor.u32 %v17729_v28, %v14230_v9  ;;  %v6613_v40 = vadd.f32 %v6612_v39, %v6611_v6 }
 0x36d   :  { %v14742_v14 = vld [vmem:[#allocation5 + $0x1770] sm:$0xf0]  ;;  %6163 = vmatmul.bf16.vlgmr.msrb.gmra.mxu0 %v19047_v55  ;;  %v6487_v28 = vadd.f32 %v6486_v62, %v6485_v54 }
 0x36e   :  { %v17585_v11 = vld [vmem:[#allocation5 + $0xeb4] sm:$0xf]  ;;  %6207 = vmatpush.bf16.msra.mxu0 %v14297_v33  ;;  %v14745_v34 = vor.u32 %v17857_v3, %v14742_v14  ;;  %6195 = vmatpush.bf16.msrb.mxu1 %v13721_v23  ;;  %v6614_v31 = vrot.slane %v6613_v40, 1 }
 0x36f   :  { %v13654_v42 = vld [vmem:[#allocation5 + $0xef0] sm:$0xf0]  ;;  %6176 = vmatmul.bf16.vlgmr.msrb.gmra.mxu2 %v19053_v7 }
 0x370   :  { %v17441_v59 = vld [vmem:[#allocation5 + $0xa34] sm:$0xf]  ;;  %6220 = vmatpush.bf16.msra.mxu2 %v14809_v46  ;;  %6183 = vmatpush.bf16.msra.mxu3 %v13145_v15  ;;  %v13657_v4 = vor.u32 %v17585_v11, %v13654_v42  ;;  %v19678_v15 = vmul.f32 0.125, %v6487_v28  ;;  %v6615_v14 = vadd.f32 %v6614_v31, %v6613_v40  ;;  %v5904_v6 = vpop.f32.mrf.mxu3 }
 0x371   :  { %v13078_v63 = vld [vmem:[#allocation5 + $0xa70] sm:$0xf0] }
 0x372   :  { %v17713_v61 = vld [vmem:[#allocation5 + $0x12b4] sm:$0xf]  ;;  %v13081_v20 = vor.u32 %v17441_v59, %v13078_v63  ;;  %6208 = vmatpush.bf16.msra.mxu0 %v14233_v8  ;;  %6196 = vmatpush.bf16.msrb.mxu1 %v13657_v4  ;;  %v6677_v29 = vmul.f32 %v19678_v15, %v19678_v15 }
 0x373   :  { %v14166_v44 = vld [vmem:[#allocation5 + $0x12f0] sm:$0xf0] }
 0x374   :  { %v17841_v36 = vld [vmem:[#allocation5 + $0x16b4] sm:$0xf]  ;;  %v14169_v48 = vor.u32 %v17713_v61, %v14166_v44  ;;  %6221 = vmatpush.bf16.msra.mxu2 %v14745_v34  ;;  %6184 = vmatpush.bf16.msra.mxu3 %v13081_v20  ;;  %v6661_v44 = vmul.f32 0.125, %v6615_v14  ;;  %v19682_v20 = vpop.eup %18490 }
 0x375   :  { %v14678_v24 = vld [vmem:[#allocation5 + $0x16f0] sm:$0xf0]  ;;  %vm6805_vm6 = vweird.f32 %v19682_v20 }
 0x376   :  { %v17569_v53 = vld [vmem:[#allocation5 + $0xe34] sm:$0xf]  ;;  %v14681_v52 = vor.u32 %v17841_v36, %v14678_v24  ;;  %6209 = vmatpush.bf16.msra.mxu0 %v14169_v48  ;;  %v5905_v24 = vadd.f32 %v5904_v6, %v5891_v1  ;;  %v6693_v50 = vsub.f32 %v6661_v44, %v6677_v29  ;;  %v12252_v29 = vld [vmem:[#allocation5 + $0x3b8] sm:$0xf]  ;;  %vm6806_vm12 = vmor %vm6804_vm10, %vm6805_vm6 }
 0x377   :  { %v13590_v21 = vld [vmem:[#allocation5 + $0xe70] sm:$0xf0]  ;;  %v17242_v6 = vld [vmem:[#allocation5 + $0x3f4] sm:$0xf0] }
 0x378   :  { %v17425_v25 = vld [vmem:[#allocation5 + $0x9b4] sm:$0xf]  ;;  %v13593_v13 = vor.u32 %v17569_v53, %v13590_v21  ;;  %6222 = vmatpush.bf16.msra.mxu2 %v14681_v52  ;;  %v5930_v21 = vpop.f32.mrf.mxu2 }
 0x379   :  { %v13014_v56 = vld [vmem:[#allocation5 + $0x9f0] sm:$0xf0] }
 0x37a   :  { %v17697_v2 = vld [vmem:[#allocation5 + $0x1234] sm:$0xf]  ;;  %v13017_v27 = vor.u32 %v17425_v25, %v13014_v56  ;;  %6197 = vmatpush.bf16.msrb.mxu1 %v13593_v13 }
 0x37b   :  { %v14102_v26 = vld [vmem:[#allocation5 + $0x1270] sm:$0xf0] }
 0x37c   :  { %v17825_v60 = vld [vmem:[#allocation5 + $0x1634] sm:$0xf]  ;;  %v14105_v3 = vor.u32 %v17697_v2, %v14102_v26  ;;  %6185 = vmatpush.bf16.msra.mxu3 %v13017_v27  ;;  %v5918_v2 = vadd.f32 %v5917_v17, %v5905_v24  ;;  %v19684_v26 = vadd.f32 1e-05, %v6693_v50 }
 0x37d   :  { %v14614_v5 = vld [vmem:[#allocation5 + $0x1670] sm:$0xf0] }
 0x37e   :  { %v17553_v12 = vld [vmem:[#allocation5 + $0xdb4] sm:$0xf]  ;;  %v14617_v11 = vor.u32 %v17825_v60, %v14614_v5  ;;  %6210 = vmatpush.bf16.msra.mxu0 %v14105_v3  ;;  %v5919_v60 = vpop.f32.mrf.mxu0  ;;  %v6799_v5 = vmul.f32 %v19682_v20, %v19673_v58  ;;  %18492 = vrsqrt.f32 %v19684_v26  ;;  %vm6814_vm8 = vweird.f32 %v19684_v26  ;;  %v17306_v58 = vld [vmem:[#allocation5 + $0x5f4] sm:$0xf0] }
 0x37f   :  { %v13526_v33 = vld [vmem:[#allocation5 + $0xdf0] sm:$0xf0] }
 0x380   :  { %v17409_v46 = vld [vmem:[#allocation5 + $0x934] sm:$0xf]  ;;  %v13529_v49 = vor.u32 %v17553_v12, %v13526_v33  ;;  %6223 = vmatpush.bf16.msra.mxu2 %v14617_v11  ;;  %v19688_v12 = vadd.f32 %v5930_v21, %v5918_v2  ;;  %v12253_v2 = vor.u32 %v17242_v6, %v12252_v29  ;;  %v13148_v29 = vld [vmem:[#allocation5 + $0xab8] sm:$0xf] }
 0x381   :  { %v12950_v9 = vld [vmem:[#allocation5 + $0x970] sm:$0xf0]  ;;  %v17466_v6 = vld [vmem:[#allocation5 + $0xaf4] sm:$0xf0] }
 0x382   :  { %v17681_v23 = vld [vmem:[#allocation5 + $0x11b4] sm:$0xf]  ;;  %v12953_v59 = vor.u32 %v17409_v46, %v12950_v9  ;;  %6198 = vmatpush.bf16.msrb.mxu1 %v13529_v49  ;;  %v5893_v46 = vpop.f32.mrf.mxu1 }
 0x383   :  { %v14038_v42 = vld [vmem:[#allocation5 + $0x11f0] sm:$0xf0] }
 0x384   :  { %v17809_v16 = vld [vmem:[#allocation5 + $0x15b4] sm:$0xf]  ;;  %v14041_v4 = vor.u32 %v17681_v23, %v14038_v42  ;;  %6186 = vmatpush.bf16.msra.mxu3 %v12953_v59  ;;  %v12764_v59 = vld [vmem:[#allocation5 + $0x7b8] sm:$0xf] }
 0x385   :  { %v14550_v63 = vld [vmem:[#allocation5 + $0x15f0] sm:$0xf0] }
 0x386   :  { %v17537_v8 = vld [vmem:[#allocation5 + $0xd34] sm:$0xf]  ;;  %v14553_v53 = vor.u32 %v17809_v16, %v14550_v63  ;;  %6211 = vmatpush.bf16.msra.mxu0 %v14041_v4  ;;  %v17370_v63 = vld [vmem:[#allocation5 + $0x7f4] sm:$0xf0]  ;;  %v19694_v60 = vpop.f32.mrf.mxu0 }
 0x387   :  { %v13462_v61 = vld [vmem:[#allocation5 + $0xd70] sm:$0xf0] }
 0x388   :  { %v17393_v34 = vld [vmem:[#allocation5 + $0x8b4] sm:$0xf]  ;;  %v13465_v56 = vor.u32 %v17537_v8, %v13462_v61  ;;  %6224 = vmatpush.bf16.msra.mxu2 %v14553_v53  ;;  %v5906_v8 = vpop.f32.mrf.mxu3  ;;  %v6800_v61 = vmul.f32 %v19682_v20, %v6799_v5  ;;  %v5932_v53 = vpop.f32.mrf.mxu2 }
 0x389   :  { %v12886_v36 = vld [vmem:[#allocation5 + $0x8f0] sm:$0xf0]  ;;  %v12124_v8 = vld [vmem:[#allocation5 + $0x2b8] sm:$0xf] }
 0x38a   :  { %v17665_v54 = vld [vmem:[#allocation5 + $0x1134] sm:$0xf]  ;;  %v12889_v48 = vor.u32 %v17393_v34, %v12886_v36  ;;  %6199 = vmatpush.bf16.msrb.mxu1 %v13465_v56  ;;  %v13788_v56 = vld [vmem:[#allocation5 + $0xfb8] sm:$0xf] }
 0x38b   :  { %v13974_v39 = vld [vmem:[#allocation5 + $0x1170] sm:$0xf0] }
 0x38c   :  { %v17793_v25 = vld [vmem:[#allocation5 + $0x1534] sm:$0xf]  ;;  %v13977_v33 = vor.u32 %v17665_v54, %v13974_v39  ;;  %6187 = vmatpush.bf16.msra.mxu3 %v12889_v48  ;;  %v12765_v54 = vor.u32 %v17370_v63, %v12764_v59  ;;  %v13276_v39 = vld [vmem:[#allocation5 + $0xbb8] sm:$0xf]  ;;  %v19692_v48 = vpop.eup %18492 }
 0x38d   :  { %v14486_v62 = vld [vmem:[#allocation5 + $0x1570] sm:$0xf0]  ;;  %vm6815_vm5 = vweird.f32 %v19692_v48 }
 0x38e   :  { %v17521_v40 = vld [vmem:[#allocation5 + $0xcb4] sm:$0xf]  ;;  %v14489_v17 = vor.u32 %v17793_v25, %v14486_v62  ;;  %6212 = vmatpush.bf16.msra.mxu0 %v13977_v33  ;;  %v17498_v25 = vld [vmem:[#allocation5 + $0xbf4] sm:$0xf0]  ;;  %vm19710_vm9 = vmor %vm6814_vm8, %vm6815_vm5 }
 0x38f   :  { %v13398_v52 = vld [vmem:[#allocation5 + $0xcf0] sm:$0xf0]  ;;  %v17626_v62 = vld [vmem:[#allocation5 + $0xff4] sm:$0xf0]  ;;  %v13277_v46 = vor.u32 %v17498_v25, %v13276_v39  ;;  %v5971_v39 = vpop.f32.mrf.mxu0 }
 0x390   :  { %v17377_v13 = vld [vmem:[#allocation5 + $0x834] sm:$0xf]  ;;  %v13401_v1 = vor.u32 %v17521_v40, %v13398_v52  ;;  %6225 = vmatpush.bf16.msra.mxu2 %v14489_v17  ;;  %v12700_v40 = vld [vmem:[#allocation5 + $0x738] sm:$0xf] }
 0x391   :  { %v12822_v27 = vld [vmem:[#allocation5 + $0x870] sm:$0xf0]  ;;  %v17354_v52 = vld [vmem:[#allocation5 + $0x774] sm:$0xf0] }
 0x392   :  { %v17889_v28 = vld [vmem:[#allocation5 + $0x1834] sm:$0xf]  ;;  %v12825_v23 = vor.u32 %v17377_v13, %v12822_v27  ;;  %6200 = vmatpush.bf16.msrb.mxu1 %v13401_v1  ;;  %v6801_v13 = vmul.f32 0.5, %v6800_v61  ;;  %v6809_v27 = vmul.f32 %v19692_v48, %v19684_v26  ;;  %v12188_v33 = vld [vmem:[#allocation5 + $0x338] sm:$0xf] }
 0x393   :  { %v14870_v31 = vld [vmem:[#allocation5 + $0x1870] sm:$0xf0]  ;;  %v13212_v1 = vld [vmem:[#allocation5 + $0xb38] sm:$0xf] }
 0x394   :  { %v17649_v9 = vld [vmem:[#allocation5 + $0x10b4] sm:$0xf]  ;;  %v14873_v49 = vor.u32 %v17889_v28, %v14870_v31  ;;  %6188 = vmatpush.bf16.msra.mxu3 %v12825_v23  ;;  %v17226_v28 = vld [vmem:[#allocation5 + $0x374] sm:$0xf0]  ;;  %v6810_v17 = vmul.f32 %v19692_v48, %v6809_v27  ;;  %v6802_v59 = vsub.f32 1.5, %v6801_v13  ;;  %v13149_v13 = vor.u32 %v17466_v6, %v13148_v29 }
 0x395   :  { %v13910_v3 = vld [vmem:[#allocation5 + $0x10f0] sm:$0xf0]  ;;  %v17482_v23 = vld [vmem:[#allocation5 + $0xb74] sm:$0xf0] }
 0x396   :  { %v17777_v14 = vld [vmem:[#allocation5 + $0x14b4] sm:$0xf]  ;;  %v13913_v44 = vor.u32 %v17649_v9, %v13910_v3  ;;  %v13789_v9 = vor.u32 %v17626_v62, %v13788_v56  ;;  %v12701_v3 = vor.u32 %v17354_v52, %v12700_v40  ;;  %v6811_v63 = vmul.f32 0.5, %v6810_v17  ;;  %v17210_v61 = vld [vmem:[#allocation5 + $0x2f4] sm:$0xf0]  ;;  %v5943_v52 = vpop.f32.mrf.mxu1 }
 0x397   :  { %v14422_v11 = vld [vmem:[#allocation5 + $0x14f0] sm:$0xf0]  ;;  %6189 = vmatmul.bf16.vlgmr.msra.gmra.mxu3 %v19045_v51  ;;  %v12125_v53 = vor.u32 %v17210_v61, %v12124_v8  ;;  %v6803_v25 = vmul.f32 %v19682_v20, %v6802_v59  ;;  %v17194_v62 = vld [vmem:[#allocation5 + $0x274] sm:$0xf0]  ;;  %v5956_v8 = vpop.f32.mrf.mxu3 }
 0x398   :  { %v17505_v42 = vld [vmem:[#allocation5 + $0xc34] sm:$0xf]  ;;  %v14425_v36 = vor.u32 %v17777_v14, %v14422_v11  ;;  %6240 = vmatpush.bf16.msrb.mxu3 %v14873_v49  ;;  %6213 = vmatpush.bf16.msra.mxu0 %v13913_v44  ;;  %v13724_v14 = vld [vmem:[#allocation5 + $0xf38] sm:$0xf]  ;;  %v12189_v11 = vor.u32 %v17226_v28, %v12188_v33  ;;  %v13213_v44 = vor.u32 %v17482_v23, %v13212_v1 }
 0x399   :  { %v13334_v16 = vld [vmem:[#allocation5 + $0xc70] sm:$0xf0]  ;;  %v17338_v49 = vld [vmem:[#allocation5 + $0x6f4] sm:$0xf0]  ;;  %v5944_v33 = vadd.f32 %v5943_v52, %v19688_v12  ;;  %v6807_v23 = vsel %vm6806_vm12, %v19682_v20, %v6803_v25 }
 0x39a   :  { %v17633_v34 = vld [vmem:[#allocation5 + $0x1034] sm:$0xf]  ;;  %v13337_v21 = vor.u32 %v17505_v42, %v13334_v16  ;;  %6226 = vmatpush.bf16.msra.mxu2 %v14425_v36  ;;  %v17610_v42 = vld [vmem:[#allocation5 + $0xf74] sm:$0xf0] }
 0x39b   :  { %v13846_v24 = vld [vmem:[#allocation5 + $0x1070] sm:$0xf0]  ;;  %v12636_v16 = vld [vmem:[#allocation5 + $0x6b8] sm:$0xf]  ;;  %v13725_v36 = vor.u32 %v17610_v42, %v13724_v14  ;;  %v5957_v6 = vadd.f32 %v5956_v8, %v5944_v33 }
 0x39c   :  { %v17761_v4 = vld [vmem:[#allocation5 + $0x1434] sm:$0xf]  ;;  %v13849_v5 = vor.u32 %v17633_v34, %v13846_v24  ;;  %6201 = vmatpush.bf16.msrb.mxu1 %v13337_v21  ;;  %6259 = vmatpush.bf16.msra.mxu3 %v12765_v54  ;;  %v6812_v34 = vsub.f32 1.5, %v6811_v63  ;;  %v12637_v24 = vor.u32 %v17338_v49, %v12636_v16  ;;  %v12572_v21 = vld [vmem:[#allocation5 + $0x638] sm:$0xf] }
 0x39d   :  { %v14358_v50 = vld [vmem:[#allocation5 + $0x1470] sm:$0xf0]  ;;  %v17322_v54 = vld [vmem:[#allocation5 + $0x674] sm:$0xf0] }
 0x39e   :  { %v14361_v31 = vor.u32 %v17761_v4, %v14358_v50  ;;  %6214 = vmatpush.bf16.msra.mxu0 %v13849_v5  ;;  %v13660_v4 = vld [vmem:[#allocation5 + $0xeb8] sm:$0xf]  ;;  %v6813_v56 = vmul.f32 %v19692_v48, %v6812_v34  ;;  %v12573_v28 = vor.u32 %v17322_v54, %v12572_v21 }
 0x39f   :  { %v17594_v50 = vld [vmem:[#allocation5 + $0xef4] sm:$0xf0]  ;;  %6202 = vmatmul.bf16.vlgmr.msrb.gmra.mxu1 %v19049_v57 }
 0x3a0   :  { %6246 = vmatpush.bf16.msra.mxu1 %v12253_v2  ;;  %6227 = vmatpush.bf16.msra.mxu2 %v14361_v31  ;;  %v12060_v2 = vld [vmem:[#allocation5 + $0x238] sm:$0xf]  ;;  %v13661_v27 = vor.u32 %v17594_v50, %v13660_v4  ;;  %v6817_v26 = vsel %vm19710_vm9, %v19692_v48, %v6813_v56  ;;  %v5945_v50 = vpop.f32.mrf.mxu1 }
 0x3a1   :  { %6260 = vmatpush.bf16.msra.mxu3 %v12701_v3  ;;  %6215 = vmatmul.bf16.vlgmr.msra.gmra.mxu0 %v19061_v30  ;;  %v13084_v5 = vld [vmem:[#allocation5 + $0xa38] sm:$0xf]  ;;  %v12061_v3 = vor.u32 %v17194_v62, %v12060_v2 }
 0x3a2   :  { %6272 = vmatpush.bf16.msrb.mxu0 %v13277_v46  ;;  %v17450_v31 = vld [vmem:[#allocation5 + $0xa74] sm:$0xf0] }
 0x3a3   :  { %6228 = vmatmul.bf16.vlgmr.msra.gmra.mxu2 %v19063_v35  ;;  %v13596_v46 = vld [vmem:[#allocation5 + $0xe38] sm:$0xf]  ;;  %v13085_v12 = vor.u32 %v17450_v31, %v13084_v5 }
 0x3a4   :  { %6285 = vmatpush.bf16.msrb.mxu2 %v13789_v9  ;;  %6247 = vmatpush.bf16.msra.mxu1 %v12189_v11  ;;  %v17578_v17 = vld [vmem:[#allocation5 + $0xe74] sm:$0xf0]  ;;  %v6901_v9 = vrot.slane %v6817_v26, 7 }
 0x3a5   :  { %6261 = vmatpush.bf16.msra.mxu3 %v12637_v24  ;;  %v12508_v1 = vld [vmem:[#allocation5 + $0x5b8] sm:$0xf]  ;;  %v13597_v42 = vor.u32 %v17578_v17, %v13596_v46  ;;  %v5995_v24 = vpop.f32.mrf.mxu0 }
 0x3a6   :  { %6273 = vmatpush.bf16.msrb.mxu0 %v13213_v44  ;;  %v11996_v14 = vld [vmem:[#allocation5 + $0x1b8] sm:$0xf]  ;;  %v19723_v11 = vsel %vm6908_vm7, %v6807_v23, %v6901_v9  ;;  %v12509_v16 = vor.u32 %v17306_v58, %v12508_v1 }
 0x3a7   :  { %v17178_v48 = vld [vmem:[#allocation5 + $0x1f4] sm:$0xf0]  ;;  %14895 = vmatmul.msk.bf16.vlgmr.msrb.gmra.mxu3 %vm4968_vm0, %v19057_v45 }
 0x3a8   :  { %6286 = vmatpush.bf16.msrb.mxu2 %v13725_v36  ;;  %6248 = vmatpush.bf16.msra.mxu1 %v12125_v53  ;;  %v13020_v49 = vld [vmem:[#allocation5 + $0x9b8] sm:$0xf]  ;;  %v11997_v61 = vor.u32 %v17178_v48, %v11996_v14  ;;  %v19728_v53 = vadd.f32 %v19694_v60, %v5957_v6 }
 0x3a9   :  { %6262 = vmatpush.bf16.msra.mxu3 %v12573_v28  ;;  %v17434_v59 = vld [vmem:[#allocation5 + $0x9f4] sm:$0xf0] }
 0x3aa   :  { %6274 = vmatpush.bf16.msrb.mxu0 %v13149_v13  ;;  %v13532_v63 = vld [vmem:[#allocation5 + $0xdb8] sm:$0xf]  ;;  %v13021_v4 = vor.u32 %v17434_v59, %v13020_v49  ;;  %v5982_v13 = vpop.f32.mrf.mxu2  ;;  %v6488_v46 = vrot.slane %v19728_v53, 4  ;;  %v6550_v17 = vmul.f32 %v19728_v53, %v19728_v53 }
 0x3ab   :  { %v17562_v44 = vld [vmem:[#allocation5 + $0xdf4] sm:$0xf0]  ;;  %v19730_v26 = vadd.f32 %v5995_v24, %v5982_v13 }
 0x3ac   :  { %6287 = vmatpush.bf16.msrb.mxu2 %v13661_v27  ;;  %6249 = vmatpush.bf16.msra.mxu1 %v12061_v3  ;;  %v12444_v29 = vld [vmem:[#allocation5 + $0x538] sm:$0xf]  ;;  %v13533_v21 = vor.u32 %v17562_v44, %v13532_v63  ;;  %v6616_v6 = vrot.slane %v6550_v17, 4 }
 0x3ad   :  { %v17290_v20 = vld [vmem:[#allocation5 + $0x574] sm:$0xf0]  ;;  %6263 = vmatpush.bf16.msra.mxu3 %v12509_v16  ;;  %v5997_v63 = vpop.f32.mrf.mxu0 }
 0x3ae   :  { %v11932_v34 = vld [vmem:[#allocation5 + $0x138] sm:$0xf]  ;;  %6275 = vmatpush.bf16.msrb.mxu0 %v13085_v12  ;;  %v12445_v54 = vor.u32 %v17290_v20, %v12444_v29  ;;  %v6489_v20 = vadd.f32 %v6488_v46, %v19728_v53  ;;  %v17362_v46 = vld [vmem:[#allocation5 + $0x7bc] sm:$0xf] }
 0x3af   :  { %v17162_v36 = vld [vmem:[#allocation5 + $0x174] sm:$0xf0]  ;;  %v17346_v63 = vld [vmem:[#allocation5 + $0x73c] sm:$0xf] }
 0x3b0   :  { %6288 = vmatpush.bf16.msrb.mxu2 %v13597_v42  ;;  %v12956_v39 = vld [vmem:[#allocation5 + $0x938] sm:$0xf]  ;;  %6250 = vmatpush.bf16.msra.mxu1 %v11997_v61  ;;  %v11933_v2 = vor.u32 %v17162_v36, %v11932_v34  ;;  %v5958_v42 = vpop.f32.mrf.mxu3 }
 0x3b1   :  { %v17418_v25 = vld [vmem:[#allocation5 + $0x974] sm:$0xf0]  ;;  %6264 = vmatpush.bf16.msra.mxu3 %v12445_v54  ;;  %v17234_v54 = vld [vmem:[#allocation5 + $0x3bc] sm:$0xf] }
 0x3b2   :  { %v13468_v56 = vld [vmem:[#allocation5 + $0xd38] sm:$0xf]  ;;  %6276 = vmatpush.bf16.msrb.mxu0 %v13021_v4  ;;  %v12957_v60 = vor.u32 %v17418_v25, %v12956_v39 }
 0x3b3   :  { %v17546_v62 = vld [vmem:[#allocation5 + $0xd74] sm:$0xf0] }
 0x3b4   :  { %v12380_v40 = vld [vmem:[#allocation5 + $0x4b8] sm:$0xf]  ;;  %6289 = vmatpush.bf16.msrb.mxu2 %v13533_v21  ;;  %v13469_v9 = vor.u32 %v17546_v62, %v13468_v56  ;;  %6251 = vmatpush.bf16.msra.mxu1 %v11933_v2  ;;  %v5984_v56 = vpop.f32.mrf.mxu2  ;;  %v12254_v62 = vld [vmem:[#allocation5 + $0x3f8] sm:$0xf0] }
 0x3b5   :  { %v17274_v52 = vld [vmem:[#allocation5 + $0x4f4] sm:$0xf0]  ;;  %v12638_v56 = vld [vmem:[#allocation5 + $0x6f8] sm:$0xf0] }
 0x3b6   :  { %v11868_v27 = vld [vmem:[#allocation5 + $0xb8] sm:$0xf]  ;;  %v12381_v3 = vor.u32 %v17274_v52, %v12380_v40  ;;  %6277 = vmatpush.bf16.msrb.mxu0 %v12957_v60  ;;  %v6490_v60 = vrot.slane %v6489_v20, 2 }
 0x3b7   :  { %v17146_v5 = vld [vmem:[#allocation5 + $0xf4] sm:$0xf0] }
 0x3b8   :  { %v12892_v33 = vld [vmem:[#allocation5 + $0x8b8] sm:$0xf]  ;;  %v11869_v23 = vor.u32 %v17146_v5, %v11868_v27  ;;  %6290 = vmatpush.bf16.msrb.mxu2 %v13469_v9  ;;  %6265 = vmatpush.bf16.msra.mxu3 %v12381_v3  ;;  %v12766_v9 = vld [vmem:[#allocation5 + $0x7f8] sm:$0xf0]  ;;  %v12257_v3 = vor.u32 %v17234_v54, %v12254_v62 }
 0x3b9   :  { %v17402_v28 = vld [vmem:[#allocation5 + $0x8f4] sm:$0xf0] }
 0x3ba   :  { %v13404_v31 = vld [vmem:[#allocation5 + $0xcb8] sm:$0xf]  ;;  %v12893_v8 = vor.u32 %v17402_v28, %v12892_v33  ;;  %6252 = vmatpush.bf16.msra.mxu1 %v11869_v23  ;;  %v6617_v33 = vadd.f32 %v6616_v6, %v6550_v17  ;;  %v12769_v17 = vor.u32 %v17362_v46, %v12766_v9 }
 0x3bb   :  { %v17530_v1 = vld [vmem:[#allocation5 + $0xcf4] sm:$0xf0] }
 0x3bc   :  { %v11804_v58 = vld [vmem:[#allocation5 + $0x38] sm:$0xf]  ;;  %v13405_v34 = vor.u32 %v17530_v1, %v13404_v31  ;;  %6278 = vmatpush.bf16.msrb.mxu0 %v12893_v8  ;;  %v12702_v8 = vld [vmem:[#allocation5 + $0x778] sm:$0xf0] }
 0x3bd   :  { %v17130_v14 = vld [vmem:[#allocation5 + $0x74] sm:$0xf0] }
 0x3be   :  { %v12316_v48 = vld [vmem:[#allocation5 + $0x438] sm:$0xf]  ;;  %v11805_v50 = vor.u32 %v17130_v14, %v11804_v58  ;;  %6291 = vmatpush.bf16.msrb.mxu2 %v13405_v34  ;;  %v17218_v58 = vld [vmem:[#allocation5 + $0x33c] sm:$0xf] }
 0x3bf   :  { %v17258_v12 = vld [vmem:[#allocation5 + $0x474] sm:$0xf0]  ;;  %v12190_v14 = vld [vmem:[#allocation5 + $0x378] sm:$0xf0] }
 0x3c0   :  { %v14300_v16 = vld [vmem:[#allocation5 + $0x13b8] sm:$0xf]  ;;  %v12317_v36 = vor.u32 %v17258_v12, %v12316_v48  ;;  %6253 = vmatpush.bf16.msra.mxu1 %v11805_v50  ;;  %v12126_v34 = vld [vmem:[#allocation5 + $0x2f8] sm:$0xf0] }
 0x3c1   :  { %v14812_v49 = vld [vmem:[#allocation5 + $0x17b8] sm:$0xf] }
 0x3c2   :  { %v17882_v59 = vld [vmem:[#allocation5 + $0x17f4] sm:$0xf0]  ;;  %6266 = vmatpush.bf16.msra.mxu3 %v12317_v36 }
 0x3c3   :  { %v17754_v61 = vld [vmem:[#allocation5 + $0x13f4] sm:$0xf0]  ;;  %v14813_v21 = vor.u32 %v17882_v59, %v14812_v49  ;;  %v6491_v49 = vadd.f32 %v6490_v60, %v6489_v20  ;;  %v6618_v59 = vrot.slane %v6617_v33, 2  ;;  %v12705_v20 = vor.u32 %v17346_v63, %v12702_v8  ;;  %6254 = vmatmul.bf16.vlgmr.msra.gmra.mxu1 %v19047_v55 }
 0x3c4   :  { %v12828_v44 = vld [vmem:[#allocation5 + $0x838] sm:$0xf]  ;;  %v14301_v2 = vor.u32 %v17754_v61, %v14300_v16  ;;  %v12193_v61 = vor.u32 %v17218_v58, %v12190_v14 }
 0x3c5   :  { %v17386_v29 = vld [vmem:[#allocation5 + $0x874] sm:$0xf0]  ;;  %6267 = vmatmul.bf16.vlgmr.msra.gmra.mxu3 %v19053_v7  ;;  %v6619_v54 = vadd.f32 %v6618_v59, %v6617_v33  ;;  %v6047_v59 = vpop.f32.mrf.mxu0 }
 0x3c6   :  { %v13340_v24 = vld [vmem:[#allocation5 + $0xc38] sm:$0xf]  ;;  %v12829_v13 = vor.u32 %v17386_v29, %v12828_v44  ;;  %6311 = vmatpush.bf16.msrb.mxu3 %v14813_v21  ;;  %6298 = vmatpush.bf16.msrb.mxu1 %v14301_v2  ;;  %v17202_v29 = vld [vmem:[#allocation5 + $0x2bc] sm:$0xf]  ;;  %v6492_v21 = vrot.slane %v6491_v49, 1 }
 0x3c7   :  { %v17514_v4 = vld [vmem:[#allocation5 + $0xc74] sm:$0xf0]  ;;  %v12129_v62 = vor.u32 %v17202_v29, %v12126_v34  ;;  %v6620_v9 = vrot.slane %v6619_v54, 1  ;;  %v12510_v34 = vld [vmem:[#allocation5 + $0x5f8] sm:$0xf0] }
 0x3c8   :  { %v14876_v39 = vld [vmem:[#allocation5 + $0x1838] sm:$0xf]  ;;  %v13341_v28 = vor.u32 %v17514_v4, %v13340_v24  ;;  %6279 = vmatpush.bf16.msrb.mxu0 %v12829_v13  ;;  %v6493_v46 = vadd.f32 %v6492_v21, %v6491_v49  ;;  %v11934_v21 = vld [vmem:[#allocation5 + $0x178] sm:$0xf0] }
 0x3c9   :  { %v17898_v25 = vld [vmem:[#allocation5 + $0x1874] sm:$0xf0] }
 0x3ca   :  { %v14748_v40 = vld [vmem:[#allocation5 + $0x1738] sm:$0xf]  ;;  %v14877_v31 = vor.u32 %v17898_v25, %v14876_v39  ;;  %6292 = vmatpush.bf16.msrb.mxu2 %v13341_v28  ;;  %v6008_v39 = vpop.f32.mrf.mxu1  ;;  %v17330_v25 = vld [vmem:[#allocation5 + $0x6bc] sm:$0xf]  ;;  %v19741_v49 = vmul.f32 0.125, %v6493_v46 }
 0x3cb   :  { %v17866_v52 = vld [vmem:[#allocation5 + $0x1774] sm:$0xf0]  ;;  %6280 = vmatmul.bf16.vlgmr.msrb.gmra.mxu0 %v19045_v51  ;;  %v6009_v2 = vadd.f32 %v6008_v39, %v19730_v26  ;;  %v12641_v28 = vor.u32 %v17330_v25, %v12638_v56 }
 0x3cc   :  { %v14236_v27 = vld [vmem:[#allocation5 + $0x1338] sm:$0xf]  ;;  %v14749_v1 = vor.u32 %v17866_v52, %v14748_v40  ;;  %6331 = vmatpush.bf16.msra.mxu0 %v14877_v31  ;;  %v17186_v52 = vld [vmem:[#allocation5 + $0x23c] sm:$0xf] }
 0x3cd   :  { %v17738_v5 = vld [vmem:[#allocation5 + $0x1374] sm:$0xf0]  ;;  %6293 = vmatmul.bf16.vlgmr.msrb.gmra.mxu2 %v19049_v57 }
 0x3ce   :  { %v14237_v23 = vor.u32 %v17738_v5, %v14236_v27  ;;  %v14684_v48 = vld [vmem:[#allocation5 + $0x16b8] sm:$0xf]  ;;  %6337 = vmatpush.bf16.msra.mxu2 %v12257_v3  ;;  %6312 = vmatpush.bf16.msrb.mxu3 %v14749_v1  ;;  %v12062_v27 = vld [vmem:[#allocation5 + $0x278] sm:$0xf0] }
 0x3cf   :  { %v17850_v12 = vld [vmem:[#allocation5 + $0x16f4] sm:$0xf0]  ;;  %v17314_v3 = vld [vmem:[#allocation5 + $0x63c] sm:$0xf]  ;;  %v12065_v26 = vor.u32 %v17186_v52, %v12062_v27  ;;  %v6678_v52 = vmul.f32 %v19741_v49, %v19741_v49 }
 0x3d0   :  { %v14172_v42 = vld [vmem:[#allocation5 + $0x12b8] sm:$0xf]  ;;  %v14685_v44 = vor.u32 %v17850_v12, %v14684_v48  ;;  %6299 = vmatpush.bf16.msrb.mxu1 %v14237_v23  ;;  %6350 = vmatpush.bf16.msrb.mxu0 %v12769_v17  ;;  %v12574_v1 = vld [vmem:[#allocation5 + $0x678] sm:$0xf0] }
 0x3d1   :  { %v17722_v16 = vld [vmem:[#allocation5 + $0x12f4] sm:$0xf0]  ;;  %v17170_v23 = vld [vmem:[#allocation5 + $0x1bc] sm:$0xf] }
 0x3d2   :  { %v14173_v6 = vor.u32 %v17722_v16, %v14172_v42  ;;  %v14620_v36 = vld [vmem:[#allocation5 + $0x1638] sm:$0xf]  ;;  %6338 = vmatpush.bf16.msra.mxu2 %v12193_v61  ;;  %6313 = vmatpush.bf16.msrb.mxu3 %v14685_v44  ;;  %v11998_v48 = vld [vmem:[#allocation5 + $0x1f8] sm:$0xf0]  ;;  %v6021_v42 = vpop.f32.mrf.mxu3  ;;  %v12577_v16 = vor.u32 %v17314_v3, %v12574_v1  ;;  %v6621_v61 = vadd.f32 %v6620_v9, %v6619_v54  ;;  %v6010_v29 = vpop.f32.mrf.mxu1 }
 0x3d3   :  { %v17834_v24 = vld [vmem:[#allocation5 + $0x1674] sm:$0xf0]  ;;  %v6022_v44 = vadd.f32 %v6021_v42, %v6009_v2  ;;  %v12446_v27 = vld [vmem:[#allocation5 + $0x578] sm:$0xf0] }
 0x3d4   :  { %v14108_v4 = vld [vmem:[#allocation5 + $0x1238] sm:$0xf]  ;;  %v14621_v40 = vor.u32 %v17834_v24, %v14620_v36  ;;  %6300 = vmatpush.bf16.msrb.mxu1 %v14173_v6  ;;  %6351 = vmatpush.bf16.msrb.mxu0 %v12705_v20  ;;  %v17298_v6 = vld [vmem:[#allocation5 + $0x5bc] sm:$0xf]  ;;  %v12001_v36 = vor.u32 %v17170_v23, %v11998_v48  ;;  %v6662_v2 = vmul.f32 0.125, %v6621_v61 }
 0x3d5   :  { %v17706_v50 = vld [vmem:[#allocation5 + $0x1274] sm:$0xf0]  ;;  %v17154_v20 = vld [vmem:[#allocation5 + $0x13c] sm:$0xf] }
 0x3d6   :  { %v14109_v13 = vor.u32 %v17706_v50, %v14108_v4  ;;  %v14556_v5 = vld [vmem:[#allocation5 + $0x15b8] sm:$0xf]  ;;  %6339 = vmatpush.bf16.msra.mxu2 %v12129_v62  ;;  %6314 = vmatpush.bf16.msrb.mxu3 %v14621_v40  ;;  %v6034_v4 = vpop.f32.mrf.mxu2  ;;  %v12513_v62 = vor.u32 %v17298_v6, %v12510_v34  ;;  %v17490_v23 = vld [vmem:[#allocation5 + $0xbbc] sm:$0xf]  ;;  %v6694_v42 = vsub.f32 %v6662_v2, %v6678_v52 }
 0x3d7   :  { %v17818_v60 = vld [vmem:[#allocation5 + $0x15f4] sm:$0xf0]  ;;  %v6035_v56 = vadd.f32 %v6034_v4, %v6022_v44  ;;  %v13790_v48 = vld [vmem:[#allocation5 + $0xff8] sm:$0xf0] }
 0x3d8   :  { %v14044_v33 = vld [vmem:[#allocation5 + $0x11b8] sm:$0xf]  ;;  %v14557_v58 = vor.u32 %v17818_v60, %v14556_v5  ;;  %6301 = vmatpush.bf16.msrb.mxu1 %v14109_v13  ;;  %6352 = vmatpush.bf16.msrb.mxu0 %v12641_v28  ;;  %v17282_v13 = vld [vmem:[#allocation5 + $0x53c] sm:$0xf]  ;;  %v11937_v60 = vor.u32 %v17154_v20, %v11934_v21  ;;  %v19752_v52 = vadd.f32 1e-05, %v6694_v42 }
 0x3d9   :  { %v17690_v31 = vld [vmem:[#allocation5 + $0x11f4] sm:$0xf0]  ;;  %v6048_v5 = vadd.f32 %v6047_v59, %v6035_v56  ;;  %v13278_v59 = vld [vmem:[#allocation5 + $0xbf8] sm:$0xf0] }
 0x3da   :  { %v14045_v14 = vor.u32 %v17690_v31, %v14044_v33  ;;  %v14492_v12 = vld [vmem:[#allocation5 + $0x1538] sm:$0xf]  ;;  %6340 = vmatpush.bf16.msra.mxu2 %v12065_v26  ;;  %6315 = vmatpush.bf16.msrb.mxu3 %v14557_v58  ;;  %v17138_v33 = vld [vmem:[#allocation5 + $0xbc] sm:$0xf]  ;;  %v12449_v58 = vor.u32 %v17282_v13, %v12446_v27  ;;  %18494 = vrsqrt.f32 %v19752_v52  ;;  %vm6824_vm1 = vweird.f32 %v19752_v52 }
 0x3db   :  { %v17802_v17 = vld [vmem:[#allocation5 + $0x1574] sm:$0xf0]  ;;  %v11870_v31 = vld [vmem:[#allocation5 + $0xf8] sm:$0xf0]  ;;  %14896 = vmatmul.msk.bf16.vlgmr.msra.gmra.mxu0 %vm4968_vm0, %v19057_v45 }
 0x3dc   :  { %v13980_v63 = vld [vmem:[#allocation5 + $0x1138] sm:$0xf]  ;;  %v14493_v24 = vor.u32 %v17802_v17, %v14492_v12  ;;  %6302 = vmatpush.bf16.msrb.mxu1 %v14045_v14  ;;  %6353 = vmatpush.bf16.msrb.mxu0 %v12577_v16  ;;  %v17618_v14 = vld [vmem:[#allocation5 + $0xfbc] sm:$0xf]  ;;  %v6023_v12 = vpop.f32.mrf.mxu3  ;;  %v6049_v17 = vpop.f32.mrf.mxu0  ;;  %v11873_v44 = vor.u32 %v17138_v33, %v11870_v31 }
 0x3dd   :  { %v17674_v8 = vld [vmem:[#allocation5 + $0x1174] sm:$0xf0]  ;;  %v6060_v16 = vpop.f32.mrf.mxu1  ;;  %v17122_v6 = vld [vmem:[#allocation5 + $0x3c] sm:$0xf]  ;;  %v13793_v20 = vor.u32 %v17618_v14, %v13790_v48 }
 0x3de   :  { %v13981_v50 = vor.u32 %v17674_v8, %v13980_v63  ;;  %v14428_v39 = vld [vmem:[#allocation5 + $0x14b8] sm:$0xf]  ;;  %6341 = vmatpush.bf16.msra.mxu2 %v12001_v36  ;;  %6316 = vmatpush.bf16.msrb.mxu3 %v14493_v24  ;;  %v17266_v63 = vld [vmem:[#allocation5 + $0x4bc] sm:$0xf]  ;;  %v19747_v61 = vadd.f32 %v6060_v16, %v6048_v5 }
 0x3df   :  { %v17786_v25 = vld [vmem:[#allocation5 + $0x14f4] sm:$0xf0]  ;;  %v12382_v8 = vld [vmem:[#allocation5 + $0x4f8] sm:$0xf0] }
 0x3e0   :  { %v13916_v40 = vld [vmem:[#allocation5 + $0x10b8] sm:$0xf]  ;;  %v14429_v28 = vor.u32 %v17786_v25, %v14428_v39  ;;  %6303 = vmatpush.bf16.msrb.mxu1 %v13981_v50  ;;  %6354 = vmatpush.bf16.msrb.mxu0 %v12513_v62  ;;  %v11806_v34 = vld [vmem:[#allocation5 + $0x78] sm:$0xf0]  ;;  %v6036_v39 = vpop.f32.mrf.mxu2  ;;  %v6494_v25 = vrot.slane %v19747_v61, 4  ;;  %v6551_v56 = vmul.f32 %v19747_v61, %v19747_v61  ;;  %v13281_v62 = vor.u32 %v17490_v23, %v13278_v59 }
 0x3e1   :  { %v17658_v54 = vld [vmem:[#allocation5 + $0x10f4] sm:$0xf0]  ;;  %v17746_v36 = vld [vmem:[#allocation5 + $0x13bc] sm:$0xf] }
 0x3e2   :  { %v13852_v46 = vld [vmem:[#allocation5 + $0x1038] sm:$0xf]  ;;  %v13917_v9 = vor.u32 %v17658_v54, %v13916_v40  ;;  %6342 = vmatpush.bf16.msra.mxu2 %v11937_v60  ;;  %6317 = vmatpush.bf16.msrb.mxu3 %v14429_v28  ;;  %v14302_v4 = vld [vmem:[#allocation5 + $0x13f8] sm:$0xf0]  ;;  %v12385_v40 = vor.u32 %v17266_v63, %v12382_v8  ;;  %v6495_v5 = vadd.f32 %v6494_v25, %v19747_v61  ;;  %v6622_v60 = vrot.slane %v6551_v56, 4 }
 0x3e3   :  { %v17642_v3 = vld [vmem:[#allocation5 + $0x1074] sm:$0xf0]  ;;  %v17474_v50 = vld [vmem:[#allocation5 + $0xb3c] sm:$0xf]  ;;  %v11809_v28 = vor.u32 %v17122_v6, %v11806_v34 }
 0x3e4   :  { %v14364_v1 = vld [vmem:[#allocation5 + $0x1438] sm:$0xf]  ;;  %6304 = vmatpush.bf16.msrb.mxu1 %v13917_v9  ;;  %v13853_v24 = vor.u32 %v17642_v3, %v13852_v46  ;;  %v13214_v21 = vld [vmem:[#allocation5 + $0xb78] sm:$0xf0]  ;;  %6355 = vmatpush.bf16.msrb.mxu0 %v12449_v58  ;;  %v14305_v46 = vor.u32 %v17746_v36, %v14302_v4  ;;  %v6623_v58 = vadd.f32 %v6622_v60, %v6551_v56 }
 0x3e5   :  { %v17770_v26 = vld [vmem:[#allocation5 + $0x1474] sm:$0xf0]  ;;  %v17602_v54 = vld [vmem:[#allocation5 + $0xf3c] sm:$0xf]  ;;  %v13217_v23 = vor.u32 %v17474_v50, %v13214_v21  ;;  %v6062_v59 = vpop.f32.mrf.mxu1 }
 0x3e6   :  { %v14365_v29 = vor.u32 %v17770_v26, %v14364_v1  ;;  %v13726_v2 = vld [vmem:[#allocation5 + $0xf78] sm:$0xf0]  ;;  %6343 = vmatpush.bf16.msra.mxu2 %v11873_v44  ;;  %v6496_v26 = vrot.slane %v6495_v5, 2  ;;  %v6624_v8 = vrot.slane %v6623_v58, 2 }
 0x3e7   :  { %v17250_v13 = vld [vmem:[#allocation5 + $0x43c] sm:$0xf]  ;;  %v13729_v9 = vor.u32 %v17602_v54, %v13726_v2 }
 0x3e8   :  { %v12318_v27 = vld [vmem:[#allocation5 + $0x478] sm:$0xf0]  ;;  %6318 = vmatpush.bf16.msrb.mxu3 %v14365_v29  ;;  %6305 = vmatpush.bf16.msrb.mxu1 %v13853_v24  ;;  %v6497_v63 = vadd.f32 %v6496_v26, %v6495_v5  ;;  %v6625_v4 = vadd.f32 %v6624_v8, %v6623_v58 }
 0x3e9   :  { %v17874_v33 = vld [vmem:[#allocation5 + $0x17bc] sm:$0xf]  ;;  %6356 = vmatpush.bf16.msrb.mxu0 %v12385_v40  ;;  %v12321_v14 = vor.u32 %v17250_v13, %v12318_v27  ;;  %v19759_v27 = vpop.eup %18494 }
 0x3ea   :  { %v14814_v31 = vld [vmem:[#allocation5 + $0x17f8] sm:$0xf0]  ;;  %6344 = vmatpush.bf16.msra.mxu2 %v11809_v28  ;;  %v6626_v54 = vrot.slane %v6625_v4, 1  ;;  %vm6825_vm13 = vweird.f32 %v19759_v27 }
 0x3eb   :  { %v17730_v3 = vld [vmem:[#allocation5 + $0x133c] sm:$0xf]  ;;  %6319 = vmatmul.bf16.vlgmr.msrb.gmra.mxu3 %v19063_v35  ;;  %v14817_v17 = vor.u32 %v17874_v33, %v14814_v31  ;;  %6306 = vmatmul.bf16.vlgmr.msrb.gmra.mxu1 %v19061_v30  ;;  %vm19787_vm6 = vmor %vm6824_vm1, %vm6825_vm13 }
 0x3ec   :  { %6376 = vmatpush.bf16.msra.mxu3 %v13793_v20  ;;  %v14238_v1 = vld [vmem:[#allocation5 + $0x1378] sm:$0xf0]  ;;  %6363 = vmatpush.bf16.msra.mxu1 %v13281_v62  ;;  %v6498_v20 = vrot.slane %v6497_v63, 1 }
 0x3ed   :  { %v17586_v48 = vld [vmem:[#allocation5 + $0xebc] sm:$0xf]  ;;  %v14241_v6 = vor.u32 %v17730_v3, %v14238_v1  ;;  %6357 = vmatpush.bf16.msrb.mxu0 %v12321_v14  ;;  %6345 = vmatmul.bf16.vlgmr.msra.gmra.mxu2 %v19047_v55  ;;  %v6086_v59 = vpop.f32.mrf.mxu1 }
 0x3ee   :  { %v13662_v12 = vld [vmem:[#allocation5 + $0xef8] sm:$0xf0]  ;;  %6389 = vmatpush.bf16.msrb.mxu2 %v14305_v46  ;;  %v6499_v40 = vadd.f32 %v6498_v20, %v6497_v63  ;;  %v6627_v46 = vadd.f32 %v6626_v54, %v6625_v4  ;;  %v6112_v4 = vpop.f32.mrf.mxu0 }
 0x3ef   :  { %v17458_v42 = vld [vmem:[#allocation5 + $0xabc] sm:$0xf]  ;;  %v13665_v34 = vor.u32 %v17586_v48, %v13662_v12 }
 0x3f0   :  { %v13150_v16 = vld [vmem:[#allocation5 + $0xaf8] sm:$0xf0]  ;;  %6377 = vmatpush.bf16.msra.mxu3 %v13729_v9  ;;  %6364 = vmatpush.bf16.msra.mxu1 %v13217_v23  ;;  %v19761_v31 = vmul.f32 0.125, %v6499_v40  ;;  %v6819_v23 = vmul.f32 %v19759_v27, %v19752_v52  ;;  %v6663_v14 = vmul.f32 0.125, %v6627_v46  ;;  %v15380_v52 = vld [vmem:[#allocation10 + $0x3c0] sm:$0xf] }
 0x3f1   :  { %v17858_v44 = vld [vmem:[#allocation5 + $0x173c] sm:$0xf]  ;;  %v13153_v50 = vor.u32 %v17458_v42, %v13150_v16  ;;  %6402 = vmatpush.bf16.msra.mxu0 %v14817_v17 }
 0x3f2   :  { %v14750_v29 = vld [vmem:[#allocation5 + $0x1778] sm:$0xf0]  ;;  %6390 = vmatpush.bf16.msrb.mxu2 %v14241_v6  ;;  %6358 = vmatmul.bf16.vlgmr.msrb.gmra.mxu0 %v19053_v7  ;;  %v6679_v48 = vmul.f32 %v19761_v31, %v19761_v31 }
 0x3f3   :  { %v17714_v36 = vld [vmem:[#allocation5 + $0x12bc] sm:$0xf]  ;;  %v14753_v25 = vor.u32 %v17858_v44, %v14750_v29 }
 0x3f4   :  { %v14174_v24 = vld [vmem:[#allocation5 + $0x12f8] sm:$0xf0]  ;;  %6378 = vmatpush.bf16.msra.mxu3 %v13665_v34  ;;  %6365 = vmatpush.bf16.msra.mxu1 %v13153_v50  ;;  %v6695_v7 = vsub.f32 %v6663_v14, %v6679_v48  ;;  %v6820_v50 = vmul.f32 %v19759_v27, %v6819_v23 }
 0x3f5   :  { %v17570_v21 = vld [vmem:[#allocation5 + $0xe3c] sm:$0xf]  ;;  %v14177_v5 = vor.u32 %v17714_v36, %v14174_v24  ;;  %6403 = vmatpush.bf16.msra.mxu0 %v14753_v25  ;;  %v6073_v36 = vpop.f32.mrf.mxu3 }
 0x3f6   :  { %v13598_v39 = vld [vmem:[#allocation5 + $0xe78] sm:$0xf0] }
 0x3f7   :  { %v17442_v56 = vld [vmem:[#allocation5 + $0xa3c] sm:$0xf]  ;;  %v13601_v60 = vor.u32 %v17570_v21, %v13598_v39  ;;  %6391 = vmatpush.bf16.msrb.mxu2 %v14177_v5  ;;  %v19769_v21 = vadd.f32 1e-05, %v6695_v7  ;;  %v6087_v39 = vadd.f32 %v6086_v59, %v6073_v36  ;;  %v6114_v36 = vpop.f32.mrf.mxu0 }
 0x3f8   :  { %v13086_v62 = vld [vmem:[#allocation5 + $0xa78] sm:$0xf0]  ;;  %v17989_v36 = vld [vmem:[#allocation10 + $0x2cc] sm:$0xf0] }
 0x3f9   :  { %v17842_v2 = vld [vmem:[#allocation5 + $0x16bc] sm:$0xf]  ;;  %v13089_v9 = vor.u32 %v17442_v56, %v13086_v62  ;;  %6379 = vmatpush.bf16.msra.mxu3 %v13601_v60  ;;  %18496 = vrsqrt.f32 %v19769_v21  ;;  %vm6834_vm8 = vweird.f32 %v19769_v21 }
 0x3fa   :  { %v14686_v13 = vld [vmem:[#allocation5 + $0x16f8] sm:$0xf0] }
 0x3fb   :  { %v17698_v28 = vld [vmem:[#allocation5 + $0x123c] sm:$0xf]  ;;  %v14689_v55 = vor.u32 %v17842_v2, %v14686_v13  ;;  %6366 = vmatpush.bf16.msra.mxu1 %v13089_v9 }
 0x3fc   :  { %v14110_v33 = vld [vmem:[#allocation5 + $0x1278] sm:$0xf0] }
 0x3fd   :  { %v17554_v3 = vld [vmem:[#allocation5 + $0xdbc] sm:$0xf]  ;;  %v14113_v42 = vor.u32 %v17698_v28, %v14110_v33  ;;  %6404 = vmatpush.bf16.msra.mxu0 %v14689_v55  ;;  %v6099_v28 = vpop.f32.mrf.mxu2 }
 0x3fe   :  { %v13534_v1 = vld [vmem:[#allocation5 + $0xdf8] sm:$0xf0] }
 0x3ff   :  { %v17426_v26 = vld [vmem:[#allocation5 + $0x9bc] sm:$0xf]  ;;  %v13537_v16 = vor.u32 %v17554_v3, %v13534_v1  ;;  %6392 = vmatpush.bf16.msrb.mxu2 %v14113_v42  ;;  %v6821_v3 = vmul.f32 0.5, %v6820_v50  ;;  %v6100_v1 = vadd.f32 %v6099_v28, %v6087_v39 }
 0x400   :  { %v13022_v58 = vld [vmem:[#allocation5 + $0x9f8] sm:$0xf0] }
 0x401   :  { %v17826_v12 = vld [vmem:[#allocation5 + $0x163c] sm:$0xf]  ;;  %v13025_v8 = vor.u32 %v17426_v26, %v13022_v58  ;;  %6380 = vmatpush.bf16.msra.mxu3 %v13537_v16  ;;  %v19772_v42 = vadd.f32 %v6112_v4, %v6100_v1  ;;  %v17993_v1 = vld [vmem:[#allocation10 + $0x2ec] sm:$0xf0] }
 0x402   :  { %v14622_v17 = vld [vmem:[#allocation5 + $0x1678] sm:$0xf0] }
 0x403   :  { %v17682_v63 = vld [vmem:[#allocation5 + $0x11bc] sm:$0xf]  ;;  %v14625_v34 = vor.u32 %v17826_v12, %v14622_v17  ;;  %6367 = vmatpush.bf16.msra.mxu1 %v13025_v8  ;;  %v6088_v17 = vpop.f32.mrf.mxu1 }
 0x404   :  { %v14046_v44 = vld [vmem:[#allocation5 + $0x11f8] sm:$0xf0]  ;;  %v15396_v17 = vld [vmem:[#allocation10 + $0x3e0] sm:$0xf] }
 0x405   :  { %v17538_v29 = vld [vmem:[#allocation5 + $0xd3c] sm:$0xf]  ;;  %v14049_v62 = vor.u32 %v17682_v63, %v14046_v44  ;;  %6405 = vmatpush.bf16.msra.mxu0 %v14625_v34  ;;  %v15012_v44 = vld [vmem:[#allocation10 + $0xe0] sm:$0xf]  ;;  %v6075_v34 = vpop.f32.mrf.mxu3 }
 0x406   :  { %v13470_v6 = vld [vmem:[#allocation5 + $0xd78] sm:$0xf0]  ;;  %v15252_v34 = vld [vmem:[#allocation10 + $0x2c0] sm:$0xf] }
 0x407   :  { %v17410_v24 = vld [vmem:[#allocation5 + $0x93c] sm:$0xf]  ;;  %v13473_v40 = vor.u32 %v17538_v29, %v13470_v6  ;;  %6393 = vmatpush.bf16.msrb.mxu2 %v14049_v62  ;;  %v17929_v29 = vld [vmem:[#allocation10 + $0xec] sm:$0xf0] }
 0x408   :  { %v12958_v20 = vld [vmem:[#allocation5 + $0x978] sm:$0xf0] }
 0x409   :  { %v17810_v25 = vld [vmem:[#allocation5 + $0x15bc] sm:$0xf]  ;;  %v12961_v2 = vor.u32 %v17410_v24, %v12958_v20  ;;  %6381 = vmatpush.bf16.msra.mxu3 %v13473_v40  ;;  %v19774_v24 = vpop.eup %18496 }
 0x40a   :  { %v14558_v56 = vld [vmem:[#allocation5 + $0x15f8] sm:$0xf0]  ;;  %v6829_v4 = vmul.f32 %v19774_v24, %v19769_v21  ;;  %vm6835_vm5 = vweird.f32 %v19774_v24  ;;  %v15236_v21 = vld [vmem:[#allocation10 + $0x2a0] sm:$0xf] }
 0x40b   :  { %v17666_v54 = vld [vmem:[#allocation5 + $0x113c] sm:$0xf]  ;;  %v14561_v33 = vor.u32 %v17810_v25, %v14558_v56  ;;  %6368 = vmatpush.bf16.msra.mxu1 %v12961_v2  ;;  %v6822_v25 = vsub.f32 1.5, %v6821_v3  ;;  %v15013_v2 = vor.u32 %v17929_v29, %v15012_v44  ;;  %v15268_v3 = vld [vmem:[#allocation10 + $0x2e0] sm:$0xf]  ;;  %vm6836_vm9 = vmor %vm6834_vm8, %vm6835_vm5 }
 0x40c   :  { %v13982_v13 = vld [vmem:[#allocation5 + $0x1178] sm:$0xf0]  ;;  %v6830_v28 = vmul.f32 %v19774_v24, %v6829_v4 }
 0x40d   :  { %v17522_v5 = vld [vmem:[#allocation5 + $0xcbc] sm:$0xf]  ;;  %v13985_v58 = vor.u32 %v17666_v54, %v13982_v13  ;;  %6406 = vmatpush.bf16.msra.mxu0 %v14561_v33  ;;  %v6101_v33 = vpop.f32.mrf.mxu2 }
 0x40e   :  { %v13406_v60 = vld [vmem:[#allocation5 + $0xcf8] sm:$0xf0] }
 0x40f   :  { %v17394_v46 = vld [vmem:[#allocation5 + $0x8bc] sm:$0xf]  ;;  %v13409_v23 = vor.u32 %v17522_v5, %v13406_v60  ;;  %6394 = vmatpush.bf16.msrb.mxu2 %v13985_v58  ;;  %v15140_v5 = vld [vmem:[#allocation10 + $0x1e0] sm:$0xf]  ;;  %v17961_v60 = vld [vmem:[#allocation10 + $0x1ec] sm:$0xf0] }
 0x410   :  { %v12894_v9 = vld [vmem:[#allocation5 + $0x8f8] sm:$0xf0] }
 0x411   :  { %v17794_v55 = vld [vmem:[#allocation5 + $0x153c] sm:$0xf]  ;;  %v12897_v16 = vor.u32 %v17394_v46, %v12894_v9  ;;  %6382 = vmatpush.bf16.msra.mxu3 %v13409_v23 }
 0x412   :  { %v14494_v26 = vld [vmem:[#allocation5 + $0x1578] sm:$0xf0] }
 0x413   :  { %v17650_v14 = vld [vmem:[#allocation5 + $0x10bc] sm:$0xf]  ;;  %v14497_v8 = vor.u32 %v17794_v55, %v14494_v26  ;;  %6369 = vmatpush.bf16.msra.mxu1 %v12897_v16  ;;  %v14996_v55 = vld [vmem:[#allocation10 + $0xc0] sm:$0xf]  ;;  %v17925_v26 = vld [vmem:[#allocation10 + $0xcc] sm:$0xf0] }
 0x414   :  { %v13918_v48 = vld [vmem:[#allocation5 + $0x10f8] sm:$0xf0]  ;;  %v18025_v16 = vld [vmem:[#allocation10 + $0x3ec] sm:$0xf0]  ;;  %v14997_v29 = vor.u32 %v17925_v26, %v14996_v55 }
 0x415   :  { %v17378_v12 = vld [vmem:[#allocation5 + $0x83c] sm:$0xf]  ;;  %v13921_v56 = vor.u32 %v17650_v14, %v13918_v48  ;;  %6407 = vmatpush.bf16.msra.mxu0 %v14497_v8  ;;  %v6823_v14 = vmul.f32 %v19759_v27, %v6822_v25  ;;  %v6831_v48 = vmul.f32 0.5, %v6830_v28  ;;  %v17957_v8 = vld [vmem:[#allocation10 + $0x1cc] sm:$0xf0] }
 0x416   :  { %v12830_v59 = vld [vmem:[#allocation5 + $0x878] sm:$0xf0]  ;;  %v17921_v25 = vld [vmem:[#allocation10 + $0xac] sm:$0xf0] }
 0x417   :  { %v17506_v63 = vld [vmem:[#allocation5 + $0xc3c] sm:$0xf]  ;;  %v12833_v54 = vor.u32 %v17378_v12, %v12830_v59  ;;  %6395 = vmatpush.bf16.msrb.mxu2 %v13921_v56  ;;  %v15141_v59 = vor.u32 %v17961_v60, %v15140_v5  ;;  %v6832_v44 = vsub.f32 1.5, %v6831_v48  ;;  %v6827_v4 = vsel %vm19787_vm6, %v19759_v27, %v6823_v14  ;;  %v17985_v5 = vld [vmem:[#allocation10 + $0x2ac] sm:$0xf0] }
 0x418   :  { %v13342_v7 = vld [vmem:[#allocation5 + $0xc78] sm:$0xf0]  ;;  %v6902_v60 = vrot.slane %v6827_v4, 6  ;;  %v15237_v26 = vor.u32 %v17985_v5, %v15236_v21  ;;  %v17949_v14 = vld [vmem:[#allocation10 + $0x18c] sm:$0xf0] }
 0x419   :  { %v17778_v6 = vld [vmem:[#allocation5 + $0x14bc] sm:$0xf]  ;;  %v13345_v62 = vor.u32 %v17506_v63, %v13342_v7  ;;  %6370 = vmatpush.bf16.msra.mxu1 %v12833_v54  ;;  %v15269_v63 = vor.u32 %v17993_v1, %v15268_v3  ;;  %v15124_v7 = vld [vmem:[#allocation10 + $0x1c0] sm:$0xf]  ;;  %v6833_v56 = vmul.f32 %v19774_v24, %v6832_v44  ;;  %v18017_v1 = vld [vmem:[#allocation10 + $0x3ac] sm:$0xf0] }
 0x41a   :  { %v14430_v20 = vld [vmem:[#allocation5 + $0x14f8] sm:$0xf0]  ;;  %v15108_v54 = vld [vmem:[#allocation10 + $0x1a0] sm:$0xf]  ;;  %v17909_v4 = vld [vmem:[#allocation10 + $0x4c] sm:$0xf0] }
 0x41b   :  { %v17890_v50 = vld [vmem:[#allocation5 + $0x183c] sm:$0xf]  ;;  %v14433_v46 = vor.u32 %v17778_v6, %v14430_v20  ;;  %6383 = vmatpush.bf16.msra.mxu3 %v13345_v62  ;;  %v18021_v62 = vld [vmem:[#allocation10 + $0x3cc] sm:$0xf0]  ;;  %v15364_v3 = vld [vmem:[#allocation10 + $0x3a0] sm:$0xf] }
 0x41c   :  { %v14878_v39 = vld [vmem:[#allocation5 + $0x1878] sm:$0xf0]  ;;  %6371 = vmatmul.bf16.vlgmr.msra.gmra.mxu1 %v19045_v51  ;;  %v19801_v51 = vpop.f32.mrf.mxu2  ;;  %v15381_v33 = vor.u32 %v18021_v62, %v15380_v52  ;;  %v15220_v48 = vld [vmem:[#allocation10 + $0x280] sm:$0xf]  ;;  %v18009_v62 = vld [vmem:[#allocation10 + $0x36c] sm:$0xf0] }
 0x41d   :  { %v17634_v40 = vld [vmem:[#allocation5 + $0x103c] sm:$0xf]  ;;  %v14881_v9 = vor.u32 %v17890_v50, %v14878_v39  ;;  %6408 = vmatpush.bf16.msra.mxu0 %v14433_v46  ;;  %v15397_v50 = vor.u32 %v18025_v16, %v15396_v17  ;;  %v14980_v39 = vld [vmem:[#allocation10 + $0xa0] sm:$0xf]  ;;  %v15365_v17 = vor.u32 %v18017_v1, %v15364_v3  ;;  %v17941_v21 = vld [vmem:[#allocation10 + $0x14c] sm:$0xf0] }
 0x41e   :  { %v13854_v13 = vld [vmem:[#allocation5 + $0x1078] sm:$0xf0]  ;;  %6384 = vmatmul.bf16.vlgmr.msra.gmra.mxu3 %v19049_v57  ;;  %v15125_v57 = vor.u32 %v17957_v8, %v15124_v7  ;;  %v14981_v27 = vor.u32 %v17921_v25, %v14980_v39  ;;  %v14964_v46 = vld [vmem:[#allocation10 + $0x80] sm:$0xf]  ;;  %v18013_v7 = vld [vmem:[#allocation10 + $0x38c] sm:$0xf0] }
 0x41f   :  { %v17762_v58 = vld [vmem:[#allocation5 + $0x143c] sm:$0xf]  ;;  %v13857_v12 = vor.u32 %v17634_v40, %v13854_v13  ;;  %10203 = vmatpush.bf16.msrb.mxu3 %v15013_v2  ;;  %6422 = vmatpush.bf16.msrb.mxu1 %v14881_v9  ;;  %v15253_v40 = vor.u32 %v17989_v36, %v15252_v34  ;;  %v6837_v2 = vsel %vm6836_vm9, %v19774_v24, %v6833_v56  ;;  %v17953_v13 = vld [vmem:[#allocation10 + $0x1ac] sm:$0xf0]  ;;  %v14948_v16 = vld [vmem:[#allocation10 + $0x60] sm:$0xf] }
 0x420   :  { %v14366_v23 = vld [vmem:[#allocation5 + $0x1478] sm:$0xf0]  ;;  %v6903_v28 = vrot.slane %v6837_v2, 5  ;;  %v17917_v9 = vld [vmem:[#allocation10 + $0x8c] sm:$0xf0]  ;;  %v15109_v55 = vor.u32 %v17953_v13, %v15108_v54 }
 0x421   :  { %v14369_v6 = vor.u32 %v17762_v58, %v14366_v23  ;;  %6396 = vmatpush.bf16.msrb.mxu2 %v13857_v12  ;;  %v15092_v58 = vld [vmem:[#allocation10 + $0x180] sm:$0xf]  ;;  %v17981_v12 = vld [vmem:[#allocation10 + $0x28c] sm:$0xf0] }
 0x422   :  { %v6923_v24 = vsel %vm6910_vm14, %v6902_v60, %v6903_v28  ;;  %v15093_v8 = vor.u32 %v17949_v14, %v15092_v58  ;;  %v15221_v44 = vor.u32 %v17981_v12, %v15220_v48  ;;  %v15204_v34 = vld [vmem:[#allocation10 + $0x260] sm:$0xf]  ;;  %v17977_v36 = vld [vmem:[#allocation10 + $0x26c] sm:$0xf0] }
 0x423   :  { %10216 = vmatpush.bf16.msra.mxu1 %v15141_v59  ;;  %10204 = vmatpush.bf16.msrb.mxu3 %v14997_v29  ;;  %v19807_v23 = vsel %vm6912_vm15, %v19723_v11, %v6923_v24  ;;  %v17913_v59 = vld [vmem:[#allocation10 + $0x6c] sm:$0xf0]  ;;  %v15076_v29 = vld [vmem:[#allocation10 + $0x160] sm:$0xf]  ;;  %v6138_v11 = vpop.f32.mrf.mxu1  ;;  %v15205_v54 = vor.u32 %v17977_v36, %v15204_v34 }
 0x424   :  { %6409 = vmatpush.bf16.msra.mxu0 %v14369_v6  ;;  %6397 = vmatmul.bf16.vlgmr.msrb.gmra.mxu2 %v19061_v30  ;;  %v14965_v30 = vor.u32 %v17917_v9, %v14964_v46  ;;  %v14949_v6 = vor.u32 %v17913_v59, %v14948_v16  ;;  %v6153_v20 = vpop.f32.mrf.mxu2  ;;  %v14932_v25 = vld [vmem:[#allocation10 + $0x40] sm:$0xf]  ;;  %v17973_v60 = vld [vmem:[#allocation10 + $0x24c] sm:$0xf0] }
 0x425   :  { %10229 = vmatpush.bf16.msra.mxu2 %v15269_v63  ;;  %v15348_v63 = vld [vmem:[#allocation10 + $0x380] sm:$0xf]  ;;  %v14933_v13 = vor.u32 %v17909_v4, %v14932_v25  ;;  %v17905_v46 = vld [vmem:[#allocation10 + $0x2c] sm:$0xf0] }
 0x426   :  { %v15349_v39 = vor.u32 %v18013_v7, %v15348_v63  ;;  %v15332_v52 = vld [vmem:[#allocation10 + $0x360] sm:$0xf]  ;;  %v18005_v3 = vld [vmem:[#allocation10 + $0x34c] sm:$0xf0] }
 0x427   :  { %10217 = vmatpush.bf16.msra.mxu1 %v15125_v57  ;;  %6410 = vmatmul.bf16.vlgmr.msra.gmra.mxu0 %v19063_v35  ;;  %v17945_v35 = vld [vmem:[#allocation10 + $0x16c] sm:$0xf0]  ;;  %v6164_v57 = vpop.f32.mrf.mxu0  ;;  %v15060_v2 = vld [vmem:[#allocation10 + $0x140] sm:$0xf]  ;;  %v15333_v28 = vor.u32 %v18009_v62, %v15332_v52 }
 0x428   :  { %10242 = vmatpush.bf16.msrb.mxu0 %v15397_v50  ;;  %10205 = vmatpush.bf16.msrb.mxu3 %v14981_v27  ;;  %v6125_v50 = vpop.f32.mrf.mxu3  ;;  %v15188_v5 = vld [vmem:[#allocation10 + $0x240] sm:$0xf]  ;;  %v15061_v1 = vor.u32 %v17941_v21, %v15060_v2  ;;  %v17937_v58 = vld [vmem:[#allocation10 + $0x12c] sm:$0xf0] }
 0x429   :  { %10230 = vmatpush.bf16.msra.mxu2 %v15253_v40  ;;  %v6126_v56 = vadd.f32 %v6125_v50, %v19772_v42  ;;  %v15077_v40 = vor.u32 %v17945_v35, %v15076_v29  ;;  %v15316_v9 = vld [vmem:[#allocation10 + $0x340] sm:$0xf]  ;;  %v15189_v24 = vor.u32 %v17973_v60, %v15188_v5  ;;  %v17969_v14 = vld [vmem:[#allocation10 + $0x22c] sm:$0xf0]  ;;  %v7100_v60 = vmax.f32 %v19632_v47, 0.0 }
 0x42a   :  { %v17901_v16 = vld [vmem:[#allocation10 + $0xc] sm:$0xf0]  ;;  %v15524_v59 = vld [vmem:[#allocation10 + $0x4e0] sm:$0xf] }
 0x42b   :  { %10218 = vmatpush.bf16.msra.mxu1 %v15109_v55  ;;  %v6139_v27 = vadd.f32 %v6138_v11, %v6126_v56  ;;  %v15044_v55 = vld [vmem:[#allocation10 + $0x120] sm:$0xf]  ;;  %v6140_v48 = vpop.f32.mrf.mxu1  ;;  %v18057_v63 = vld [vmem:[#allocation10 + $0x4ec] sm:$0xf0] }
 0x42c   :  { %10243 = vmatpush.bf16.msrb.mxu0 %v15381_v33  ;;  %10206 = vmatpush.bf16.msrb.mxu3 %v14965_v30  ;;  %v14916_v33 = vld [vmem:[#allocation10 + $0x20] sm:$0xf]  ;;  %v6177_v12 = vpop.f32.mrf.mxu2  ;;  %v15045_v29 = vor.u32 %v17937_v58, %v15044_v55  ;;  %v17933_v36 = vld [vmem:[#allocation10 + $0x10c] sm:$0xf0] }
 0x42d   :  { %10231 = vmatpush.bf16.msra.mxu2 %v15237_v26  ;;  %v19812_v42 = vadd.f32 %v19801_v51, %v6139_v27  ;;  %14897 = vmatmul.msk.bf16.vlgmr.msrb.gmra.mxu1 %vm4968_vm0, %v19057_v45  ;;  %v14917_v26 = vor.u32 %v17905_v46, %v14916_v33  ;;  %v15172_v30 = vld [vmem:[#allocation10 + $0x220] sm:$0xf]  ;;  %v15317_v51 = vor.u32 %v18005_v3, %v15316_v9  ;;  %v17965_v50 = vld [vmem:[#allocation10 + $0x20c] sm:$0xf0] }
 0x42e   :  { %v15300_v7 = vld [vmem:[#allocation10 + $0x320] sm:$0xf]  ;;  %v15173_v11 = vor.u32 %v17969_v14, %v15172_v30  ;;  %v18089_v56 = vld [vmem:[#allocation10 + $0x5ec] sm:$0xf0]  ;;  %v19817_v2 = vadd.f32 %v6177_v12, %v6164_v57  ;;  %v7102_v14 = vmax.f32 %v19638_v10, 0.0 }
 0x42f   :  { %10219 = vmatpush.bf16.msra.mxu1 %v15093_v8  ;;  %v18001_v8 = vld [vmem:[#allocation10 + $0x32c] sm:$0xf0]  ;;  %v15028_v35 = vld [vmem:[#allocation10 + $0x100] sm:$0xf] }
 0x430   :  { %10244 = vmatpush.bf16.msrb.mxu0 %v15365_v17  ;;  %10207 = vmatpush.bf16.msrb.mxu3 %v14949_v6  ;;  %v14900_v17 = vld [vmem:[#allocation10] sm:$0xf]  ;;  %v6127_v45 = vpop.f32.mrf.mxu3  ;;  %v7099_v6 = vmax.f32 %v19625_v43, 0.0  ;;  %v15301_v25 = vor.u32 %v18001_v8, %v15300_v7  ;;  %v18121_v62 = vld [vmem:[#allocation10 + $0x6ec] sm:$0xf0]  ;;  %v15029_v43 = vor.u32 %v17933_v36, %v15028_v35 }
 0x431   :  { %10232 = vmatpush.bf16.msra.mxu2 %v15221_v44  ;;  %v6166_v44 = vpop.f32.mrf.mxu0  ;;  %v14901_v34 = vor.u32 %v17901_v16, %v14900_v17  ;;  %v15156_v20 = vld [vmem:[#allocation10 + $0x200] sm:$0xf]  ;;  %v18153_v33 = vld [vmem:[#allocation10 + $0x7ec] sm:$0xf0] }
 0x432   :  { %v15652_v4 = vld [vmem:[#allocation10 + $0x5e0] sm:$0xf]  ;;  %v15157_v21 = vor.u32 %v17965_v50, %v15156_v20  ;;  %v19820_v9 = vpack.c.bf16 %v7099_v6, %v7099_v6  ;;  %v18085_v55 = vld [vmem:[#allocation10 + $0x5cc] sm:$0xf0] }
 0x433   :  { %10220 = vmatpush.bf16.msra.mxu1 %v15077_v40  ;;  %v15780_v52 = vld [vmem:[#allocation10 + $0x6e0] sm:$0xf]  ;;  %v15653_v5 = vor.u32 %v18089_v56, %v15652_v4  ;;  %v18117_v30 = vld [vmem:[#allocation10 + $0x6cc] sm:$0xf0] }
 0x434   :  { %10245 = vmatpush.bf16.msrb.mxu0 %v15349_v39  ;;  %10208 = vmatpush.bf16.msrb.mxu3 %v14933_v13  ;;  %v15525_v39 = vor.u32 %v18057_v63, %v15524_v59  ;;  %v15508_v40 = vld [vmem:[#allocation10 + $0x4c0] sm:$0xf]  ;;  %v17997_v13 = vld [vmem:[#allocation10 + $0x30c] sm:$0xf0]  ;;  %v6179_v46 = vpop.f32.mrf.mxu2  ;;  %v15781_v3 = vor.u32 %v18121_v62, %v15780_v52 }
 0x435   :  { %10233 = vmatpush.bf16.msra.mxu2 %v15205_v54  ;;  %v18053_v54 = vld [vmem:[#allocation10 + $0x4cc] sm:$0xf0]  ;;  %v15284_v27 = vld [vmem:[#allocation10 + $0x300] sm:$0xf] }
 0x436   :  { %v15509_v57 = vor.u32 %v18053_v54, %v15508_v40  ;;  %v15764_v58 = vld [vmem:[#allocation10 + $0x6c0] sm:$0xf]  ;;  %v18049_v12 = vld [vmem:[#allocation10 + $0x4ac] sm:$0xf0] }
 0x437   :  { %10221 = vmatpush.bf16.msra.mxu1 %v15061_v1  ;;  %v7101_v1 = vmax.f32 %v19635_v41, 0.0  ;;  %v15492_v48 = vld [vmem:[#allocation10 + $0x4a0] sm:$0xf]  ;;  %v18149_v41 = vld [vmem:[#allocation10 + $0x7cc] sm:$0xf0]  ;;  %v15765_v45 = vor.u32 %v18117_v30, %v15764_v58  ;;  %v6203_v58 = vpop.f32.mrf.mxu1 }
 0x438   :  { %10246 = vmatpush.bf16.msrb.mxu0 %v15333_v28  ;;  %10209 = vmatpush.bf16.msrb.mxu3 %v14917_v26  ;;  %v15908_v28 = vld [vmem:[#allocation10 + $0x7e0] sm:$0xf]  ;;  %v15285_v26 = vor.u32 %v17997_v13, %v15284_v27  ;;  %v18081_v7 = vld [vmem:[#allocation10 + $0x5ac] sm:$0xf0]  ;;  %v15493_v10 = vor.u32 %v18049_v12, %v15492_v48 }
 0x439   :  { %10234 = vmatpush.bf16.msra.mxu2 %v15189_v24  ;;  %v15636_v24 = vld [vmem:[#allocation10 + $0x5c0] sm:$0xf]  ;;  %v15909_v47 = vor.u32 %v18153_v33, %v15908_v28  ;;  %v19827_v59 = vpack.c.bf16 %v7101_v1, %v7101_v1  ;;  %v18113_v44 = vld [vmem:[#allocation10 + $0x6ac] sm:$0xf0]  ;;  %v6190_v28 = vpop.f32.mrf.mxu3 }
 0x43a   :  { %v15637_v17 = vor.u32 %v18085_v55, %v15636_v24  ;;  %v15892_v16 = vld [vmem:[#allocation10 + $0x7c0] sm:$0xf]  ;;  %v18045_v35 = vld [vmem:[#allocation10 + $0x48c] sm:$0xf0]  ;;  %v6191_v1 = vadd.f32 %v6190_v28, %v19817_v2 }
 0x43b   :  { %10222 = vmatpush.bf16.msra.mxu1 %v15045_v29  ;;  %v15620_v63 = vld [vmem:[#allocation10 + $0x5a0] sm:$0xf]  ;;  %v19831_v29 = vpack.c.bf16 %v7102_v14, %v7102_v14  ;;  %v18145_v20 = vld [vmem:[#allocation10 + $0x7ac] sm:$0xf0] }
 0x43c   :  { %10247 = vmatpush.bf16.msrb.mxu0 %v15317_v51  ;;  %10210 = vmatpush.bf16.msrb.mxu3 %v14901_v34  ;;  %v19825_v51 = vpack.c.bf16 %v7100_v60, %v7100_v60  ;;  %v15748_v8 = vld [vmem:[#allocation10 + $0x6a0] sm:$0xf]  ;;  %v15621_v34 = vor.u32 %v18081_v7, %v15620_v63  ;;  %v18109_v52 = vld [vmem:[#allocation10 + $0x68c] sm:$0xf0]  ;;  %v6204_v12 = vadd.f32 %v6203_v58, %v6191_v1  ;;  %v7103_v1 = vmax.f32 %v19645_v38, 0.0 }
 0x43d   :  { %10235 = vmatpush.bf16.msra.mxu2 %v15173_v11  ;;  %v15893_v11 = vor.u32 %v18149_v41, %v15892_v16  ;;  %v15476_v6 = vld [vmem:[#allocation10 + $0x480] sm:$0xf]  ;;  %v15749_v50 = vor.u32 %v18113_v44, %v15748_v8  ;;  %v18041_v54 = vld [vmem:[#allocation10 + $0x46c] sm:$0xf0]  ;;  %v7106_v38 = vmax.f32 %v19605_v18, 0.0 }
 0x43e   :  { %v15876_v36 = vld [vmem:[#allocation10 + $0x7a0] sm:$0xf]  ;;  %v15477_v4 = vor.u32 %v18045_v35, %v15476_v6  ;;  %v18141_v13 = vld [vmem:[#allocation10 + $0x78c] sm:$0xf0] }
 0x43f   :  { %10211 = vmatmul.bf16.vlgmr.msrb.gmra.mxu3 %v19820_v9  ;;  %10223 = vmatpush.bf16.msra.mxu1 %v15029_v43  ;;  %v15732_v56 = vld [vmem:[#allocation10 + $0x680] sm:$0xf]  ;;  %v15877_v62 = vor.u32 %v18145_v20, %v15876_v36  ;;  %v18073_v60 = vld [vmem:[#allocation10 + $0x56c] sm:$0xf0] }
 0x440   :  { %10255 = vmatpush.bf16.msra.mxu3 %v15525_v39  ;;  %10248 = vmatpush.bf16.msrb.mxu0 %v15301_v25  ;;  %v15604_v39 = vld [vmem:[#allocation10 + $0x580] sm:$0xf]  ;;  %v18077_v25 = vld [vmem:[#allocation10 + $0x58c] sm:$0xf0] }
 0x441   :  { %10236 = vmatpush.bf16.msra.mxu2 %v15157_v21  ;;  %v15460_v40 = vld [vmem:[#allocation10 + $0x460] sm:$0xf]  ;;  %v15605_v43 = vor.u32 %v18077_v25, %v15604_v39  ;;  %v15733_v21 = vor.u32 %v18109_v52, %v15732_v56  ;;  %v18137_v14 = vld [vmem:[#allocation10 + $0x76c] sm:$0xf0] }
 0x442   :  { %10224 = vmatmul.bf16.vlgmr.msra.gmra.mxu1 %v19825_v51  ;;  %v15860_v27 = vld [vmem:[#allocation10 + $0x780] sm:$0xf]  ;;  %v15461_v33 = vor.u32 %v18041_v54, %v15460_v40  ;;  %v18069_v16 = vld [vmem:[#allocation10 + $0x54c] sm:$0xf0] }
 0x443   :  { %10268 = vmatpush.bf16.msrb.mxu1 %v15653_v5  ;;  %v15588_v5 = vld [vmem:[#allocation10 + $0x560] sm:$0xf]  ;;  %v15861_v24 = vor.u32 %v18141_v13, %v15860_v27  ;;  %v18101_v63 = vld [vmem:[#allocation10 + $0x64c] sm:$0xf0] }
 0x444   :  { %10256 = vmatpush.bf16.msra.mxu3 %v15509_v57  ;;  %10249 = vmatpush.bf16.msrb.mxu0 %v15285_v26  ;;  %v15716_v46 = vld [vmem:[#allocation10 + $0x660] sm:$0xf]  ;;  %v6216_v57 = vpop.f32.mrf.mxu0  ;;  %v18037_v26 = vld [vmem:[#allocation10 + $0x44c] sm:$0xf0]  ;;  %v15589_v30 = vor.u32 %v18073_v60, %v15588_v5 }
 0x445   :  { %10281 = vmatpush.bf16.msrb.mxu2 %v15781_v3  ;;  %v18105_v3 = vld [vmem:[#allocation10 + $0x66c] sm:$0xf0]  ;;  %v15444_v55 = vld [vmem:[#allocation10 + $0x440] sm:$0xf]  ;;  %v6217_v7 = vadd.f32 %v6216_v57, %v6204_v12 }
 0x446   :  { %10237 = vmatmul.bf16.vlgmr.msra.gmra.mxu2 %v19827_v59  ;;  %v15717_v48 = vor.u32 %v18105_v3, %v15716_v46  ;;  %v15445_v41 = vor.u32 %v18037_v26, %v15444_v55  ;;  %v18033_v8 = vld [vmem:[#allocation10 + $0x42c] sm:$0xf0]  ;;  %v15556_v36 = vld [vmem:[#allocation10 + $0x520] sm:$0xf] }
 0x447   :  { %10269 = vmatpush.bf16.msrb.mxu1 %v15637_v17  ;;  %10250 = vmatmul.bf16.vlgmr.msrb.gmra.mxu0 %v19831_v29  ;;  %v15572_v17 = vld [vmem:[#allocation10 + $0x540] sm:$0xf]  ;;  %v18133_v6 = vld [vmem:[#allocation10 + $0x74c] sm:$0xf0] }
 0x448   :  { %10294 = vmatpush.bf16.msra.mxu0 %v15909_v47  ;;  %10257 = vmatpush.bf16.msra.mxu3 %v15493_v10  ;;  %v15844_v47 = vld [vmem:[#allocation10 + $0x760] sm:$0xf]  ;;  %v15573_v44 = vor.u32 %v18069_v16, %v15572_v17  ;;  %v18065_v20 = vld [vmem:[#allocation10 + $0x52c] sm:$0xf0]  ;;  %v19840_v17 = vpack.c.bf16 %v7103_v1, %v7103_v1 }
 0x449   :  { %10282 = vmatpush.bf16.msrb.mxu2 %v15765_v45  ;;  %v15700_v45 = vld [vmem:[#allocation10 + $0x640] sm:$0xf]  ;;  %v15845_v2 = vor.u32 %v18137_v14, %v15844_v47  ;;  %v18097_v56 = vld [vmem:[#allocation10 + $0x62c] sm:$0xf0]  ;;  %v15557_v27 = vor.u32 %v18065_v20, %v15556_v36 }
 0x44a   :  { %v15428_v10 = vld [vmem:[#allocation10 + $0x420] sm:$0xf]  ;;  %v15701_v35 = vor.u32 %v18101_v63, %v15700_v45  ;;  %v18029_v54 = vld [vmem:[#allocation10 + $0x40c] sm:$0xf0] }
 0x44b   :  { %10270 = vmatpush.bf16.msrb.mxu1 %v15621_v34  ;;  %v6229_v34 = vpop.f32.mrf.mxu2  ;;  %v15429_v39 = vor.u32 %v18033_v8, %v15428_v10  ;;  %v15412_v40 = vld [vmem:[#allocation10 + $0x400] sm:$0xf]  ;;  %v18061_v28 = vld [vmem:[#allocation10 + $0x50c] sm:$0xf0] }
 0x44c   :  { %10295 = vmatpush.bf16.msra.mxu0 %v15893_v11  ;;  %10258 = vmatpush.bf16.msra.mxu3 %v15477_v4  ;;  %v15828_v11 = vld [vmem:[#allocation10 + $0x740] sm:$0xf]  ;;  %v6230_v25 = vadd.f32 %v6229_v34, %v6217_v7  ;;  %v6218_v52 = vpop.f32.mrf.mxu0  ;;  %v18093_v3 = vld [vmem:[#allocation10 + $0x60c] sm:$0xf0] }
 0x44d   :  { %10283 = vmatpush.bf16.msrb.mxu2 %v15749_v50  ;;  %v6192_v50 = vpop.f32.mrf.mxu3  ;;  %v15684_v4 = vld [vmem:[#allocation10 + $0x620] sm:$0xf]  ;;  %v18125_v26 = vld [vmem:[#allocation10 + $0x70c] sm:$0xf0] }
 0x44e   :  { %v15812_v13 = vld [vmem:[#allocation10 + $0x720] sm:$0xf]  ;;  %v15685_v5 = vor.u32 %v18097_v56, %v15684_v4  ;;  %v6500_v50 = vrot.slane %v19812_v42, 4 }
 0x44f   :  { %10271 = vmatpush.bf16.msrb.mxu1 %v15605_v43  ;;  %v6205_v43 = vpop.f32.mrf.mxu1  ;;  %v15540_v60 = vld [vmem:[#allocation10 + $0x500] sm:$0xf] }
 0x450   :  { %10296 = vmatpush.bf16.msra.mxu0 %v15877_v62  ;;  %10259 = vmatpush.bf16.msra.mxu3 %v15461_v33  ;;  %v15829_v62 = vor.u32 %v18133_v6, %v15828_v11  ;;  %v15413_v33 = vor.u32 %v18029_v54, %v15412_v40  ;;  %v15668_v46 = vld [vmem:[#allocation10 + $0x600] sm:$0xf] }
 0x451   :  { %10284 = vmatpush.bf16.msrb.mxu2 %v15733_v21  ;;  %v18129_v21 = vld [vmem:[#allocation10 + $0x72c] sm:$0xf0]  ;;  %v15796_v55 = vld [vmem:[#allocation10 + $0x700] sm:$0xf]  ;;  %v15669_v58 = vor.u32 %v18093_v3, %v15668_v46 }
 0x452   :  { %v15813_v57 = vor.u32 %v18129_v21, %v15812_v13  ;;  %v15797_v16 = vor.u32 %v18125_v26, %v15796_v55 }
 0x453   :  { %10272 = vmatpush.bf16.msrb.mxu1 %v15589_v30  ;;  %v7104_v30 = vmax.f32 %v19655_v0, 0.0  ;;  %v6231_v47 = vpop.f32.mrf.mxu2 }
 0x454   :  { %10297 = vmatpush.bf16.msra.mxu0 %v15861_v24  ;;  %10260 = vmatpush.bf16.msra.mxu3 %v15445_v41  ;;  %v15541_v24 = vor.u32 %v18061_v28, %v15540_v60  ;;  %v6281_v63 = vpop.f32.mrf.mxu0 }
 0x455   :  { %10285 = vmatpush.bf16.msrb.mxu2 %v15717_v48  ;;  %v6242_v14 = vpop.f32.mrf.mxu3  ;;  %v7105_v48 = vmax.f32 %v19657_v22, 0.0  ;;  %v19844_v41 = vpack.c.bf16 %v7104_v30, %v7104_v30  ;;  %v19849_v22 = vpack.c.bf16 %v7106_v38, %v7106_v38 }
 0x456   :  { %v19838_v12 = vadd.f32 %v6242_v14, %v6230_v25 }
 0x457   :  { %10273 = vmatpush.bf16.msrb.mxu1 %v15573_v44  ;;  %v19846_v0 = vpack.c.bf16 %v7105_v48, %v7105_v48  ;;  %v6255_v18 = vpop.f32.mrf.mxu1 }
 0x458   :  { %10298 = vmatpush.bf16.msra.mxu0 %v15845_v2  ;;  %10261 = vmatpush.bf16.msra.mxu3 %v15429_v39  ;;  %v6552_v39 = vmul.f32 %v19812_v42, %v19812_v42  ;;  %v6506_v25 = vrot.slane %v19838_v12, 4  ;;  %v6553_v4 = vmul.f32 %v19838_v12, %v19838_v12 }
 0x459   :  { %10286 = vmatpush.bf16.msrb.mxu2 %v15701_v35 }
 0x45a   :  { %v6628_v40 = vrot.slane %v6552_v39, 4  ;;  %v6507_v43 = vadd.f32 %v6506_v25, %v19838_v12 }
 0x45b   :  { %10274 = vmatpush.bf16.msrb.mxu1 %v15557_v27  ;;  %v6294_v7 = vpop.f32.mrf.mxu2  ;;  %v6634_v27 = vrot.slane %v6553_v4, 4 }
 0x45c   :  { %10299 = vmatpush.bf16.msra.mxu0 %v15829_v62  ;;  %10262 = vmatpush.bf16.msra.mxu3 %v15413_v33  ;;  %v6283_v10 = vpop.f32.mrf.mxu0  ;;  %v6501_v62 = vadd.f32 %v6500_v50, %v19812_v42  ;;  %v6629_v33 = vadd.f32 %v6628_v40, %v6552_v39  ;;  %v6508_v3 = vrot.slane %v6507_v43, 2 }
 0x45d   :  { %10287 = vmatpush.bf16.msrb.mxu2 %v15685_v5  ;;  %v6244_v45 = vpop.f32.mrf.mxu3 }
 0x45e   :  { %v6502_v28 = vrot.slane %v6501_v62, 2  ;;  %v6630_v47 = vrot.slane %v6629_v33, 2  ;;  %v6509_v14 = vadd.f32 %v6508_v3, %v6507_v43 }
 0x45f   :  { %10275 = vmatpush.bf16.msrb.mxu1 %v15541_v24  ;;  %10263 = vmatmul.bf16.vlgmr.msra.gmra.mxu3 %v19840_v17  ;;  %v6257_v8 = vpop.f32.mrf.mxu1 }
 0x460   :  { %10300 = vmatpush.bf16.msra.mxu0 %v15813_v57  ;;  %v6635_v57 = vadd.f32 %v6634_v27, %v6553_v4  ;;  %v6503_v30 = vadd.f32 %v6502_v28, %v6501_v62 }
 0x461   :  { %10288 = vmatpush.bf16.msrb.mxu2 %v15669_v58 }
 0x462   :  { %10276 = vmatmul.bf16.vlgmr.msrb.gmra.mxu1 %v19844_v41  ;;  %v6636_v48 = vrot.slane %v6635_v57, 2 }
 0x463   :  { %v6296_v11 = vpop.f32.mrf.mxu2 }
 0x464   :  { %10301 = vmatpush.bf16.msra.mxu0 %v15797_v16  ;;  %10289 = vmatmul.bf16.vlgmr.msrb.gmra.mxu2 %v19846_v0  ;;  %v6333_v6 = vpop.f32.mrf.mxu0  ;;  %v6637_v10 = vadd.f32 %v6636_v48, %v6635_v57 }
 0x465   :  { %v6268_v2 = vpop.f32.mrf.mxu3 }
 0x466   :  { %v6269_v35 = vadd.f32 %v6268_v2, %v6255_v18  ;;  %v6504_v18 = vrot.slane %v6503_v30, 1  ;;  %v6631_v2 = vadd.f32 %v6630_v47, %v6629_v33 }
 0x467   :  { %10302 = vmatmul.bf16.vlgmr.msra.gmra.mxu0 %v19849_v22 }
 0x468   :  { %v6282_v36 = vadd.f32 %v6281_v63, %v6269_v35  ;;  %v6307_v20 = vpop.f32.mrf.mxu1  ;;  %v6505_v11 = vadd.f32 %v6504_v18, %v6503_v30  ;;  %v18217_v18 = vld [vmem:[#allocation10 + $0x9ec] sm:$0xf0] }
 0x46a   :  { %v6295_v56 = vadd.f32 %v6294_v7, %v6282_v36  ;;  %v6510_v7 = vrot.slane %v6509_v14, 1  ;;  %v19867_v50 = vmul.f32 0.125, %v6505_v11  ;;  %v18281_v11 = vld [vmem:[#allocation10 + $0xbec] sm:$0xf0] }
 0x46c   :  { %v6335_v34 = vpop.f32.mrf.mxu0  ;;  %v6308_v52 = vadd.f32 %v6307_v20, %v6295_v56  ;;  %v6511_v35 = vadd.f32 %v6510_v7, %v6509_v14  ;;  %v18249_v7 = vld [vmem:[#allocation10 + $0xaec] sm:$0xf0] }
 0x46d   :  { %v6270_v44 = vpop.f32.mrf.mxu3  ;;  %v6638_v34 = vrot.slane %v6637_v10, 1 }
 0x46e   :  { %v19869_v25 = vmul.f32 0.125, %v6511_v35 }
 0x46f   :  { %v6639_v4 = vadd.f32 %v6638_v34, %v6637_v10 }
 0x470   :  { %v6309_v60 = vpop.f32.mrf.mxu1  ;;  %v6346_v46 = vpop.f32.mrf.mxu2  ;;  %v6681_v27 = vmul.f32 %v19869_v25, %v19869_v25 }
 0x471   :  { %v6665_v43 = vmul.f32 0.125, %v6639_v4 }
 0x473   :  { %v6697_v3 = vsub.f32 %v6665_v43, %v6681_v27  ;;  %v18245_v27 = vld [vmem:[#allocation10 + $0xacc] sm:$0xf0] }
 0x474   :  { %v6359_v21 = vpop.f32.mrf.mxu0 }
 0x475   :  { %v6320_v54 = vpop.f32.mrf.mxu3  ;;  %v6360_v28 = vadd.f32 %v6359_v21, %v6346_v46  ;;  %v19881_v14 = vadd.f32 1e-05, %v6697_v3  ;;  %v16164_v21 = vld [vmem:[#allocation10 + $0x9e0] sm:$0xf] }
 0x476   :  { %v6321_v13 = vadd.f32 %v6320_v54, %v6308_v52  ;;  %v6680_v54 = vmul.f32 %v19867_v50, %v19867_v50  ;;  %v16165_v10 = vor.u32 %v18217_v18, %v16164_v21  ;;  %v16388_v18 = vld [vmem:[#allocation10 + $0xba0] sm:$0xf] }
 0x477   :  { %vm6854_vm1 = vweird.f32 %v19881_v14 }
 0x478   :  { %v19861_v5 = vadd.f32 %v6333_v6, %v6321_v13  ;;  %v6348_v63 = vpop.f32.mrf.mxu2  ;;  %v6632_v6 = vrot.slane %v6631_v2, 1  ;;  %10320 = vmatpush.bf16.msra.mxu1 %v16165_v10 }
 0x47a   :  { %v6512_v1 = vrot.slane %v19861_v5, 4  ;;  %v6554_v24 = vmul.f32 %v19861_v5, %v19861_v5  ;;  %v6633_v39 = vadd.f32 %v6632_v6, %v6631_v2  ;;  %v16292_v2 = vld [vmem:[#allocation10 + $0xae0] sm:$0xf] }
 0x47c   :  { %v6513_v55 = vadd.f32 %v6512_v1, %v19861_v5  ;;  %v6640_v26 = vrot.slane %v6554_v24, 4  ;;  %v6361_v45 = vpop.f32.mrf.mxu0  ;;  %v6664_v40 = vmul.f32 0.125, %v6633_v39  ;;  %v18181_v39 = vld [vmem:[#allocation10 + $0x8cc] sm:$0xf0] }
 0x47d   :  { %v6322_v58 = vpop.f32.mrf.mxu3  ;;  %v18185_v45 = vld [vmem:[#allocation10 + $0x8ec] sm:$0xf0] }
 0x47e   :  { %v6514_v16 = vrot.slane %v6513_v55, 2  ;;  %v6641_v38 = vadd.f32 %v6640_v26, %v6554_v24  ;;  %v6696_v33 = vsub.f32 %v6664_v40, %v6680_v54  ;;  %v16276_v40 = vld [vmem:[#allocation10 + $0xac0] sm:$0xf] }
 0x480   :  { %v6515_v8 = vadd.f32 %v6514_v16, %v6513_v55  ;;  %v6642_v44 = vrot.slane %v6641_v38, 2  ;;  %v19879_v47 = vadd.f32 1e-05, %v6696_v33 }
 0x482   :  { %v6516_v36 = vrot.slane %v6515_v8, 1  ;;  %v6643_v20 = vadd.f32 %v6642_v44, %v6641_v38  ;;  %v16036_v38 = vld [vmem:[#allocation10 + $0x8e0] sm:$0xf]  ;;  %18498 = vrsqrt.f32 %v19879_v47  ;;  %vm6844_vm10 = vweird.f32 %v19879_v47 }
 0x483   :  { %v16037_v63 = vor.u32 %v18185_v45, %v16036_v38  ;;  %v16420_v44 = vld [vmem:[#allocation10 + $0xbe0] sm:$0xf]  ;;  %18500 = vrsqrt.f32 %v19881_v14  ;;  %v18209_v38 = vld [vmem:[#allocation10 + $0x9ac] sm:$0xf0] }
 0x484   :  { %v6517_v56 = vadd.f32 %v6516_v36, %v6515_v8  ;;  %v6644_v52 = vrot.slane %v6643_v20, 1  ;;  %v16293_v8 = vor.u32 %v18249_v7, %v16292_v2  ;;  %v16421_v35 = vor.u32 %v18281_v11, %v16420_v44  ;;  %v16260_v45 = vld [vmem:[#allocation10 + $0xaa0] sm:$0xf]  ;;  %v18273_v2 = vld [vmem:[#allocation10 + $0xbac] sm:$0xf0] }
 0x485   :  { %10307 = vmatpush.bf16.msrb.mxu3 %v16037_v63  ;;  %v18241_v63 = vld [vmem:[#allocation10 + $0xaac] sm:$0xf0]  ;;  %v16389_v44 = vor.u32 %v18273_v2, %v16388_v18  ;;  %v16228_v18 = vld [vmem:[#allocation10 + $0xa60] sm:$0xf] }
 0x486   :  { %v19875_v13 = vmul.f32 0.125, %v6517_v56  ;;  %v6645_v60 = vadd.f32 %v6644_v52, %v6643_v20  ;;  %10333 = vmatpush.bf16.msra.mxu2 %v16293_v8  ;;  %v16020_v20 = vld [vmem:[#allocation10 + $0x8c0] sm:$0xf]  ;;  %10346 = vmatpush.bf16.msrb.mxu0 %v16421_v35  ;;  %v16261_v8 = vor.u32 %v18241_v63, %v16260_v45  ;;  %v18173_v35 = vld [vmem:[#allocation10 + $0x88c] sm:$0xf0] }
 0x487   :  { %v16021_v56 = vor.u32 %v18181_v39, %v16020_v20  ;;  %v16148_v52 = vld [vmem:[#allocation10 + $0x9c0] sm:$0xf]  ;;  %v18201_v63 = vld [vmem:[#allocation10 + $0x96c] sm:$0xf0] }
 0x488   :  { %v6666_v24 = vmul.f32 0.125, %v6645_v60  ;;  %v6682_v55 = vmul.f32 %v19875_v13, %v19875_v13  ;;  %v16404_v60 = vld [vmem:[#allocation10 + $0xbc0] sm:$0xf] }
 0x489   :  { %10308 = vmatpush.bf16.msrb.mxu3 %v16021_v56 }
 0x48a   :  { %v6698_v16 = vsub.f32 %v6666_v24, %v6682_v55  ;;  %v16004_v24 = vld [vmem:[#allocation10 + $0x8a0] sm:$0xf]  ;;  %v18177_v55 = vld [vmem:[#allocation10 + $0x8ac] sm:$0xf0] }
 0x48c   :  { %v19885_v34 = vadd.f32 1e-05, %v6698_v16  ;;  %v16005_v16 = vor.u32 %v18177_v55, %v16004_v24 }
 0x48e   :  { %18502 = vrsqrt.f32 %v19885_v34  ;;  %10309 = vmatpush.bf16.msrb.mxu3 %v16005_v16  ;;  %vm6864_vm8 = vweird.f32 %v19885_v34 }
 0x499   :  { %v6372_v62 = vpop.f32.mrf.mxu1 }
 0x49a   :  { %v6373_v57 = vadd.f32 %v6372_v62, %v6360_v28  ;;  %v18213_v62 = vld [vmem:[#allocation10 + $0x9cc] sm:$0xf0] }
 0x49b   :  { %v16149_v43 = vor.u32 %v18213_v62, %v16148_v52  ;;  %v18277_v28 = vld [vmem:[#allocation10 + $0xbcc] sm:$0xf0]  ;;  %v16244_v62 = vld [vmem:[#allocation10 + $0xa80] sm:$0xf] }
 0x49c   :  { %v18205_v52 = vld [vmem:[#allocation10 + $0x98c] sm:$0xf0] }
 0x49d   :  { %10321 = vmatpush.bf16.msra.mxu1 %v16149_v43  ;;  %v18237_v43 = vld [vmem:[#allocation10 + $0xa8c] sm:$0xf0] }
 0x4a1   :  { %v6385_v1 = vpop.f32.mrf.mxu3  ;;  %v6374_v30 = vpop.f32.mrf.mxu1 }
 0x4a2   :  { %v6386_v58 = vadd.f32 %v6385_v1, %v6373_v57  ;;  %v16277_v57 = vor.u32 %v18245_v27, %v16276_v40  ;;  %v16405_v1 = vor.u32 %v18277_v28, %v16404_v60  ;;  %v16372_v27 = vld [vmem:[#allocation10 + $0xb80] sm:$0xf]  ;;  %v18269_v60 = vld [vmem:[#allocation10 + $0xb8c] sm:$0xf0] }
 0x4a3   :  { %v16373_v24 = vor.u32 %v18269_v60, %v16372_v27 }
 0x4a4   :  { %v6411_v26 = vpop.f32.mrf.mxu0  ;;  %10334 = vmatpush.bf16.msra.mxu2 %v16277_v57  ;;  %10347 = vmatpush.bf16.msrb.mxu0 %v16405_v1  ;;  %v16245_v1 = vor.u32 %v18237_v43, %v16244_v62  ;;  %v18197_v43 = vld [vmem:[#allocation10 + $0x94c] sm:$0xf0] }
 0x4a7   :  { %v6398_v48 = vpop.f32.mrf.mxu2 }
 0x4a8   :  { %v6399_v46 = vadd.f32 %v6398_v48, %v6386_v58  ;;  %v19889_v58 = vpop.eup %18498  ;;  %10335 = vmatpush.bf16.msra.mxu2 %v16261_v8  ;;  %10348 = vmatpush.bf16.msrb.mxu0 %v16389_v44  ;;  %v16356_v8 = vld [vmem:[#allocation10 + $0xb60] sm:$0xf]  ;;  %v18265_v44 = vld [vmem:[#allocation10 + $0xb6c] sm:$0xf0] }
 0x4a9   :  { %v6387_v6 = vpop.f32.mrf.mxu3  ;;  %v19895_v21 = vpop.eup %18500  ;;  %v6839_v11 = vmul.f32 %v19889_v58, %v19879_v47  ;;  %vm6845_vm0 = vweird.f32 %v19889_v58 }
 0x4aa   :  { %v6412_v4 = vadd.f32 %v6411_v26, %v6399_v46  ;;  %v6424_v54 = vpop.f32.mrf.mxu1  ;;  %v16132_v26 = vld [vmem:[#allocation10 + $0x9a0] sm:$0xf]  ;;  %v6849_v20 = vmul.f32 %v19895_v21, %v19881_v14  ;;  %v19902_v28 = vpop.eup %18502  ;;  %vm19924_vm12 = vmor %vm6844_vm10, %vm6845_vm0  ;;  %vm6855_vm13 = vweird.f32 %v19895_v21 }
 0x4ab   :  { %v16133_v46 = vor.u32 %v18209_v38, %v16132_v26  ;;  %v15988_v6 = vld [vmem:[#allocation10 + $0x880] sm:$0xf]  ;;  %v6840_v55 = vmul.f32 %v19889_v58, %v6839_v11  ;;  %v6859_v2 = vmul.f32 %v19902_v28, %v19885_v34  ;;  %vm19952_vm5 = vmor %vm6854_vm1, %vm6855_vm13  ;;  %vm6865_vm6 = vweird.f32 %v19902_v28 }
 0x4ac   :  { %v6413_v36 = vpop.f32.mrf.mxu0  ;;  %v19887_v33 = vadd.f32 %v6424_v54, %v6412_v4  ;;  %v15989_v56 = vor.u32 %v18173_v35, %v15988_v6  ;;  %v15972_v26 = vld [vmem:[#allocation10 + $0x860] sm:$0xf]  ;;  %v6850_v16 = vmul.f32 %v19895_v21, %v6849_v20  ;;  %10336 = vmatpush.bf16.msra.mxu2 %v16245_v1  ;;  %10349 = vmatpush.bf16.msrb.mxu0 %v16373_v24  ;;  %vm19966_vm0 = vmor %vm6864_vm8, %vm6865_vm6 }
 0x4ad   :  { %10322 = vmatpush.bf16.msra.mxu1 %v16133_v46  ;;  %v16116_v36 = vld [vmem:[#allocation10 + $0x980] sm:$0xf]  ;;  %v19908_v20 = vmul.f32 0.5, %v6840_v55  ;;  %v6860_v24 = vmul.f32 %v19902_v28, %v6859_v2 }
 0x4ae   :  { %v6518_v30 = vrot.slane %v19887_v33, 4  ;;  %v6555_v48 = vmul.f32 %v19887_v33, %v19887_v33  ;;  %v16117_v54 = vor.u32 %v18205_v52, %v16116_v36  ;;  %10310 = vmatpush.bf16.msrb.mxu3 %v15989_v56  ;;  %v16357_v36 = vor.u32 %v18265_v44, %v16356_v8  ;;  %v16340_v1 = vld [vmem:[#allocation10 + $0xb40] sm:$0xf]  ;;  %v18225_v44 = vld [vmem:[#allocation10 + $0xa2c] sm:$0xf0] }
 0x4af   :  { %v6400_v3 = vpop.f32.mrf.mxu2  ;;  %v19910_v56 = vmul.f32 0.5, %v6850_v16  ;;  %v16196_v8 = vld [vmem:[#allocation10 + $0xa20] sm:$0xf] }
 0x4b0   :  { %v6519_v7 = vadd.f32 %v6518_v30, %v19887_v33  ;;  %v6646_v10 = vrot.slane %v6555_v48, 4  ;;  %v18169_v30 = vld [vmem:[#allocation10 + $0x86c] sm:$0xf0]  ;;  %10350 = vmatpush.bf16.msrb.mxu0 %v16357_v36  ;;  %v16197_v36 = vor.u32 %v18225_v44, %v16196_v8 }
 0x4b1   :  { %10323 = vmatpush.bf16.msra.mxu1 %v16117_v54  ;;  %v15973_v46 = vor.u32 %v18169_v30, %v15972_v26  ;;  %v16084_v54 = vld [vmem:[#allocation10 + $0x940] sm:$0xf] }
 0x4b2   :  { %v6520_v39 = vrot.slane %v6519_v7, 2  ;;  %v6647_v4 = vadd.f32 %v6646_v10, %v6555_v48  ;;  %v6426_v40 = vpop.f32.mrf.mxu1  ;;  %v16100_v48 = vld [vmem:[#allocation10 + $0x960] sm:$0xf]  ;;  %v18233_v10 = vld [vmem:[#allocation10 + $0xa6c] sm:$0xf0]  ;;  %v16085_v60 = vor.u32 %v18197_v43, %v16084_v54  ;;  %v19929_v54 = vmul.f32 0.5, %v6860_v24 }
 0x4b3   :  { %10311 = vmatpush.bf16.msrb.mxu3 %v15973_v46  ;;  %v16229_v35 = vor.u32 %v18233_v10, %v16228_v18  ;;  %v16068_v46 = vld [vmem:[#allocation10 + $0x920] sm:$0xf]  ;;  %v18193_v10 = vld [vmem:[#allocation10 + $0x92c] sm:$0xf0] }
 0x4b4   :  { %v6521_v3 = vadd.f32 %v6520_v39, %v6519_v7  ;;  %v6648_v57 = vrot.slane %v6647_v4, 2  ;;  %v16101_v7 = vor.u32 %v18201_v63, %v16100_v48  ;;  %v15956_v39 = vld [vmem:[#allocation10 + $0x840] sm:$0xf]  ;;  %v18261_v48 = vld [vmem:[#allocation10 + $0xb4c] sm:$0xf0] }
 0x4b5   :  { %10337 = vmatpush.bf16.msra.mxu2 %v16229_v35  ;;  %v16341_v16 = vor.u32 %v18261_v48, %v16340_v1  ;;  %v16069_v35 = vor.u32 %v18193_v10, %v16068_v46  ;;  %v18189_v1 = vld [vmem:[#allocation10 + $0x90c] sm:$0xf0]  ;;  %v16548_v46 = vld [vmem:[#allocation10 + $0xce0] sm:$0xf] }
 0x4b6   :  { %v6522_v38 = vrot.slane %v6521_v3, 1  ;;  %v6649_v45 = vadd.f32 %v6648_v57, %v6647_v4  ;;  %10324 = vmatpush.bf16.msra.mxu1 %v16101_v7  ;;  %v18165_v4 = vld [vmem:[#allocation10 + $0x84c] sm:$0xf0] }
 0x4b7   :  { %v15957_v40 = vor.u32 %v18165_v4, %v15956_v39  ;;  %v18229_v57 = vld [vmem:[#allocation10 + $0xa4c] sm:$0xf0]  ;;  %10351 = vmatpush.bf16.msrb.mxu0 %v16341_v16  ;;  %v16324_v39 = vld [vmem:[#allocation10 + $0xb20] sm:$0xf] }
 0x4b8   :  { %v6523_v11 = vadd.f32 %v6522_v38, %v6521_v3  ;;  %v6650_v6 = vrot.slane %v6649_v45, 1  ;;  %v16212_v3 = vld [vmem:[#allocation10 + $0xa40] sm:$0xf]  ;;  %v18257_v4 = vld [vmem:[#allocation10 + $0xb2c] sm:$0xf0] }
 0x4b9   :  { %10312 = vmatpush.bf16.msrb.mxu3 %v15957_v40  ;;  %v16213_v30 = vor.u32 %v18229_v57, %v16212_v3  ;;  %v15940_v38 = vld [vmem:[#allocation10 + $0x820] sm:$0xf]  ;;  %v6852_v40 = vsub.f32 1.5, %v19910_v56  ;;  %v18345_v10 = vld [vmem:[#allocation10 + $0xdec] sm:$0xf0] }
 0x4ba   :  { %v19912_v52 = vmul.f32 0.125, %v6523_v11  ;;  %v6651_v62 = vadd.f32 %v6650_v6, %v6649_v45  ;;  %10325 = vmatpush.bf16.msra.mxu1 %v16085_v60  ;;  %v18161_v45 = vld [vmem:[#allocation10 + $0x82c] sm:$0xf0]  ;;  %v6842_v11 = vsub.f32 1.5, %v19908_v20  ;;  %v16325_v20 = vor.u32 %v18257_v4, %v16324_v39  ;;  %v16052_v3 = vld [vmem:[#allocation10 + $0x900] sm:$0xf] }
 0x4bb   :  { %10338 = vmatpush.bf16.msra.mxu2 %v16213_v30  ;;  %v15941_v2 = vor.u32 %v18161_v45, %v15940_v38  ;;  %v18157_v60 = vld [vmem:[#allocation10 + $0x80c] sm:$0xf0]  ;;  %v16053_v48 = vor.u32 %v18189_v1, %v16052_v3  ;;  %v16308_v38 = vld [vmem:[#allocation10 + $0xb00] sm:$0xf] }
 0x4bc   :  { %v6667_v55 = vmul.f32 0.125, %v6651_v62  ;;  %v6683_v26 = vmul.f32 %v19912_v52, %v19912_v52  ;;  %v6843_v56 = vmul.f32 %v19889_v58, %v6842_v11  ;;  %10352 = vmatpush.bf16.msrb.mxu0 %v16325_v20  ;;  %v18253_v45 = vld [vmem:[#allocation10 + $0xb0c] sm:$0xf0]  ;;  %v16932_v39 = vld [vmem:[#allocation10 + $0xfe0] sm:$0xf] }
 0x4bd   :  { %10313 = vmatpush.bf16.msrb.mxu3 %v15941_v2  ;;  %v16676_v2 = vld [vmem:[#allocation10 + $0xde0] sm:$0xf]  ;;  %v18309_v3 = vld [vmem:[#allocation10 + $0xccc] sm:$0xf0] }
 0x4be   :  { %v6699_v63 = vsub.f32 %v6667_v55, %v6683_v26  ;;  %10326 = vmatpush.bf16.msra.mxu1 %v16069_v35  ;;  %v16180_v55 = vld [vmem:[#allocation10 + $0xa00] sm:$0xf]  ;;  %v18221_v26 = vld [vmem:[#allocation10 + $0xa0c] sm:$0xf0]  ;;  %v16677_v44 = vor.u32 %v18345_v10, %v16676_v2 }
 0x4bf   :  { %v10225_v27 = vpop.f32.mrf.mxu1  ;;  %10339 = vmatpush.bf16.msra.mxu2 %v16197_v36  ;;  %v16181_v16 = vor.u32 %v18221_v26, %v16180_v55  ;;  %v16804_v35 = vld [vmem:[#allocation10 + $0xee0] sm:$0xf]  ;;  %v18377_v36 = vld [vmem:[#allocation10 + $0xeec] sm:$0xf0] }
 0x4c0   :  { %v19931_v43 = vadd.f32 1e-05, %v6699_v63  ;;  %v16309_v63 = vor.u32 %v18253_v45, %v16308_v38  ;;  %v16805_v20 = vor.u32 %v18377_v36, %v16804_v35  ;;  %v16660_v55 = vld [vmem:[#allocation10 + $0xdc0] sm:$0xf]  ;;  %v18373_v62 = vld [vmem:[#allocation10 + $0xecc] sm:$0xf0] }
 0x4c1   :  { %v16788_v26 = vld [vmem:[#allocation10 + $0xec0] sm:$0xf]  ;;  %v18305_v2 = vld [vmem:[#allocation10 + $0xcac] sm:$0xf0] }
 0x4c2   :  { %v10212_v18 = vpop.f32.mrf.mxu3  ;;  %18504 = vrsqrt.f32 %v19931_v43  ;;  %10327 = vmatpush.bf16.msra.mxu1 %v16053_v48  ;;  %10353 = vmatpush.bf16.msrb.mxu0 %v16309_v63  ;;  %v16789_v45 = vor.u32 %v18373_v62, %v16788_v26  ;;  %v16772_v35 = vld [vmem:[#allocation10 + $0xea0] sm:$0xf]  ;;  %vm6874_vm10 = vweird.f32 %v19931_v43 }
 0x4c3   :  { %v10226_v6 = vadd.f32 %v10225_v27, %v10212_v18  ;;  %v15924_v27 = vld [vmem:[#allocation10 + $0x800] sm:$0xf]  ;;  %v18313_v18 = vld [vmem:[#allocation10 + $0xcec] sm:$0xf0]  ;;  %10340 = vmatpush.bf16.msra.mxu2 %v16181_v16  ;;  %v6862_v16 = vsub.f32 1.5, %v19929_v54 }
 0x4c4   :  { %v10251_v7 = vpop.f32.mrf.mxu0  ;;  %v15925_v47 = vor.u32 %v18157_v60, %v15924_v27  ;;  %v16549_v8 = vor.u32 %v18313_v18, %v16548_v46  ;;  %v18409_v27 = vld [vmem:[#allocation10 + $0xfec] sm:$0xf0]  ;;  %v16532_v60 = vld [vmem:[#allocation10 + $0xcc0] sm:$0xf] }
 0x4c5   :  { %v16533_v1 = vor.u32 %v18309_v3, %v16532_v60  ;;  %v16516_v18 = vld [vmem:[#allocation10 + $0xca0] sm:$0xf] }
 0x4c6   :  { %10314 = vmatpush.bf16.msrb.mxu3 %v15925_v47  ;;  %v16933_v47 = vor.u32 %v18409_v27, %v16932_v39  ;;  %10372 = vmatpush.bf16.msrb.mxu1 %v16677_v44  ;;  %v16517_v10 = vor.u32 %v18305_v2, %v16516_v18  ;;  %v18337_v44 = vld [vmem:[#allocation10 + $0xdac] sm:$0xf0]  ;;  %v6863_v27 = vmul.f32 %v19902_v28, %v6862_v16  ;;  %v16612_v2 = vld [vmem:[#allocation10 + $0xd60] sm:$0xf] }
 0x4c7   :  { %v10227_v30 = vpop.f32.mrf.mxu1  ;;  %10385 = vmatpush.bf16.msrb.mxu2 %v16805_v20  ;;  %v18401_v20 = vld [vmem:[#allocation10 + $0xfac] sm:$0xf0] }
 0x4c8   :  { %v6853_v30 = vmul.f32 %v19895_v21, %v6852_v40  ;;  %10398 = vmatpush.bf16.msra.mxu0 %v16933_v47  ;;  %v18301_v47 = vld [vmem:[#allocation10 + $0xc8c] sm:$0xf0]  ;;  %v6867_v14 = vsel %vm19966_vm0, %v19902_v28, %v6863_v27  ;;  %v6701_v27 = vld [vmem:[#allocation7 + $0x8] sm:$0xff] }
 0x4c9   :  { %v10238_v57 = vpop.f32.mrf.mxu2  ;;  %v6906_v28 = vrot.slane %v6867_v14, 2 }
 0x4ca   :  { %v10239_v24 = vadd.f32 %v10238_v57, %v10226_v6  ;;  %v10214_v6 = vpop.f32.mrf.mxu3  ;;  %v6847_v57 = vsel %vm19924_vm12, %v19889_v58, %v6843_v56  ;;  %10359 = vmatpush.bf16.msra.mxu3 %v16549_v8  ;;  %v16916_v58 = vld [vmem:[#allocation10 + $0xfc0] sm:$0xf]  ;;  %v18405_v56 = vld [vmem:[#allocation10 + $0xfcc] sm:$0xf0]  ;;  %v6857_v36 = vsel %vm19952_vm5, %v19895_v21, %v6853_v30 }
 0x4cb   :  { %v16917_v46 = vor.u32 %v18405_v56, %v16916_v58  ;;  %v19948_v63 = vrot.slane %v6847_v57, 4  ;;  %v16644_v8 = vld [vmem:[#allocation10 + $0xda0] sm:$0xf]  ;;  %10386 = vmatpush.bf16.msrb.mxu2 %v16789_v45  ;;  %v18369_v6 = vld [vmem:[#allocation10 + $0xeac] sm:$0xf0]  ;;  %v6905_v26 = vrot.slane %v6857_v36, 3 }
 0x4cc   :  { %v19935_v11 = vadd.f32 %v10251_v7, %v10239_v24  ;;  %v10253_v4 = vpop.f32.mrf.mxu0  ;;  %v18341_v7 = vld [vmem:[#allocation10 + $0xdcc] sm:$0xf0]  ;;  %v19941_v24 = vpop.eup %18504  ;;  %v16645_v39 = vor.u32 %v18337_v44, %v16644_v8  ;;  %v16773_v21 = vor.u32 %v18369_v6, %v16772_v35  ;;  %v16500_v57 = vld [vmem:[#allocation10 + $0xc80] sm:$0xf] }
 0x4cd   :  { %v16661_v48 = vor.u32 %v18341_v7, %v16660_v55  ;;  %v6869_v38 = vmul.f32 %v19941_v24, %v19931_v43  ;;  %vm6875_vm9 = vweird.f32 %v19941_v24  ;;  %v16900_v4 = vld [vmem:[#allocation10 + $0xfa0] sm:$0xf]  ;;  %10399 = vmatpush.bf16.msra.mxu0 %v16917_v46  ;;  %v18333_v55 = vld [vmem:[#allocation10 + $0xd8c] sm:$0xf0]  ;;  %v16501_v62 = vor.u32 %v18301_v47, %v16500_v57 }
 0x4ce   :  { %10360 = vmatpush.bf16.msra.mxu3 %v16533_v1  ;;  %v16901_v34 = vor.u32 %v18401_v20, %v16900_v4  ;;  %v16628_v1 = vld [vmem:[#allocation10 + $0xd80] sm:$0xf]  ;;  %vm19973_vm12 = vmor %vm6874_vm10, %vm6875_vm9  ;;  %v18365_v58 = vld [vmem:[#allocation10 + $0xe8c] sm:$0xf0] }
 0x4cf   :  { %v6870_v54 = vmul.f32 %v19941_v24, %v6869_v38  ;;  %10373 = vmatpush.bf16.msrb.mxu1 %v16661_v48  ;;  %v16756_v7 = vld [vmem:[#allocation10 + $0xe80] sm:$0xf]  ;;  %10387 = vmatpush.bf16.msrb.mxu2 %v16773_v21  ;;  %v16629_v16 = vor.u32 %v18333_v55, %v16628_v1  ;;  %v18397_v43 = vld [vmem:[#allocation10 + $0xf8c] sm:$0xf0] }
 0x4d0   :  { %v16884_v56 = vld [vmem:[#allocation10 + $0xf80] sm:$0xf]  ;;  %v16757_v38 = vor.u32 %v18365_v58, %v16756_v7  ;;  %v18297_v46 = vld [vmem:[#allocation10 + $0xc6c] sm:$0xf0] }
 0x4d1   :  { %v10240_v40 = vpop.f32.mrf.mxu2  ;;  %v6871_v3 = vmul.f32 0.5, %v6870_v54  ;;  %v16484_v45 = vld [vmem:[#allocation10 + $0xc60] sm:$0xf]  ;;  %10400 = vmatpush.bf16.msra.mxu0 %v16901_v34  ;;  %v16885_v18 = vor.u32 %v18397_v43, %v16884_v56  ;;  %v18329_v54 = vld [vmem:[#allocation10 + $0xd6c] sm:$0xf0] }
 0x4d2   :  { %10361 = vmatpush.bf16.msra.mxu3 %v16517_v10  ;;  %v16740_v10 = vld [vmem:[#allocation10 + $0xe60] sm:$0xf]  ;;  %v18361_v8 = vld [vmem:[#allocation10 + $0xe6c] sm:$0xf0] }
 0x4d3   :  { %v6872_v30 = vsub.f32 1.5, %v6871_v3  ;;  %10374 = vmatpush.bf16.msrb.mxu1 %v16645_v39  ;;  %v16868_v44 = vld [vmem:[#allocation10 + $0xf60] sm:$0xf]  ;;  %v18393_v35 = vld [vmem:[#allocation10 + $0xf6c] sm:$0xf0]  ;;  %v16485_v39 = vor.u32 %v18297_v46, %v16484_v45  ;;  %10388 = vmatpush.bf16.msrb.mxu2 %v16757_v38  ;;  %v16613_v3 = vor.u32 %v18329_v54, %v16612_v2  ;;  %v16741_v21 = vor.u32 %v18361_v8, %v16740_v10 }
 0x4d4   :  { %v16468_v6 = vld [vmem:[#allocation10 + $0xc40] sm:$0xf]  ;;  %v18293_v4 = vld [vmem:[#allocation10 + $0xc4c] sm:$0xf0]  ;;  %v16869_v47 = vor.u32 %v18393_v35, %v16868_v44 }
 0x4d5   :  { %v6873_v40 = vmul.f32 %v19941_v24, %v6872_v30  ;;  %v16596_v20 = vld [vmem:[#allocation10 + $0xd40] sm:$0xf]  ;;  %v18325_v34 = vld [vmem:[#allocation10 + $0xd4c] sm:$0xf0]  ;;  %10401 = vmatpush.bf16.msra.mxu0 %v16885_v18 }
 0x4d6   :  { %10362 = vmatpush.bf16.msra.mxu3 %v16501_v62  ;;  %v16724_v57 = vld [vmem:[#allocation10 + $0xe40] sm:$0xf]  ;;  %v18357_v1 = vld [vmem:[#allocation10 + $0xe4c] sm:$0xf0] }
 0x4d7   :  { %v6877_v36 = vsel %vm19973_vm12, %v19941_v24, %v6873_v40  ;;  %10375 = vmatpush.bf16.msrb.mxu1 %v16629_v16  ;;  %v16852_v55 = vld [vmem:[#allocation10 + $0xf40] sm:$0xf]  ;;  %v18389_v7 = vld [vmem:[#allocation10 + $0xf4c] sm:$0xf0]  ;;  %v6925_v24 = vsel %vm6914_vm11, %v19948_v63, %v6905_v26  ;;  %v16469_v16 = vor.u32 %v18293_v4, %v16468_v6  ;;  %10389 = vmatpush.bf16.msrb.mxu2 %v16741_v21  ;;  %vm11639_vm12 = vcmask 261120  }
 0x4d8   :  { %v6907_v60 = vrot.slane %v6877_v36, 1  ;;  %v16452_v48 = vld [vmem:[#allocation10 + $0xc20] sm:$0xf]  ;;  %v18289_v62 = vld [vmem:[#allocation10 + $0xc2c] sm:$0xf0]  ;;  %v16597_v63 = vor.u32 %v18325_v34, %v16596_v20  ;;  %v16725_v26 = vor.u32 %v18357_v1, %v16724_v57  ;;  %v16853_v10 = vor.u32 %v18389_v7, %v16852_v55 }
 0x4d9   :  { %v19987_v58 = vld [vmem:[#allocation10 + $0xd20] sm:$0xf]  ;;  %v18321_v38 = vld [vmem:[#allocation10 + $0xd2c] sm:$0xf0]  ;;  %10402 = vmatpush.bf16.msra.mxu0 %v16869_v47  ;;  %v16453_v8 = vor.u32 %v18289_v62, %v16452_v48 }
 0x4da   :  { %v6926_v30 = vsel %vm6916_vm2, %v6906_v28, %v6907_v60  ;;  %10363 = vmatpush.bf16.msra.mxu3 %v16485_v39  ;;  %v16708_v43 = vld [vmem:[#allocation10 + $0xe20] sm:$0xf]  ;;  %v18353_v45 = vld [vmem:[#allocation10 + $0xe2c] sm:$0xf0]  ;;  %v16581_v44 = vor.u32 %v18321_v38, %v19987_v58 }
 0x4db   :  { %v6927_v56 = vsel %vm6918_vm3, %v6925_v24, %v6926_v30  ;;  %10376 = vmatpush.bf16.msrb.mxu1 %v16613_v3  ;;  %v16836_v40 = vld [vmem:[#allocation10 + $0xf20] sm:$0xf]  ;;  %v18385_v18 = vld [vmem:[#allocation10 + $0xf2c] sm:$0xf0]  ;;  %v16709_v39 = vor.u32 %v18353_v45, %v16708_v43  ;;  %10390 = vmatpush.bf16.msrb.mxu2 %v16725_v26 }
 0x4dc   :  { %v6928_v46 = vsel %vm6920_vm4, %v19807_v23, %v6927_v56  ;;  %v19994_v2 = vld [vmem:[#allocation10 + $0xc00] sm:$0xf]  ;;  %v18285_v35 = vld [vmem:[#allocation10 + $0xc0c] sm:$0xf0]  ;;  %v16837_v6 = vor.u32 %v18385_v18, %v16836_v40 }
 0x4dd   :  { %v19996_v54 = vmul.f32 %v6928_v46, %v6701_v27  ;;  %v19999_v36 = vld [vmem:[#allocation10 + $0xd00] sm:$0xf]  ;;  %v18317_v23 = vld [vmem:[#allocation10 + $0xd0c] sm:$0xf0]  ;;  %v16437_v4 = vor.u32 %v18285_v35, %v19994_v2  ;;  %10403 = vmatpush.bf16.msra.mxu0 %v16853_v10  ;;  %v6934_v35 = vld [vmem:[#allocation8 + $0x8] sm:$0xff] }
 0x4de   :  { %v16565_v20 = vor.u32 %v18317_v23, %v19999_v36  ;;  %10364 = vmatpush.bf16.msra.mxu3 %v16469_v16  ;;  %v18349_v16 = vld [vmem:[#allocation10 + $0xe0c] sm:$0xf0] }
 0x4df   :  { %v19992_v14 = vpop.f32.mrf.mxu1  ;;  %v6945_v28 = vperm.slane %v19996_v54, 0  ;;  %v6946_v27 = vperm.slane %v19996_v54, 1  ;;  %v6947_v60 = vperm.slane %v19996_v54, 2  ;;  %v6948_v3 = vperm.slane %v19996_v54, 3  ;;  %10377 = vmatpush.bf16.msrb.mxu1 %v16597_v63  ;;  %10391 = vmatpush.bf16.msrb.mxu2 %v16709_v39 }
 0x4e0   :  { %v6949_v34 = vperm.slane %v19996_v54, 4  ;;  %v6950_v57 = vperm.slane %v19996_v54, 5  ;;  %v6951_v47 = vperm.slane %v19996_v54, 6  ;;  %v6952_v1 = vperm.slane %v19996_v54, 7  ;;  %v17951_v54 = vld [vmem:[#allocation10 + $0x1a4] sm:$0xf] }
 0x4e1   :  { %v6977_v7 = vmul.f32 %v6945_v28, %v19661_v32  ;;  %v6978_v24 = vmul.f32 %v6946_v27, %v19678_v15  ;;  %v6979_v30 = vmul.f32 %v6947_v60, %v19741_v49  ;;  %v6980_v48 = vmul.f32 %v6948_v3, %v19761_v31  ;;  %v16692_v15 = vld [vmem:[#allocation10 + $0xe00] sm:$0xf]  ;;  %10404 = vmatpush.bf16.msra.mxu0 %v16837_v6 }
 0x4e2   :  { %v10264_v55 = vpop.f32.mrf.mxu3  ;;  %v6981_v62 = vmul.f32 %v6949_v34, %v19867_v50  ;;  %v6982_v58 = vmul.f32 %v6950_v57, %v19869_v25  ;;  %v6983_v56 = vmul.f32 %v6951_v47, %v19875_v13  ;;  %v6984_v32 = vmul.f32 %v6952_v1, %v19912_v52  ;;  %v16820_v49 = vld [vmem:[#allocation10 + $0xf00] sm:$0xf]  ;;  %10365 = vmatpush.bf16.msra.mxu3 %v16453_v8  ;;  %v18381_v50 = vld [vmem:[#allocation10 + $0xf0c] sm:$0xf0] }
 0x4e3   :  { %v7008_v38 = vrot.slane %v6978_v24, 7  ;;  %v7009_v31 = vrot.slane %v6979_v30, 6  ;;  %v7010_v43 = vrot.slane %v6980_v48, 5  ;;  %v7048_v45 = vmul.f32 %v6952_v1, %v19887_v33  ;;  %10378 = vmatpush.bf16.msrb.mxu1 %v16581_v44 }
 0x4e4   :  { %v20007_v21 = vpop.f32.mrf.mxu0  ;;  %v7011_v63 = vrot.slane %v6981_v62, 4  ;;  %v7012_v26 = vrot.slane %v6982_v58, 3  ;;  %v7013_v25 = vrot.slane %v6983_v56, 2  ;;  %v7014_v40 = vrot.slane %v6984_v32, 1 }
 0x4e5   :  { %v7022_v13 = vsel %vm6908_vm7, %v6977_v7, %v7008_v38  ;;  %v7023_v52 = vsel %vm6910_vm14, %v7009_v31, %v7010_v43  ;;  %v10265_v2 = vadd.f32 %v10264_v55, %v19935_v11  ;;  %v16693_v10 = vor.u32 %v18349_v16, %v16692_v15  ;;  %v15014_v16 = vld [vmem:[#allocation10 + $0xf0] sm:$0xf0]  ;;  %v18023_v38 = vld [vmem:[#allocation10 + $0x3e4] sm:$0xf] }
 0x4e6   :  { %v7024_v33 = vsel %vm6912_vm15, %v7022_v13, %v7023_v52  ;;  %v7025_v8 = vsel %vm6914_vm11, %v7011_v63, %v7012_v26  ;;  %v7026_v36 = vsel %vm6916_vm2, %v7013_v25, %v7014_v40  ;;  %v16821_v23 = vor.u32 %v18381_v50, %v16820_v49  ;;  %10366 = vmatpush.bf16.msra.mxu3 %v16437_v4  ;;  %v15270_v49 = vld [vmem:[#allocation10 + $0x2f0] sm:$0xf0]  ;;  %v17923_v40 = vld [vmem:[#allocation10 + $0xc4] sm:$0xf] }
 0x4e7   :  { %v10290_v46 = vpop.f32.mrf.mxu2  ;;  %v10279_v18 = vpop.f32.mrf.mxu1  ;;  %v7027_v1 = vsel %vm6918_vm3, %v7025_v8, %v7026_v36  ;;  %v10278_v44 = vadd.f32 %v19992_v14, %v10265_v2  ;;  %v7041_v7 = vmul.f32 %v6945_v28, %v19590_v19  ;;  %v7042_v11 = vmul.f32 %v6946_v27, %v19665_v37  ;;  %10379 = vmatpush.bf16.msrb.mxu1 %v16565_v20  ;;  %v17927_v37 = vld [vmem:[#allocation10 + $0xe4] sm:$0xf]  ;;  %v15398_v50 = vld [vmem:[#allocation10 + $0x3f0] sm:$0xf0] }
 0x4e8   :  { %v7028_v6 = vsel %vm6920_vm4, %v7024_v33, %v7027_v1  ;;  %10392 = vmatpush.bf16.msrb.mxu2 %v16693_v10  ;;  %v7043_v24 = vmul.f32 %v6947_v60, %v19728_v53  ;;  %v7044_v30 = vmul.f32 %v6948_v3, %v19747_v61  ;;  %10405 = vmatpush.bf16.msra.mxu0 %v16821_v23  ;;  %v17959_v53 = vld [vmem:[#allocation10 + $0x1e4] sm:$0xf]  ;;  %v15142_v60 = vld [vmem:[#allocation10 + $0x1f0] sm:$0xf0] }
 0x4e9   :  { %v7032_v48 = vsub.f32 %v6934_v35, %v7028_v6  ;;  %v20041_v62 = vadd.f32 %v10290_v46, %v10278_v44  ;;  %v17991_v3 = vld [vmem:[#allocation10 + $0x2e4] sm:$0xf]  ;;  %v15017_v26 = vor.u32 %v17927_v37, %v15014_v16  ;;  %v15145_v25 = vor.u32 %v17959_v53, %v15142_v60  ;;  %v14998_v2 = vld [vmem:[#allocation10 + $0xd0] sm:$0xf0] }
 0x4ea   :  { %v10266_v55 = vpop.f32.mrf.mxu3  ;;  %v15273_v52 = vor.u32 %v17991_v3, %v15270_v49  ;;  %v17955_v10 = vld [vmem:[#allocation10 + $0x1c4] sm:$0xf]  ;;  %v15126_v35 = vld [vmem:[#allocation10 + $0x1d0] sm:$0xf0]  ;;  %v15401_v8 = vor.u32 %v18023_v38, %v15398_v50  ;;  %v7045_v1 = vmul.f32 %v6949_v34, %v19812_v42  ;;  %v15001_v42 = vor.u32 %v17923_v40, %v14998_v2 }
 0x4eb   :  { %v7066_v14 = vperm.slane %v7032_v48, 7  ;;  %v7059_v4 = vperm.slane %v7032_v48, 0  ;;  %v7060_v56 = vperm.slane %v7032_v48, 1  ;;  %v7061_v19 = vperm.slane %v7032_v48, 2  ;;  %v17987_v36 = vld [vmem:[#allocation10 + $0x2c4] sm:$0xf] }
 0x4ec   :  { %v10305_v39 = vpop.f32.mrf.mxu0  ;;  %v7062_v28 = vperm.slane %v7032_v48, 3  ;;  %v15254_v23 = vld [vmem:[#allocation10 + $0x2d0] sm:$0xf0]  ;;  %v7063_v44 = vperm.slane %v7032_v48, 4  ;;  %v7064_v6 = vperm.slane %v7032_v48, 5  ;;  %v7047_v55 = vmul.f32 %v6951_v47, %v19861_v5 }
 0x4ed   :  { %v20043_v27 = vadd.f32 %v7066_v14, %v7048_v45  ;;  %v7091_v32 = vadd.f32 %v7059_v4, %v7041_v7  ;;  %v7092_v20 = vadd.f32 %v7060_v56, %v7042_v11  ;;  %v7093_v15 = vadd.f32 %v7061_v19, %v7043_v24  ;;  %v18019_v39 = vld [vmem:[#allocation10 + $0x3c4] sm:$0xf]  ;;  %v15382_v7 = vld [vmem:[#allocation10 + $0x3d0] sm:$0xf0] }
 0x4ee   :  { %v7094_v61 = vadd.f32 %v7062_v28, %v7044_v30  ;;  %v7046_v11 = vmul.f32 %v6950_v57, %v19838_v12  ;;  %v7065_v24 = vperm.slane %v7032_v48, 6  ;;  %v7095_v34 = vadd.f32 %v7063_v44, %v7045_v1  ;;  %v17919_v14 = vld [vmem:[#allocation10 + $0xa4] sm:$0xf]  ;;  %v15110_v5 = vld [vmem:[#allocation10 + $0x1b0] sm:$0xf0] }
 0x4ef   :  { %v10292_v58 = vpop.f32.mrf.mxu2  ;;  %v7107_v31 = vmax.f32 %v7091_v32, 0.0  ;;  %v7108_v43 = vmax.f32 %v7092_v20, 0.0  ;;  %v7109_v46 = vmax.f32 %v7093_v15, 0.0  ;;  %v15129_v30 = vor.u32 %v17955_v10, %v15126_v35  ;;  %v17983_v47 = vld [vmem:[#allocation10 + $0x2a4] sm:$0xf] }
 0x4f0   :  { %v7110_v63 = vmax.f32 %v7094_v61, 0.0  ;;  %v14982_v58 = vld [vmem:[#allocation10 + $0xb0] sm:$0xf0]  ;;  %v7096_v4 = vadd.f32 %v7064_v6, %v7046_v11  ;;  %v7097_v56 = vadd.f32 %v7065_v24, %v7047_v55  ;;  %v15257_v12 = vor.u32 %v17987_v36, %v15254_v23  ;;  %v18015_v19 = vld [vmem:[#allocation10 + $0x3a4] sm:$0xf] }
 0x4f1   :  { %v20045_v45 = vpack.c.bf16 %v7107_v31, %v7107_v31  ;;  %v20047_v18 = vpack.c.bf16 %v7108_v43, %v7108_v43  ;;  %v20049_v13 = vpack.c.bf16 %v7109_v46, %v7109_v46  ;;  %v15385_v57 = vor.u32 %v18019_v39, %v15382_v7  ;;  %v15238_v48 = vld [vmem:[#allocation10 + $0x2b0] sm:$0xf0]  ;;  %v17915_v20 = vld [vmem:[#allocation10 + $0x84] sm:$0xf] }
 0x4f2   :  { %v20051_v33 = vpack.c.bf16 %v7110_v63, %v7110_v63  ;;  %v15366_v28 = vld [vmem:[#allocation10 + $0x3b0] sm:$0xf0]  ;;  %v14985_v37 = vor.u32 %v17919_v14, %v14982_v58  ;;  %v15113_v32 = vor.u32 %v17951_v54, %v15110_v5  ;;  %v15241_v16 = vor.u32 %v17983_v47, %v15238_v48  ;;  %v17947_v60 = vld [vmem:[#allocation10 + $0x184] sm:$0xf] }
 0x4f3   :  { %10315 = vmatmul.bf16.vlgmr.msrb.gmra.mxu3 %v20045_v45  ;;  %10328 = vmatmul.bf16.vlgmr.msra.gmra.mxu1 %v20047_v18  ;;  %v14966_v15 = vld [vmem:[#allocation10 + $0x90] sm:$0xf0]  ;;  %v15369_v53 = vor.u32 %v18015_v19, %v15366_v28  ;;  %v17979_v3 = vld [vmem:[#allocation10 + $0x284] sm:$0xf]  ;;  %v20068_v43 = vadd.f32 %v20007_v21, %v20041_v62  ;;  %v7114_v46 = vmax.f32 %v20043_v27, 0.0  ;;  %v7112_v40 = vmax.f32 %v7096_v4, 0.0 }
 0x4f4   :  { %10341 = vmatmul.bf16.vlgmr.msra.gmra.mxu2 %v20049_v13  ;;  %10354 = vmatmul.bf16.vlgmr.msrb.gmra.mxu0 %v20051_v33  ;;  %v15094_v61 = vld [vmem:[#allocation10 + $0x190] sm:$0xf0]  ;;  %v18011_v38 = vld [vmem:[#allocation10 + $0x384] sm:$0xf]  ;;  %v14969_v63 = vor.u32 %v17915_v20, %v14966_v15 }
 0x4f5   :  { %10411 = vmatpush.bf16.msrb.mxu3 %v15017_v26  ;;  %10424 = vmatpush.bf16.msra.mxu1 %v15145_v25  ;;  %v15222_v49 = vld [vmem:[#allocation10 + $0x290] sm:$0xf0]  ;;  %v17911_v50 = vld [vmem:[#allocation10 + $0x64] sm:$0xf]  ;;  %v15097_v26 = vor.u32 %v17947_v60, %v15094_v61  ;;  %v7111_v25 = vmax.f32 %v7095_v34, 0.0  ;;  %v20071_v27 = vpack.c.bf16 %v7114_v46, %v7114_v46  ;;  %v20075_v7 = vpack.c.bf16 %v7112_v40, %v7112_v40 }
 0x4f6   :  { %10437 = vmatpush.bf16.msra.mxu2 %v15273_v52  ;;  %10450 = vmatpush.bf16.msrb.mxu0 %v15401_v8  ;;  %v15350_v31 = vld [vmem:[#allocation10 + $0x390] sm:$0xf0]  ;;  %v17943_v2 = vld [vmem:[#allocation10 + $0x164] sm:$0xf]  ;;  %v15225_v10 = vor.u32 %v17979_v3, %v15222_v49  ;;  %v7113_v8 = vmax.f32 %v7097_v56, 0.0 }
 0x4f7   :  { %v14950_v52 = vld [vmem:[#allocation10 + $0x70] sm:$0xf0]  ;;  %v15353_v35 = vor.u32 %v18011_v38, %v15350_v31  ;;  %v17975_v23 = vld [vmem:[#allocation10 + $0x264] sm:$0xf]  ;;  %v20073_v39 = vpack.c.bf16 %v7111_v25, %v7111_v25 }
 0x4f8   :  { %v15078_v36 = vld [vmem:[#allocation10 + $0x170] sm:$0xf0]  ;;  %v18007_v62 = vld [vmem:[#allocation10 + $0x364] sm:$0xf]  ;;  %v14953_v44 = vor.u32 %v17911_v50, %v14950_v52  ;;  %v20077_v24 = vpack.c.bf16 %v7113_v8, %v7113_v8 }
 0x4f9   :  { %10412 = vmatpush.bf16.msrb.mxu3 %v15001_v42  ;;  %10425 = vmatpush.bf16.msra.mxu1 %v15129_v30  ;;  %v15206_v21 = vld [vmem:[#allocation10 + $0x270] sm:$0xf0]  ;;  %v15081_v11 = vor.u32 %v17943_v2, %v15078_v36  ;;  %v17907_v6 = vld [vmem:[#allocation10 + $0x44] sm:$0xf] }
 0x4fa   :  { %10438 = vmatpush.bf16.msra.mxu2 %v15257_v12  ;;  %10451 = vmatpush.bf16.msrb.mxu0 %v15385_v57  ;;  %v15334_v1 = vld [vmem:[#allocation10 + $0x370] sm:$0xf0]  ;;  %v15209_v42 = vor.u32 %v17975_v23, %v15206_v21  ;;  %v17939_v30 = vld [vmem:[#allocation10 + $0x144] sm:$0xf] }
 0x4fb   :  { %v14934_v55 = vld [vmem:[#allocation10 + $0x50] sm:$0xf0]  ;;  %v15337_v34 = vor.u32 %v18007_v62, %v15334_v1  ;;  %v17971_v58 = vld [vmem:[#allocation10 + $0x244] sm:$0xf] }
 0x4fc   :  { %v15062_v14 = vld [vmem:[#allocation10 + $0x150] sm:$0xf0]  ;;  %v18003_v56 = vld [vmem:[#allocation10 + $0x344] sm:$0xf]  ;;  %v14937_v57 = vor.u32 %v17907_v6, %v14934_v55 }
 0x4fd   :  { %10413 = vmatpush.bf16.msrb.mxu3 %v14985_v37  ;;  %10426 = vmatpush.bf16.msra.mxu1 %v15113_v32  ;;  %v15190_v4 = vld [vmem:[#allocation10 + $0x250] sm:$0xf0]  ;;  %v15065_v54 = vor.u32 %v17939_v30, %v15062_v14  ;;  %v17903_v5 = vld [vmem:[#allocation10 + $0x24] sm:$0xf] }
 0x4fe   :  { %10439 = vmatpush.bf16.msra.mxu2 %v15241_v16  ;;  %10452 = vmatpush.bf16.msrb.mxu0 %v15369_v53  ;;  %v15318_v12 = vld [vmem:[#allocation10 + $0x350] sm:$0xf0]  ;;  %v15193_v48 = vor.u32 %v17971_v58, %v15190_v4  ;;  %v17935_v28 = vld [vmem:[#allocation10 + $0x124] sm:$0xf] }
 0x4ff   :  { %v14918_v47 = vld [vmem:[#allocation10 + $0x30] sm:$0xf0]  ;;  %v15321_v19 = vor.u32 %v18003_v56, %v15318_v12  ;;  %v17967_v32 = vld [vmem:[#allocation10 + $0x224] sm:$0xf] }
 0x500   :  { %v15046_v37 = vld [vmem:[#allocation10 + $0x130] sm:$0xf0]  ;;  %v17999_v15 = vld [vmem:[#allocation10 + $0x324] sm:$0xf]  ;;  %v14921_v60 = vor.u32 %v17903_v5, %v14918_v47 }
 0x501   :  { %10414 = vmatpush.bf16.msrb.mxu3 %v14969_v63  ;;  %10427 = vmatpush.bf16.msra.mxu1 %v15097_v26  ;;  %v15174_v20 = vld [vmem:[#allocation10 + $0x230] sm:$0xf0]  ;;  %v17899_v53 = vld [vmem:[#allocation10 + $0x4] sm:$0xf]  ;;  %v15049_v61 = vor.u32 %v17935_v28, %v15046_v37 }
 0x502   :  { %10440 = vmatpush.bf16.msra.mxu2 %v15225_v10  ;;  %10453 = vmatpush.bf16.msrb.mxu0 %v15353_v35  ;;  %v15302_v16 = vld [vmem:[#allocation10 + $0x330] sm:$0xf0]  ;;  %v17931_v49 = vld [vmem:[#allocation10 + $0x104] sm:$0xf]  ;;  %v15177_v31 = vor.u32 %v17967_v32, %v15174_v20 }
 0x503   :  { %10367 = vmatmul.bf16.vlgmr.msra.gmra.mxu3 %v20073_v39  ;;  %10380 = vmatmul.bf16.vlgmr.msrb.gmra.mxu1 %v20075_v7  ;;  %v14902_v3 = vld [vmem:[#allocation10 + $0x10] sm:$0xf0]  ;;  %v15305_v46 = vor.u32 %v17999_v15, %v15302_v16  ;;  %v17963_v50 = vld [vmem:[#allocation10 + $0x204] sm:$0xf] }
 0x504   :  { %10393 = vmatmul.bf16.vlgmr.msrb.gmra.mxu2 %v20077_v24  ;;  %10406 = vmatmul.bf16.vlgmr.msra.gmra.mxu0 %v20071_v27  ;;  %v15030_v38 = vld [vmem:[#allocation10 + $0x110] sm:$0xf0]  ;;  %v17995_v26 = vld [vmem:[#allocation10 + $0x304] sm:$0xf]  ;;  %v14905_v8 = vor.u32 %v17899_v53, %v14902_v3 }
 0x505   :  { %10415 = vmatpush.bf16.msrb.mxu3 %v14953_v44  ;;  %10428 = vmatpush.bf16.msra.mxu1 %v15081_v11  ;;  %v15158_v63 = vld [vmem:[#allocation10 + $0x210] sm:$0xf0]  ;;  %v18055_v40 = vld [vmem:[#allocation10 + $0x4e4] sm:$0xf]  ;;  %v15033_v36 = vor.u32 %v17931_v49, %v15030_v38 }
 0x506   :  { %10441 = vmatpush.bf16.msra.mxu2 %v15209_v42  ;;  %10454 = vmatpush.bf16.msrb.mxu0 %v15337_v34  ;;  %v15286_v25 = vld [vmem:[#allocation10 + $0x310] sm:$0xf0]  ;;  %v18087_v2 = vld [vmem:[#allocation10 + $0x5e4] sm:$0xf]  ;;  %v15161_v1 = vor.u32 %v17963_v50, %v15158_v63 }
 0x507   :  { %v15526_v52 = vld [vmem:[#allocation10 + $0x4f0] sm:$0xf0]  ;;  %v18119_v35 = vld [vmem:[#allocation10 + $0x6e4] sm:$0xf]  ;;  %v15289_v44 = vor.u32 %v17995_v26, %v15286_v25 }
 0x508   :  { %v15654_v10 = vld [vmem:[#allocation10 + $0x5f0] sm:$0xf0]  ;;  %v18151_v21 = vld [vmem:[#allocation10 + $0x7e4] sm:$0xf]  ;;  %v15529_v11 = vor.u32 %v18055_v40, %v15526_v52 }
 0x509   :  { %10416 = vmatpush.bf16.msrb.mxu3 %v14937_v57  ;;  %10429 = vmatpush.bf16.msra.mxu1 %v15065_v54  ;;  %v15782_v23 = vld [vmem:[#allocation10 + $0x6f0] sm:$0xf0]  ;;  %v15657_v6 = vor.u32 %v18087_v2, %v15654_v10  ;;  %v18051_v55 = vld [vmem:[#allocation10 + $0x4c4] sm:$0xf] }
 0x50a   :  { %10442 = vmatpush.bf16.msra.mxu2 %v15193_v48  ;;  %10455 = vmatpush.bf16.msrb.mxu0 %v15321_v19  ;;  %v15910_v62 = vld [vmem:[#allocation10 + $0x7f0] sm:$0xf0]  ;;  %v15785_v34 = vor.u32 %v18119_v35, %v15782_v23  ;;  %v18083_v14 = vld [vmem:[#allocation10 + $0x5c4] sm:$0xf] }
 0x50b   :  { %v15510_v42 = vld [vmem:[#allocation10 + $0x4d0] sm:$0xf0]  ;;  %v15913_v30 = vor.u32 %v18151_v21, %v15910_v62  ;;  %v18115_v4 = vld [vmem:[#allocation10 + $0x6c4] sm:$0xf] }
 0x50c   :  { %v15638_v58 = vld [vmem:[#allocation10 + $0x5d0] sm:$0xf0]  ;;  %v18147_v12 = vld [vmem:[#allocation10 + $0x7c4] sm:$0xf]  ;;  %v15513_v54 = vor.u32 %v18051_v55, %v15510_v42 }
 0x50d   :  { %10417 = vmatpush.bf16.msrb.mxu3 %v14921_v60  ;;  %10430 = vmatpush.bf16.msra.mxu1 %v15049_v61  ;;  %v15766_v56 = vld [vmem:[#allocation10 + $0x6d0] sm:$0xf0]  ;;  %v15641_v5 = vor.u32 %v18083_v14, %v15638_v58  ;;  %v18047_v47 = vld [vmem:[#allocation10 + $0x4a4] sm:$0xf] }
 0x50e   :  { %10443 = vmatpush.bf16.msra.mxu2 %v15177_v31  ;;  %10456 = vmatpush.bf16.msrb.mxu0 %v15305_v46  ;;  %v15894_v57 = vld [vmem:[#allocation10 + $0x7d0] sm:$0xf0]  ;;  %v15769_v19 = vor.u32 %v18115_v4, %v15766_v56  ;;  %v18079_v37 = vld [vmem:[#allocation10 + $0x5a4] sm:$0xf] }
 0x50f   :  { %v15494_v48 = vld [vmem:[#allocation10 + $0x4b0] sm:$0xf0]  ;;  %v15897_v28 = vor.u32 %v18147_v12, %v15894_v57  ;;  %v18111_v20 = vld [vmem:[#allocation10 + $0x6a4] sm:$0xf] }
 0x510   :  { %v15622_v32 = vld [vmem:[#allocation10 + $0x5b0] sm:$0xf0]  ;;  %v18143_v16 = vld [vmem:[#allocation10 + $0x7a4] sm:$0xf]  ;;  %v15497_v60 = vor.u32 %v18047_v47, %v15494_v48 }
 0x511   :  { %10418 = vmatpush.bf16.msrb.mxu3 %v14905_v8  ;;  %10431 = vmatpush.bf16.msra.mxu1 %v15033_v36  ;;  %v15750_v15 = vld [vmem:[#allocation10 + $0x6b0] sm:$0xf0]  ;;  %v15625_v61 = vor.u32 %v18079_v37, %v15622_v32  ;;  %v18043_v3 = vld [vmem:[#allocation10 + $0x484] sm:$0xf] }
 0x512   :  { %10444 = vmatpush.bf16.msra.mxu2 %v15161_v1  ;;  %10457 = vmatpush.bf16.msrb.mxu0 %v15289_v44  ;;  %v15878_v53 = vld [vmem:[#allocation10 + $0x7b0] sm:$0xf0]  ;;  %v15753_v38 = vor.u32 %v18111_v20, %v15750_v15  ;;  %v18075_v46 = vld [vmem:[#allocation10 + $0x584] sm:$0xf] }
 0x513   :  { %v15478_v49 = vld [vmem:[#allocation10 + $0x490] sm:$0xf0]  ;;  %v15881_v31 = vor.u32 %v18143_v16, %v15878_v53  ;;  %v18107_v63 = vld [vmem:[#allocation10 + $0x684] sm:$0xf] }
 0x514   :  { %10419 = vmatmul.bf16.vlgmr.msrb.gmra.mxu3 %v19820_v9  ;;  %10432 = vmatmul.bf16.vlgmr.msra.gmra.mxu1 %v19825_v51  ;;  %v15606_v50 = vld [vmem:[#allocation10 + $0x590] sm:$0xf0]  ;;  %v18139_v25 = vld [vmem:[#allocation10 + $0x784] sm:$0xf]  ;;  %v15481_v52 = vor.u32 %v18043_v3, %v15478_v49 }
 0x515   :  { %10463 = vmatpush.bf16.msra.mxu3 %v15529_v11  ;;  %10476 = vmatpush.bf16.msrb.mxu1 %v15657_v6  ;;  %v15734_v26 = vld [vmem:[#allocation10 + $0x690] sm:$0xf0]  ;;  %v15609_v2 = vor.u32 %v18075_v46, %v15606_v50  ;;  %v18039_v10 = vld [vmem:[#allocation10 + $0x464] sm:$0xf] }
 0x516   :  { %10489 = vmatpush.bf16.msrb.mxu2 %v15785_v34  ;;  %10502 = vmatpush.bf16.msra.mxu0 %v15913_v30  ;;  %v15862_v40 = vld [vmem:[#allocation10 + $0x790] sm:$0xf0]  ;;  %v15737_v8 = vor.u32 %v18107_v63, %v15734_v26  ;;  %v18071_v23 = vld [vmem:[#allocation10 + $0x564] sm:$0xf] }
 0x517   :  { %10445 = vmatmul.bf16.vlgmr.msra.gmra.mxu2 %v19827_v59  ;;  %10458 = vmatmul.bf16.vlgmr.msrb.gmra.mxu0 %v19831_v29  ;;  %v15462_v35 = vld [vmem:[#allocation10 + $0x470] sm:$0xf0]  ;;  %v15865_v36 = vor.u32 %v18139_v25, %v15862_v40  ;;  %v18103_v62 = vld [vmem:[#allocation10 + $0x664] sm:$0xf] }
 0x518   :  { %v15590_v21 = vld [vmem:[#allocation10 + $0x570] sm:$0xf0]  ;;  %v18135_v44 = vld [vmem:[#allocation10 + $0x764] sm:$0xf]  ;;  %v15465_v6 = vor.u32 %v18039_v10, %v15462_v35 }
 0x519   :  { %10464 = vmatpush.bf16.msra.mxu3 %v15513_v54  ;;  %10477 = vmatpush.bf16.msrb.mxu1 %v15641_v5  ;;  %v15718_v1 = vld [vmem:[#allocation10 + $0x670] sm:$0xf0]  ;;  %v15593_v55 = vor.u32 %v18071_v23, %v15590_v21  ;;  %v18035_v42 = vld [vmem:[#allocation10 + $0x444] sm:$0xf] }
 0x51a   :  { %10490 = vmatpush.bf16.msrb.mxu2 %v15769_v19  ;;  %10503 = vmatpush.bf16.msra.mxu0 %v15897_v28  ;;  %v15846_v11 = vld [vmem:[#allocation10 + $0x770] sm:$0xf0]  ;;  %v15721_v30 = vor.u32 %v18103_v62, %v15718_v1  ;;  %v18067_v58 = vld [vmem:[#allocation10 + $0x544] sm:$0xf] }
 0x51b   :  { %v15446_v34 = vld [vmem:[#allocation10 + $0x450] sm:$0xf0]  ;;  %v15849_v14 = vor.u32 %v18135_v44, %v15846_v11  ;;  %v18099_v56 = vld [vmem:[#allocation10 + $0x644] sm:$0xf] }
 0x51c   :  { %v15574_v4 = vld [vmem:[#allocation10 + $0x550] sm:$0xf0]  ;;  %v18131_v57 = vld [vmem:[#allocation10 + $0x744] sm:$0xf]  ;;  %v15449_v5 = vor.u32 %v18035_v42, %v15446_v34 }
 0x51d   :  { %10465 = vmatpush.bf16.msra.mxu3 %v15497_v60  ;;  %10478 = vmatpush.bf16.msrb.mxu1 %v15625_v61  ;;  %v15702_v12 = vld [vmem:[#allocation10 + $0x650] sm:$0xf0]  ;;  %v15577_v47 = vor.u32 %v18067_v58, %v15574_v4  ;;  %v18031_v48 = vld [vmem:[#allocation10 + $0x424] sm:$0xf] }
 0x51e   :  { %10491 = vmatpush.bf16.msrb.mxu2 %v15753_v38  ;;  %10504 = vmatpush.bf16.msra.mxu0 %v15881_v31  ;;  %v15830_v54 = vld [vmem:[#allocation10 + $0x750] sm:$0xf0]  ;;  %v15705_v28 = vor.u32 %v18099_v56, %v15702_v12  ;;  %v18063_v32 = vld [vmem:[#allocation10 + $0x524] sm:$0xf] }
 0x51f   :  { %v15430_v19 = vld [vmem:[#allocation10 + $0x430] sm:$0xf0]  ;;  %v15833_v37 = vor.u32 %v18131_v57, %v15830_v54  ;;  %v18095_v15 = vld [vmem:[#allocation10 + $0x624] sm:$0xf] }
 0x520   :  { %v15558_v20 = vld [vmem:[#allocation10 + $0x530] sm:$0xf0]  ;;  %v18127_v53 = vld [vmem:[#allocation10 + $0x724] sm:$0xf]  ;;  %v15433_v3 = vor.u32 %v18031_v48, %v15430_v19 }
 0x521   :  { %10466 = vmatpush.bf16.msra.mxu3 %v15481_v52  ;;  %10479 = vmatpush.bf16.msrb.mxu1 %v15609_v2  ;;  %v15686_v16 = vld [vmem:[#allocation10 + $0x630] sm:$0xf0]  ;;  %v18027_v61 = vld [vmem:[#allocation10 + $0x404] sm:$0xf]  ;;  %v15561_v49 = vor.u32 %v18063_v32, %v15558_v20 }
 0x522   :  { %10492 = vmatpush.bf16.msrb.mxu2 %v15737_v8  ;;  %10505 = vmatpush.bf16.msra.mxu0 %v15865_v36  ;;  %v15814_v60 = vld [vmem:[#allocation10 + $0x730] sm:$0xf0]  ;;  %v18059_v31 = vld [vmem:[#allocation10 + $0x504] sm:$0xf]  ;;  %v15689_v50 = vor.u32 %v18095_v15, %v15686_v16 }
 0x523   :  { %v15414_v38 = vld [vmem:[#allocation10 + $0x410] sm:$0xf0]  ;;  %v15817_v63 = vor.u32 %v18127_v53, %v15814_v60  ;;  %v18091_v26 = vld [vmem:[#allocation10 + $0x604] sm:$0xf] }
 0x524   :  { %v15542_v46 = vld [vmem:[#allocation10 + $0x510] sm:$0xf0]  ;;  %v18123_v40 = vld [vmem:[#allocation10 + $0x704] sm:$0xf]  ;;  %v15417_v23 = vor.u32 %v18027_v61, %v15414_v38 }
 0x525   :  { %10467 = vmatpush.bf16.msra.mxu3 %v15465_v6  ;;  %10480 = vmatpush.bf16.msrb.mxu1 %v15593_v55  ;;  %v15670_v25 = vld [vmem:[#allocation10 + $0x610] sm:$0xf0]  ;;  %v18183_v2 = vld [vmem:[#allocation10 + $0x8e4] sm:$0xf]  ;;  %v15545_v21 = vor.u32 %v18059_v31, %v15542_v46 }
 0x526   :  { %10493 = vmatpush.bf16.msrb.mxu2 %v15721_v30  ;;  %10506 = vmatpush.bf16.msra.mxu0 %v15849_v14  ;;  %v15798_v52 = vld [vmem:[#allocation10 + $0x710] sm:$0xf0]  ;;  %v18215_v35 = vld [vmem:[#allocation10 + $0x9e4] sm:$0xf]  ;;  %v15673_v11 = vor.u32 %v18091_v26, %v15670_v25 }
 0x527   :  { %v16038_v10 = vld [vmem:[#allocation10 + $0x8f0] sm:$0xf0]  ;;  %v18247_v36 = vld [vmem:[#allocation10 + $0xae4] sm:$0xf]  ;;  %v15801_v6 = vor.u32 %v18123_v40, %v15798_v52 }
 0x528   :  { %v16166_v8 = vld [vmem:[#allocation10 + $0x9f0] sm:$0xf0]  ;;  %v18279_v1 = vld [vmem:[#allocation10 + $0xbe4] sm:$0xf]  ;;  %v16041_v55 = vor.u32 %v18183_v2, %v16038_v10 }
 0x529   :  { %10468 = vmatpush.bf16.msra.mxu3 %v15449_v5  ;;  %10481 = vmatpush.bf16.msrb.mxu1 %v15577_v47  ;;  %v16294_v62 = vld [vmem:[#allocation10 + $0xaf0] sm:$0xf0]  ;;  %v16169_v42 = vor.u32 %v18215_v35, %v16166_v8  ;;  %v18179_v34 = vld [vmem:[#allocation10 + $0x8c4] sm:$0xf] }
 0x52a   :  { %10494 = vmatpush.bf16.msrb.mxu2 %v15705_v28  ;;  %10507 = vmatpush.bf16.msra.mxu0 %v15833_v37  ;;  %v16422_v44 = vld [vmem:[#allocation10 + $0xbf0] sm:$0xf0]  ;;  %v16297_v14 = vor.u32 %v18247_v36, %v16294_v62  ;;  %v18211_v4 = vld [vmem:[#allocation10 + $0x9c4] sm:$0xf] }
 0x52b   :  { %v16022_v30 = vld [vmem:[#allocation10 + $0x8d0] sm:$0xf0]  ;;  %v16425_v58 = vor.u32 %v18279_v1, %v16422_v44  ;;  %v18243_v12 = vld [vmem:[#allocation10 + $0xac4] sm:$0xf] }
 0x52c   :  { %v16150_v56 = vld [vmem:[#allocation10 + $0x9d0] sm:$0xf0]  ;;  %v18275_v54 = vld [vmem:[#allocation10 + $0xbc4] sm:$0xf]  ;;  %v16025_v47 = vor.u32 %v18179_v34, %v16022_v30 }
 0x52d   :  { %10469 = vmatpush.bf16.msra.mxu3 %v15433_v3  ;;  %10482 = vmatpush.bf16.msrb.mxu1 %v15561_v49  ;;  %v16278_v57 = vld [vmem:[#allocation10 + $0xad0] sm:$0xf0]  ;;  %v16153_v48 = vor.u32 %v18211_v4, %v16150_v56  ;;  %v18175_v19 = vld [vmem:[#allocation10 + $0x8a4] sm:$0xf] }
 0x52e   :  { %10495 = vmatpush.bf16.msrb.mxu2 %v15689_v50  ;;  %10508 = vmatpush.bf16.msra.mxu0 %v15817_v63  ;;  %v16406_v5 = vld [vmem:[#allocation10 + $0xbd0] sm:$0xf0]  ;;  %v16281_v37 = vor.u32 %v18243_v12, %v16278_v57  ;;  %v18207_v20 = vld [vmem:[#allocation10 + $0x9a4] sm:$0xf] }
 0x52f   :  { %v16006_v28 = vld [vmem:[#allocation10 + $0x8b0] sm:$0xf0]  ;;  %v16409_v32 = vor.u32 %v18275_v54, %v16406_v5  ;;  %v18239_v16 = vld [vmem:[#allocation10 + $0xaa4] sm:$0xf] }
 0x530   :  { %v16134_v15 = vld [vmem:[#allocation10 + $0x9b0] sm:$0xf0]  ;;  %v18271_v60 = vld [vmem:[#allocation10 + $0xba4] sm:$0xf]  ;;  %v16009_v3 = vor.u32 %v18175_v19, %v16006_v28 }
 0x531   :  { %10470 = vmatpush.bf16.msra.mxu3 %v15417_v23  ;;  %10483 = vmatpush.bf16.msrb.mxu1 %v15545_v21  ;;  %v16262_v53 = vld [vmem:[#allocation10 + $0xab0] sm:$0xf0]  ;;  %v16137_v49 = vor.u32 %v18207_v20, %v16134_v15  ;;  %v18171_v38 = vld [vmem:[#allocation10 + $0x884] sm:$0xf] }
 0x532   :  { %10496 = vmatpush.bf16.msrb.mxu2 %v15673_v11  ;;  %10509 = vmatpush.bf16.msra.mxu0 %v15801_v6  ;;  %v16390_v61 = vld [vmem:[#allocation10 + $0xbb0] sm:$0xf0]  ;;  %v16265_v46 = vor.u32 %v18239_v16, %v16262_v53  ;;  %v18203_v63 = vld [vmem:[#allocation10 + $0x984] sm:$0xf] }
 0x533   :  { %v15990_v31 = vld [vmem:[#allocation10 + $0x890] sm:$0xf0]  ;;  %v16393_v50 = vor.u32 %v18271_v60, %v16390_v61  ;;  %v18235_v25 = vld [vmem:[#allocation10 + $0xa84] sm:$0xf] }
 0x534   :  { %10471 = vmatmul.bf16.vlgmr.msra.gmra.mxu3 %v19840_v17  ;;  %10484 = vmatmul.bf16.vlgmr.msrb.gmra.mxu1 %v19844_v41  ;;  %v16118_v26 = vld [vmem:[#allocation10 + $0x990] sm:$0xf0]  ;;  %v18267_v52 = vld [vmem:[#allocation10 + $0xb84] sm:$0xf]  ;;  %v15993_v10 = vor.u32 %v18171_v38, %v15990_v31 }
 0x535   :  { %10515 = vmatpush.bf16.msrb.mxu3 %v16041_v55  ;;  %10528 = vmatpush.bf16.msra.mxu1 %v16169_v42  ;;  %v16246_v40 = vld [vmem:[#allocation10 + $0xa90] sm:$0xf0]  ;;  %v16121_v35 = vor.u32 %v18203_v63, %v16118_v26  ;;  %v18167_v8 = vld [vmem:[#allocation10 + $0x864] sm:$0xf] }
 0x536   :  { %10541 = vmatpush.bf16.msra.mxu2 %v16297_v14  ;;  %10554 = vmatpush.bf16.msrb.mxu0 %v16425_v58  ;;  %v16374_v2 = vld [vmem:[#allocation10 + $0xb90] sm:$0xf0]  ;;  %v16249_v23 = vor.u32 %v18235_v25, %v16246_v40  ;;  %v18199_v62 = vld [vmem:[#allocation10 + $0x964] sm:$0xf] }
 0x537   :  { %10497 = vmatmul.bf16.vlgmr.msrb.gmra.mxu2 %v19846_v0  ;;  %10510 = vmatmul.bf16.vlgmr.msra.gmra.mxu0 %v19849_v22  ;;  %v15974_v36 = vld [vmem:[#allocation10 + $0x870] sm:$0xf0]  ;;  %v16377_v21 = vor.u32 %v18267_v52, %v16374_v2  ;;  %v18231_v44 = vld [vmem:[#allocation10 + $0xa64] sm:$0xf] }
 0x538   :  { %v16102_v1 = vld [vmem:[#allocation10 + $0x970] sm:$0xf0]  ;;  %v18263_v6 = vld [vmem:[#allocation10 + $0xb64] sm:$0xf]  ;;  %v15977_v42 = vor.u32 %v18167_v8, %v15974_v36 }
 0x539   :  { %10516 = vmatpush.bf16.msrb.mxu3 %v16025_v47  ;;  %10529 = vmatpush.bf16.msra.mxu1 %v16153_v48  ;;  %v16230_v11 = vld [vmem:[#allocation10 + $0xa70] sm:$0xf0]  ;;  %v16105_v34 = vor.u32 %v18199_v62, %v16102_v1  ;;  %v18163_v30 = vld [vmem:[#allocation10 + $0x844] sm:$0xf] }
 0x53a   :  { %10542 = vmatpush.bf16.msra.mxu2 %v16281_v37  ;;  %10555 = vmatpush.bf16.msrb.mxu0 %v16409_v32  ;;  %v16358_v55 = vld [vmem:[#allocation10 + $0xb70] sm:$0xf0]  ;;  %v16233_v58 = vor.u32 %v18231_v44, %v16230_v11  ;;  %v18195_v56 = vld [vmem:[#allocation10 + $0x944] sm:$0xf] }
 0x53b   :  { %v15958_v14 = vld [vmem:[#allocation10 + $0x850] sm:$0xf0]  ;;  %v16361_v4 = vor.u32 %v18263_v6, %v16358_v55  ;;  %v18227_v57 = vld [vmem:[#allocation10 + $0xa44] sm:$0xf] }
 0x53c   :  { %v16086_v12 = vld [vmem:[#allocation10 + $0x950] sm:$0xf0]  ;;  %v18259_v5 = vld [vmem:[#allocation10 + $0xb44] sm:$0xf]  ;;  %v15961_v48 = vor.u32 %v18163_v30, %v15958_v14 }
 0x53d   :  { %10517 = vmatpush.bf16.msrb.mxu3 %v16009_v3  ;;  %10530 = vmatpush.bf16.msra.mxu1 %v16137_v49  ;;  %v16214_v54 = vld [vmem:[#allocation10 + $0xa50] sm:$0xf0]  ;;  %v16089_v19 = vor.u32 %v18195_v56, %v16086_v12  ;;  %v18159_v28 = vld [vmem:[#allocation10 + $0x824] sm:$0xf] }
 0x53e   :  { %10543 = vmatpush.bf16.msra.mxu2 %v16265_v46  ;;  %10556 = vmatpush.bf16.msrb.mxu0 %v16393_v50  ;;  %v16342_v47 = vld [vmem:[#allocation10 + $0xb50] sm:$0xf0]  ;;  %v16217_v32 = vor.u32 %v18227_v57, %v16214_v54  ;;  %v18191_v15 = vld [vmem:[#allocation10 + $0x924] sm:$0xf] }
 0x53f   :  { %v15942_v37 = vld [vmem:[#allocation10 + $0x830] sm:$0xf0]  ;;  %v16345_v20 = vor.u32 %v18259_v5, %v16342_v47  ;;  %v18223_v53 = vld [vmem:[#allocation10 + $0xa24] sm:$0xf] }
 0x540   :  { %v16070_v16 = vld [vmem:[#allocation10 + $0x930] sm:$0xf0]  ;;  %v18255_v61 = vld [vmem:[#allocation10 + $0xb24] sm:$0xf]  ;;  %v15945_v38 = vor.u32 %v18159_v28, %v15942_v37 }
 0x541   :  { %10518 = vmatpush.bf16.msrb.mxu3 %v15993_v10  ;;  %10531 = vmatpush.bf16.msra.mxu1 %v16121_v35  ;;  %v16198_v60 = vld [vmem:[#allocation10 + $0xa30] sm:$0xf0]  ;;  %v18155_v49 = vld [vmem:[#allocation10 + $0x804] sm:$0xf]  ;;  %v16073_v31 = vor.u32 %v18191_v15, %v16070_v16 }
 0x542   :  { %10544 = vmatpush.bf16.msra.mxu2 %v16249_v23  ;;  %10557 = vmatpush.bf16.msrb.mxu0 %v16377_v21  ;;  %v16326_v3 = vld [vmem:[#allocation10 + $0xb30] sm:$0xf0]  ;;  %v18187_v50 = vld [vmem:[#allocation10 + $0x904] sm:$0xf]  ;;  %v16201_v26 = vor.u32 %v18223_v53, %v16198_v60 }
 0x543   :  { %v15926_v46 = vld [vmem:[#allocation10 + $0x810] sm:$0xf0]  ;;  %v16329_v25 = vor.u32 %v18255_v61, %v16326_v3  ;;  %v18219_v40 = vld [vmem:[#allocation10 + $0xa04] sm:$0xf] }
 0x544   :  { %v16054_v63 = vld [vmem:[#allocation10 + $0x910] sm:$0xf0]  ;;  %v18251_v2 = vld [vmem:[#allocation10 + $0xb04] sm:$0xf]  ;;  %v15929_v62 = vor.u32 %v18155_v49, %v15926_v46 }
 0x545   :  { %10519 = vmatpush.bf16.msrb.mxu3 %v15977_v42  ;;  %10532 = vmatpush.bf16.msra.mxu1 %v16105_v34  ;;  %v16182_v52 = vld [vmem:[#allocation10 + $0xa10] sm:$0xf0]  ;;  %v18311_v35 = vld [vmem:[#allocation10 + $0xce4] sm:$0xf]  ;;  %v16057_v1 = vor.u32 %v18187_v50, %v16054_v63 }
 0x546   :  { %10545 = vmatpush.bf16.msra.mxu2 %v16233_v58  ;;  %10558 = vmatpush.bf16.msrb.mxu0 %v16361_v4  ;;  %v16310_v10 = vld [vmem:[#allocation10 + $0xb10] sm:$0xf0]  ;;  %v18343_v36 = vld [vmem:[#allocation10 + $0xde4] sm:$0xf]  ;;  %v16185_v55 = vor.u32 %v18219_v40, %v16182_v52 }
 0x547   :  { %v16550_v8 = vld [vmem:[#allocation10 + $0xcf0] sm:$0xf0]  ;;  %v18375_v21 = vld [vmem:[#allocation10 + $0xee4] sm:$0xf]  ;;  %v16313_v42 = vor.u32 %v18251_v2, %v16310_v10 }
 0x548   :  { %v16678_v23 = vld [vmem:[#allocation10 + $0xdf0] sm:$0xf0]  ;;  %v18407_v11 = vld [vmem:[#allocation10 + $0xfe4] sm:$0xf]  ;;  %v16553_v34 = vor.u32 %v18311_v35, %v16550_v8 }
 0x549   :  { %10520 = vmatpush.bf16.msrb.mxu3 %v15961_v48  ;;  %10533 = vmatpush.bf16.msra.mxu1 %v16089_v19  ;;  %v16806_v44 = vld [vmem:[#allocation10 + $0xef0] sm:$0xf0]  ;;  %v16681_v30 = vor.u32 %v18343_v36, %v16678_v23  ;;  %v18307_v14 = vld [vmem:[#allocation10 + $0xcc4] sm:$0xf] }
 0x54a   :  { %10546 = vmatpush.bf16.msra.mxu2 %v16217_v32  ;;  %10559 = vmatpush.bf16.msrb.mxu0 %v16345_v20  ;;  %v16934_v6 = vld [vmem:[#allocation10 + $0xff0] sm:$0xf0]  ;;  %v16809_v4 = vor.u32 %v18375_v21, %v16806_v44  ;;  %v18339_v12 = vld [vmem:[#allocation10 + $0xdc4] sm:$0xf] }
 0x54b   :  { %v16534_v58 = vld [vmem:[#allocation10 + $0xcd0] sm:$0xf0]  ;;  %v16937_v56 = vor.u32 %v18407_v11, %v16934_v6  ;;  %v18371_v54 = vld [vmem:[#allocation10 + $0xec4] sm:$0xf] }
 0x54c   :  { %v16662_v57 = vld [vmem:[#allocation10 + $0xdd0] sm:$0xf0]  ;;  %v18403_v47 = vld [vmem:[#allocation10 + $0xfc4] sm:$0xf]  ;;  %v16537_v19 = vor.u32 %v18307_v14, %v16534_v58 }
 0x54d   :  { %10521 = vmatpush.bf16.msrb.mxu3 %v15945_v38  ;;  %10534 = vmatpush.bf16.msra.mxu1 %v16073_v31  ;;  %v16790_v5 = vld [vmem:[#allocation10 + $0xed0] sm:$0xf0]  ;;  %v16665_v28 = vor.u32 %v18339_v12, %v16662_v57  ;;  %v18303_v37 = vld [vmem:[#allocation10 + $0xca4] sm:$0xf] }
 0x54e   :  { %10547 = vmatpush.bf16.msra.mxu2 %v16201_v26  ;;  %10560 = vmatpush.bf16.msrb.mxu0 %v16329_v25  ;;  %v16918_v48 = vld [vmem:[#allocation10 + $0xfd0] sm:$0xf0]  ;;  %v16793_v20 = vor.u32 %v18371_v54, %v16790_v5  ;;  %v18335_v16 = vld [vmem:[#allocation10 + $0xda4] sm:$0xf] }
 0x54f   :  { %v16518_v32 = vld [vmem:[#allocation10 + $0xcb0] sm:$0xf0]  ;;  %v16921_v15 = vor.u32 %v18403_v47, %v16918_v48  ;;  %v18367_v60 = vld [vmem:[#allocation10 + $0xea4] sm:$0xf] }
 0x550   :  { %v16646_v53 = vld [vmem:[#allocation10 + $0xdb0] sm:$0xf0]  ;;  %v18399_v3 = vld [vmem:[#allocation10 + $0xfa4] sm:$0xf]  ;;  %v16521_v38 = vor.u32 %v18303_v37, %v16518_v32 }
 0x551   :  { %10522 = vmatpush.bf16.msrb.mxu3 %v15929_v62  ;;  %10535 = vmatpush.bf16.msra.mxu1 %v16057_v1  ;;  %v16774_v61 = vld [vmem:[#allocation10 + $0xeb0] sm:$0xf0]  ;;  %v16649_v31 = vor.u32 %v18335_v16, %v16646_v53  ;;  %v18299_v46 = vld [vmem:[#allocation10 + $0xc84] sm:$0xf] }
 0x552   :  { %10548 = vmatpush.bf16.msra.mxu2 %v16185_v55  ;;  %10561 = vmatpush.bf16.msrb.mxu0 %v16313_v42  ;;  %v16902_v49 = vld [vmem:[#allocation10 + $0xfb0] sm:$0xf0]  ;;  %v16777_v63 = vor.u32 %v18367_v60, %v16774_v61  ;;  %v18331_v25 = vld [vmem:[#allocation10 + $0xd84] sm:$0xf] }
 0x553   :  { %v16502_v50 = vld [vmem:[#allocation10 + $0xc90] sm:$0xf0]  ;;  %v16905_v26 = vor.u32 %v18399_v3, %v16902_v49  ;;  %v18363_v52 = vld [vmem:[#allocation10 + $0xe84] sm:$0xf] }
 0x554   :  { %10523 = vmatmul.bf16.vlgmr.msrb.gmra.mxu3 %v20045_v45  ;;  %10536 = vmatmul.bf16.vlgmr.msra.gmra.mxu1 %v20047_v18  ;;  %v16630_v40 = vld [vmem:[#allocation10 + $0xd90] sm:$0xf0]  ;;  %v18395_v10 = vld [vmem:[#allocation10 + $0xf84] sm:$0xf]  ;;  %v16505_v8 = vor.u32 %v18299_v46, %v16502_v50 }
 0x555   :  { %10567 = vmatpush.bf16.msra.mxu3 %v16553_v34  ;;  %10580 = vmatpush.bf16.msrb.mxu1 %v16681_v30  ;;  %v16758_v2 = vld [vmem:[#allocation10 + $0xe90] sm:$0xf0]  ;;  %v16633_v36 = vor.u32 %v18331_v25, %v16630_v40  ;;  %v18295_v23 = vld [vmem:[#allocation10 + $0xc64] sm:$0xf] }
 0x556   :  { %10593 = vmatpush.bf16.msrb.mxu2 %v16809_v4  ;;  %10606 = vmatpush.bf16.msra.mxu0 %v16937_v56  ;;  %v16886_v35 = vld [vmem:[#allocation10 + $0xf90] sm:$0xf0]  ;;  %v16761_v62 = vor.u32 %v18363_v52, %v16758_v2  ;;  %v18327_v44 = vld [vmem:[#allocation10 + $0xd64] sm:$0xf] }
 0x557   :  { %10549 = vmatmul.bf16.vlgmr.msra.gmra.mxu2 %v20049_v13  ;;  %10562 = vmatmul.bf16.vlgmr.msrb.gmra.mxu0 %v20051_v33  ;;  %v16486_v21 = vld [vmem:[#allocation10 + $0xc70] sm:$0xf0]  ;;  %v16889_v1 = vor.u32 %v18395_v10, %v16886_v35  ;;  %v18359_v6 = vld [vmem:[#allocation10 + $0xe64] sm:$0xf] }
 0x558   :  { %v16614_v11 = vld [vmem:[#allocation10 + $0xd70] sm:$0xf0]  ;;  %v18391_v42 = vld [vmem:[#allocation10 + $0xf64] sm:$0xf]  ;;  %v16489_v30 = vor.u32 %v18295_v23, %v16486_v21  ;;  %v17930_v23 = vld [vmem:[#allocation10 + $0xf4] sm:$0xf0] }
 0x559   :  { %10568 = vmatpush.bf16.msra.mxu3 %v16537_v19  ;;  %10581 = vmatpush.bf16.msrb.mxu1 %v16665_v28  ;;  %v16742_v55 = vld [vmem:[#allocation10 + $0xe70] sm:$0xf0]  ;;  %v16617_v14 = vor.u32 %v18327_v44, %v16614_v11  ;;  %v18291_v58 = vld [vmem:[#allocation10 + $0xc44] sm:$0xf]  ;;  %v15148_v21 = vld [vmem:[#allocation10 + $0x1e8] sm:$0xf] }
 0x55a   :  { %10594 = vmatpush.bf16.msrb.mxu2 %v16793_v20  ;;  %10607 = vmatpush.bf16.msra.mxu0 %v16921_v15  ;;  %v16870_v34 = vld [vmem:[#allocation10 + $0xf70] sm:$0xf0]  ;;  %v16745_v56 = vor.u32 %v18359_v6, %v16742_v55  ;;  %v18323_v57 = vld [vmem:[#allocation10 + $0xd44] sm:$0xf]  ;;  %v17994_v6 = vld [vmem:[#allocation10 + $0x2f4] sm:$0xf0] }
 0x55b   :  { %v16470_v4 = vld [vmem:[#allocation10 + $0xc50] sm:$0xf0]  ;;  %v16873_v12 = vor.u32 %v18391_v42, %v16870_v34  ;;  %v18355_v5 = vld [vmem:[#allocation10 + $0xe44] sm:$0xf]  ;;  %v15404_v55 = vld [vmem:[#allocation10 + $0x3e8] sm:$0xf] }
 0x55c   :  { %v16598_v54 = vld [vmem:[#allocation10 + $0xd50] sm:$0xf0]  ;;  %v18387_v48 = vld [vmem:[#allocation10 + $0xf44] sm:$0xf]  ;;  %v16473_v28 = vor.u32 %v18291_v58, %v16470_v4  ;;  %v18026_v42 = vld [vmem:[#allocation10 + $0x3f4] sm:$0xf0] }
 0x55d   :  { %10569 = vmatpush.bf16.msra.mxu3 %v16521_v38  ;;  %10582 = vmatpush.bf16.msrb.mxu1 %v16649_v31  ;;  %v16726_v47 = vld [vmem:[#allocation10 + $0xe50] sm:$0xf0]  ;;  %v16601_v37 = vor.u32 %v18323_v57, %v16598_v54  ;;  %v18287_v32 = vld [vmem:[#allocation10 + $0xc24] sm:$0xf]  ;;  %v15004_v4 = vld [vmem:[#allocation10 + $0xc8] sm:$0xf]  ;;  %v15405_v57 = vor.u32 %v18026_v42, %v15404_v55 }
 0x55e   :  { %10595 = vmatpush.bf16.msrb.mxu2 %v16777_v63  ;;  %10608 = vmatpush.bf16.msra.mxu0 %v16905_v26  ;;  %v16854_v19 = vld [vmem:[#allocation10 + $0xf50] sm:$0xf0]  ;;  %v16729_v15 = vor.u32 %v18355_v5, %v16726_v47  ;;  %v18319_v53 = vld [vmem:[#allocation10 + $0xd24] sm:$0xf]  ;;  %v15132_v54 = vld [vmem:[#allocation10 + $0x1c8] sm:$0xf] }
 0x55f   :  { %v16454_v20 = vld [vmem:[#allocation10 + $0xc30] sm:$0xf0]  ;;  %v16857_v16 = vor.u32 %v18387_v48, %v16854_v19  ;;  %v18351_v61 = vld [vmem:[#allocation10 + $0xe24] sm:$0xf]  ;;  %v17958_v5 = vld [vmem:[#allocation10 + $0x1d4] sm:$0xf0] }
 0x560   :  { %v16582_v60 = vld [vmem:[#allocation10 + $0xd30] sm:$0xf0]  ;;  %v18383_v49 = vld [vmem:[#allocation10 + $0xf24] sm:$0xf]  ;;  %v16457_v46 = vor.u32 %v18287_v32, %v16454_v20  ;;  %v15260_v47 = vld [vmem:[#allocation10 + $0x2c8] sm:$0xf]  ;;  %v15133_v32 = vor.u32 %v17958_v5, %v15132_v54 }
 0x561   :  { %10570 = vmatpush.bf16.msra.mxu3 %v16505_v8  ;;  %10583 = vmatpush.bf16.msrb.mxu1 %v16633_v36  ;;  %v16710_v3 = vld [vmem:[#allocation10 + $0xe30] sm:$0xf0]  ;;  %v18283_v31 = vld [vmem:[#allocation10 + $0xc04] sm:$0xf]  ;;  %v16585_v50 = vor.u32 %v18319_v53, %v16582_v60  ;;  %v15020_v36 = vld [vmem:[#allocation10 + $0xe8] sm:$0xf] }
 0x562   :  { %10596 = vmatpush.bf16.msrb.mxu2 %v16761_v62  ;;  %10609 = vmatpush.bf16.msra.mxu0 %v16889_v1  ;;  %v16838_v38 = vld [vmem:[#allocation10 + $0xf30] sm:$0xf0]  ;;  %v18315_v26 = vld [vmem:[#allocation10 + $0xd04] sm:$0xf]  ;;  %v16713_v40 = vor.u32 %v18351_v61, %v16710_v3  ;;  %v17962_v62 = vld [vmem:[#allocation10 + $0x1f4] sm:$0xf0] }
 0x563   :  { %v16438_v63 = vld [vmem:[#allocation10 + $0xc10] sm:$0xf0]  ;;  %v16841_v52 = vor.u32 %v18383_v49, %v16838_v38  ;;  %v18347_v2 = vld [vmem:[#allocation10 + $0xe04] sm:$0xf]  ;;  %v15276_v1 = vld [vmem:[#allocation10 + $0x2e8] sm:$0xf]  ;;  %v15149_v58 = vor.u32 %v17962_v62, %v15148_v21 }
 0x564   :  { %v16566_v25 = vld [vmem:[#allocation10 + $0xd10] sm:$0xf0]  ;;  %v18379_v35 = vld [vmem:[#allocation10 + $0xf04] sm:$0xf]  ;;  %v16441_v44 = vor.u32 %v18283_v31, %v16438_v63  ;;  %v17990_v48 = vld [vmem:[#allocation10 + $0x2d4] sm:$0xf0] }
 0x565   :  { %10571 = vmatpush.bf16.msra.mxu3 %v16489_v30  ;;  %10584 = vmatpush.bf16.msrb.mxu1 %v16617_v14  ;;  %v16694_v10 = vld [vmem:[#allocation10 + $0xe10] sm:$0xf0]  ;;  %v16569_v11 = vor.u32 %v18315_v26, %v16566_v25  ;;  %v15021_v14 = vor.u32 %v17930_v23, %v15020_v36  ;;  %v15388_v19 = vld [vmem:[#allocation10 + $0x3c8] sm:$0xf]  ;;  %v17954_v61 = vld [vmem:[#allocation10 + $0x1b4] sm:$0xf0] }
 0x566   :  { %10597 = vmatpush.bf16.msrb.mxu2 %v16745_v56  ;;  %10610 = vmatpush.bf16.msra.mxu0 %v16873_v12  ;;  %v16822_v8 = vld [vmem:[#allocation10 + $0xf10] sm:$0xf0]  ;;  %v16697_v34 = vor.u32 %v18347_v2, %v16694_v10  ;;  %v17926_v56 = vld [vmem:[#allocation10 + $0xd4] sm:$0xf0]  ;;  %v15277_v12 = vor.u32 %v17994_v6, %v15276_v1  ;;  %v14988_v20 = vld [vmem:[#allocation10 + $0xa8] sm:$0xf] }
 0x567   :  { %v16825_v30 = vor.u32 %v18379_v35, %v16822_v8  ;;  %v15116_v60 = vld [vmem:[#allocation10 + $0x1a8] sm:$0xf]  ;;  %v17986_v49 = vld [vmem:[#allocation10 + $0x2b4] sm:$0xf0] }
 0x568   :  { %v15244_v3 = vld [vmem:[#allocation10 + $0x2a8] sm:$0xf]  ;;  %v18018_v31 = vld [vmem:[#allocation10 + $0x3b4] sm:$0xf0]  ;;  %v15117_v63 = vor.u32 %v17954_v61, %v15116_v60 }
 0x569   :  { %10572 = vmatpush.bf16.msra.mxu3 %v16473_v28  ;;  %10585 = vmatpush.bf16.msrb.mxu1 %v16601_v37  ;;  %v18022_v28 = vld [vmem:[#allocation10 + $0x3d4] sm:$0xf0]  ;;  %v15005_v37 = vor.u32 %v17926_v56, %v15004_v4  ;;  %v15372_v38 = vld [vmem:[#allocation10 + $0x3a8] sm:$0xf] }
 0x56a   :  { %10598 = vmatpush.bf16.msrb.mxu2 %v16729_v15  ;;  %10611 = vmatpush.bf16.msra.mxu0 %v16857_v16  ;;  %v17922_v15 = vld [vmem:[#allocation10 + $0xb4] sm:$0xf0]  ;;  %v15261_v16 = vor.u32 %v17990_v48, %v15260_v47  ;;  %v15389_v53 = vor.u32 %v18022_v28, %v15388_v19  ;;  %v14972_v25 = vld [vmem:[#allocation10 + $0x88] sm:$0xf]  ;;  %v15373_v2 = vor.u32 %v18018_v31, %v15372_v38 }
 0x56b   :  { %v15100_v10 = vld [vmem:[#allocation10 + $0x188] sm:$0xf]  ;;  %v17950_v35 = vld [vmem:[#allocation10 + $0x194] sm:$0xf0] }
 0x56c   :  { %v15228_v8 = vld [vmem:[#allocation10 + $0x288] sm:$0xf]  ;;  %v17982_v36 = vld [vmem:[#allocation10 + $0x294] sm:$0xf0]  ;;  %v15101_v1 = vor.u32 %v17950_v35, %v15100_v10 }
 0x56d   :  { %10573 = vmatpush.bf16.msra.mxu3 %v16457_v46  ;;  %10586 = vmatpush.bf16.msrb.mxu1 %v16585_v50  ;;  %v14989_v50 = vor.u32 %v17922_v15, %v14988_v20  ;;  %v15356_v23 = vld [vmem:[#allocation10 + $0x388] sm:$0xf]  ;;  %v18014_v21 = vld [vmem:[#allocation10 + $0x394] sm:$0xf0]  ;;  %v15229_v6 = vor.u32 %v17982_v36, %v15228_v8 }
 0x56e   :  { %10599 = vmatpush.bf16.msrb.mxu2 %v16713_v40  ;;  %10612 = vmatpush.bf16.msra.mxu0 %v16841_v52  ;;  %v17918_v40 = vld [vmem:[#allocation10 + $0x94] sm:$0xf0]  ;;  %v15245_v52 = vor.u32 %v17986_v49, %v15244_v3  ;;  %v15357_v55 = vor.u32 %v18014_v21, %v15356_v23  ;;  %v14940_v28 = vld [vmem:[#allocation10 + $0x48] sm:$0xf] }
 0x56f   :  { %v14973_v62 = vor.u32 %v17918_v40, %v14972_v25  ;;  %v17978_v56 = vld [vmem:[#allocation10 + $0x274] sm:$0xf0]  ;;  %v15068_v15 = vld [vmem:[#allocation10 + $0x148] sm:$0xf] }
 0x570   :  { %v10329_v46 = vpop.f32.mrf.mxu1  ;;  %v17974_v60 = vld [vmem:[#allocation10 + $0x254] sm:$0xf0]  ;;  %v15324_v61 = vld [vmem:[#allocation10 + $0x348] sm:$0xf] }
 0x571   :  { %10574 = vmatpush.bf16.msra.mxu3 %v16441_v44  ;;  %10587 = vmatpush.bf16.msrb.mxu1 %v16569_v11  ;;  %v10355_v26 = vpop.f32.mrf.mxu0  ;;  %v14956_v44 = vld [vmem:[#allocation10 + $0x68] sm:$0xf]  ;;  %v17914_v11 = vld [vmem:[#allocation10 + $0x74] sm:$0xf0] }
 0x572   :  { %10600 = vmatpush.bf16.msrb.mxu2 %v16697_v34  ;;  %10613 = vmatpush.bf16.msra.mxu0 %v16825_v30  ;;  %v15084_v34 = vld [vmem:[#allocation10 + $0x168] sm:$0xf]  ;;  %v17946_v30 = vld [vmem:[#allocation10 + $0x174] sm:$0xf0]  ;;  %v14957_v47 = vor.u32 %v17914_v11, %v14956_v44 }
 0x573   :  { %v15085_v48 = vor.u32 %v17946_v30, %v15084_v34  ;;  %v18006_v3 = vld [vmem:[#allocation10 + $0x354] sm:$0xf0]  ;;  %v14924_v31 = vld [vmem:[#allocation10 + $0x28] sm:$0xf] }
 0x574   :  { %10575 = vmatmul.bf16.vlgmr.msra.gmra.mxu3 %v20073_v39  ;;  %10588 = vmatmul.bf16.vlgmr.msrb.gmra.mxu1 %v20075_v7  ;;  %v15325_v25 = vor.u32 %v18006_v3, %v15324_v61  ;;  %v15180_v10 = vld [vmem:[#allocation10 + $0x228] sm:$0xf]  ;;  %v17970_v8 = vld [vmem:[#allocation10 + $0x234] sm:$0xf0] }
 0x575   :  { %10619 = vmatpush.bf16.msrb.mxu3 %v15021_v14  ;;  %10632 = vmatpush.bf16.msra.mxu1 %v15149_v58  ;;  %v15212_v14 = vld [vmem:[#allocation10 + $0x268] sm:$0xf]  ;;  %v18002_v23 = vld [vmem:[#allocation10 + $0x334] sm:$0xf0] }
 0x576   :  { %10645 = vmatpush.bf16.msra.mxu2 %v15277_v12  ;;  %10658 = vmatpush.bf16.msrb.mxu0 %v15405_v57  ;;  %v10316_v42 = vpop.f32.mrf.mxu3  ;;  %v15340_v12 = vld [vmem:[#allocation10 + $0x368] sm:$0xf]  ;;  %v18010_v57 = vld [vmem:[#allocation10 + $0x374] sm:$0xf0] }
 0x577   :  { %10601 = vmatmul.bf16.vlgmr.msrb.gmra.mxu2 %v20077_v24  ;;  %10614 = vmatmul.bf16.vlgmr.msra.gmra.mxu0 %v20071_v27  ;;  %v10317_v58 = vadd.f32 %v10316_v42, %v20068_v43  ;;  %v10342_v4 = vpop.f32.mrf.mxu2  ;;  %v15341_v20 = vor.u32 %v18010_v57, %v15340_v12  ;;  %v15196_v43 = vld [vmem:[#allocation10 + $0x248] sm:$0xf]  ;;  %v15181_v42 = vor.u32 %v17970_v8, %v15180_v10  ;;  %v18058_v12 = vld [vmem:[#allocation10 + $0x4f4] sm:$0xf0] }
 0x578   :  { %v10331_v54 = vpop.f32.mrf.mxu1  ;;  %v15308_v36 = vld [vmem:[#allocation10 + $0x328] sm:$0xf]  ;;  %v18054_v3 = vld [vmem:[#allocation10 + $0x4d4] sm:$0xf0] }
 0x579   :  { %10620 = vmatpush.bf16.msrb.mxu3 %v15005_v37  ;;  %10633 = vmatpush.bf16.msra.mxu1 %v15133_v32  ;;  %v10330_v5 = vadd.f32 %v10329_v46, %v10317_v58  ;;  %v10357_v19 = vpop.f32.mrf.mxu0  ;;  %v17910_v37 = vld [vmem:[#allocation10 + $0x54] sm:$0xf0]  ;;  %v15213_v32 = vor.u32 %v17978_v56, %v15212_v14  ;;  %v15309_v34 = vor.u32 %v18002_v23, %v15308_v36  ;;  %v15164_v30 = vld [vmem:[#allocation10 + $0x208] sm:$0xf] }
 0x57a   :  { %10646 = vmatpush.bf16.msra.mxu2 %v15261_v16  ;;  %10659 = vmatpush.bf16.msrb.mxu0 %v15389_v53  ;;  %v17942_v16 = vld [vmem:[#allocation10 + $0x154] sm:$0xf0]  ;;  %v14941_v49 = vor.u32 %v17910_v37, %v14940_v28  ;;  %v15292_v58 = vld [vmem:[#allocation10 + $0x308] sm:$0xf] }
 0x57b   :  { %v10343_v53 = vadd.f32 %v10342_v4, %v10330_v5  ;;  %v15069_v38 = vor.u32 %v17942_v16, %v15068_v15  ;;  %v17906_v46 = vld [vmem:[#allocation10 + $0x34] sm:$0xf0]  ;;  %v15532_v56 = vld [vmem:[#allocation10 + $0x4e8] sm:$0xf] }
 0x57c   :  { %v17966_v14 = vld [vmem:[#allocation10 + $0x214] sm:$0xf0]  ;;  %v15660_v57 = vld [vmem:[#allocation10 + $0x5e8] sm:$0xf]  ;;  %v15533_v16 = vor.u32 %v18058_v12, %v15532_v56 }
 0x57d   :  { %10621 = vmatpush.bf16.msrb.mxu3 %v14989_v50  ;;  %10634 = vmatpush.bf16.msra.mxu1 %v15117_v63  ;;  %v10356_v50 = vadd.f32 %v10355_v26, %v10343_v53  ;;  %v15197_v63 = vor.u32 %v17974_v60, %v15196_v43  ;;  %v17902_v26 = vld [vmem:[#allocation10 + $0x14] sm:$0xf0]  ;;  %v15788_v5 = vld [vmem:[#allocation10 + $0x6e8] sm:$0xf] }
 0x57e   :  { %10647 = vmatpush.bf16.msra.mxu2 %v15245_v52  ;;  %10660 = vmatpush.bf16.msrb.mxu0 %v15373_v2  ;;  %v10318_v40 = vpop.f32.mrf.mxu3  ;;  %v15052_v52 = vld [vmem:[#allocation10 + $0x128] sm:$0xf]  ;;  %v17938_v2 = vld [vmem:[#allocation10 + $0x134] sm:$0xf0] }
 0x57f   :  { %v10344_v35 = vpop.f32.mrf.mxu2  ;;  %v15053_v44 = vor.u32 %v17938_v2, %v15052_v52  ;;  %v17998_v4 = vld [vmem:[#allocation10 + $0x314] sm:$0xf0]  ;;  %v15916_v28 = vld [vmem:[#allocation10 + $0x7e8] sm:$0xf] }
 0x580   :  { %v10381_v21 = vpop.f32.mrf.mxu1  ;;  %v18090_v54 = vld [vmem:[#allocation10 + $0x5f4] sm:$0xf0]  ;;  %v15516_v61 = vld [vmem:[#allocation10 + $0x4c8] sm:$0xf] }
 0x581   :  { %10622 = vmatpush.bf16.msrb.mxu3 %v14973_v62  ;;  %10635 = vmatpush.bf16.msra.mxu1 %v15101_v1  ;;  %v14908_v62 = vld [vmem:[#allocation10 + $0x8] sm:$0xf]  ;;  %v14925_v1 = vor.u32 %v17906_v46, %v14924_v31  ;;  %v20100_v11 = vpop.f32.mrf.mxu0  ;;  %v18122_v19 = vld [vmem:[#allocation10 + $0x6f4] sm:$0xf0]  ;;  %v15661_v43 = vor.u32 %v18090_v54, %v15660_v57  ;;  %v15517_v8 = vor.u32 %v18054_v3, %v15516_v61 }
 0x582   :  { %10648 = vmatpush.bf16.msra.mxu2 %v15229_v6  ;;  %10661 = vmatpush.bf16.msrb.mxu0 %v15357_v55  ;;  %v15036_v6 = vld [vmem:[#allocation10 + $0x108] sm:$0xf]  ;;  %v17934_v55 = vld [vmem:[#allocation10 + $0x114] sm:$0xf0] }
 0x583   :  { %v18154_v37 = vld [vmem:[#allocation10 + $0x7f4] sm:$0xf0]  ;;  %v15644_v46 = vld [vmem:[#allocation10 + $0x5c8] sm:$0xf] }
 0x584   :  { %v18118_v2 = vld [vmem:[#allocation10 + $0x6d4] sm:$0xf0]  ;;  %v15900_v10 = vld [vmem:[#allocation10 + $0x7c8] sm:$0xf] }
 0x585   :  { %10623 = vmatpush.bf16.msrb.mxu3 %v14957_v47  ;;  %10636 = vmatpush.bf16.msra.mxu1 %v15085_v48  ;;  %v14909_v47 = vor.u32 %v17902_v26, %v14908_v62  ;;  %v15037_v48 = vor.u32 %v17934_v55, %v15036_v6  ;;  %v18150_v35 = vld [vmem:[#allocation10 + $0x7d4] sm:$0xf0]  ;;  %v15500_v23 = vld [vmem:[#allocation10 + $0x4a8] sm:$0xf] }
 0x586   :  { %10649 = vmatpush.bf16.msra.mxu2 %v15213_v32  ;;  %10662 = vmatpush.bf16.msrb.mxu0 %v15341_v20  ;;  %v15165_v32 = vor.u32 %v17966_v14, %v15164_v30  ;;  %v15293_v20 = vor.u32 %v17998_v4, %v15292_v58  ;;  %v10368_v15 = vpop.f32.mrf.mxu3  ;;  %v18050_v62 = vld [vmem:[#allocation10 + $0x4b4] sm:$0xf0]  ;;  %v15628_v26 = vld [vmem:[#allocation10 + $0x5a8] sm:$0xf] }
 0x587   :  { %v10369_v53 = vadd.f32 %v10368_v15, %v10356_v50  ;;  %v10394_v60 = vpop.f32.mrf.mxu2  ;;  %v18082_v6 = vld [vmem:[#allocation10 + $0x5b4] sm:$0xf0]  ;;  %v15501_v58 = vor.u32 %v18050_v62, %v15500_v23  ;;  %v15484_v12 = vld [vmem:[#allocation10 + $0x488] sm:$0xf] }
 0x588   :  { %v10383_v31 = vpop.f32.mrf.mxu1  ;;  %v18146_v30 = vld [vmem:[#allocation10 + $0x7b4] sm:$0xf0]  ;;  %v15629_v4 = vor.u32 %v18082_v6, %v15628_v26  ;;  %v15596_v3 = vld [vmem:[#allocation10 + $0x568] sm:$0xf] }
 0x589   :  { %10624 = vmatpush.bf16.msrb.mxu3 %v14941_v49  ;;  %10637 = vmatpush.bf16.msra.mxu1 %v15069_v38  ;;  %v15789_v49 = vor.u32 %v18122_v19, %v15788_v5  ;;  %v15917_v38 = vor.u32 %v18154_v37, %v15916_v28  ;;  %v10382_v40 = vadd.f32 %v10381_v21, %v10369_v53  ;;  %v10409_v52 = vpop.f32.mrf.mxu0  ;;  %v15756_v21 = vld [vmem:[#allocation10 + $0x6a8] sm:$0xf]  ;;  %v18110_v19 = vld [vmem:[#allocation10 + $0x694] sm:$0xf0] }
 0x58a   :  { %10650 = vmatpush.bf16.msra.mxu2 %v15197_v63  ;;  %10663 = vmatpush.bf16.msrb.mxu0 %v15325_v25  ;;  %v18086_v63 = vld [vmem:[#allocation10 + $0x5d4] sm:$0xf0]  ;;  %v15772_v25 = vld [vmem:[#allocation10 + $0x6c8] sm:$0xf] }
 0x58b   :  { %v10395_v50 = vadd.f32 %v10394_v60, %v10382_v40  ;;  %v15645_v36 = vor.u32 %v18086_v63, %v15644_v46  ;;  %v15612_v5 = vld [vmem:[#allocation10 + $0x588] sm:$0xf]  ;;  %v18142_v37 = vld [vmem:[#allocation10 + $0x794] sm:$0xf0] }
 0x58c   :  { %v15868_v28 = vld [vmem:[#allocation10 + $0x788] sm:$0xf]  ;;  %v18042_v53 = vld [vmem:[#allocation10 + $0x474] sm:$0xf0] }
 0x58d   :  { %10625 = vmatpush.bf16.msrb.mxu3 %v14925_v1  ;;  %10638 = vmatpush.bf16.msra.mxu1 %v15053_v44  ;;  %v15773_v1 = vor.u32 %v18118_v2, %v15772_v25  ;;  %v15901_v44 = vor.u32 %v18150_v35, %v15900_v10  ;;  %v20103_v55 = vadd.f32 %v20100_v11, %v10395_v50  ;;  %v18046_v11 = vld [vmem:[#allocation10 + $0x494] sm:$0xf0]  ;;  %v15852_v46 = vld [vmem:[#allocation10 + $0x768] sm:$0xf] }
 0x58e   :  { %10651 = vmatpush.bf16.msra.mxu2 %v15181_v42  ;;  %10664 = vmatpush.bf16.msrb.mxu0 %v15309_v34  ;;  %v18114_v42 = vld [vmem:[#allocation10 + $0x6b4] sm:$0xf0]  ;;  %v15884_v34 = vld [vmem:[#allocation10 + $0x7a8] sm:$0xf]  ;;  %v10370_v14 = vpop.f32.mrf.mxu3  ;;  %v15485_v15 = vor.u32 %v18046_v11, %v15484_v12  ;;  %v15869_v61 = vor.u32 %v18142_v37, %v15868_v28 }
 0x58f   :  { %v10396_v56 = vpop.f32.mrf.mxu2  ;;  %v15757_v57 = vor.u32 %v18114_v42, %v15756_v21  ;;  %v15885_v54 = vor.u32 %v18146_v30, %v15884_v34  ;;  %v18106_v31 = vld [vmem:[#allocation10 + $0x674] sm:$0xf0]  ;;  %v15452_v52 = vld [vmem:[#allocation10 + $0x448] sm:$0xf] }
 0x590   :  { %v18138_v63 = vld [vmem:[#allocation10 + $0x774] sm:$0xf0]  ;;  %v15708_v23 = vld [vmem:[#allocation10 + $0x648] sm:$0xf] }
 0x591   :  { %10626 = vmatpush.bf16.msrb.mxu3 %v14909_v47  ;;  %10639 = vmatpush.bf16.msra.mxu1 %v15037_v48  ;;  %v18078_v47 = vld [vmem:[#allocation10 + $0x594] sm:$0xf0]  ;;  %v15740_v48 = vld [vmem:[#allocation10 + $0x688] sm:$0xf]  ;;  %v15853_v35 = vor.u32 %v18138_v63, %v15852_v46 }
 0x592   :  { %10652 = vmatpush.bf16.msra.mxu2 %v15165_v32  ;;  %10665 = vmatpush.bf16.msrb.mxu0 %v15293_v20  ;;  %v10433_v32 = vpop.f32.mrf.mxu1  ;;  %v15741_v60 = vor.u32 %v18110_v19, %v15740_v48  ;;  %v18038_v2 = vld [vmem:[#allocation10 + $0x454] sm:$0xf0]  ;;  %v15836_v26 = vld [vmem:[#allocation10 + $0x748] sm:$0xf] }
 0x593   :  { %v18134_v6 = vld [vmem:[#allocation10 + $0x754] sm:$0xf0]  ;;  %v15453_v30 = vor.u32 %v18038_v2, %v15452_v52  ;;  %v15564_v11 = vld [vmem:[#allocation10 + $0x528] sm:$0xf] }
 0x594   :  { %10627 = vmatmul.bf16.vlgmr.msrb.gmra.mxu3 %v19820_v9  ;;  %10640 = vmatmul.bf16.vlgmr.msra.gmra.mxu1 %v19825_v51  ;;  %v10459_v20 = vpop.f32.mrf.mxu0  ;;  %v15837_v12 = vor.u32 %v18134_v6, %v15836_v26  ;;  %v18130_v48 = vld [vmem:[#allocation10 + $0x734] sm:$0xf0]  ;;  %v15420_v19 = vld [vmem:[#allocation10 + $0x408] sm:$0xf] }
 0x595   :  { %10671 = vmatpush.bf16.msra.mxu3 %v15533_v16  ;;  %10684 = vmatpush.bf16.msrb.mxu1 %v15661_v43  ;;  %v15613_v16 = vor.u32 %v18078_v47, %v15612_v5  ;;  %v15468_v43 = vld [vmem:[#allocation10 + $0x468] sm:$0xf]  ;;  %v18098_v5 = vld [vmem:[#allocation10 + $0x634] sm:$0xf0] }
 0x596   :  { %10697 = vmatpush.bf16.msrb.mxu2 %v15789_v49  ;;  %10710 = vmatpush.bf16.msra.mxu0 %v15917_v38  ;;  %v18074_v49 = vld [vmem:[#allocation10 + $0x574] sm:$0xf0]  ;;  %v15724_v38 = vld [vmem:[#allocation10 + $0x668] sm:$0xf]  ;;  %v15469_v25 = vor.u32 %v18042_v53, %v15468_v43 }
 0x597   :  { %10653 = vmatmul.bf16.vlgmr.msra.gmra.mxu2 %v19827_v59  ;;  %10666 = vmatmul.bf16.vlgmr.msrb.gmra.mxu0 %v19831_v29  ;;  %v15597_v40 = vor.u32 %v18074_v49, %v15596_v3  ;;  %v15725_v10 = vor.u32 %v18106_v31, %v15724_v38  ;;  %v10420_v50 = vpop.f32.mrf.mxu3  ;;  %v15820_v47 = vld [vmem:[#allocation10 + $0x728] sm:$0xf]  ;;  %v18062_v43 = vld [vmem:[#allocation10 + $0x514] sm:$0xf0] }
 0x598   :  { %v10434_v62 = vadd.f32 %v10433_v32, %v10420_v50  ;;  %v15676_v3 = vld [vmem:[#allocation10 + $0x608] sm:$0xf]  ;;  %v18094_v49 = vld [vmem:[#allocation10 + $0x614] sm:$0xf0] }
 0x599   :  { %10672 = vmatpush.bf16.msra.mxu3 %v15517_v8  ;;  %10685 = vmatpush.bf16.msrb.mxu1 %v15645_v36  ;;  %v15580_v8 = vld [vmem:[#allocation10 + $0x548] sm:$0xf]  ;;  %v18070_v36 = vld [vmem:[#allocation10 + $0x554] sm:$0xf0] }
 0x59a   :  { %10698 = vmatpush.bf16.msrb.mxu2 %v15773_v1  ;;  %10711 = vmatpush.bf16.msra.mxu0 %v15901_v44  ;;  %v10446_v1 = vpop.f32.mrf.mxu2  ;;  %v18102_v44 = vld [vmem:[#allocation10 + $0x654] sm:$0xf0]  ;;  %v10435_v21 = vpop.f32.mrf.mxu1  ;;  %v15581_v14 = vor.u32 %v18070_v36, %v15580_v8  ;;  %v15804_v38 = vld [vmem:[#allocation10 + $0x708] sm:$0xf]  ;;  %v15677_v36 = vor.u32 %v18094_v49, %v15676_v3 }
 0x59b   :  { %v10447_v42 = vadd.f32 %v10446_v1, %v10434_v62  ;;  %v15709_v56 = vor.u32 %v18102_v44, %v15708_v23  ;;  %v18126_v46 = vld [vmem:[#allocation10 + $0x714] sm:$0xf0]  ;;  %v16044_v63 = vld [vmem:[#allocation10 + $0x8e8] sm:$0xf] }
 0x59c   :  { %v10461_v34 = vpop.f32.mrf.mxu0  ;;  %v16300_v52 = vld [vmem:[#allocation10 + $0xae8] sm:$0xf]  ;;  %v18282_v8 = vld [vmem:[#allocation10 + $0xbf4] sm:$0xf0]  ;;  %v15805_v23 = vor.u32 %v18126_v46, %v15804_v38 }
 0x59d   :  { %10673 = vmatpush.bf16.msra.mxu3 %v15501_v58  ;;  %10686 = vmatpush.bf16.msrb.mxu1 %v15629_v4  ;;  %v15436_v58 = vld [vmem:[#allocation10 + $0x428] sm:$0xf]  ;;  %v18034_v4 = vld [vmem:[#allocation10 + $0x434] sm:$0xf0]  ;;  %v20109_v28 = vadd.f32 %v10459_v20, %v10447_v42 }
 0x59e   :  { %10699 = vmatpush.bf16.msrb.mxu2 %v15757_v57  ;;  %10712 = vmatpush.bf16.msra.mxu0 %v15885_v54  ;;  %v18066_v57 = vld [vmem:[#allocation10 + $0x534] sm:$0xf0]  ;;  %v15692_v54 = vld [vmem:[#allocation10 + $0x628] sm:$0xf]  ;;  %v15437_v37 = vor.u32 %v18034_v4, %v15436_v58 }
 0x59f   :  { %v15565_v32 = vor.u32 %v18066_v57, %v15564_v11  ;;  %v15693_v53 = vor.u32 %v18098_v5, %v15692_v54  ;;  %v18186_v20 = vld [vmem:[#allocation10 + $0x8f4] sm:$0xf0]  ;;  %v16428_v50 = vld [vmem:[#allocation10 + $0xbe8] sm:$0xf] }
 0x5a0   :  { %v16045_v62 = vor.u32 %v18186_v20, %v16044_v63  ;;  %v16028_v44 = vld [vmem:[#allocation10 + $0x8c8] sm:$0xf]  ;;  %v18182_v26 = vld [vmem:[#allocation10 + $0x8d4] sm:$0xf0]  ;;  %v16429_v21 = vor.u32 %v18282_v8, %v16428_v50 }
 0x5a1   :  { %10674 = vmatpush.bf16.msra.mxu3 %v15485_v15  ;;  %10687 = vmatpush.bf16.msrb.mxu1 %v15613_v16  ;;  %v18030_v15 = vld [vmem:[#allocation10 + $0x414] sm:$0xf0]  ;;  %v15548_v16 = vld [vmem:[#allocation10 + $0x508] sm:$0xf] }
 0x5a2   :  { %10700 = vmatpush.bf16.msrb.mxu2 %v15741_v60  ;;  %10713 = vmatpush.bf16.msra.mxu0 %v15869_v61  ;;  %v15821_v60 = vor.u32 %v18130_v48, %v15820_v47  ;;  %v10422_v61 = vpop.f32.mrf.mxu3  ;;  %v10448_v31 = vpop.f32.mrf.mxu2  ;;  %v15421_v2 = vor.u32 %v18030_v15, %v15420_v19  ;;  %v16156_v42 = vld [vmem:[#allocation10 + $0x9c8] sm:$0xf]  ;;  %v18214_v34 = vld [vmem:[#allocation10 + $0x9d4] sm:$0xf0] }
 0x5a3   :  { %v16412_v58 = vld [vmem:[#allocation10 + $0xbc8] sm:$0xf]  ;;  %v18278_v4 = vld [vmem:[#allocation10 + $0xbd4] sm:$0xf0] }
 0x5a4   :  { %v16012_v11 = vld [vmem:[#allocation10 + $0x8a8] sm:$0xf]  ;;  %v18178_v57 = vld [vmem:[#allocation10 + $0x8b4] sm:$0xf0]  ;;  %v16413_v5 = vor.u32 %v18278_v4, %v16412_v58 }
 0x5a5   :  { %10675 = vmatpush.bf16.msra.mxu3 %v15469_v25  ;;  %10688 = vmatpush.bf16.msrb.mxu1 %v15597_v40  ;;  %v16172_v25 = vld [vmem:[#allocation10 + $0x9e8] sm:$0xf]  ;;  %v18218_v40 = vld [vmem:[#allocation10 + $0x9f4] sm:$0xf0] }
 0x5a6   :  { %10701 = vmatpush.bf16.msrb.mxu2 %v15725_v10  ;;  %10714 = vmatpush.bf16.msra.mxu0 %v15853_v35  ;;  %v15549_v10 = vor.u32 %v18062_v43, %v15548_v16  ;;  %v18250_v35 = vld [vmem:[#allocation10 + $0xaf4] sm:$0xf0]  ;;  %v16173_v1 = vor.u32 %v18218_v40, %v16172_v25  ;;  %v16140_v47 = vld [vmem:[#allocation10 + $0x9a8] sm:$0xf]  ;;  %v16013_v16 = vor.u32 %v18178_v57, %v16012_v11 }
 0x5a7   :  { %v16301_v6 = vor.u32 %v18250_v35, %v16300_v52  ;;  %v18210_v48 = vld [vmem:[#allocation10 + $0x9b4] sm:$0xf0]  ;;  %v16268_v19 = vld [vmem:[#allocation10 + $0xaa8] sm:$0xf] }
 0x5a8   :  { %v18274_v15 = vld [vmem:[#allocation10 + $0xbb4] sm:$0xf0]  ;;  %v16141_v43 = vor.u32 %v18210_v48, %v16140_v47  ;;  %v16124_v49 = vld [vmem:[#allocation10 + $0x988] sm:$0xf] }
 0x5a9   :  { %10676 = vmatpush.bf16.msra.mxu3 %v15453_v30  ;;  %10689 = vmatpush.bf16.msrb.mxu1 %v15581_v14  ;;  %v16284_v30 = vld [vmem:[#allocation10 + $0xac8] sm:$0xf]  ;;  %v18246_v14 = vld [vmem:[#allocation10 + $0xad4] sm:$0xf0] }
 0x5aa   :  { %10702 = vmatpush.bf16.msrb.mxu2 %v15709_v56  ;;  %10715 = vmatpush.bf16.msra.mxu0 %v15837_v12  ;;  %v16029_v56 = vor.u32 %v18182_v26, %v16028_v44  ;;  %v16157_v12 = vor.u32 %v18214_v34, %v16156_v42  ;;  %v16285_v54 = vor.u32 %v18246_v14, %v16284_v30  ;;  %v18206_v38 = vld [vmem:[#allocation10 + $0x994] sm:$0xf0]  ;;  %v16252_v31 = vld [vmem:[#allocation10 + $0xa88] sm:$0xf] }
 0x5ab   :  { %v18238_v46 = vld [vmem:[#allocation10 + $0xa94] sm:$0xf0]  ;;  %v16380_v63 = vld [vmem:[#allocation10 + $0xb88] sm:$0xf] }
 0x5ac   :  { %v18270_v20 = vld [vmem:[#allocation10 + $0xb94] sm:$0xf0]  ;;  %v16253_v50 = vor.u32 %v18238_v46, %v16252_v31  ;;  %v16364_v44 = vld [vmem:[#allocation10 + $0xb68] sm:$0xf] }
 0x5ad   :  { %10677 = vmatpush.bf16.msra.mxu3 %v15437_v37  ;;  %10690 = vmatpush.bf16.msrb.mxu1 %v15565_v32  ;;  %v18242_v37 = vld [vmem:[#allocation10 + $0xab4] sm:$0xf0]  ;;  %v16396_v32 = vld [vmem:[#allocation10 + $0xba8] sm:$0xf]  ;;  %v16381_v8 = vor.u32 %v18270_v20, %v16380_v63 }
 0x5ae   :  { %10703 = vmatpush.bf16.msrb.mxu2 %v15693_v53  ;;  %10716 = vmatpush.bf16.msra.mxu0 %v15821_v60  ;;  %v15996_v53 = vld [vmem:[#allocation10 + $0x888] sm:$0xf]  ;;  %v18174_v60 = vld [vmem:[#allocation10 + $0x894] sm:$0xf0]  ;;  %v16269_v61 = vor.u32 %v18242_v37, %v16268_v19  ;;  %v16397_v3 = vor.u32 %v18274_v15, %v16396_v32 }
 0x5af   :  { %v15997_v52 = vor.u32 %v18174_v60, %v15996_v53  ;;  %v18170_v35 = vld [vmem:[#allocation10 + $0x874] sm:$0xf0]  ;;  %v15964_v42 = vld [vmem:[#allocation10 + $0x848] sm:$0xf] }
 0x5b0   :  { %v18266_v26 = vld [vmem:[#allocation10 + $0xb74] sm:$0xf0]  ;;  %v16092_v4 = vld [vmem:[#allocation10 + $0x948] sm:$0xf] }
 0x5b1   :  { %10678 = vmatpush.bf16.msra.mxu3 %v15421_v2  ;;  %10691 = vmatpush.bf16.msrb.mxu1 %v15549_v10  ;;  %v10485_v25 = vpop.f32.mrf.mxu1  ;;  %v16125_v2 = vor.u32 %v18206_v38, %v16124_v49  ;;  %v15980_v10 = vld [vmem:[#allocation10 + $0x868] sm:$0xf]  ;;  %v18166_v34 = vld [vmem:[#allocation10 + $0x854] sm:$0xf0]  ;;  %v16365_v14 = vor.u32 %v18266_v26, %v16364_v44 }
 0x5b2   :  { %10704 = vmatpush.bf16.msrb.mxu2 %v15677_v36  ;;  %10717 = vmatpush.bf16.msra.mxu0 %v15805_v23  ;;  %v16108_v36 = vld [vmem:[#allocation10 + $0x968] sm:$0xf]  ;;  %v18202_v23 = vld [vmem:[#allocation10 + $0x974] sm:$0xf0]  ;;  %v15965_v32 = vor.u32 %v18166_v34, %v15964_v42 }
 0x5b3   :  { %v18262_v47 = vld [vmem:[#allocation10 + $0xb54] sm:$0xf0]  ;;  %v16332_v31 = vld [vmem:[#allocation10 + $0xb28] sm:$0xf] }
 0x5b4   :  { %10679 = vmatmul.bf16.vlgmr.msra.gmra.mxu3 %v19840_v17  ;;  %10692 = vmatmul.bf16.vlgmr.msrb.gmra.mxu1 %v19844_v41  ;;  %v10511_v40 = vpop.f32.mrf.mxu0  ;;  %v18226_v38 = vld [vmem:[#allocation10 + $0xa34] sm:$0xf0]  ;;  %v15932_v63 = vld [vmem:[#allocation10 + $0x808] sm:$0xf] }
 0x5b5   :  { %10723 = vmatpush.bf16.msrb.mxu3 %v16045_v62  ;;  %10736 = vmatpush.bf16.msra.mxu1 %v16173_v1  ;;  %v16236_v62 = vld [vmem:[#allocation10 + $0xa68] sm:$0xf]  ;;  %v18234_v1 = vld [vmem:[#allocation10 + $0xa74] sm:$0xf0] }
 0x5b6   :  { %10749 = vmatpush.bf16.msra.mxu2 %v16301_v6  ;;  %10762 = vmatpush.bf16.msrb.mxu0 %v16429_v21  ;;  %v15981_v6 = vor.u32 %v18170_v35, %v15980_v10  ;;  %v16109_v21 = vor.u32 %v18202_v23, %v16108_v36  ;;  %v16237_v30 = vor.u32 %v18234_v1, %v16236_v62  ;;  %v18258_v46 = vld [vmem:[#allocation10 + $0xb34] sm:$0xf0]  ;;  %v16188_v23 = vld [vmem:[#allocation10 + $0xa08] sm:$0xf] }
 0x5b7   :  { %10705 = vmatmul.bf16.vlgmr.msrb.gmra.mxu2 %v19846_v0  ;;  %10718 = vmatmul.bf16.vlgmr.msra.gmra.mxu0 %v19849_v22  ;;  %v10472_v58 = vpop.f32.mrf.mxu3  ;;  %v18190_v10 = vld [vmem:[#allocation10 + $0x914] sm:$0xf0]  ;;  %v16316_v1 = vld [vmem:[#allocation10 + $0xb08] sm:$0xf] }
 0x5b8   :  { %v10473_v11 = vadd.f32 %v10472_v58, %v20109_v28  ;;  %v16204_v28 = vld [vmem:[#allocation10 + $0xa28] sm:$0xf]  ;;  %v18222_v62 = vld [vmem:[#allocation10 + $0xa14] sm:$0xf0] }
 0x5b9   :  { %10724 = vmatpush.bf16.msrb.mxu3 %v16029_v56  ;;  %10737 = vmatpush.bf16.msra.mxu1 %v16157_v12  ;;  %v18198_v56 = vld [vmem:[#allocation10 + $0x954] sm:$0xf0]  ;;  %v16220_v12 = vld [vmem:[#allocation10 + $0xa48] sm:$0xf]  ;;  %v10487_v48 = vpop.f32.mrf.mxu1 }
 0x5ba   :  { %10750 = vmatpush.bf16.msra.mxu2 %v16285_v54  ;;  %10763 = vmatpush.bf16.msrb.mxu0 %v16413_v5  ;;  %v10498_v57 = vpop.f32.mrf.mxu2  ;;  %v18230_v54 = vld [vmem:[#allocation10 + $0xa54] sm:$0xf0]  ;;  %v16348_v5 = vld [vmem:[#allocation10 + $0xb48] sm:$0xf]  ;;  %v10486_v19 = vadd.f32 %v10485_v25, %v10473_v11  ;;  %v16093_v15 = vor.u32 %v18198_v56, %v16092_v4 }
 0x5bb   :  { %v16221_v53 = vor.u32 %v18230_v54, %v16220_v12  ;;  %v16349_v60 = vor.u32 %v18262_v47, %v16348_v5  ;;  %v18254_v26 = vld [vmem:[#allocation10 + $0xb14] sm:$0xf0]  ;;  %v16684_v42 = vld [vmem:[#allocation10 + $0xde8] sm:$0xf]  ;;  %v16189_v12 = vor.u32 %v18222_v62, %v16188_v23 }
 0x5bc   :  { %v10513_v37 = vpop.f32.mrf.mxu0  ;;  %v10499_v49 = vadd.f32 %v10498_v57, %v10486_v19  ;;  %v18346_v34 = vld [vmem:[#allocation10 + $0xdf4] sm:$0xf0]  ;;  %v16940_v4 = vld [vmem:[#allocation10 + $0xfe8] sm:$0xf]  ;;  %v16317_v11 = vor.u32 %v18254_v26, %v16316_v1 }
 0x5bd   :  { %10725 = vmatpush.bf16.msrb.mxu3 %v16013_v16  ;;  %10738 = vmatpush.bf16.msra.mxu1 %v16141_v43  ;;  %v15948_v16 = vld [vmem:[#allocation10 + $0x828] sm:$0xf]  ;;  %v18162_v43 = vld [vmem:[#allocation10 + $0x834] sm:$0xf0]  ;;  %v16685_v54 = vor.u32 %v18346_v34, %v16684_v42  ;;  %v11063_v42 = vmul.f32 %v20103_v55, %v20103_v55 }
 0x5be   :  { %10751 = vmatpush.bf16.msra.mxu2 %v16269_v61  ;;  %10764 = vmatpush.bf16.msrb.mxu0 %v16397_v3  ;;  %v16076_v61 = vld [vmem:[#allocation10 + $0x928] sm:$0xf]  ;;  %v18194_v3 = vld [vmem:[#allocation10 + $0x934] sm:$0xf0]  ;;  %v15949_v20 = vor.u32 %v18162_v43, %v15948_v16  ;;  %v20116_v35 = vadd.f32 %v10511_v40, %v10499_v49 }
 0x5bf   :  { %v16077_v25 = vor.u32 %v18194_v3, %v16076_v61  ;;  %v10474_v36 = vpop.f32.mrf.mxu3  ;;  %v18378_v58 = vld [vmem:[#allocation10 + $0xef4] sm:$0xf0]  ;;  %v16540_v5 = vld [vmem:[#allocation10 + $0xcc8] sm:$0xf] }
 0x5c0   :  { %v18410_v56 = vld [vmem:[#allocation10 + $0xff4] sm:$0xf0]  ;;  %v16668_v37 = vld [vmem:[#allocation10 + $0xdc8] sm:$0xf] }
 0x5c1   :  { %10726 = vmatpush.bf16.msrb.mxu3 %v15997_v52  ;;  %10739 = vmatpush.bf16.msra.mxu1 %v16125_v2  ;;  %v18158_v52 = vld [vmem:[#allocation10 + $0x814] sm:$0xf0]  ;;  %v16060_v2 = vld [vmem:[#allocation10 + $0x908] sm:$0xf]  ;;  %v16941_v19 = vor.u32 %v18410_v56, %v16940_v4 }
 0x5c2   :  { %10752 = vmatpush.bf16.msra.mxu2 %v16253_v50  ;;  %10765 = vmatpush.bf16.msrb.mxu0 %v16381_v8  ;;  %v16205_v50 = vor.u32 %v18226_v38, %v16204_v28  ;;  %v16333_v8 = vor.u32 %v18258_v46, %v16332_v31  ;;  %v10500_v44 = vpop.f32.mrf.mxu2  ;;  %v16061_v40 = vor.u32 %v18190_v10, %v16060_v2  ;;  %v18310_v47 = vld [vmem:[#allocation10 + $0xcd4] sm:$0xf0]  ;;  %v16924_v43 = vld [vmem:[#allocation10 + $0xfc8] sm:$0xf] }
 0x5c3   :  { %v18374_v16 = vld [vmem:[#allocation10 + $0xed4] sm:$0xf0]  ;;  %v16524_v3 = vld [vmem:[#allocation10 + $0xca8] sm:$0xf] }
 0x5c4   :  { %v18306_v28 = vld [vmem:[#allocation10 + $0xcb4] sm:$0xf0]  ;;  %v16652_v31 = vld [vmem:[#allocation10 + $0xda8] sm:$0xf] }
 0x5c5   :  { %10727 = vmatpush.bf16.msrb.mxu3 %v15981_v6  ;;  %10740 = vmatpush.bf16.msra.mxu1 %v16109_v21  ;;  %v16556_v6 = vld [vmem:[#allocation10 + $0xce8] sm:$0xf]  ;;  %v18314_v21 = vld [vmem:[#allocation10 + $0xcf4] sm:$0xf0]  ;;  %v16525_v2 = vor.u32 %v18306_v28, %v16524_v3 }
 0x5c6   :  { %10753 = vmatpush.bf16.msra.mxu2 %v16237_v30  ;;  %10766 = vmatpush.bf16.msrb.mxu0 %v16365_v14  ;;  %v16812_v30 = vld [vmem:[#allocation10 + $0xee8] sm:$0xf]  ;;  %v15933_v14 = vor.u32 %v18158_v52, %v15932_v63  ;;  %v16557_v57 = vor.u32 %v18314_v21, %v16556_v6  ;;  %v18338_v46 = vld [vmem:[#allocation10 + $0xdb4] sm:$0xf0] }
 0x5c7   :  { %v16813_v48 = vor.u32 %v18378_v58, %v16812_v30  ;;  %v16780_v63 = vld [vmem:[#allocation10 + $0xea8] sm:$0xf]  ;;  %v18402_v52 = vld [vmem:[#allocation10 + $0xfb4] sm:$0xf0]  ;;  %v16653_v10 = vor.u32 %v18338_v46, %v16652_v31  ;;  %v11035_v30 = vrot.slane %v20103_v55, 4 }
 0x5c8   :  { %v16636_v62 = vld [vmem:[#allocation10 + $0xd88] sm:$0xf]  ;;  %v18334_v1 = vld [vmem:[#allocation10 + $0xd94] sm:$0xf0] }
 0x5c9   :  { %10728 = vmatpush.bf16.msrb.mxu3 %v15965_v32  ;;  %10741 = vmatpush.bf16.msra.mxu1 %v16093_v15  ;;  %v18342_v32 = vld [vmem:[#allocation10 + $0xdd4] sm:$0xf0]  ;;  %v16796_v15 = vld [vmem:[#allocation10 + $0xec8] sm:$0xf]  ;;  %v16637_v58 = vor.u32 %v18334_v1, %v16636_v62 }
 0x5ca   :  { %10754 = vmatpush.bf16.msra.mxu2 %v16221_v53  ;;  %10767 = vmatpush.bf16.msrb.mxu0 %v16349_v60  ;;  %v18406_v53 = vld [vmem:[#allocation10 + $0xfd4] sm:$0xf0]  ;;  %v16541_v60 = vor.u32 %v18310_v47, %v16540_v5  ;;  %v16669_v61 = vor.u32 %v18342_v32, %v16668_v37  ;;  %v16797_v49 = vor.u32 %v18374_v16, %v16796_v15  ;;  %v16764_v44 = vld [vmem:[#allocation10 + $0xe88] sm:$0xf]  ;;  %v11067_v37 = vrot.slane %v11063_v42, 4 }
 0x5cb   :  { %v16925_v38 = vor.u32 %v18406_v53, %v16924_v43  ;;  %v18366_v26 = vld [vmem:[#allocation10 + $0xe94] sm:$0xf0]  ;;  %v16892_v6 = vld [vmem:[#allocation10 + $0xf88] sm:$0xf]  ;;  %v11036_v32 = vadd.f32 %v11035_v30, %v20103_v55 }
 0x5cc   :  { %v18398_v21 = vld [vmem:[#allocation10 + $0xf94] sm:$0xf0]  ;;  %v16492_v4 = vld [vmem:[#allocation10 + $0xc68] sm:$0xf] }
 0x5cd   :  { %10729 = vmatpush.bf16.msrb.mxu3 %v15949_v20  ;;  %10742 = vmatpush.bf16.msra.mxu1 %v16077_v25  ;;  %v18370_v20 = vld [vmem:[#allocation10 + $0xeb4] sm:$0xf0]  ;;  %v16908_v25 = vld [vmem:[#allocation10 + $0xfa8] sm:$0xf] }
 0x5ce   :  { %10755 = vmatpush.bf16.msra.mxu2 %v16205_v50  ;;  %10768 = vmatpush.bf16.msrb.mxu0 %v16333_v8  ;;  %v16508_v50 = vld [vmem:[#allocation10 + $0xc88] sm:$0xf]  ;;  %v18302_v8 = vld [vmem:[#allocation10 + $0xc94] sm:$0xf0]  ;;  %v16781_v36 = vor.u32 %v18370_v20, %v16780_v63  ;;  %v16909_v23 = vor.u32 %v18402_v52, %v16908_v25  ;;  %v11068_v52 = vadd.f32 %v11067_v37, %v11063_v42 }
 0x5cf   :  { %v18298_v56 = vld [vmem:[#allocation10 + $0xc74] sm:$0xf0]  ;;  %v16748_v5 = vld [vmem:[#allocation10 + $0xe68] sm:$0xf] }
 0x5d0   :  { %v18362_v47 = vld [vmem:[#allocation10 + $0xe74] sm:$0xf0]  ;;  %v16493_v15 = vor.u32 %v18298_v56, %v16492_v4  ;;  %v16476_v43 = vld [vmem:[#allocation10 + $0xc48] sm:$0xf]  ;;  %v11069_v4 = vrot.slane %v11068_v52, 2 }
 0x5d1   :  { %10730 = vmatpush.bf16.msrb.mxu3 %v15933_v14  ;;  %10743 = vmatpush.bf16.msra.mxu1 %v16061_v40  ;;  %v10537_v34 = vpop.f32.mrf.mxu1  ;;  %v16509_v40 = vor.u32 %v18302_v8, %v16508_v50  ;;  %v18294_v53 = vld [vmem:[#allocation10 + $0xc54] sm:$0xf0]  ;;  %v16604_v28 = vld [vmem:[#allocation10 + $0xd48] sm:$0xf] }
 0x5d2   :  { %10756 = vmatpush.bf16.msra.mxu2 %v16189_v12  ;;  %10769 = vmatpush.bf16.msrb.mxu0 %v16317_v11  ;;  %v16765_v12 = vor.u32 %v18366_v26, %v16764_v44  ;;  %v16893_v11 = vor.u32 %v18398_v21, %v16892_v6  ;;  %v18358_v63 = vld [vmem:[#allocation10 + $0xe54] sm:$0xf0]  ;;  %v16860_v20 = vld [vmem:[#allocation10 + $0xf48] sm:$0xf] }
 0x5d3   :  { %v18390_v25 = vld [vmem:[#allocation10 + $0xf54] sm:$0xf0]  ;;  %v16460_v62 = vld [vmem:[#allocation10 + $0xc28] sm:$0xf] }
 0x5d4   :  { %10731 = vmatmul.bf16.vlgmr.msrb.gmra.mxu3 %v20045_v45  ;;  %10744 = vmatmul.bf16.vlgmr.msra.gmra.mxu1 %v20047_v18  ;;  %v20125_v14 = vpop.f32.mrf.mxu0  ;;  %v18290_v1 = vld [vmem:[#allocation10 + $0xc34] sm:$0xf0]  ;;  %v16861_v26 = vor.u32 %v18390_v25, %v16860_v20  ;;  %v16716_v21 = vld [vmem:[#allocation10 + $0xe28] sm:$0xf]  ;;  %v15406_v20 = vld [vmem:[#allocation10 + $0x3f8] sm:$0xf0] }
 0x5d5   :  { %10775 = vmatpush.bf16.msra.mxu3 %v16557_v57  ;;  %10788 = vmatpush.bf16.msrb.mxu1 %v16685_v54  ;;  %v16620_v57 = vld [vmem:[#allocation10 + $0xd68] sm:$0xf]  ;;  %v18330_v54 = vld [vmem:[#allocation10 + $0xd74] sm:$0xf0] }
 0x5d6   :  { %10801 = vmatpush.bf16.msrb.mxu2 %v16813_v48  ;;  %10814 = vmatpush.bf16.msra.mxu0 %v16941_v19  ;;  %v16876_v48 = vld [vmem:[#allocation10 + $0xf68] sm:$0xf]  ;;  %v18394_v19 = vld [vmem:[#allocation10 + $0xf74] sm:$0xf0]  ;;  %v16621_v16 = vor.u32 %v18330_v54, %v16620_v57 }
 0x5d7   :  { %10757 = vmatmul.bf16.vlgmr.msra.gmra.mxu2 %v20049_v13  ;;  %10770 = vmatmul.bf16.vlgmr.msrb.gmra.mxu0 %v20051_v33  ;;  %v10524_v3 = vpop.f32.mrf.mxu3  ;;  %v18322_v6 = vld [vmem:[#allocation10 + $0xd34] sm:$0xf0]  ;;  %v16844_v42 = vld [vmem:[#allocation10 + $0xf28] sm:$0xf] }
 0x5d8   :  { %v10525_v31 = vadd.f32 %v10524_v3, %v20116_v35  ;;  %v16588_v35 = vld [vmem:[#allocation10 + $0xd28] sm:$0xf]  ;;  %v18318_v54 = vld [vmem:[#allocation10 + $0xd14] sm:$0xf0]  ;;  %v15022_v3 = vld [vmem:[#allocation10 + $0xf8] sm:$0xf0] }
 0x5d9   :  { %10776 = vmatpush.bf16.msra.mxu3 %v16541_v60  ;;  %10789 = vmatpush.bf16.msrb.mxu1 %v16669_v61  ;;  %v16749_v60 = vor.u32 %v18362_v47, %v16748_v5  ;;  %v16877_v61 = vor.u32 %v18394_v19, %v16876_v48  ;;  %v16444_v56 = vld [vmem:[#allocation10 + $0xc08] sm:$0xf] }
 0x5da   :  { %10802 = vmatpush.bf16.msrb.mxu2 %v16797_v49  ;;  %10815 = vmatpush.bf16.msra.mxu0 %v16925_v38  ;;  %v18326_v49 = vld [vmem:[#allocation10 + $0xd54] sm:$0xf0]  ;;  %v16732_v38 = vld [vmem:[#allocation10 + $0xe48] sm:$0xf]  ;;  %v10550_v46 = vpop.f32.mrf.mxu2  ;;  %v10538_v50 = vadd.f32 %v10537_v34, %v10525_v31  ;;  %v16461_v34 = vor.u32 %v18290_v1, %v16460_v62 }
 0x5db   :  { %v16733_v44 = vor.u32 %v18358_v63, %v16732_v38  ;;  %v16572_v57 = vld [vmem:[#allocation10 + $0xd08] sm:$0xf]  ;;  %v17992_v38 = vld [vmem:[#allocation10 + $0x2ec] sm:$0xf] }
 0x5dc   :  { %v10565_v8 = vpop.f32.mrf.mxu0  ;;  %v10551_v30 = vadd.f32 %v10550_v46, %v10538_v50  ;;  %v16700_v37 = vld [vmem:[#allocation10 + $0xe08] sm:$0xf]  ;;  %v16573_v31 = vor.u32 %v18318_v54, %v16572_v57  ;;  %v15278_v46 = vld [vmem:[#allocation10 + $0x2f8] sm:$0xf0]  ;;  %v18024_v63 = vld [vmem:[#allocation10 + $0x3ec] sm:$0xf] }
 0x5dd   :  { %10777 = vmatpush.bf16.msra.mxu3 %v16525_v2  ;;  %10790 = vmatpush.bf16.msrb.mxu1 %v16653_v10  ;;  %v10539_v2 = vpop.f32.mrf.mxu1  ;;  %v11037_v10 = vrot.slane %v11036_v32, 2  ;;  %v15281_v62 = vor.u32 %v17992_v38, %v15278_v46  ;;  %v15409_v1 = vor.u32 %v18024_v63, %v15406_v20  ;;  %v15118_v57 = vld [vmem:[#allocation10 + $0x1b8] sm:$0xf0]  ;;  %v17984_v54 = vld [vmem:[#allocation10 + $0x2ac] sm:$0xf] }
 0x5de   :  { %10803 = vmatpush.bf16.msrb.mxu2 %v16781_v36  ;;  %10816 = vmatpush.bf16.msra.mxu0 %v16909_v23  ;;  %v16477_v36 = vor.u32 %v18294_v53, %v16476_v43  ;;  %v16605_v23 = vor.u32 %v18326_v49, %v16604_v28  ;;  %v20130_v5 = vadd.f32 %v20125_v14, %v10551_v30  ;;  %v17960_v28 = vld [vmem:[#allocation10 + $0x1ec] sm:$0xf]  ;;  %v15150_v49 = vld [vmem:[#allocation10 + $0x1f8] sm:$0xf0] }
 0x5df   :  { %v10526_v19 = vpop.f32.mrf.mxu3  ;;  %v11038_v43 = vadd.f32 %v11037_v10, %v11036_v32  ;;  %v11070_v32 = vadd.f32 %v11069_v4, %v11068_v52  ;;  %v15153_v8 = vor.u32 %v17960_v28, %v15150_v49  ;;  %v15390_v30 = vld [vmem:[#allocation10 + $0x3d8] sm:$0xf0]  ;;  %v17920_v4 = vld [vmem:[#allocation10 + $0xac] sm:$0xf] }
 0x5e0   :  { %v15374_v19 = vld [vmem:[#allocation10 + $0x3b8] sm:$0xf0]  ;;  %v17948_v28 = vld [vmem:[#allocation10 + $0x18c] sm:$0xf] }
 0x5e1   :  { %10778 = vmatpush.bf16.msra.mxu3 %v16509_v40  ;;  %10791 = vmatpush.bf16.msrb.mxu1 %v16637_v58  ;;  %v18354_v40 = vld [vmem:[#allocation10 + $0xe34] sm:$0xf0]  ;;  %v11039_v50 = vrot.slane %v11038_v43, 1  ;;  %v15102_v49 = vld [vmem:[#allocation10 + $0x198] sm:$0xf0] }
 0x5e2   :  { %10804 = vmatpush.bf16.msrb.mxu2 %v16765_v12  ;;  %10817 = vmatpush.bf16.msra.mxu0 %v16893_v11  ;;  %v18386_v58 = vld [vmem:[#allocation10 + $0xf34] sm:$0xf0]  ;;  %v16589_v12 = vor.u32 %v18322_v6, %v16588_v35  ;;  %v16717_v47 = vor.u32 %v18354_v40, %v16716_v21  ;;  %v10552_v53 = vpop.f32.mrf.mxu2  ;;  %v17988_v35 = vld [vmem:[#allocation10 + $0x2cc] sm:$0xf]  ;;  %v15262_v6 = vld [vmem:[#allocation10 + $0x2d8] sm:$0xf0] }
 0x5e3   :  { %v18286_v11 = vld [vmem:[#allocation10 + $0xc14] sm:$0xf0]  ;;  %v16845_v48 = vor.u32 %v18386_v58, %v16844_v42  ;;  %v18020_v21 = vld [vmem:[#allocation10 + $0x3cc] sm:$0xf]  ;;  %v11040_v40 = vadd.f32 %v11039_v50, %v11038_v43  ;;  %v11071_v42 = vrot.slane %v11070_v32, 1 }
 0x5e4   :  { %v16445_v14 = vor.u32 %v18286_v11, %v16444_v56  ;;  %v14990_v56 = vld [vmem:[#allocation10 + $0xb8] sm:$0xf0]  ;;  %v17952_v11 = vld [vmem:[#allocation10 + $0x1ac] sm:$0xf] }
 0x5e5   :  { %10779 = vmatpush.bf16.msra.mxu3 %v16493_v15  ;;  %10792 = vmatpush.bf16.msrb.mxu1 %v16621_v16  ;;  %v18350_v15 = vld [vmem:[#allocation10 + $0xe14] sm:$0xf0]  ;;  %v16828_v16 = vld [vmem:[#allocation10 + $0xf08] sm:$0xf]  ;;  %v15121_v43 = vor.u32 %v17952_v11, %v15118_v57  ;;  %v17916_v53 = vld [vmem:[#allocation10 + $0x8c] sm:$0xf] }
 0x5e6   :  { %10805 = vmatpush.bf16.msrb.mxu2 %v16749_v60  ;;  %10818 = vmatpush.bf16.msra.mxu0 %v16877_v61  ;;  %v18382_v60 = vld [vmem:[#allocation10 + $0xf14] sm:$0xf0]  ;;  %v17928_v61 = vld [vmem:[#allocation10 + $0xec] sm:$0xf]  ;;  %v16701_v25 = vor.u32 %v18350_v15, %v16700_v37  ;;  %v20136_v37 = vmul.f32 0.125, %v11040_v40  ;;  %v11072_v15 = vadd.f32 %v11071_v42, %v11070_v32  ;;  %v15105_v32 = vor.u32 %v17948_v28, %v15102_v49 }
 0x5e7   :  { %v16829_v2 = vor.u32 %v18382_v60, %v16828_v16  ;;  %v15025_v10 = vor.u32 %v17928_v61, %v15022_v3  ;;  %v14993_v16 = vor.u32 %v17920_v4, %v14990_v56  ;;  %v14974_v60 = vld [vmem:[#allocation10 + $0x98] sm:$0xf0]  ;;  %v17980_v38 = vld [vmem:[#allocation10 + $0x28c] sm:$0xf] }
 0x5e8   :  { %v15358_v46 = vld [vmem:[#allocation10 + $0x398] sm:$0xf0]  ;;  %v11091_v20 = vmul.f32 0.125, %v11072_v15  ;;  %v14977_v50 = vor.u32 %v17916_v53, %v14974_v60  ;;  %v17908_v42 = vld [vmem:[#allocation10 + $0x4c] sm:$0xf] }
 0x5e9   :  { %10780 = vmatpush.bf16.msra.mxu3 %v16477_v36  ;;  %10793 = vmatpush.bf16.msrb.mxu1 %v16605_v23  ;;  %v17924_v36 = vld [vmem:[#allocation10 + $0xcc] sm:$0xf]  ;;  %v15006_v23 = vld [vmem:[#allocation10 + $0xd8] sm:$0xf0] }
 0x5ea   :  { %10806 = vmatpush.bf16.msrb.mxu2 %v16733_v44  ;;  %10819 = vmatpush.bf16.msra.mxu0 %v16861_v26  ;;  %v17956_v44 = vld [vmem:[#allocation10 + $0x1cc] sm:$0xf]  ;;  %v15134_v26 = vld [vmem:[#allocation10 + $0x1d8] sm:$0xf0]  ;;  %v15009_v52 = vor.u32 %v17924_v36, %v15006_v23 }
 0x5eb   :  { %v15137_v58 = vor.u32 %v17956_v44, %v15134_v26  ;;  %v17976_v44 = vld [vmem:[#allocation10 + $0x26c] sm:$0xf]  ;;  %v15214_v26 = vld [vmem:[#allocation10 + $0x278] sm:$0xf0] }
 0x5ec   :  { %v17972_v11 = vld [vmem:[#allocation10 + $0x24c] sm:$0xf]  ;;  %v14926_v28 = vld [vmem:[#allocation10 + $0x38] sm:$0xf0] }
 0x5ed   :  { %10781 = vmatpush.bf16.msra.mxu3 %v16461_v34  ;;  %10794 = vmatpush.bf16.msrb.mxu1 %v16589_v12  ;;  %v15265_v34 = vor.u32 %v17988_v35, %v15262_v6  ;;  %v15393_v12 = vor.u32 %v18020_v21, %v15390_v30  ;;  %v18008_v35 = vld [vmem:[#allocation10 + $0x36c] sm:$0xf]  ;;  %v15342_v6 = vld [vmem:[#allocation10 + $0x378] sm:$0xf0] }
 0x5ee   :  { %10807 = vmatpush.bf16.msrb.mxu2 %v16717_v47  ;;  %10820 = vmatpush.bf16.msra.mxu0 %v16845_v48  ;;  %v15246_v47 = vld [vmem:[#allocation10 + $0x2b8] sm:$0xf0]  ;;  %v18016_v48 = vld [vmem:[#allocation10 + $0x3ac] sm:$0xf]  ;;  %v15345_v4 = vor.u32 %v18008_v35, %v15342_v6 }
 0x5ef   :  { %v15249_v61 = vor.u32 %v17984_v54, %v15246_v47  ;;  %v15377_v3 = vor.u32 %v18016_v48, %v15374_v19  ;;  %v15198_v47 = vld [vmem:[#allocation10 + $0x258] sm:$0xf0]  ;;  %v18004_v48 = vld [vmem:[#allocation10 + $0x34c] sm:$0xf] }
 0x5f0   :  { %v15326_v19 = vld [vmem:[#allocation10 + $0x358] sm:$0xf0]  ;;  %v15201_v49 = vor.u32 %v17972_v11, %v15198_v47 }
 0x5f1   :  { %10782 = vmatpush.bf16.msra.mxu3 %v16445_v14  ;;  %10795 = vmatpush.bf16.msrb.mxu1 %v16573_v31  ;;  %v15230_v14 = vld [vmem:[#allocation10 + $0x298] sm:$0xf0]  ;;  %v18012_v31 = vld [vmem:[#allocation10 + $0x38c] sm:$0xf]  ;;  %v10589_v63 = vpop.f32.mrf.mxu1 }
 0x5f2   :  { %10808 = vmatpush.bf16.msrb.mxu2 %v16701_v25  ;;  %10821 = vmatpush.bf16.msra.mxu0 %v16829_v2  ;;  %v11095_v25 = vmul.f32 %v20136_v37, %v20136_v37  ;;  %v15233_v36 = vor.u32 %v17980_v38, %v15230_v14  ;;  %v15361_v23 = vor.u32 %v18012_v31, %v15358_v46  ;;  %v15054_v14 = vld [vmem:[#allocation10 + $0x138] sm:$0xf0]  ;;  %v17968_v31 = vld [vmem:[#allocation10 + $0x22c] sm:$0xf] }
 0x5f3   :  { %v15329_v38 = vor.u32 %v18004_v48, %v15326_v19  ;;  %v18152_v48 = vld [vmem:[#allocation10 + $0x7ec] sm:$0xf]  ;;  %v15918_v19 = vld [vmem:[#allocation10 + $0x7f8] sm:$0xf0] }
 0x5f4   :  { %10783 = vmatmul.bf16.vlgmr.msra.gmra.mxu3 %v20073_v39  ;;  %10796 = vmatmul.bf16.vlgmr.msrb.gmra.mxu1 %v20075_v7  ;;  %v10615_v2 = vpop.f32.mrf.mxu0  ;;  %v11099_v21 = vsub.f32 %v11091_v20, %v11095_v25  ;;  %v15182_v20 = vld [vmem:[#allocation10 + $0x238] sm:$0xf0]  ;;  %v18000_v25 = vld [vmem:[#allocation10 + $0x32c] sm:$0xf] }
 0x5f5   :  { %10827 = vmatpush.bf16.msrb.mxu3 %v15025_v10  ;;  %10840 = vmatpush.bf16.msra.mxu1 %v15153_v8  ;;  %v17912_v10 = vld [vmem:[#allocation10 + $0x6c] sm:$0xf]  ;;  %v14958_v8 = vld [vmem:[#allocation10 + $0x78] sm:$0xf0] }
 0x5f6   :  { %10853 = vmatpush.bf16.msra.mxu2 %v15281_v62  ;;  %10866 = vmatpush.bf16.msrb.mxu0 %v15409_v1  ;;  %v17944_v62 = vld [vmem:[#allocation10 + $0x16c] sm:$0xf]  ;;  %v15086_v1 = vld [vmem:[#allocation10 + $0x178] sm:$0xf0]  ;;  %v14961_v30 = vor.u32 %v17912_v10, %v14958_v8 }
 0x5f7   :  { %10809 = vmatmul.bf16.vlgmr.msrb.gmra.mxu2 %v20077_v24  ;;  %10822 = vmatmul.bf16.vlgmr.msra.gmra.mxu0 %v20071_v27  ;;  %v15089_v40 = vor.u32 %v17944_v62, %v15086_v1  ;;  %v10576_v56 = vpop.f32.mrf.mxu3  ;;  %v14910_v10 = vld [vmem:[#allocation10 + $0x18] sm:$0xf0]  ;;  %v17932_v8 = vld [vmem:[#allocation10 + $0x10c] sm:$0xf] }
 0x5f8   :  { %v10577_v57 = vadd.f32 %v10576_v56, %v20130_v5  ;;  %v17936_v5 = vld [vmem:[#allocation10 + $0x12c] sm:$0xf]  ;;  %v15038_v62 = vld [vmem:[#allocation10 + $0x118] sm:$0xf0] }
 0x5f9   :  { %10828 = vmatpush.bf16.msrb.mxu3 %v15009_v52  ;;  %10841 = vmatpush.bf16.msra.mxu1 %v15137_v58  ;;  %v14942_v52 = vld [vmem:[#allocation10 + $0x58] sm:$0xf0]  ;;  %v15217_v58 = vor.u32 %v17976_v44, %v15214_v26  ;;  %v10591_v15 = vpop.f32.mrf.mxu1  ;;  %v17964_v1 = vld [vmem:[#allocation10 + $0x20c] sm:$0xf]  ;;  %v15185_v26 = vor.u32 %v17968_v31, %v15182_v20  ;;  %v15041_v47 = vor.u32 %v17932_v8, %v15038_v62 }
 0x5fa   :  { %10854 = vmatpush.bf16.msra.mxu2 %v15265_v34  ;;  %10867 = vmatpush.bf16.msrb.mxu0 %v15393_v12  ;;  %v17940_v34 = vld [vmem:[#allocation10 + $0x14c] sm:$0xf]  ;;  %v15070_v12 = vld [vmem:[#allocation10 + $0x158] sm:$0xf0]  ;;  %v10602_v54 = vpop.f32.mrf.mxu2  ;;  %v14945_v60 = vor.u32 %v17908_v42, %v14942_v52 }
 0x5fb   :  { %v15166_v44 = vld [vmem:[#allocation10 + $0x218] sm:$0xf0]  ;;  %v18048_v8 = vld [vmem:[#allocation10 + $0x4ac] sm:$0xf] }
 0x5fc   :  { %v10617_v53 = vpop.f32.mrf.mxu0  ;;  %v15662_v56 = vld [vmem:[#allocation10 + $0x5f8] sm:$0xf0]  ;;  %v15169_v15 = vor.u32 %v17964_v1, %v15166_v44 }
 0x5fd   :  { %10829 = vmatpush.bf16.msrb.mxu3 %v14993_v16  ;;  %10842 = vmatpush.bf16.msra.mxu1 %v15121_v43  ;;  %v20141_v16 = vadd.f32 1e-05, %v11099_v21  ;;  %v10590_v43 = vadd.f32 %v10589_v63, %v10577_v57  ;;  %v17996_v21 = vld [vmem:[#allocation10 + $0x30c] sm:$0xf]  ;;  %v15646_v31 = vld [vmem:[#allocation10 + $0x5d8] sm:$0xf0] }
 0x5fe   :  { %10855 = vmatpush.bf16.msra.mxu2 %v15249_v61  ;;  %10868 = vmatpush.bf16.msrb.mxu0 %v15377_v3  ;;  %v15073_v61 = vor.u32 %v17940_v34, %v15070_v12  ;;  %v17904_v3 = vld [vmem:[#allocation10 + $0x2c] sm:$0xf]  ;;  %v15790_v12 = vld [vmem:[#allocation10 + $0x6f8] sm:$0xf0] }
 0x5ff   :  { %v10603_v46 = vadd.f32 %v10602_v54, %v10590_v43  ;;  %v10578_v6 = vpop.f32.mrf.mxu3  ;;  %v18120_v34 = vld [vmem:[#allocation10 + $0x6ec] sm:$0xf]  ;;  %v15774_v20 = vld [vmem:[#allocation10 + $0x6d8] sm:$0xf0]  ;;  %18506 = vrsqrt.f32 %v20141_v16  ;;  %vm11114_vm13 = vweird.f32 %v20141_v16 }
 0x600   :  { %v18052_v53 = vld [vmem:[#allocation10 + $0x4cc] sm:$0xf]  ;;  %v15502_v44 = vld [vmem:[#allocation10 + $0x4b8] sm:$0xf0] }
 0x601   :  { %10830 = vmatpush.bf16.msrb.mxu3 %v14977_v50  ;;  %10843 = vmatpush.bf16.msra.mxu1 %v15105_v32  ;;  %v15310_v50 = vld [vmem:[#allocation10 + $0x338] sm:$0xf0]  ;;  %v17900_v32 = vld [vmem:[#allocation10 + $0xc] sm:$0xf]  ;;  %v20143_v63 = vadd.f32 %v10615_v2, %v10603_v46 }
 0x602   :  { %10856 = vmatpush.bf16.msra.mxu2 %v15233_v36  ;;  %10869 = vmatpush.bf16.msrb.mxu0 %v15361_v23  ;;  %v14929_v36 = vor.u32 %v17904_v3, %v14926_v28  ;;  %v15057_v23 = vor.u32 %v17936_v5, %v15054_v14  ;;  %v15313_v35 = vor.u32 %v18000_v25, %v15310_v50  ;;  %v10604_v52 = vpop.f32.mrf.mxu2  ;;  %v18116_v46 = vld [vmem:[#allocation10 + $0x6cc] sm:$0xf] }
 0x603   :  { %v11041_v42 = vrot.slane %v20143_v63, 4  ;;  %v11064_v2 = vmul.f32 %v20143_v63, %v20143_v63  ;;  %v14913_v54 = vor.u32 %v17900_v32, %v14910_v10  ;;  %v15793_v5 = vor.u32 %v18120_v34, %v15790_v12  ;;  %v18148_v32 = vld [vmem:[#allocation10 + $0x7cc] sm:$0xf]  ;;  %v15902_v10 = vld [vmem:[#allocation10 + $0x7d8] sm:$0xf0] }
 0x604   :  { %v15921_v14 = vor.u32 %v18152_v48, %v15918_v19  ;;  %v15905_v6 = vor.u32 %v18148_v32, %v15902_v10  ;;  %v18144_v52 = vld [vmem:[#allocation10 + $0x7ac] sm:$0xf]  ;;  %v15614_v48 = vld [vmem:[#allocation10 + $0x598] sm:$0xf0] }
 0x605   :  { %10831 = vmatpush.bf16.msrb.mxu3 %v14961_v30  ;;  %10844 = vmatpush.bf16.msra.mxu1 %v15089_v40  ;;  %v15294_v30 = vld [vmem:[#allocation10 + $0x318] sm:$0xf0]  ;;  %v18056_v40 = vld [vmem:[#allocation10 + $0x4ec] sm:$0xf]  ;;  %v11042_v11 = vadd.f32 %v11041_v42, %v20143_v63  ;;  %v11073_v57 = vrot.slane %v11064_v2, 4 }
 0x606   :  { %10857 = vmatpush.bf16.msra.mxu2 %v15217_v58  ;;  %10870 = vmatpush.bf16.msrb.mxu0 %v15345_v4  ;;  %v15534_v58 = vld [vmem:[#allocation10 + $0x4f8] sm:$0xf0]  ;;  %v18088_v4 = vld [vmem:[#allocation10 + $0x5ec] sm:$0xf]  ;;  %v15297_v43 = vor.u32 %v17996_v21, %v15294_v30 }
 0x607   :  { %v15537_v3 = vor.u32 %v18056_v40, %v15534_v58  ;;  %v15665_v28 = vor.u32 %v18088_v4, %v15662_v56  ;;  %v15630_v21 = vld [vmem:[#allocation10 + $0x5b8] sm:$0xf0]  ;;  %v18112_v30 = vld [vmem:[#allocation10 + $0x6ac] sm:$0xf]  ;;  %v20154_v56 = vpop.eup %18506 }
 0x608   :  { %v15758_v40 = vld [vmem:[#allocation10 + $0x6b8] sm:$0xf0]  ;;  %v18044_v4 = vld [vmem:[#allocation10 + $0x48c] sm:$0xf]  ;;  %vm11115_vm2 = vweird.f32 %v20154_v56 }
 0x609   :  { %10832 = vmatpush.bf16.msrb.mxu3 %v14945_v60  ;;  %10845 = vmatpush.bf16.msra.mxu1 %v15073_v61  ;;  %v11043_v60 = vrot.slane %v11042_v11, 2  ;;  %v11074_v61 = vadd.f32 %v11073_v57, %v11064_v2  ;;  %v15886_v58 = vld [vmem:[#allocation10 + $0x7b8] sm:$0xf0]  ;;  %vm20187_vm1 = vmor %vm11114_vm13, %vm11115_vm2 }
 0x60a   :  { %10858 = vmatpush.bf16.msra.mxu2 %v15201_v49  ;;  %10871 = vmatpush.bf16.msrb.mxu0 %v15329_v38  ;;  %v15518_v49 = vld [vmem:[#allocation10 + $0x4d8] sm:$0xf0]  ;;  %v18084_v38 = vld [vmem:[#allocation10 + $0x5cc] sm:$0xf] }
 0x60b   :  { %v11044_v25 = vadd.f32 %v11043_v60, %v11042_v11  ;;  %v11075_v50 = vrot.slane %v11074_v61, 2  ;;  %v15521_v62 = vor.u32 %v18052_v53, %v15518_v49  ;;  %v15649_v1 = vor.u32 %v18084_v38, %v15646_v31  ;;  %v15742_v19 = vld [vmem:[#allocation10 + $0x698] sm:$0xf0]  ;;  %v18072_v31 = vld [vmem:[#allocation10 + $0x56c] sm:$0xf] }
 0x60c   :  { %v15505_v11 = vor.u32 %v18048_v8, %v15502_v44  ;;  %v15870_v53 = vld [vmem:[#allocation10 + $0x798] sm:$0xf0]  ;;  %v11109_v60 = vmul.f32 %v20154_v56, %v20141_v16  ;;  %v18136_v8 = vld [vmem:[#allocation10 + $0x76c] sm:$0xf] }
 0x60d   :  { %10833 = vmatpush.bf16.msrb.mxu3 %v14929_v36  ;;  %10846 = vmatpush.bf16.msra.mxu1 %v15057_v23  ;;  %v11045_v36 = vrot.slane %v11044_v25, 1  ;;  %v11076_v23 = vadd.f32 %v11075_v50, %v11074_v61  ;;  %v18104_v50 = vld [vmem:[#allocation10 + $0x66c] sm:$0xf]  ;;  %v15726_v32 = vld [vmem:[#allocation10 + $0x678] sm:$0xf0] }
 0x60e   :  { %10859 = vmatpush.bf16.msra.mxu2 %v15185_v26  ;;  %10872 = vmatpush.bf16.msrb.mxu0 %v15313_v35  ;;  %v18080_v26 = vld [vmem:[#allocation10 + $0x5ac] sm:$0xf]  ;;  %v15777_v35 = vor.u32 %v18116_v46, %v15774_v20 }
 0x60f   :  { %v11046_v42 = vadd.f32 %v11045_v36, %v11044_v25  ;;  %v11077_v2 = vrot.slane %v11076_v23, 1  ;;  %v15633_v57 = vor.u32 %v18080_v26, %v15630_v21  ;;  %v15598_v25 = vld [vmem:[#allocation10 + $0x578] sm:$0xf0]  ;;  %v18036_v44 = vld [vmem:[#allocation10 + $0x44c] sm:$0xf] }
 0x610   :  { %v15854_v36 = vld [vmem:[#allocation10 + $0x778] sm:$0xf0] }
 0x611   :  { %10834 = vmatpush.bf16.msrb.mxu3 %v14913_v54  ;;  %10847 = vmatpush.bf16.msra.mxu1 %v15041_v47  ;;  %v20156_v34 = vmul.f32 0.125, %v11046_v42  ;;  %v11078_v12 = vadd.f32 %v11077_v2, %v11076_v23  ;;  %v15486_v54 = vld [vmem:[#allocation10 + $0x498] sm:$0xf0]  ;;  %v15889_v47 = vor.u32 %v18144_v52, %v15886_v58  ;;  %v10641_v61 = vpop.f32.mrf.mxu1  ;;  %v11110_v23 = vmul.f32 %v20154_v56, %v11109_v60  ;;  %v18100_v42 = vld [vmem:[#allocation10 + $0x64c] sm:$0xf] }
 0x612   :  { %10860 = vmatpush.bf16.msra.mxu2 %v15169_v15  ;;  %10873 = vmatpush.bf16.msrb.mxu0 %v15297_v43  ;;  %v18140_v43 = vld [vmem:[#allocation10 + $0x78c] sm:$0xf]  ;;  %v15489_v49 = vor.u32 %v18044_v4, %v15486_v54  ;;  %v15454_v26 = vld [vmem:[#allocation10 + $0x458] sm:$0xf0] }
 0x613   :  { %v11096_v15 = vmul.f32 %v20156_v34, %v20156_v34  ;;  %v15873_v20 = vor.u32 %v18140_v43, %v15870_v53  ;;  %v15710_v58 = vld [vmem:[#allocation10 + $0x658] sm:$0xf0]  ;;  %v18132_v4 = vld [vmem:[#allocation10 + $0x74c] sm:$0xf] }
 0x614   :  { %10835 = vmatmul.bf16.vlgmr.msrb.gmra.mxu3 %v19820_v9  ;;  %10848 = vmatmul.bf16.vlgmr.msra.gmra.mxu1 %v19825_v51  ;;  %v18076_v9 = vld [vmem:[#allocation10 + $0x58c] sm:$0xf]  ;;  %v15761_v51 = vor.u32 %v18112_v30, %v15758_v40  ;;  %v15582_v40 = vld [vmem:[#allocation10 + $0x558] sm:$0xf0] }
 0x615   :  { %10879 = vmatpush.bf16.msra.mxu3 %v15537_v3  ;;  %10892 = vmatpush.bf16.msrb.mxu1 %v15665_v28  ;;  %v10667_v28 = vpop.f32.mrf.mxu0  ;;  %v15617_v38 = vor.u32 %v18076_v9, %v15614_v48  ;;  %v18068_v30 = vld [vmem:[#allocation10 + $0x54c] sm:$0xf]  ;;  %v15566_v43 = vld [vmem:[#allocation10 + $0x538] sm:$0xf0] }
 0x616   :  { %10905 = vmatpush.bf16.msrb.mxu2 %v15793_v5  ;;  %10918 = vmatpush.bf16.msra.mxu0 %v15921_v14  ;;  %v18040_v5 = vld [vmem:[#allocation10 + $0x46c] sm:$0xf]  ;;  %v15470_v14 = vld [vmem:[#allocation10 + $0x478] sm:$0xf0] }
 0x617   :  { %10861 = vmatmul.bf16.vlgmr.msra.gmra.mxu2 %v19827_v59  ;;  %10874 = vmatmul.bf16.vlgmr.msrb.gmra.mxu0 %v19831_v29  ;;  %v18108_v59 = vld [vmem:[#allocation10 + $0x68c] sm:$0xf]  ;;  %v11092_v29 = vmul.f32 0.125, %v11078_v12  ;;  %v10628_v21 = vpop.f32.mrf.mxu3  ;;  %v15838_v12 = vld [vmem:[#allocation10 + $0x758] sm:$0xf0] }
 0x618   :  { %v15745_v46 = vor.u32 %v18108_v59, %v15742_v19  ;;  %v10642_v2 = vadd.f32 %v10641_v61, %v10628_v21  ;;  %v18032_v48 = vld [vmem:[#allocation10 + $0x42c] sm:$0xf]  ;;  %v15438_v59 = vld [vmem:[#allocation10 + $0x438] sm:$0xf0]  ;;  %v15713_v19 = vor.u32 %v18100_v42, %v15710_v58 }
 0x619   :  { %10880 = vmatpush.bf16.msra.mxu3 %v15521_v62  ;;  %10893 = vmatpush.bf16.msrb.mxu1 %v15649_v1  ;;  %v11100_v3 = vsub.f32 %v11092_v29, %v11096_v15  ;;  %v15473_v62 = vor.u32 %v18040_v5, %v15470_v14  ;;  %v15601_v1 = vor.u32 %v18072_v31, %v15598_v25  ;;  %v18064_v15 = vld [vmem:[#allocation10 + $0x52c] sm:$0xf]  ;;  %v15694_v61 = vld [vmem:[#allocation10 + $0x638] sm:$0xf0] }
 0x61a   :  { %10906 = vmatpush.bf16.msrb.mxu2 %v15777_v35  ;;  %10919 = vmatpush.bf16.msra.mxu0 %v15905_v6  ;;  %v15729_v35 = vor.u32 %v18104_v50, %v15726_v32  ;;  %v15857_v6 = vor.u32 %v18136_v8, %v15854_v36  ;;  %v10654_v52 = vpop.f32.mrf.mxu2  ;;  %v15841_v29 = vor.u32 %v18132_v4, %v15838_v12  ;;  %v18096_v53 = vld [vmem:[#allocation10 + $0x62c] sm:$0xf]  ;;  %v15550_v32 = vld [vmem:[#allocation10 + $0x518] sm:$0xf0] }
 0x61b   :  { %v20162_v10 = vadd.f32 1e-05, %v11100_v3  ;;  %v10655_v54 = vadd.f32 %v10654_v52, %v10642_v2  ;;  %v18128_v3 = vld [vmem:[#allocation10 + $0x72c] sm:$0xf]  ;;  %v15569_v25 = vor.u32 %v18064_v15, %v15566_v43  ;;  %v16046_v21 = vld [vmem:[#allocation10 + $0x8f8] sm:$0xf0] }
 0x61c   :  { %v18028_v31 = vld [vmem:[#allocation10 + $0x40c] sm:$0xf]  ;;  %v16174_v42 = vld [vmem:[#allocation10 + $0x9f8] sm:$0xf0] }
 0x61d   :  { %10881 = vmatpush.bf16.msra.mxu3 %v15505_v11  ;;  %10894 = vmatpush.bf16.msrb.mxu1 %v15633_v57  ;;  %18508 = vrsqrt.f32 %v20162_v10  ;;  %v20166_v11 = vmul.f32 0.5, %v11110_v23  ;;  %v10643_v57 = vpop.f32.mrf.mxu1  ;;  %v10669_v9 = vpop.f32.mrf.mxu0  ;;  %v18060_v50 = vld [vmem:[#allocation10 + $0x50c] sm:$0xf]  ;;  %v16302_v4 = vld [vmem:[#allocation10 + $0xaf8] sm:$0xf0]  ;;  %vm11124_vm3 = vweird.f32 %v20162_v10 }
 0x61e   :  { %10907 = vmatpush.bf16.msrb.mxu2 %v15761_v51  ;;  %10920 = vmatpush.bf16.msra.mxu0 %v15889_v47  ;;  %v15457_v51 = vor.u32 %v18036_v44, %v15454_v26  ;;  %v15585_v47 = vor.u32 %v18068_v30, %v15582_v40  ;;  %v18092_v8 = vld [vmem:[#allocation10 + $0x60c] sm:$0xf]  ;;  %v15806_v26 = vld [vmem:[#allocation10 + $0x718] sm:$0xf0]  ;;  %v15553_v58 = vor.u32 %v18060_v50, %v15550_v32 }
 0x61f   :  { %v11112_v5 = vsub.f32 1.5, %v20166_v11  ;;  %v18124_v44 = vld [vmem:[#allocation10 + $0x70c] sm:$0xf]  ;;  %v16430_v11 = vld [vmem:[#allocation10 + $0xbf8] sm:$0xf0] }
 0x620   :  { %v18216_v30 = vld [vmem:[#allocation10 + $0x9ec] sm:$0xf]  ;;  %v15809_v9 = vor.u32 %v18124_v44, %v15806_v26  ;;  %v16014_v32 = vld [vmem:[#allocation10 + $0x8b8] sm:$0xf0] }
 0x621   :  { %10882 = vmatpush.bf16.msra.mxu3 %v15489_v49  ;;  %10895 = vmatpush.bf16.msrb.mxu1 %v15617_v38  ;;  %v15822_v49 = vld [vmem:[#allocation10 + $0x738] sm:$0xf0]  ;;  %v20170_v38 = vadd.f32 %v10667_v28, %v10655_v54  ;;  %v15697_v28 = vor.u32 %v18096_v53, %v15694_v61  ;;  %v18248_v2 = vld [vmem:[#allocation10 + $0xaec] sm:$0xf] }
 0x622   :  { %10908 = vmatpush.bf16.msrb.mxu2 %v15745_v46  ;;  %10921 = vmatpush.bf16.msra.mxu0 %v15873_v20  ;;  %v15422_v46 = vld [vmem:[#allocation10 + $0x418] sm:$0xf0]  ;;  %v15441_v20 = vor.u32 %v18032_v48, %v15438_v59  ;;  %v15825_v23 = vor.u32 %v18128_v3, %v15822_v49  ;;  %v18280_v12 = vld [vmem:[#allocation10 + $0xbec] sm:$0xf]  ;;  %v16177_v48 = vor.u32 %v18216_v30, %v16174_v42 }
 0x623   :  { %v20168_v60 = vpop.eup %18508  ;;  %v15425_v52 = vor.u32 %v18028_v31, %v15422_v46  ;;  %v18180_v59 = vld [vmem:[#allocation10 + $0x8cc] sm:$0xf]  ;;  %v16305_v43 = vor.u32 %v18248_v2, %v16302_v4  ;;  %v16433_v53 = vor.u32 %v18280_v12, %v16430_v11  ;;  %v16158_v61 = vld [vmem:[#allocation10 + $0x9d8] sm:$0xf0] }
 0x624   :  { %v11119_v14 = vmul.f32 %v20168_v60, %v20162_v10  ;;  %vm11125_vm11 = vweird.f32 %v20168_v60  ;;  %v18244_v3 = vld [vmem:[#allocation10 + $0xacc] sm:$0xf]  ;;  %v16286_v49 = vld [vmem:[#allocation10 + $0xad8] sm:$0xf0] }
 0x625   :  { %10883 = vmatpush.bf16.msra.mxu3 %v15473_v62  ;;  %10896 = vmatpush.bf16.msrb.mxu1 %v15601_v1  ;;  %v10630_v62 = vpop.f32.mrf.mxu3  ;;  %v15678_v1 = vld [vmem:[#allocation10 + $0x618] sm:$0xf0]  ;;  %vm11126_vm4 = vmor %vm11124_vm3, %vm11125_vm11  ;;  %v18176_v50 = vld [vmem:[#allocation10 + $0x8ac] sm:$0xf]  ;;  %v16289_v16 = vor.u32 %v18244_v3, %v16286_v49 }
 0x626   :  { %10909 = vmatpush.bf16.msrb.mxu2 %v15729_v35  ;;  %10922 = vmatpush.bf16.msra.mxu0 %v15857_v6  ;;  %v11120_v36 = vmul.f32 %v20168_v60, %v11119_v14  ;;  %v10656_v35 = vpop.f32.mrf.mxu2  ;;  %v18184_v6 = vld [vmem:[#allocation10 + $0x8ec] sm:$0xf]  ;;  %v15681_v54 = vor.u32 %v18092_v8, %v15678_v1  ;;  %v16414_v14 = vld [vmem:[#allocation10 + $0xbd8] sm:$0xf0] }
 0x627   :  { %v16270_v62 = vld [vmem:[#allocation10 + $0xab8] sm:$0xf0]  ;;  %v18272_v1 = vld [vmem:[#allocation10 + $0xbac] sm:$0xf]  ;;  %v16017_v35 = vor.u32 %v18176_v50, %v16014_v32 }
 0x628   :  { %v11121_v40 = vmul.f32 0.5, %v11120_v36  ;;  %v16142_v36 = vld [vmem:[#allocation10 + $0x9b8] sm:$0xf0]  ;;  %v18204_v30 = vld [vmem:[#allocation10 + $0x98c] sm:$0xf] }
 0x629   :  { %10884 = vmatpush.bf16.msra.mxu3 %v15457_v51  ;;  %10897 = vmatpush.bf16.msrb.mxu1 %v15585_v47  ;;  %v11113_v51 = vmul.f32 %v20154_v56, %v11112_v5  ;;  %v16049_v47 = vor.u32 %v18184_v6, %v16046_v21  ;;  %v18276_v5 = vld [vmem:[#allocation10 + $0xbcc] sm:$0xf]  ;;  %v16398_v44 = vld [vmem:[#allocation10 + $0xbb8] sm:$0xf0] }
 0x62a   :  { %10910 = vmatpush.bf16.msrb.mxu2 %v15713_v19  ;;  %10923 = vmatpush.bf16.msra.mxu0 %v15841_v29  ;;  %v11122_v57 = vsub.f32 1.5, %v11121_v40  ;;  %v16030_v19 = vld [vmem:[#allocation10 + $0x8d8] sm:$0xf0]  ;;  %v18212_v29 = vld [vmem:[#allocation10 + $0x9cc] sm:$0xf]  ;;  %v16417_v8 = vor.u32 %v18276_v5, %v16414_v14 }
 0x62b   :  { %v18172_v21 = vld [vmem:[#allocation10 + $0x88c] sm:$0xf]  ;;  %v16126_v40 = vld [vmem:[#allocation10 + $0x998] sm:$0xf0] }
 0x62c   :  { %v11123_v15 = vmul.f32 %v20168_v60, %v11122_v57  ;;  %v18236_v42 = vld [vmem:[#allocation10 + $0xa8c] sm:$0xf]  ;;  %v16254_v2 = vld [vmem:[#allocation10 + $0xa98] sm:$0xf0]  ;;  %v16129_v12 = vor.u32 %v18204_v30, %v16126_v40 }
 0x62d   :  { %10885 = vmatpush.bf16.msra.mxu3 %v15441_v20  ;;  %10898 = vmatpush.bf16.msrb.mxu1 %v15569_v25  ;;  %v16033_v20 = vor.u32 %v18180_v59, %v16030_v19  ;;  %v16161_v25 = vor.u32 %v18212_v29, %v16158_v61  ;;  %v18168_v11 = vld [vmem:[#allocation10 + $0x86c] sm:$0xf]  ;;  %v15982_v57 = vld [vmem:[#allocation10 + $0x878] sm:$0xf0] }
 0x62e   :  { %10911 = vmatpush.bf16.msrb.mxu2 %v15697_v28  ;;  %10924 = vmatpush.bf16.msra.mxu0 %v15825_v23  ;;  %v11127_v31 = vsel %vm11126_vm4, %v20168_v60, %v11123_v15  ;;  %v18208_v60 = vld [vmem:[#allocation10 + $0x9ac] sm:$0xf]  ;;  %v11117_v23 = vsel %vm20187_vm1, %v20154_v56, %v11113_v51  ;;  %v15998_v56 = vld [vmem:[#allocation10 + $0x898] sm:$0xf0]  ;;  %v15985_v15 = vor.u32 %v18168_v11, %v15982_v57 }
 0x62f   :  { %v11152_v46 = vrot.slane %v11127_v31, 7  ;;  %v18240_v28 = vld [vmem:[#allocation10 + $0xaac] sm:$0xf]  ;;  %v16145_v6 = vor.u32 %v18208_v60, %v16142_v36  ;;  %v16238_v59 = vld [vmem:[#allocation10 + $0xa78] sm:$0xf0] }
 0x630   :  { %v18200_v51 = vld [vmem:[#allocation10 + $0x96c] sm:$0xf]  ;;  %v16366_v29 = vld [vmem:[#allocation10 + $0xb78] sm:$0xf0] }
 0x631   :  { %10886 = vmatpush.bf16.msra.mxu3 %v15425_v52  ;;  %10899 = vmatpush.bf16.msrb.mxu1 %v15553_v58  ;;  %v20197_v26 = vsel %vm6908_vm7, %v11117_v23, %v11152_v46  ;;  %v18268_v52 = vld [vmem:[#allocation10 + $0xb8c] sm:$0xf]  ;;  %v16382_v58 = vld [vmem:[#allocation10 + $0xb98] sm:$0xf0]  ;;  %v10693_v4 = vpop.f32.mrf.mxu1 }
 0x632   :  { %10912 = vmatpush.bf16.msrb.mxu2 %v15681_v54  ;;  %10925 = vmatpush.bf16.msra.mxu0 %v15809_v9  ;;  %v16257_v54 = vor.u32 %v18236_v42, %v16254_v2  ;;  %v16385_v9 = vor.u32 %v18268_v52, %v16382_v58  ;;  %v18264_v19 = vld [vmem:[#allocation10 + $0xb6c] sm:$0xf]  ;;  %v15966_v61 = vld [vmem:[#allocation10 + $0x858] sm:$0xf0] }
 0x633   :  { %v16369_v49 = vor.u32 %v18264_v19, %v16366_v29  ;;  %v18196_v14 = vld [vmem:[#allocation10 + $0x94c] sm:$0xf]  ;;  %v16094_v31 = vld [vmem:[#allocation10 + $0x958] sm:$0xf0] }
 0x634   :  { %10887 = vmatmul.bf16.vlgmr.msra.gmra.mxu3 %v19840_v17  ;;  %10900 = vmatmul.bf16.vlgmr.msrb.gmra.mxu1 %v19844_v41  ;;  %v16273_v17 = vor.u32 %v18240_v28, %v16270_v62  ;;  %v16401_v41 = vor.u32 %v18272_v1, %v16398_v44  ;;  %v18228_v10 = vld [vmem:[#allocation10 + $0xa4c] sm:$0xf]  ;;  %v16350_v32 = vld [vmem:[#allocation10 + $0xb58] sm:$0xf0]  ;;  %v16097_v28 = vor.u32 %v18196_v14, %v16094_v31 }
 0x635   :  { %10931 = vmatpush.bf16.msrb.mxu3 %v16049_v47  ;;  %10944 = vmatpush.bf16.msra.mxu1 %v16177_v48  ;;  %v16110_v47 = vld [vmem:[#allocation10 + $0x978] sm:$0xf0]  ;;  %v18232_v48 = vld [vmem:[#allocation10 + $0xa6c] sm:$0xf] }
 0x636   :  { %10957 = vmatpush.bf16.msra.mxu2 %v16305_v43  ;;  %10970 = vmatpush.bf16.msrb.mxu0 %v16433_v53  ;;  %v16113_v43 = vor.u32 %v18200_v51, %v16110_v47  ;;  %v18164_v53 = vld [vmem:[#allocation10 + $0x84c] sm:$0xf]  ;;  %v16241_v3 = vor.u32 %v18232_v48, %v16238_v59  ;;  %v15950_v62 = vld [vmem:[#allocation10 + $0x838] sm:$0xf0] }
 0x637   :  { %10913 = vmatmul.bf16.vlgmr.msrb.gmra.mxu2 %v19846_v0  ;;  %10926 = vmatmul.bf16.vlgmr.msra.gmra.mxu0 %v19849_v22  ;;  %v10719_v0 = vpop.f32.mrf.mxu0  ;;  %v16001_v22 = vor.u32 %v18172_v21, %v15998_v56  ;;  %v10680_v5 = vpop.f32.mrf.mxu3  ;;  %v18260_v50 = vld [vmem:[#allocation10 + $0xb4c] sm:$0xf]  ;;  %v15969_v36 = vor.u32 %v18164_v53, %v15966_v61  ;;  %v16206_v56 = vld [vmem:[#allocation10 + $0xa38] sm:$0xf0] }
 0x638   :  { %v10681_v46 = vadd.f32 %v10680_v5, %v20170_v38  ;;  %v18160_v23 = vld [vmem:[#allocation10 + $0x82c] sm:$0xf]  ;;  %v16353_v44 = vor.u32 %v18260_v50, %v16350_v32  ;;  %v15934_v2 = vld [vmem:[#allocation10 + $0x818] sm:$0xf0] }
 0x639   :  { %10932 = vmatpush.bf16.msrb.mxu3 %v16033_v20  ;;  %10945 = vmatpush.bf16.msra.mxu1 %v16161_v25  ;;  %v16222_v25 = vld [vmem:[#allocation10 + $0xa58] sm:$0xf0]  ;;  %v18224_v38 = vld [vmem:[#allocation10 + $0xa2c] sm:$0xf]  ;;  %v15953_v40 = vor.u32 %v18160_v23, %v15950_v62 }
 0x63a   :  { %10958 = vmatpush.bf16.msra.mxu2 %v16289_v16  ;;  %10971 = vmatpush.bf16.msrb.mxu0 %v16417_v8  ;;  %v10706_v20 = vpop.f32.mrf.mxu2  ;;  %v10695_v16 = vpop.f32.mrf.mxu1  ;;  %v10694_v8 = vadd.f32 %v10693_v4, %v10681_v46  ;;  %v16225_v1 = vor.u32 %v18228_v10, %v16222_v25  ;;  %v18156_v30 = vld [vmem:[#allocation10 + $0x80c] sm:$0xf]  ;;  %v16062_v58 = vld [vmem:[#allocation10 + $0x918] sm:$0xf0] }
 0x63b   :  { %v18188_v52 = vld [vmem:[#allocation10 + $0x90c] sm:$0xf]  ;;  %v16318_v47 = vld [vmem:[#allocation10 + $0xb18] sm:$0xf0] }
 0x63c   :  { %v10707_v21 = vadd.f32 %v10706_v20, %v10694_v8  ;;  %v18220_v57 = vld [vmem:[#allocation10 + $0xa0c] sm:$0xf]  ;;  %v16558_v59 = vld [vmem:[#allocation10 + $0xcf8] sm:$0xf0] }
 0x63d   :  { %10933 = vmatpush.bf16.msrb.mxu3 %v16017_v35  ;;  %10946 = vmatpush.bf16.msra.mxu1 %v16145_v6  ;;  %v18192_v35 = vld [vmem:[#allocation10 + $0x92c] sm:$0xf]  ;;  %v16078_v6 = vld [vmem:[#allocation10 + $0x938] sm:$0xf0] }
 0x63e   :  { %10959 = vmatpush.bf16.msra.mxu2 %v16273_v17  ;;  %10972 = vmatpush.bf16.msrb.mxu0 %v16401_v41  ;;  %v18256_v17 = vld [vmem:[#allocation10 + $0xb2c] sm:$0xf]  ;;  %v16334_v41 = vld [vmem:[#allocation10 + $0xb38] sm:$0xf0]  ;;  %v16081_v42 = vor.u32 %v18192_v35, %v16078_v6  ;;  %v20202_v4 = vadd.f32 %v10719_v0, %v10707_v21  ;;  %v16065_v0 = vor.u32 %v18188_v52, %v16062_v58 }
 0x63f   :  { %v10721_v60 = vpop.f32.mrf.mxu0  ;;  %v10682_v11 = vpop.f32.mrf.mxu3  ;;  %v18312_v48 = vld [vmem:[#allocation10 + $0xcec] sm:$0xf]  ;;  %v16686_v29 = vld [vmem:[#allocation10 + $0xdf8] sm:$0xf0] }
 0x640   :  { %v18344_v19 = vld [vmem:[#allocation10 + $0xdec] sm:$0xf]  ;;  %v16814_v53 = vld [vmem:[#allocation10 + $0xef8] sm:$0xf0]  ;;  %v16561_v14 = vor.u32 %v18312_v48, %v16558_v59 }
 0x641   :  { %10934 = vmatpush.bf16.msrb.mxu3 %v16001_v22  ;;  %10947 = vmatpush.bf16.msra.mxu1 %v16129_v12  ;;  %v16209_v22 = vor.u32 %v18224_v38, %v16206_v56  ;;  %v16337_v12 = vor.u32 %v18256_v17, %v16334_v41  ;;  %v18408_v61 = vld [vmem:[#allocation10 + $0xfec] sm:$0xf]  ;;  %v16689_v31 = vor.u32 %v18344_v19, %v16686_v29  ;;  %v16542_v46 = vld [vmem:[#allocation10 + $0xcd8] sm:$0xf0] }
 0x642   :  { %10960 = vmatpush.bf16.msra.mxu2 %v16257_v54  ;;  %10973 = vmatpush.bf16.msrb.mxu0 %v16385_v9  ;;  %v16190_v54 = vld [vmem:[#allocation10 + $0xa18] sm:$0xf0]  ;;  %v18252_v9 = vld [vmem:[#allocation10 + $0xb0c] sm:$0xf]  ;;  %v10708_v51 = vpop.f32.mrf.mxu2 }
 0x643   :  { %v16321_v5 = vor.u32 %v18252_v9, %v16318_v47  ;;  %v18308_v10 = vld [vmem:[#allocation10 + $0xccc] sm:$0xf]  ;;  %v16670_v32 = vld [vmem:[#allocation10 + $0xdd8] sm:$0xf0] }
 0x644   :  { %v18340_v50 = vld [vmem:[#allocation10 + $0xdcc] sm:$0xf]  ;;  %v16798_v8 = vld [vmem:[#allocation10 + $0xed8] sm:$0xf0] }
 0x645   :  { %10935 = vmatpush.bf16.msrb.mxu3 %v15985_v15  ;;  %10948 = vmatpush.bf16.msra.mxu1 %v16113_v43  ;;  %v18376_v15 = vld [vmem:[#allocation10 + $0xeec] sm:$0xf]  ;;  %v15937_v43 = vor.u32 %v18156_v30, %v15934_v2  ;;  %v16673_v23 = vor.u32 %v18340_v50, %v16670_v32  ;;  %v16654_v38 = vld [vmem:[#allocation10 + $0xdb8] sm:$0xf0] }
 0x646   :  { %10961 = vmatpush.bf16.msra.mxu2 %v16241_v3  ;;  %10974 = vmatpush.bf16.msrb.mxu0 %v16369_v49  ;;  %v16942_v3 = vld [vmem:[#allocation10 + $0xff8] sm:$0xf0]  ;;  %v16193_v49 = vor.u32 %v18220_v57, %v16190_v54  ;;  %v16817_v20 = vor.u32 %v18376_v15, %v16814_v53  ;;  %v18372_v16 = vld [vmem:[#allocation10 + $0xecc] sm:$0xf] }
 0x647   :  { %v16945_v25 = vor.u32 %v18408_v61, %v16942_v3  ;;  %v18404_v60 = vld [vmem:[#allocation10 + $0xfcc] sm:$0xf]  ;;  %v16782_v56 = vld [vmem:[#allocation10 + $0xeb8] sm:$0xf0] }
 0x648   :  { %v18304_v62 = vld [vmem:[#allocation10 + $0xcac] sm:$0xf]  ;;  %v16910_v41 = vld [vmem:[#allocation10 + $0xfb8] sm:$0xf0] }
 0x649   :  { %10936 = vmatpush.bf16.msrb.mxu3 %v15969_v36  ;;  %10949 = vmatpush.bf16.msra.mxu1 %v16097_v28  ;;  %v16926_v36 = vld [vmem:[#allocation10 + $0xfd8] sm:$0xf0]  ;;  %v16545_v28 = vor.u32 %v18308_v10, %v16542_v46  ;;  %v18336_v6 = vld [vmem:[#allocation10 + $0xdac] sm:$0xf] }
 0x64a   :  { %10962 = vmatpush.bf16.msra.mxu2 %v16225_v1  ;;  %10975 = vmatpush.bf16.msrb.mxu0 %v16353_v44  ;;  %v16526_v1 = vld [vmem:[#allocation10 + $0xcb8] sm:$0xf0]  ;;  %v16801_v44 = vor.u32 %v18372_v16, %v16798_v8  ;;  %v16929_v35 = vor.u32 %v18404_v60, %v16926_v36  ;;  %v18368_v21 = vld [vmem:[#allocation10 + $0xeac] sm:$0xf] }
 0x64b   :  { %v18400_v17 = vld [vmem:[#allocation10 + $0xfac] sm:$0xf]  ;;  %v16529_v30 = vor.u32 %v18304_v62, %v16526_v1  ;;  %v16510_v2 = vld [vmem:[#allocation10 + $0xc98] sm:$0xf0]  ;;  %v16785_v52 = vor.u32 %v18368_v21, %v16782_v56 }
 0x64c   :  { %v16913_v58 = vor.u32 %v18400_v17, %v16910_v41  ;;  %v18396_v11 = vld [vmem:[#allocation10 + $0xf8c] sm:$0xf]  ;;  %v16894_v57 = vld [vmem:[#allocation10 + $0xf98] sm:$0xf0] }
 0x64d   :  { %10937 = vmatpush.bf16.msrb.mxu3 %v15953_v40  ;;  %10950 = vmatpush.bf16.msra.mxu1 %v16081_v42  ;;  %v16657_v40 = vor.u32 %v18336_v6, %v16654_v38  ;;  %v18300_v42 = vld [vmem:[#allocation10 + $0xc8c] sm:$0xf]  ;;  %v16494_v47 = vld [vmem:[#allocation10 + $0xc78] sm:$0xf0]  ;;  %v16897_v59 = vor.u32 %v18396_v11, %v16894_v57 }
 0x64e   :  { %10963 = vmatpush.bf16.msra.mxu2 %v16209_v22  ;;  %10976 = vmatpush.bf16.msrb.mxu0 %v16337_v12  ;;  %v16638_v22 = vld [vmem:[#allocation10 + $0xd98] sm:$0xf0]  ;;  %v18296_v51 = vld [vmem:[#allocation10 + $0xc6c] sm:$0xf] }
 0x64f   :  { %v16766_v12 = vld [vmem:[#allocation10 + $0xe98] sm:$0xf0]  ;;  %v18328_v19 = vld [vmem:[#allocation10 + $0xd6c] sm:$0xf]  ;;  %v16497_v61 = vor.u32 %v18296_v51, %v16494_v47 }
 0x650   :  { %v16622_v29 = vld [vmem:[#allocation10 + $0xd78] sm:$0xf0]  ;;  %v18360_v15 = vld [vmem:[#allocation10 + $0xe6c] sm:$0xf] }
 0x651   :  { %10938 = vmatpush.bf16.msrb.mxu3 %v15937_v43  ;;  %10951 = vmatpush.bf16.msra.mxu1 %v16065_v0  ;;  %v10745_v54 = vpop.f32.mrf.mxu1  ;;  %v16750_v43 = vld [vmem:[#allocation10 + $0xe78] sm:$0xf0]  ;;  %v18392_v0 = vld [vmem:[#allocation10 + $0xf6c] sm:$0xf]  ;;  %v16625_v3 = vor.u32 %v18328_v19, %v16622_v29 }
 0x652   :  { %10964 = vmatpush.bf16.msra.mxu2 %v16193_v49  ;;  %10977 = vmatpush.bf16.msrb.mxu0 %v16321_v5  ;;  %v16878_v53 = vld [vmem:[#allocation10 + $0xf78] sm:$0xf0]  ;;  %v18292_v49 = vld [vmem:[#allocation10 + $0xc4c] sm:$0xf] }
 0x653   :  { %v16478_v5 = vld [vmem:[#allocation10 + $0xc58] sm:$0xf0]  ;;  %v18324_v46 = vld [vmem:[#allocation10 + $0xd4c] sm:$0xf] }
 0x654   :  { %10939 = vmatmul.bf16.vlgmr.msrb.gmra.mxu3 %v20045_v45  ;;  %10952 = vmatmul.bf16.vlgmr.msra.gmra.mxu1 %v20047_v18  ;;  %v18332_v45 = vld [vmem:[#allocation10 + $0xd8c] sm:$0xf]  ;;  %v16734_v16 = vld [vmem:[#allocation10 + $0xe58] sm:$0xf0]  ;;  %v16481_v62 = vor.u32 %v18292_v49, %v16478_v5 }
 0x655   :  { %10983 = vmatpush.bf16.msra.mxu3 %v16561_v14  ;;  %10996 = vmatpush.bf16.msrb.mxu1 %v16689_v31  ;;  %v18364_v18 = vld [vmem:[#allocation10 + $0xe8c] sm:$0xf]  ;;  %v16641_v9 = vor.u32 %v18332_v45, %v16638_v22  ;;  %v16753_v14 = vor.u32 %v18360_v15, %v16750_v43  ;;  %v16881_v31 = vor.u32 %v18392_v0, %v16878_v53  ;;  %v16862_v60 = vld [vmem:[#allocation10 + $0xf58] sm:$0xf0] }
 0x656   :  { %11009 = vmatpush.bf16.msrb.mxu2 %v16817_v20  ;;  %11022 = vmatpush.bf16.msra.mxu0 %v16945_v25  ;;  %v16769_v48 = vor.u32 %v18364_v18, %v16766_v12  ;;  %v16606_v20 = vld [vmem:[#allocation10 + $0xd58] sm:$0xf0]  ;;  %v18356_v25 = vld [vmem:[#allocation10 + $0xe4c] sm:$0xf] }
 0x657   :  { %10965 = vmatmul.bf16.vlgmr.msra.gmra.mxu2 %v20049_v13  ;;  %10978 = vmatmul.bf16.vlgmr.msrb.gmra.mxu0 %v20051_v33  ;;  %v10771_v13 = vpop.f32.mrf.mxu0  ;;  %v16513_v33 = vor.u32 %v18300_v42, %v16510_v2  ;;  %v10732_v10 = vpop.f32.mrf.mxu3  ;;  %v18388_v8 = vld [vmem:[#allocation10 + $0xf4c] sm:$0xf]  ;;  %v16609_v1 = vor.u32 %v18324_v46, %v16606_v20  ;;  %v16737_v6 = vor.u32 %v18356_v25, %v16734_v16  ;;  %v16590_v56 = vld [vmem:[#allocation10 + $0xd38] sm:$0xf0] }
 0x658   :  { %v10733_v50 = vadd.f32 %v10732_v10, %v20202_v4  ;;  %v16865_v38 = vor.u32 %v18388_v8, %v16862_v60  ;;  %v18320_v21 = vld [vmem:[#allocation10 + $0xd2c] sm:$0xf]  ;;  %v16718_v41 = vld [vmem:[#allocation10 + $0xe38] sm:$0xf0] }
 0x659   :  { %10984 = vmatpush.bf16.msra.mxu3 %v16545_v28  ;;  %10997 = vmatpush.bf16.msrb.mxu1 %v16673_v23  ;;  %v10747_v36 = vpop.f32.mrf.mxu1  ;;  %v18352_v4 = vld [vmem:[#allocation10 + $0xe2c] sm:$0xf]  ;;  %v16593_v2 = vor.u32 %v18320_v21, %v16590_v56  ;;  %v16574_v57 = vld [vmem:[#allocation10 + $0xd18] sm:$0xf0] }
 0x65a   :  { %11010 = vmatpush.bf16.msrb.mxu2 %v16801_v44  ;;  %11023 = vmatpush.bf16.msra.mxu0 %v16929_v35  ;;  %v10758_v32 = vpop.f32.mrf.mxu2  ;;  %v10746_v28 = vadd.f32 %v10745_v54, %v10733_v50  ;;  %v18288_v44 = vld [vmem:[#allocation10 + $0xc2c] sm:$0xf]  ;;  %v16462_v35 = vld [vmem:[#allocation10 + $0xc38] sm:$0xf0]  ;;  %v16721_v22 = vor.u32 %v18352_v4, %v16718_v41 }
 0x65b   :  { %v16465_v42 = vor.u32 %v18288_v44, %v16462_v35  ;;  %v18316_v11 = vld [vmem:[#allocation10 + $0xd0c] sm:$0xf]  ;;  %v16830_v47 = vld [vmem:[#allocation10 + $0xf18] sm:$0xf0] }
 0x65c   :  { %v10759_v17 = vadd.f32 %v10758_v32, %v10746_v28  ;;  %v18348_v54 = vld [vmem:[#allocation10 + $0xe0c] sm:$0xf] }
 0x65d   :  { %10985 = vmatpush.bf16.msra.mxu3 %v16529_v30  ;;  %10998 = vmatpush.bf16.msrb.mxu1 %v16657_v40  ;;  %v18384_v30 = vld [vmem:[#allocation10 + $0xf2c] sm:$0xf]  ;;  %v16846_v40 = vld [vmem:[#allocation10 + $0xf38] sm:$0xf0] }
 0x65e   :  { %11011 = vmatpush.bf16.msrb.mxu2 %v16785_v52  ;;  %11024 = vmatpush.bf16.msra.mxu0 %v16913_v58  ;;  %v18284_v52 = vld [vmem:[#allocation10 + $0xc0c] sm:$0xf]  ;;  %v16446_v58 = vld [vmem:[#allocation10 + $0xc18] sm:$0xf0]  ;;  %v10772_v45 = vadd.f32 %v10771_v13, %v10759_v17  ;;  %v16849_v18 = vor.u32 %v18384_v30, %v16846_v40 }
 0x65f   :  { %v10773_v23 = vpop.f32.mrf.mxu0  ;;  %v10734_v12 = vpop.f32.mrf.mxu3  ;;  %v18380_v51 = vld [vmem:[#allocation10 + $0xf0c] sm:$0xf] }
 0x660   :  { %v16833_v13 = vor.u32 %v18380_v51, %v16830_v47 }
 0x661   :  { %10986 = vmatpush.bf16.msra.mxu3 %v16513_v33  ;;  %10999 = vmatpush.bf16.msrb.mxu1 %v16641_v9  ;;  %v16702_v9 = vld [vmem:[#allocation10 + $0xe18] sm:$0xf0] }
 0x662   :  { %11012 = vmatpush.bf16.msrb.mxu2 %v16769_v48  ;;  %11025 = vmatpush.bf16.msra.mxu0 %v16897_v59  ;;  %v10760_v33 = vpop.f32.mrf.mxu2  ;;  %v16449_v48 = vor.u32 %v18284_v52, %v16446_v58  ;;  %v16577_v59 = vor.u32 %v18316_v11, %v16574_v57  ;;  %v16705_v19 = vor.u32 %v18348_v54, %v16702_v9 }
 0x665   :  { %10987 = vmatpush.bf16.msra.mxu3 %v16497_v61  ;;  %11000 = vmatpush.bf16.msrb.mxu1 %v16625_v3 }
 0x666   :  { %11013 = vmatpush.bf16.msrb.mxu2 %v16753_v14  ;;  %11026 = vmatpush.bf16.msra.mxu0 %v16881_v31 }
 0x669   :  { %10988 = vmatpush.bf16.msra.mxu3 %v16481_v62  ;;  %11001 = vmatpush.bf16.msrb.mxu1 %v16609_v1 }
 0x66a   :  { %11014 = vmatpush.bf16.msrb.mxu2 %v16737_v6  ;;  %11027 = vmatpush.bf16.msra.mxu0 %v16865_v38 }
 0x66d   :  { %10989 = vmatpush.bf16.msra.mxu3 %v16465_v42  ;;  %11002 = vmatpush.bf16.msrb.mxu1 %v16593_v2 }
 0x66e   :  { %11015 = vmatpush.bf16.msrb.mxu2 %v16721_v22  ;;  %11028 = vmatpush.bf16.msra.mxu0 %v16849_v18 }
 0x671   :  { %10990 = vmatpush.bf16.msra.mxu3 %v16449_v48  ;;  %11003 = vmatpush.bf16.msrb.mxu1 %v16577_v59  ;;  %v10797_v29 = vpop.f32.mrf.mxu1 }
 0x672   :  { %11016 = vmatpush.bf16.msrb.mxu2 %v16705_v19  ;;  %11029 = vmatpush.bf16.msra.mxu0 %v16833_v13 }
 0x674   :  { %10991 = vmatmul.bf16.vlgmr.msra.gmra.mxu3 %v20073_v39  ;;  %11004 = vmatmul.bf16.vlgmr.msrb.gmra.mxu1 %v20075_v7  ;;  %v10823_v15 = vpop.f32.mrf.mxu0 }
 0x675   :  { %11017 = vmatmul.bf16.vlgmr.msrb.gmra.mxu2 %v20077_v24  ;;  %11030 = vmatmul.bf16.vlgmr.msra.gmra.mxu0 %v20071_v27 }
 0x677   :  { %v10784_v43 = vpop.f32.mrf.mxu3 }
 0x678   :  { %v10785_v0 = vadd.f32 %v10784_v43, %v10772_v45 }
 0x679   :  { %v10799_v61 = vpop.f32.mrf.mxu1 }
 0x67a   :  { %v10810_v53 = vpop.f32.mrf.mxu2  ;;  %v10798_v3 = vadd.f32 %v10797_v29, %v10785_v0 }
 0x67c   :  { %v10825_v49 = vpop.f32.mrf.mxu0  ;;  %v10811_v5 = vadd.f32 %v10810_v53, %v10798_v3 }
 0x67e   :  { %v20213_v14 = vadd.f32 %v10823_v15, %v10811_v5 }
 0x67f   :  { %v10786_v31 = vpop.f32.mrf.mxu3 }
 0x680   :  { %v11047_v30 = vrot.slane %v20213_v14, 4  ;;  %v11065_v40 = vmul.f32 %v20213_v14, %v20213_v14 }
 0x682   :  { %v10812_v10 = vpop.f32.mrf.mxu2  ;;  %v11048_v2 = vadd.f32 %v11047_v30, %v20213_v14  ;;  %v11079_v52 = vrot.slane %v11065_v40, 4 }
 0x684   :  { %v11049_v18 = vrot.slane %v11048_v2, 2  ;;  %v11080_v12 = vadd.f32 %v11079_v52, %v11065_v40  ;;  %v18416_v52 = vld [vmem:[#allocation14 + $0x28] sm:$0xff] }
 0x686   :  { %v11050_v57 = vadd.f32 %v11049_v18, %v11048_v2  ;;  %v11081_v54 = vrot.slane %v11080_v12, 2 }
 0x688   :  { %v11051_v9 = vrot.slane %v11050_v57, 1  ;;  %v11082_v51 = vadd.f32 %v11081_v54, %v11080_v12  ;;  %v18415_v54 = vld [vmem:[#allocation14 + $0x20] sm:$0xff] }
 0x68a   :  { %v11052_v59 = vadd.f32 %v11051_v9, %v11050_v57  ;;  %v11083_v19 = vrot.slane %v11082_v51, 1  ;;  %v18431_v9 = vld [vmem:[#allocation14 + $0xa0] sm:$0xff] }
 0x68c   :  { %v20219_v15 = vmul.f32 0.125, %v11052_v59  ;;  %v11084_v43 = vadd.f32 %v11083_v19, %v11082_v51  ;;  %v18439_v51 = vld [vmem:[#allocation14 + $0xe0] sm:$0xff]  ;;  %v18414_v59 = vld [vmem:[#allocation14 + $0x18] sm:$0xff] }
 0x68d   :  { %v18422_v19 = vld [vmem:[#allocation14 + $0x58] sm:$0xff] }
 0x68e   :  { %v11093_v5 = vmul.f32 0.125, %v11084_v43  ;;  %v11097_v31 = vmul.f32 %v20219_v15, %v20219_v15 }
 0x691   :  { %v10849_v39 = vpop.f32.mrf.mxu1 }
 0x694   :  { %v10875_v46 = vpop.f32.mrf.mxu0 }
 0x697   :  { %v10836_v7 = vpop.f32.mrf.mxu3 }
 0x698   :  { %v10850_v20 = vadd.f32 %v10849_v39, %v10836_v7  ;;  %v11101_v7 = vsub.f32 %v11093_v5, %v11097_v31  ;;  %v18412_v5 = vld [vmem:[#allocation14 + $0x8] sm:$0xff] }
 0x699   :  { %v10851_v25 = vpop.f32.mrf.mxu1  ;;  %v18420_v31 = vld [vmem:[#allocation14 + $0x48] sm:$0xff] }
 0x69a   :  { %v10862_v24 = vpop.f32.mrf.mxu2 }
 0x69b   :  { %v10863_v27 = vadd.f32 %v10862_v24, %v10850_v20 }
 0x69c   :  { %v10877_v50 = vpop.f32.mrf.mxu0 }
 0x69d   :  { %v10876_v32 = vadd.f32 %v10875_v46, %v10863_v27 }
 0x69f   :  { %v10838_v16 = vpop.f32.mrf.mxu3 }
 0x6a2   :  { %v10864_v8 = vpop.f32.mrf.mxu2 }
 0x6b1   :  { %v10901_v60 = vpop.f32.mrf.mxu1 }
 0x6b4   :  { %v10927_v36 = vpop.f32.mrf.mxu0 }
 0x6b7   :  { %v10888_v28 = vpop.f32.mrf.mxu3 }
 0x6b8   :  { %v10889_v4 = vadd.f32 %v10888_v28, %v10876_v32  ;;  %v20228_v32 = vadd.f32 1e-05, %v11101_v7  ;;  %v18418_v28 = vld [vmem:[#allocation14 + $0x38] sm:$0xff]  ;;  %v18436_v7 = vld [vmem:[#allocation14 + $0xc8] sm:$0xff] }
 0x6b9   :  { %v10903_v62 = vpop.f32.mrf.mxu1  ;;  %11467 = vmatpush.bf16.msrb.mxu3 %v18418_v28 }
 0x6ba   :  { %v10914_v23 = vpop.f32.mrf.mxu2  ;;  %v10902_v42 = vadd.f32 %v10901_v60, %v10889_v4  ;;  %v18434_v62 = vld [vmem:[#allocation14 + $0xb8] sm:$0xff]  ;;  %18510 = vrsqrt.f32 %v20228_v32  ;;  %v18433_v4 = vld [vmem:[#allocation14 + $0xb0] sm:$0xff]  ;;  %vm11134_vm6 = vweird.f32 %v20228_v32 }
 0x6bb   :  { %11493 = vmatpush.bf16.msra.mxu2 %v18434_v62 }
 0x6bc   :  { %v10929_v1 = vpop.f32.mrf.mxu0  ;;  %v10915_v22 = vadd.f32 %v10914_v23, %v10902_v42  ;;  %v18426_v23 = vld [vmem:[#allocation14 + $0x78] sm:$0xff] }
 0x6bd   :  { %v18442_v1 = vld [vmem:[#allocation14 + $0xf8] sm:$0xff]  ;;  %11480 = vmatpush.bf16.msra.mxu1 %v18426_v23 }
 0x6be   :  { %v10928_v11 = vadd.f32 %v10927_v36, %v10915_v22  ;;  %11506 = vmatpush.bf16.msrb.mxu0 %v18442_v1  ;;  %v18440_v22 = vld [vmem:[#allocation14 + $0xe8] sm:$0xff] }
 0x6bf   :  { %v10890_v44 = vpop.f32.mrf.mxu3  ;;  %11494 = vmatpush.bf16.msra.mxu2 %v18433_v4 }
 0x6c0   :  { %v20232_v40 = vpop.eup %18510 }
 0x6c1   :  { %vm11135_vm5 = vweird.f32 %v20232_v40 }
 0x6c2   :  { %v10916_v35 = vpop.f32.mrf.mxu2  ;;  %vm11136_vm9 = vmor %vm11134_vm6, %vm11135_vm5 }
 0x6d1   :  { %v10953_v6 = vpop.f32.mrf.mxu1 }
 0x6d4   :  { %v10979_v38 = vpop.f32.mrf.mxu0 }
 0x6d7   :  { %v10940_v21 = vpop.f32.mrf.mxu3 }
 0x6d8   :  { %v10941_v33 = vadd.f32 %v10940_v21, %v10928_v11  ;;  %v18417_v21 = vld [vmem:[#allocation14 + $0x30] sm:$0xff]  ;;  %v11129_v11 = vmul.f32 %v20232_v40, %v20228_v32 }
 0x6d9   :  { %v10955_v17 = vpop.f32.mrf.mxu1  ;;  %11468 = vmatpush.bf16.msrb.mxu3 %v18417_v21 }
 0x6da   :  { %v10966_v56 = vpop.f32.mrf.mxu2  ;;  %v10954_v47 = vadd.f32 %v10953_v6, %v10941_v33  ;;  %v18441_v17 = vld [vmem:[#allocation14 + $0xf0] sm:$0xff]  ;;  %v18423_v33 = vld [vmem:[#allocation14 + $0x60] sm:$0xff] }
 0x6db   :  { %11507 = vmatpush.bf16.msrb.mxu0 %v18441_v17 }
 0x6dc   :  { %v10981_v41 = vpop.f32.mrf.mxu0  ;;  %v10967_v13 = vadd.f32 %v10966_v56, %v10954_v47  ;;  %v18425_v56 = vld [vmem:[#allocation14 + $0x70] sm:$0xff] }
 0x6dd   :  { %11481 = vmatpush.bf16.msra.mxu1 %v18425_v56  ;;  %11469 = vmatpush.bf16.msrb.mxu3 %v18416_v52 }
 0x6de   :  { %v10980_v0 = vadd.f32 %v10979_v38, %v10967_v13  ;;  %v18430_v13 = vld [vmem:[#allocation14 + $0x98] sm:$0xff] }
 0x6df   :  { %v10942_v58 = vpop.f32.mrf.mxu3  ;;  %11508 = vmatpush.bf16.msrb.mxu0 %v18440_v22 }
 0x6e0   :  { %v18424_v58 = vld [vmem:[#allocation14 + $0x68] sm:$0xff] }
 0x6e1   :  { %11482 = vmatpush.bf16.msra.mxu1 %v18424_v58  ;;  %11470 = vmatpush.bf16.msrb.mxu3 %v18415_v54 }
 0x6e2   :  { %v10968_v45 = vpop.f32.mrf.mxu2 }
 0x6e3   :  { %v18432_v45 = vld [vmem:[#allocation14 + $0xa8] sm:$0xff]  ;;  %11509 = vmatpush.bf16.msrb.mxu0 %v18439_v51 }
 0x6e4   :  { %11495 = vmatpush.bf16.msra.mxu2 %v18432_v45 }
 0x6e5   :  { %11483 = vmatpush.bf16.msra.mxu1 %v18423_v33  ;;  %11471 = vmatpush.bf16.msrb.mxu3 %v18414_v59 }
 0x6e8   :  { %11496 = vmatpush.bf16.msra.mxu2 %v18431_v9 }
 0x6e9   :  { %11484 = vmatpush.bf16.msra.mxu1 %v18422_v19 }
 0x6ec   :  { %11497 = vmatpush.bf16.msra.mxu2 %v18430_v13 }
 0x6f1   :  { %v11005_v48 = vpop.f32.mrf.mxu1 }
 0x6f2   :  { %v11031_v29 = vpop.f32.mrf.mxu0 }
 0x6f7   :  { %v10992_v53 = vpop.f32.mrf.mxu3 }
 0x6f8   :  { %v10993_v61 = vadd.f32 %v10992_v53, %v10980_v0  ;;  %v11018_v3 = vpop.f32.mrf.mxu2  ;;  %v18413_v0 = vld [vmem:[#allocation14 + $0x10] sm:$0xff] }
 0x6f9   :  { %v11007_v49 = vpop.f32.mrf.mxu1  ;;  %v18421_v53 = vld [vmem:[#allocation14 + $0x50] sm:$0xff]  ;;  %11472 = vmatpush.bf16.msrb.mxu3 %v18413_v0 }
 0x6fa   :  { %v11006_v10 = vadd.f32 %v11005_v48, %v10993_v61  ;;  %v11033_v39 = vpop.f32.mrf.mxu0  ;;  %v11130_v48 = vmul.f32 %v20232_v40, %v11129_v11  ;;  %v18429_v61 = vld [vmem:[#allocation14 + $0x90] sm:$0xff]  ;;  %11485 = vmatpush.bf16.msra.mxu1 %v18421_v53  ;;  %v11160_v11 = vld [vmem:[#allocation13] sm:$0xf] }
 0x6fb   :  { %11498 = vmatpush.bf16.msra.mxu2 %v18429_v61 }
 0x6fc   :  { %v11019_v46 = vadd.f32 %v11018_v3, %v11006_v10  ;;  %v11131_v43 = vmul.f32 0.5, %v11130_v48  ;;  %v18437_v3 = vld [vmem:[#allocation14 + $0xd0] sm:$0xff] }
 0x6fd   :  { %11473 = vmatpush.bf16.msrb.mxu3 %v18412_v5  ;;  %v18450_v5 = vld [vmem:[%s20299_s10 + $0x38] sm:$0xff] }
 0x6fe   :  { %v20223_v20 = vadd.f32 %v11031_v29, %v11019_v46  ;;  %v18438_v29 = vld [vmem:[#allocation14 + $0xd8] sm:$0xff]  ;;  %v11132_v10 = vsub.f32 1.5, %v11131_v43  ;;  %v18428_v46 = vld [vmem:[#allocation14 + $0x88] sm:$0xff]  ;;  %11486 = vmatpush.bf16.msra.mxu1 %v18420_v31 }
 0x6ff   :  { %v10994_v24 = vpop.f32.mrf.mxu3  ;;  %11510 = vmatpush.bf16.msrb.mxu0 %v18438_v29  ;;  %11499 = vmatpush.bf16.msra.mxu2 %v18428_v46 }
 0x700   :  { %v11053_v25 = vrot.slane %v20223_v20, 4  ;;  %v11066_v27 = vmul.f32 %v20223_v20, %v20223_v20  ;;  %v11020_v50 = vpop.f32.mrf.mxu2 }
 0x701   :  { %v11133_v50 = vmul.f32 %v20232_v40, %v11132_v10 }
 0x702   :  { %v11054_v16 = vadd.f32 %v11053_v25, %v20223_v20  ;;  %v11085_v8 = vrot.slane %v11066_v27, 4  ;;  %v18411_v25 = vld [vmem:[#allocation14] sm:$0xff] }
 0x703   :  { %11511 = vmatpush.bf16.msrb.mxu0 %v18437_v3  ;;  %11474 = vmatpush.bf16.msrb.mxu3 %v18411_v25  ;;  %v11137_v28 = vsel %vm11136_vm9, %v20232_v40, %v11133_v50 }
 0x704   :  { %v11055_v60 = vrot.slane %v11054_v16, 2  ;;  %v11086_v36 = vadd.f32 %v11085_v8, %v11066_v27  ;;  %v18419_v27 = vld [vmem:[#allocation14 + $0x40] sm:$0xff]  ;;  %v11153_v1 = vrot.slane %v11137_v28, 6 }
 0x705   :  { %v18427_v8 = vld [vmem:[#allocation14 + $0x80] sm:$0xff]  ;;  %11487 = vmatpush.bf16.msra.mxu1 %v18419_v27 }
 0x706   :  { %v11056_v44 = vadd.f32 %v11055_v60, %v11054_v16  ;;  %v11087_v35 = vrot.slane %v11086_v36, 2  ;;  %v18435_v60 = vld [vmem:[#allocation14 + $0xc0] sm:$0xff]  ;;  %11500 = vmatpush.bf16.msra.mxu2 %v18427_v8 }
 0x707   :  { %11512 = vmatpush.bf16.msrb.mxu0 %v18436_v7  ;;  %11626 = vmatpush.bf16.msra.mxu3 %v18450_v5  ;;  %v18449_v7 = vld [vmem:[%s20299_s10 + $0x30] sm:$0xff] }
 0x708   :  { %v11057_v6 = vrot.slane %v11056_v44, 1  ;;  %v11088_v38 = vadd.f32 %v11087_v35, %v11086_v36  ;;  %v11103_v35 = vld [vmem:[#allocation11] sm:$0xf] }
 0x70a   :  { %v11058_v41 = vadd.f32 %v11057_v6, %v11056_v44  ;;  %v11089_v30 = vrot.slane %v11088_v38, 1 }
 0x70b   :  { %11513 = vmatpush.bf16.msrb.mxu0 %v18435_v60  ;;  %11627 = vmatpush.bf16.msra.mxu3 %v18449_v7  ;;  %v18448_v60 = vld [vmem:[%s20299_s10 + $0x28] sm:$0xff] }
 0x70c   :  { %v20234_v42 = vmul.f32 0.125, %v11058_v41  ;;  %v11090_v2 = vadd.f32 %v11089_v30, %v11088_v38 }
 0x70e   :  { %v11094_v18 = vmul.f32 0.125, %v11090_v2  ;;  %v11098_v12 = vmul.f32 %v20234_v42, %v20234_v42 }
 0x70f   :  { %11628 = vmatpush.bf16.msra.mxu3 %v18448_v60 }
 0x710   :  { %v11102_v57 = vsub.f32 %v11094_v18, %v11098_v12 }
 0x712   :  { %v11107_v47 = vadd.f32 1e-05, %v11102_v57 }
 0x714   :  { %18512 = vrsqrt.f32 %v11107_v47  ;;  %vm11144_vm0 = vweird.f32 %v11107_v47 }
 0x71a   :  { %v18513_v49 = vpop.eup %18512 }
 0x71b   :  { %v11139_v39 = vmul.f32 %v18513_v49, %v11107_v47  ;;  %vm11145_vm8 = vweird.f32 %v18513_v49 }
 0x71c   :  { %vm11146_vm10 = vmor %vm11144_vm0, %vm11145_vm8 }
 0x71d   :  { %v11140_v24 = vmul.f32 %v18513_v49, %v11139_v39 }
 0x71f   :  { %v11141_v16 = vmul.f32 0.5, %v11140_v24 }
 0x721   :  { %v11142_v36 = vsub.f32 1.5, %v11141_v16 }
 0x723   :  { %v11143_v23 = vmul.f32 %v18513_v49, %v11142_v36 }
 0x725   :  { %v11147_v62 = vsel %vm11146_vm10, %v18513_v49, %v11143_v23 }
 0x726   :  { %v11154_v44 = vrot.slane %v11147_v62, 5 }
 0x728   :  { %v11156_v6 = vsel %vm6910_vm14, %v11153_v1, %v11154_v44  ;;  %v18447_v1 = vld [vmem:[%s20299_s10 + $0x20] sm:$0xff] }
 0x729   :  { %v11157_v32 = vsel %vm6912_vm15, %v20197_v26, %v11156_v6  ;;  %11629 = vmatpush.bf16.msra.mxu3 %v18447_v1 }
 0x72a   :  { %v11159_v38 = vmul.f32 %v11157_v32, %v11103_v35 }
 0x72c   :  { %v11162_v21 = vperm.slane %v11159_v38, 0  ;;  %v11163_v56 = vperm.slane %v11159_v38, 1  ;;  %v11164_v4 = vperm.slane %v11159_v38, 2  ;;  %v11165_v17 = vperm.slane %v11159_v38, 3  ;;  %v18446_v38 = vld [vmem:[%s20299_s10 + $0x18] sm:$0xff] }
 0x72d   :  { %11630 = vmatpush.bf16.msra.mxu3 %v18446_v38 }
 0x72e   :  { %v11170_v41 = vmul.f32 %v11162_v21, %v20136_v37  ;;  %v11171_v30 = vmul.f32 %v11163_v56, %v20156_v34  ;;  %v11172_v40 = vmul.f32 %v11164_v4, %v20219_v15  ;;  %v11173_v2 = vmul.f32 %v11165_v17, %v20234_v42 }
 0x72f   :  { %v11189_v52 = vmul.f32 %v11165_v17, %v20223_v20  ;;  %v11186_v58 = vmul.f32 %v11162_v21, %v20103_v55  ;;  %v11187_v45 = vmul.f32 %v11163_v56, %v20143_v63  ;;  %v11188_v26 = vmul.f32 %v11164_v4, %v20213_v14 }
 0x730   :  { %v11178_v22 = vrot.slane %v11171_v30, 7  ;;  %v11179_v18 = vrot.slane %v11172_v40, 6  ;;  %v11180_v12 = vrot.slane %v11173_v2, 5  ;;  %v18444_v40 = vld [vmem:[%s20299_s10 + $0x8] sm:$0xff] }
 0x732   :  { %v11181_v37 = vsel %vm6908_vm7, %v11170_v41, %v11178_v22  ;;  %v11182_v34 = vsel %vm6910_vm14, %v11179_v18, %v11180_v12  ;;  %v18445_v41 = vld [vmem:[%s20299_s10 + $0x10] sm:$0xff]  ;;  %v11536_v12 = vld [vmem:[#allocation16] sm:$0x1] }
 0x733   :  { %v11183_v15 = vsel %vm6912_vm15, %v11181_v37, %v11182_v34  ;;  %11631 = vmatpush.bf16.msra.mxu3 %v18445_v41 }
 0x734   :  { %v11185_v57 = vsub.f32 %v11160_v11, %v11183_v15  ;;  %v11549_v15 = vld [vmem:[#allocation17] sm:$0x1] }
 0x736   :  { %v11194_v42 = vperm.slane %v11185_v57, 3  ;;  %v11191_v54 = vperm.slane %v11185_v57, 0  ;;  %v11192_v20 = vperm.slane %v11185_v57, 1  ;;  %v11193_v33 = vperm.slane %v11185_v57, 2 }
 0x737   :  { %11632 = vmatpush.bf16.msra.mxu3 %v18444_v40 }
 0x738   :  { %v11202_v55 = vadd.f32 %v11194_v42, %v11189_v52  ;;  %v11199_v9 = vadd.f32 %v11191_v54, %v11186_v58  ;;  %v11200_v63 = vadd.f32 %v11192_v20, %v11187_v45  ;;  %v11201_v51 = vadd.f32 %v11193_v33, %v11188_v26  ;;  %v18443_v52 = vld [vmem:[%s20299_s10] sm:$0xff]  ;;  %s18915_s10 = smov [#allocation25]  }
 0x739   :  { %s11727_s22 = sshll.u32 %s18915_s10, 4  ;;  %s11728_s22 = int_to_ptr.vmem [resolvable:$true] %s11727_s22 }
 0x73a   :  { %v11203_v14 = vmax.f32 %v11199_v9, 0.0  ;;  %v11204_v47 = vmax.f32 %v11200_v63, 0.0  ;;  %v11205_v48 = vmax.f32 %v11201_v51, 0.0  ;;  %v11206_v59 = vmax.f32 %v11202_v55, 0.0 }
 0x73b   :  { %11633 = vmatpush.bf16.msra.mxu3 %v18443_v52 }
 0x73c   :  { %v11207_v19 = vpack.c.bf16 %v11203_v14, %v11203_v14  ;;  %v11208_v13 = vpack.c.bf16 %v11204_v47, %v11204_v47  ;;  %v11209_v29 = vpack.c.bf16 %v11205_v48, %v11205_v48  ;;  %v11210_v43 = vpack.c.bf16 %v11206_v59, %v11206_v59 }
 0x73e   :  { %11475 = vmatmul.bf16.vlgmr.msrb.gmra.mxu3 %v11207_v19  ;;  %11488 = vmatmul.bf16.vlgmr.msra.gmra.mxu1 %v11208_v13 }
 0x73f   :  { %11501 = vmatmul.bf16.vlgmr.msra.gmra.mxu2 %v11209_v29  ;;  %11514 = vmatmul.bf16.vlgmr.msrb.gmra.mxu0 %v11210_v43 }
 0x7bb   :  { %v11489_v0 = vpop.f32.mrf.mxu1 }
 0x7bc   :  { %v11515_v53 = vpop.f32.mrf.mxu0 }
 0x7c1   :  { %v11476_v61 = vpop.f32.mrf.mxu3 }
 0x7c2   :  { %v11490_v3 = vadd.f32 %v11489_v0, %v11476_v61  ;;  %v11502_v49 = vpop.f32.mrf.mxu2 }
 0x7c3   :  { %v11491_v31 = vpop.f32.mrf.mxu1 }
 0x7c4   :  { %v11503_v10 = vadd.f32 %v11502_v49, %v11490_v3  ;;  %v11517_v39 = vpop.f32.mrf.mxu0 }
 0x7c6   :  { %v11516_v46 = vadd.f32 %v11515_v53, %v11503_v10 }
 0x7c8   :  { %v11519_v24 = vrot.slane %v11516_v46, 4  ;;  %v11526_v25 = vmul.f32 %v11516_v46, %v11516_v46 }
 0x7c9   :  { %v11478_v27 = vpop.f32.mrf.mxu3 }
 0x7ca   :  { %v11520_v50 = vadd.f32 %v11519_v24, %v11516_v46  ;;  %v11527_v16 = vrot.slane %v11526_v25, 4  ;;  %v11504_v8 = vpop.f32.mrf.mxu2  ;;  %v18452_v27 = vld [vmem:[#allocation22 + $0x8] sm:$0xff] }
 0x7cb   :  { %11714 = vmatpush.bf16.msrb.mxu1 %v18452_v27 }
 0x7cc   :  { %v11521_v36 = vrot.slane %v11520_v50, 2  ;;  %v11528_v28 = vadd.f32 %v11527_v16, %v11526_v25 }
 0x7ce   :  { %v11522_v23 = vadd.f32 %v11521_v36, %v11520_v50  ;;  %v11529_v62 = vrot.slane %v11528_v28, 2  ;;  %v18451_v50 = vld [vmem:[#allocation22] sm:$0xff] }
 0x7cf   :  { %11715 = vmatpush.bf16.msrb.mxu1 %v18451_v50 }
 0x7d0   :  { %v11523_v44 = vrot.slane %v11522_v23, 1  ;;  %v11530_v35 = vadd.f32 %v11529_v62, %v11528_v28 }
 0x7d2   :  { %v11524_v6 = vadd.f32 %v11523_v44, %v11522_v23  ;;  %v11531_v32 = vrot.slane %v11530_v35, 1  ;;  %v11659_v23 = vld [vmem:[#allocation19] sm:$0x1] }
 0x7d4   :  { %v11525_v21 = vmul.f32 0.125, %v11524_v6  ;;  %v11532_v56 = vadd.f32 %v11531_v32, %v11530_v35  ;;  %v11672_v35 = vld [vmem:[#allocation20] sm:$0x1] }
 0x7d6   :  { %v11533_v4 = vmul.f32 0.125, %v11532_v56  ;;  %v11534_v17 = vmul.f32 %v11525_v21, %v11525_v21 }
 0x7d8   :  { %v11535_v30 = vsub.f32 %v11533_v4, %v11534_v17 }
 0x7da   :  { %v11537_v2 = vadd.f32 1e-05, %v11535_v30  ;;  %v18473_v30 = vld [vmem:[#allocation23] ss:$0 sm:$0xff] }
 0x7dc   :  { %18514 = vrsqrt.f32 %v11537_v2  ;;  %vm11544_vm14 = vweird.f32 %v11537_v2 }
 0x7e2   :  { %v18515_v58 = vpop.eup %18514 }
 0x7e3   :  { %v11539_v45 = vmul.f32 %v18515_v58, %v11537_v2  ;;  %vm11545_vm7 = vweird.f32 %v18515_v58 }
 0x7e4   :  { %vm11546_vm15 = vmor %vm11544_vm14, %vm11545_vm7 }
 0x7e5   :  { %v11540_v26 = vmul.f32 %v18515_v58, %v11539_v45 }
 0x7e7   :  { %v11541_v22 = vmul.f32 0.5, %v11540_v26 }
 0x7e9   :  { %v11542_v18 = vsub.f32 1.5, %v11541_v22 }
 0x7eb   :  { %v11543_v11 = vmul.f32 %v18515_v58, %v11542_v18 }
 0x7ed   :  { %v11547_v37 = vsel %vm11546_vm15, %v18515_v58, %v11543_v11 }
 0x7ee   :  { %v11548_v34 = vmul.f32 %v11547_v37, %v11536_v12 }
 0x7f0   :  { %v11550_v57 = vmul.f32 %v11548_v34, %v11525_v21  ;;  %v11553_v42 = vperm.slane %v11548_v34, 0 }
 0x7f2   :  { %v11551_v54 = vsub.f32 %v11549_v15, %v11550_v57  ;;  %v11555_v20 = vmul.f32 %v11553_v42, %v11516_v46 }
 0x7f4   :  { %v11557_v33 = vperm.slane %v11551_v54, 0 }
 0x7f6   :  { %v11559_v55 = vadd.f32 %v11557_v33, %v11555_v20 }
 0x7f8   :  { %v11560_v9 = vmax.f32 %v11559_v55, 0.0 }
 0x7fa   :  { %v11561_v63 = vpack.c.bf16 %v11560_v9, %v11560_v9 }
 0x7fc   :  { %11634 = vmatmul.bf16.vlgmr.msra.gmra.mxu3 %v11561_v63 }
 0x87f   :  { %v11635_v51 = vpop.f32.mrf.mxu3 }
 0x880   :  { %v11640_v14 = vsel %vm11639_vm12, %v11635_v51, 0.0  ;;  %v11648_v47 = vmul.f32 %v11635_v51, %v11635_v51 }
 0x881   :  { %v11641_v48 = vrot.slane %v11640_v14, 4 }
 0x882   :  { %v11649_v59 = vsel %vm11639_vm12, %v11648_v47, 0.0 }
 0x883   :  { %v11642_v19 = vadd.f32 %v11641_v48, %v11640_v14  ;;  %v11650_v13 = vrot.slane %v11649_v59, 4 }
 0x885   :  { %v11643_v29 = vrot.slane %v11642_v19, 2  ;;  %v11651_v43 = vadd.f32 %v11650_v13, %v11649_v59 }
 0x887   :  { %v11644_v0 = vadd.f32 %v11643_v29, %v11642_v19  ;;  %v11652_v53 = vrot.slane %v11651_v43, 2  ;;  %v11637_v61 = vpop.f32.mrf.mxu3 }
 0x889   :  { %v11645_v3 = vrot.slane %v11644_v0, 1  ;;  %v11653_v49 = vadd.f32 %v11652_v53, %v11651_v43 }
 0x88b   :  { %v11646_v5 = vadd.f32 %v11645_v3, %v11644_v0  ;;  %v11654_v31 = vrot.slane %v11653_v49, 1 }
 0x88d   :  { %v11647_v10 = vmul.f32 0.125, %v11646_v5  ;;  %v11655_v39 = vadd.f32 %v11654_v31, %v11653_v49 }
 0x88f   :  { %v11656_v46 = vmul.f32 0.125, %v11655_v39  ;;  %v11657_v7 = vmul.f32 %v11647_v10, %v11647_v10 }
 0x891   :  { %v11658_v24 = vsub.f32 %v11656_v46, %v11657_v7 }
 0x893   :  { %v11660_v25 = vadd.f32 1e-05, %v11658_v24 }
 0x895   :  { %18516 = vrsqrt.f32 %v11660_v25  ;;  %vm11667_vm2 = vweird.f32 %v11660_v25 }
 0x89b   :  { %v18517_v16 = vpop.eup %18516 }
 0x89c   :  { %v11662_v8 = vmul.f32 %v18517_v16, %v11660_v25  ;;  %vm11668_vm11 = vweird.f32 %v18517_v16 }
 0x89d   :  { %vm11669_vm3 = vmor %vm11667_vm2, %vm11668_vm11 }
 0x89e   :  { %v11663_v60 = vmul.f32 %v18517_v16, %v11662_v8 }
 0x8a0   :  { %v11664_v36 = vmul.f32 0.5, %v11663_v60 }
 0x8a2   :  { %v11665_v28 = vsub.f32 1.5, %v11664_v36 }
 0x8a4   :  { %v11666_v62 = vmul.f32 %v18517_v16, %v11665_v28 }
 0x8a6   :  { %v11670_v1 = vsel %vm11669_vm3, %v18517_v16, %v11666_v62 }
 0x8a7   :  { %v11671_v44 = vmul.f32 %v11670_v1, %v11659_v23 }
 0x8a9   :  { %v11673_v6 = vmul.f32 %v11671_v44, %v11647_v10  ;;  %v11676_v32 = vperm.slane %v11671_v44, 0 }
 0x8ab   :  { %v11674_v38 = vsub.f32 %v11672_v35, %v11673_v6  ;;  %v11678_v21 = vmul.f32 %v11676_v32, %v11635_v51 }
 0x8ad   :  { %v11680_v56 = vperm.slane %v11674_v38, 0 }
 0x8af   :  { %v11682_v4 = vadd.f32 %v11680_v56, %v11678_v21 }
 0x8b1   :  { %v11683_v17 = vmax.f32 %v11682_v4, 0.0 }
 0x8b3   :  { %v11684_v41 = vpack.c.bf16 %v11683_v17, %v11683_v17 }
 0x8b5   :  { %17114 = vmatmul.msk.bf16.vlgmr.msrb.gmra.mxu1 %vm11639_vm12, %v11684_v41 }
 0x932   :  { %v11717_v40 = vpop.f32.mrf.mxu1 }
 0x933   :  { %v11718_v2 = vadd.f32 %v18473_v30, %v11717_v40 }
 0x935   :  { %11721 = vst [vmem:[#allocation25] sm:$0xff] %v11718_v2 }
 0x936   :  { %11732 = dma.vmem_to_hbm [thread:$0]  %s11728_s22, 128, %s11730_s23, [#allocation4]  }
 0x93a   :  { %v11719_v52 = vpop.f32.mrf.mxu1 }
 0x93b   :  { %18894 = dma.done.wait [#allocation4], 128  }
 0x93c   :  { %18895 = vsyncadd [#allocation4], 4294967168 }
 0x93d   :  { %11737 = vsyncpa [#allocation3], 1 }
 0x93e   :  { %11738 = vsyncpa [#allocation6], 1 }
 0x93f   :  { %11739 = vsyncpa [#allocation9], 1 }
 0x940   :  { %11740 = vsyncpa [#allocation12], 1 }
 0x941   :  { %11741 = vsyncpa [#allocation15], 1 }
 0x942   :  { %11742 = vsyncpa [#allocation18], 1 }
 0x943   :  { %11743 = vsyncpa [#allocation21], 1 }
 0x944   :  { %11744 = vsyncpa [#allocation24], 1 }
 0x945   :  { %11745 = vsyncpa [#allocation4], 1 }

</bundles_post_ra>
